<compile_context>
chip_gen: v7x
topology: tpu7x:2x2x1
jax: 0.10.0
libtpu: 0.0.40
codegen_flags: <defaults>
</compile_context>

<pallas_src>
import jax
import jax.numpy as jnp
from jax.experimental import pallas as pl
from jax.experimental.pallas import tpu as pltpu

jax.config.update("jax_default_matmul_precision", "float32")

# ----- SKConv configuration (SKConv(features=C, M=M, G=G, r=R, stride=1, L=L))
B, C, H, W = 2, 128, 8, 8
M, G, R, L = 2, 4, 4, 32
D = max(C // R, L)            # length of z
K = 1 + 2 * (M - 1)           # max branch kernel size
PAD = M - 1                   # max padding
BN_EPS = 1e-5
HP, WP = H + 2 * PAD, W + 2 * PAD
HW = H * W


# --------------------------------------------------------------------------
# Pallas kernel: one batch element per grid step, everything fused.
# --------------------------------------------------------------------------
def skconv_kernel(xpad_ref, *refs):
    wconv_refs = refs[:M]                               # per-branch (k*k*C, C)
    bns_ref, bnb_ref, wfc_ref, bfc_ref, wfcs_ref, bfcs_ref = refs[M:M + 6]
    out_ref = refs[M + 6]

    xpad = xpad_ref[0]                                  # (HP, WP, C)

    # --- shifted patches, computed ONCE and shared by all branches
    patches = {}
    for dh in range(K):
        for dw in range(K):
            patches[(dh, dw)] = xpad[dh:dh + H, dw:dw + W, :].reshape(HW, C)

    # --- M conv branches: single fused im2col matmul each, then BN + ReLU
    branches = []
    for m in range(M):
        k = 1 + 2 * m
        off = (K - k) // 2
        cols = [patches[(off + dh, off + dw)]
                for dh in range(k) for dw in range(k)]
        lhs = cols[0] if len(cols) == 1 else jnp.concatenate(cols, axis=1)
        y = jnp.dot(lhs, wconv_refs[m][...],
                    preferred_element_type=jnp.float32)  # (HW, C)
        scale = bns_ref[pl.ds(m, 1), :]                  # (1, C)
        bias = bnb_ref[pl.ds(m, 1), :]                   # (1, C)
        branches.append(jnp.maximum(y * scale + bias, 0.0))

    # --- fea_U = sum over branches; global average pool over spatial
    fea_u = branches[0]
    for y in branches[1:]:
        fea_u = fea_u + y
    fea_s = jnp.mean(fea_u, axis=0, keepdims=True)       # (1, C)

    # --- fc: C -> D
    fea_z = jnp.dot(fea_s, wfc_ref[...],
                    preferred_element_type=jnp.float32) + bfc_ref[...]  # (1, D)

    # --- fused per-branch fc D -> M*C, softmax over the branch axis
    v_all = jnp.dot(fea_z, wfcs_ref[...],
                    preferred_element_type=jnp.float32) + bfcs_ref[...]  # (1, M*C)
    logits = [v_all[:, m * C:(m + 1) * C] for m in range(M)]
    mx = logits[0]
    for v in logits[1:]:
        mx = jnp.maximum(mx, v)
    exps = [jnp.exp(v - mx) for v in logits]
    den = exps[0]
    for e in exps[1:]:
        den = den + e
    inv = 1.0 / den

    # --- attention-weighted sum of branches
    fea_v = branches[0] * (exps[0] * inv)
    for m in range(1, M):
        fea_v = fea_v + branches[m] * (exps[m] * inv)

    out_ref[0] = fea_v                                   # lane-dense (HW, C) store


def skconv_pallas(x_nhwc, wconv_list, bn_scale, bn_bias, wfc_t, bfc,
                  wfcs_cat, bfcs_cat):
    xpad = jnp.pad(x_nhwc, ((0, 0), (PAD, PAD), (PAD, PAD), (0, 0)))

    in_specs = [pl.BlockSpec((1, HP, WP, C), lambda b: (b, 0, 0, 0))]
    for m in range(M):
        k = 1 + 2 * m
        in_specs.append(pl.BlockSpec((k * k * C, C), lambda b: (0, 0)))
    in_specs += [
        pl.BlockSpec((M, C), lambda b: (0, 0)),          # BN scale
        pl.BlockSpec((M, C), lambda b: (0, 0)),          # BN bias
        pl.BlockSpec((C, D), lambda b: (0, 0)),          # fc weight (C, D)
        pl.BlockSpec((1, D), lambda b: (0, 0)),          # fc bias
        pl.BlockSpec((D, M * C), lambda b: (0, 0)),      # fused fcs weight
        pl.BlockSpec((1, M * C), lambda b: (0, 0)),      # fused fcs bias
    ]

    out = pl.pallas_call(
        skconv_kernel,
        out_shape=jax.ShapeDtypeStruct((B, HW, C), jnp.float32),
        grid_spec=pltpu.PrefetchScalarGridSpec(
            num_scalar_prefetch=0,
            grid=(B,),
            in_specs=in_specs,
            out_specs=pl.BlockSpec((1, HW, C), lambda b: (b, 0, 0)),
        ),
        compiler_params=pltpu.CompilerParams(
            dimension_semantics=("parallel",)),
    )(xpad, *wconv_list, bn_scale, bn_bias, wfc_t, bfc, wfcs_cat, bfcs_cat)

    return out.reshape(B, H, W, C)


# --------------------------------------------------------------------------
# Glue: deterministic parameter init + compact grouped-conv weight packing
# --------------------------------------------------------------------------
def pack_branch_weight(w):
    """PyTorch grouped conv weight (Cout, Cin/G, k, k) -> compact im2col weight
    (k*k*C, Cout): one dense (C, Cout) slab per tap (group-block structure kept
    inside each slab), tap order (dh, dw) row-major to match the kernel LHS."""
    cout, cin_g, k, _ = w.shape
    cg_out = cout // G
    taps = []
    for dh in range(k):
        for dw in range(k):
            dense = jnp.zeros((C, cout), jnp.float32)
            for g in range(G):
                wg = w[g * cg_out:(g + 1) * cg_out, :, dh, dw]   # (cg_out, cin_g)
                dense = dense.at[g * cin_g:(g + 1) * cin_g,
                                 g * cg_out:(g + 1) * cg_out].set(wg.T)
            taps.append(dense)
    return jnp.concatenate(taps, axis=0)                          # (k*k*C, Cout)


def make_params(key):
    keys = jax.random.split(key, 12)
    conv_ws = []
    for m in range(M):
        k = 1 + 2 * m
        conv_ws.append(0.1 * jax.random.normal(keys[m], (C, C // G, k, k),
                                               jnp.float32))
    bn_gamma = 1.0 + 0.1 * jax.random.normal(keys[4], (M, C), jnp.float32)
    bn_beta = 0.1 * jax.random.normal(keys[5], (M, C), jnp.float32)
    # TODO(synk): eval-mode BatchNorm folded with default running stats
    # (mean=0, var=1); fold the module's actual running stats in real use.
    bn_scale = bn_gamma / jnp.sqrt(1.0 + BN_EPS)
    bn_bias = bn_beta
    fc_w = 0.1 * jax.random.normal(keys[6], (D, C), jnp.float32)    # Linear(C, D)
    fc_b = 0.1 * jax.random.normal(keys[7], (D,), jnp.float32)
    fcs_w = 0.1 * jax.random.normal(keys[8], (M, C, D), jnp.float32)  # M x Linear(D, C)
    fcs_b = 0.1 * jax.random.normal(keys[9], (M, C), jnp.float32)
    return conv_ws, bn_scale, bn_bias, fc_w, fc_b, fcs_w, fcs_b, keys[10]


# --------------------------------------------------------------------------
# Pure-JAX reference (matches the PyTorch forward, NCHW)
# --------------------------------------------------------------------------
def skconv_reference(x_nchw, conv_ws, bn_scale, bn_bias, fc_w, fc_b, fcs_w, fcs_b):
    feas = []
    for m in range(M):
        pad = m
        y = jax.lax.conv_general_dilated(
            x_nchw, conv_ws[m], window_strides=(1, 1),
            padding=[(pad, pad), (pad, pad)],
            dimension_numbers=("NCHW", "OIHW", "NCHW"),
            feature_group_count=G,
            precision=jax.lax.Precision.HIGHEST)
        y = y * bn_scale[m][None, :, None, None] + bn_bias[m][None, :, None, None]
        feas.append(jnp.maximum(y, 0.0))
    feas = jnp.stack(feas, axis=1)                       # (B, M, C, H, W)
    fea_u = feas.sum(axis=1)
    fea_s = fea_u.mean(axis=(2, 3))                      # (B, C)
    fea_z = fea_s @ fc_w.T + fc_b                        # (B, D)
    vs = jnp.stack([fea_z @ fcs_w[m].T + fcs_b[m] for m in range(M)], axis=1)
    att = jax.nn.softmax(vs, axis=1)                     # (B, M, C)
    return (feas * att[:, :, :, None, None]).sum(axis=1)


if __name__ == "__main__":
    key = jax.random.PRNGKey(0)
    conv_ws, bn_scale, bn_bias, fc_w, fc_b, fcs_w, fcs_b, xkey = make_params(key)
    x_nchw = jax.random.normal(xkey, (B, C, H, W), jnp.float32)
    x_nhwc = jnp.transpose(x_nchw, (0, 2, 3, 1))

    # Kernel-side parameter packing (compact per-branch im2col weights, fused fcs)
    wconv_list = [pack_branch_weight(conv_ws[m]) for m in range(M)]
    wfcs_cat = jnp.concatenate([fcs_w[m].T for m in range(M)], axis=1)  # (D, M*C)
    bfcs_cat = fcs_b.reshape(1, M * C)                                  # (1, M*C)

    out = skconv_pallas(x_nhwc, wconv_list, bn_scale, bn_bias,
                        fc_w.T, fc_b[None, :], wfcs_cat, bfcs_cat)
    out = jax.block_until_ready(out)

    ref = skconv_reference(x_nchw, conv_ws, bn_scale, bn_bias,
                           fc_w, fc_b, fcs_w, fcs_b)
    ref_nhwc = jnp.transpose(ref, (0, 2, 3, 1))

    err = float(jnp.max(jnp.abs(out - ref_nhwc)))
    assert jnp.allclose(out, ref_nhwc, atol=1e-3, rtol=1e-3), err
    print("KERNEL_OK")
</pallas_src>

<mosaic_0001>
module attributes {stable_mosaic.version = 11 : i64} {
  func.func @skconv_kernel(%arg0: i32, %arg1: memref<1x10x10x128xf32, #tpu.memory_space<vmem>>, %arg2: memref<128x128xf32, #tpu.memory_space<vmem>>, %arg3: memref<1152x128xf32, #tpu.memory_space<vmem>>, %arg4: memref<2x128xf32, #tpu.memory_space<vmem>>, %arg5: memref<2x128xf32, #tpu.memory_space<vmem>>, %arg6: memref<128x32xf32, #tpu.memory_space<vmem>>, %arg7: memref<1x32xf32, #tpu.memory_space<vmem>>, %arg8: memref<32x256xf32, #tpu.memory_space<vmem>>, %arg9: memref<1x256xf32, #tpu.memory_space<vmem>>, %arg10: memref<1x64x128xf32, #tpu.memory_space<vmem>>) attributes {dimension_semantics = [#tpu.dimension_semantics<parallel>], iteration_bounds = array<i64: 2>, scalar_prefetch = 0 : i64, scratch_operands = 0 : i64, tpu.core_type = #tpu.core_type<tc>, window_params = [{transform_indices = @transform_0, window_bounds = array<i64: 1, 10, 10, 128>}, {pipeline_mode = #tpu.pipeline_mode<synchronous>, transform_indices = @transform_1, window_bounds = array<i64: 128, 128>}, {pipeline_mode = #tpu.pipeline_mode<synchronous>, transform_indices = @transform_2, window_bounds = array<i64: 1152, 128>}, {pipeline_mode = #tpu.pipeline_mode<synchronous>, transform_indices = @transform_3, window_bounds = array<i64: 2, 128>}, {pipeline_mode = #tpu.pipeline_mode<synchronous>, transform_indices = @transform_4, window_bounds = array<i64: 2, 128>}, {pipeline_mode = #tpu.pipeline_mode<synchronous>, transform_indices = @transform_5, window_bounds = array<i64: 128, 32>}, {pipeline_mode = #tpu.pipeline_mode<synchronous>, transform_indices = @transform_6, window_bounds = array<i64: 1, 32>}, {pipeline_mode = #tpu.pipeline_mode<synchronous>, transform_indices = @transform_7, window_bounds = array<i64: 32, 256>}, {pipeline_mode = #tpu.pipeline_mode<synchronous>, transform_indices = @transform_8, window_bounds = array<i64: 1, 256>}, {transform_indices = @transform_9, window_bounds = array<i64: 1, 64, 128>}]} {
    %c0 = arith.constant 0 : index
    %c0_0 = arith.constant 0 : index
    %c0_1 = arith.constant 0 : index
    %c0_2 = arith.constant 0 : index
    %0 = vector.load %arg1[%c0, %c0_0, %c0_1, %c0_2] : memref<1x10x10x128xf32, #tpu.memory_space<vmem>>, vector<1x10x10x128xf32>
    %1 = vector.shape_cast %0 : vector<1x10x10x128xf32> to vector<10x10x128xf32>
    %2 = vector.extract_strided_slice %1 {offsets = [0, 0, 0], sizes = [8, 8, 128], strides = [1, 1, 1]} : vector<10x10x128xf32> to vector<8x8x128xf32>
    %3 = vector.shape_cast %2 : vector<8x8x128xf32> to vector<64x128xf32>
    %4 = vector.extract_strided_slice %1 {offsets = [0, 1, 0], sizes = [8, 8, 128], strides = [1, 1, 1]} : vector<10x10x128xf32> to vector<8x8x128xf32>
    %5 = vector.shape_cast %4 : vector<8x8x128xf32> to vector<64x128xf32>
    %6 = vector.extract_strided_slice %1 {offsets = [0, 2, 0], sizes = [8, 8, 128], strides = [1, 1, 1]} : vector<10x10x128xf32> to vector<8x8x128xf32>
    %7 = vector.shape_cast %6 : vector<8x8x128xf32> to vector<64x128xf32>
    %8 = vector.extract_strided_slice %1 {offsets = [1, 0, 0], sizes = [8, 8, 128], strides = [1, 1, 1]} : vector<10x10x128xf32> to vector<8x8x128xf32>
    %9 = vector.shape_cast %8 : vector<8x8x128xf32> to vector<64x128xf32>
    %10 = vector.extract_strided_slice %1 {offsets = [1, 1, 0], sizes = [8, 8, 128], strides = [1, 1, 1]} : vector<10x10x128xf32> to vector<8x8x128xf32>
    %11 = vector.shape_cast %10 : vector<8x8x128xf32> to vector<64x128xf32>
    %12 = vector.extract_strided_slice %1 {offsets = [1, 2, 0], sizes = [8, 8, 128], strides = [1, 1, 1]} : vector<10x10x128xf32> to vector<8x8x128xf32>
    %13 = vector.shape_cast %12 : vector<8x8x128xf32> to vector<64x128xf32>
    %14 = vector.extract_strided_slice %1 {offsets = [2, 0, 0], sizes = [8, 8, 128], strides = [1, 1, 1]} : vector<10x10x128xf32> to vector<8x8x128xf32>
    %15 = vector.shape_cast %14 : vector<8x8x128xf32> to vector<64x128xf32>
    %16 = vector.extract_strided_slice %1 {offsets = [2, 1, 0], sizes = [8, 8, 128], strides = [1, 1, 1]} : vector<10x10x128xf32> to vector<8x8x128xf32>
    %17 = vector.shape_cast %16 : vector<8x8x128xf32> to vector<64x128xf32>
    %18 = vector.extract_strided_slice %1 {offsets = [2, 2, 0], sizes = [8, 8, 128], strides = [1, 1, 1]} : vector<10x10x128xf32> to vector<8x8x128xf32>
    %19 = vector.shape_cast %18 : vector<8x8x128xf32> to vector<64x128xf32>
    %c0_3 = arith.constant 0 : index
    %c0_4 = arith.constant 0 : index
    %20 = vector.load %arg2[%c0_3, %c0_4] : memref<128x128xf32, #tpu.memory_space<vmem>>, vector<128x128xf32>
    %cst = arith.constant dense<0.000000e+00> : vector<64x128xf32>
    %21 = tpu.matmul %11, %20, %cst {dimension_numbers = #tpu.dot_dimension_numbers<[1], [0], [0], [1], [0, 0, 1, 1], [], []>, precision = #tpu.contract_precision<fp32>} : vector<64x128xf32>, vector<128x128xf32>, vector<64x128xf32> -> vector<64x128xf32>
    %c0_5 = arith.constant 0 : index
    %c0_6 = arith.constant 0 : index
    %22 = vector.load %arg4[%c0_5, %c0_6] : memref<2x128xf32, #tpu.memory_space<vmem>>, vector<1x128xf32>
    %c0_7 = arith.constant 0 : index
    %c0_8 = arith.constant 0 : index
    %23 = vector.load %arg5[%c0_7, %c0_8] : memref<2x128xf32, #tpu.memory_space<vmem>>, vector<1x128xf32>
    %24 = vector.broadcast %22 : vector<1x128xf32> to vector<64x128xf32>
    %25 = arith.mulf %21, %24 : vector<64x128xf32>
    %26 = vector.broadcast %23 : vector<1x128xf32> to vector<64x128xf32>
    %27 = arith.addf %25, %26 : vector<64x128xf32>
    %cst_9 = arith.constant 0.000000e+00 : f32
    %28 = vector.broadcast %cst_9 : f32 to vector<64x128xf32>
    %29 = arith.maximumf %27, %28 : vector<64x128xf32>
    %30 = tpu.concatenate %3, %5, %7, %9, %11, %13, %15, %17, %19 in 1 : vector<64x128xf32>, vector<64x128xf32>, vector<64x128xf32>, vector<64x128xf32>, vector<64x128xf32>, vector<64x128xf32>, vector<64x128xf32>, vector<64x128xf32>, vector<64x128xf32> -> vector<64x1152xf32>
    %c0_10 = arith.constant 0 : index
    %c0_11 = arith.constant 0 : index
    %31 = vector.load %arg3[%c0_10, %c0_11] : memref<1152x128xf32, #tpu.memory_space<vmem>>, vector<1152x128xf32>
    %cst_12 = arith.constant dense<0.000000e+00> : vector<64x128xf32>
    %32 = tpu.matmul %30, %31, %cst_12 {dimension_numbers = #tpu.dot_dimension_numbers<[1], [0], [0], [1], [0, 0, 1, 1], [], []>, precision = #tpu.contract_precision<fp32>} : vector<64x1152xf32>, vector<1152x128xf32>, vector<64x128xf32> -> vector<64x128xf32>
    %c1 = arith.constant 1 : index
    %c0_13 = arith.constant 0 : index
    %33 = vector.load %arg4[%c1, %c0_13] : memref<2x128xf32, #tpu.memory_space<vmem>>, vector<1x128xf32>
    %c1_14 = arith.constant 1 : index
    %c0_15 = arith.constant 0 : index
    %34 = vector.load %arg5[%c1_14, %c0_15] : memref<2x128xf32, #tpu.memory_space<vmem>>, vector<1x128xf32>
    %35 = vector.broadcast %33 : vector<1x128xf32> to vector<64x128xf32>
    %36 = arith.mulf %32, %35 : vector<64x128xf32>
    %37 = vector.broadcast %34 : vector<1x128xf32> to vector<64x128xf32>
    %38 = arith.addf %36, %37 : vector<64x128xf32>
    %cst_16 = arith.constant 0.000000e+00 : f32
    %39 = vector.broadcast %cst_16 : f32 to vector<64x128xf32>
    %40 = arith.maximumf %38, %39 : vector<64x128xf32>
    %41 = arith.addf %29, %40 : vector<64x128xf32>
    %cst_17 = arith.constant dense<0.000000e+00> : vector<128xf32>
    %42 = vector.multi_reduction <add>, %41, %cst_17 [0] : vector<64x128xf32> to vector<128xf32>
    %43 = vector.shape_cast %42 : vector<128xf32> to vector<1x128xf32>
    %cst_18 = arith.constant 6.400000e+01 : f32
    %44 = vector.broadcast %cst_18 : f32 to vector<1x128xf32>
    %45 = arith.divf %43, %44 : vector<1x128xf32>
    %c0_19 = arith.constant 0 : index
    %c0_20 = arith.constant 0 : index
    %46 = vector.load %arg6[%c0_19, %c0_20] : memref<128x32xf32, #tpu.memory_space<vmem>>, vector<128x32xf32>
    %cst_21 = arith.constant dense<0.000000e+00> : vector<1x32xf32>
    %47 = tpu.matmul %45, %46, %cst_21 {dimension_numbers = #tpu.dot_dimension_numbers<[1], [0], [0], [1], [0, 0, 1, 1], [], []>, precision = #tpu.contract_precision<fp32>} : vector<1x128xf32>, vector<128x32xf32>, vector<1x32xf32> -> vector<1x32xf32>
    %c0_22 = arith.constant 0 : index
    %c0_23 = arith.constant 0 : index
    %48 = vector.load %arg7[%c0_22, %c0_23] : memref<1x32xf32, #tpu.memory_space<vmem>>, vector<1x32xf32>
    %49 = arith.addf %47, %48 : vector<1x32xf32>
    %c0_24 = arith.constant 0 : index
    %c0_25 = arith.constant 0 : index
    %50 = vector.load %arg8[%c0_24, %c0_25] : memref<32x256xf32, #tpu.memory_space<vmem>>, vector<32x256xf32>
    %cst_26 = arith.constant dense<0.000000e+00> : vector<1x256xf32>
    %51 = tpu.matmul %49, %50, %cst_26 {dimension_numbers = #tpu.dot_dimension_numbers<[1], [0], [0], [1], [0, 0, 1, 1], [], []>, precision = #tpu.contract_precision<fp32>} : vector<1x32xf32>, vector<32x256xf32>, vector<1x256xf32> -> vector<1x256xf32>
    %c0_27 = arith.constant 0 : index
    %c0_28 = arith.constant 0 : index
    %52 = vector.load %arg9[%c0_27, %c0_28] : memref<1x256xf32, #tpu.memory_space<vmem>>, vector<1x256xf32>
    %53 = arith.addf %51, %52 : vector<1x256xf32>
    %54 = vector.extract_strided_slice %53 {offsets = [0, 0], sizes = [1, 128], strides = [1, 1]} : vector<1x256xf32> to vector<1x128xf32>
    %55 = vector.extract_strided_slice %53 {offsets = [0, 128], sizes = [1, 128], strides = [1, 1]} : vector<1x256xf32> to vector<1x128xf32>
    %56 = arith.maximumf %54, %55 : vector<1x128xf32>
    %57 = arith.subf %54, %56 : vector<1x128xf32>
    %58 = math.exp %57 : vector<1x128xf32>
    %59 = arith.subf %55, %56 : vector<1x128xf32>
    %60 = math.exp %59 : vector<1x128xf32>
    %61 = arith.addf %58, %60 : vector<1x128xf32>
    %cst_29 = arith.constant 1.000000e+00 : f32
    %62 = vector.broadcast %cst_29 : f32 to vector<1x128xf32>
    %63 = arith.divf %62, %61 : vector<1x128xf32>
    %64 = arith.mulf %58, %63 : vector<1x128xf32>
    %65 = vector.broadcast %64 : vector<1x128xf32> to vector<64x128xf32>
    %66 = arith.mulf %29, %65 : vector<64x128xf32>
    %67 = arith.mulf %60, %63 : vector<1x128xf32>
    %68 = vector.broadcast %67 : vector<1x128xf32> to vector<64x128xf32>
    %69 = arith.mulf %40, %68 : vector<64x128xf32>
    %70 = arith.addf %66, %69 : vector<64x128xf32>
    %c0_30 = arith.constant 0 : index
    %c0_31 = arith.constant 0 : index
    %c0_32 = arith.constant 0 : index
    %71 = vector.load %arg10[%c0_30, %c0_31, %c0_32] : memref<1x64x128xf32, #tpu.memory_space<vmem>>, vector<1x64x128xf32>
    %72 = vector.shape_cast %71 : vector<1x64x128xf32> to vector<64x128xf32>
    %73 = vector.shape_cast %70 : vector<64x128xf32> to vector<1x64x128xf32>
    tpu.vector_store %arg10[%c0_30, %c0_31, %c0_32], %73 {strides = array<i32>} : memref<1x64x128xf32, #tpu.memory_space<vmem>>, vector<1x64x128xf32>,
    return
  }
  func.func @transform_0(%arg0: i32) -> (i32, i32, i32, i32) {
    %c0_i32 = arith.constant 0 : i32
    %c0_i32_0 = arith.constant 0 : i32
    %c0_i32_1 = arith.constant 0 : i32
    %c0_i32_2 = arith.constant 0 : i32
    return %arg0, %c0_i32, %c0_i32_0, %c0_i32_1 : i32, i32, i32, i32
  }
  func.func @transform_1(%arg0: i32) -> (i32, i32) {
    %c0_i32 = arith.constant 0 : i32
    %c0_i32_0 = arith.constant 0 : i32
    %c0_i32_1 = arith.constant 0 : i32
    return %c0_i32, %c0_i32_0 : i32, i32
  }
  func.func @transform_2(%arg0: i32) -> (i32, i32) {
    %c0_i32 = arith.constant 0 : i32
    %c0_i32_0 = arith.constant 0 : i32
    %c0_i32_1 = arith.constant 0 : i32
    return %c0_i32, %c0_i32_0 : i32, i32
  }
  func.func @transform_3(%arg0: i32) -> (i32, i32) {
    %c0_i32 = arith.constant 0 : i32
    %c0_i32_0 = arith.constant 0 : i32
    %c0_i32_1 = arith.constant 0 : i32
    return %c0_i32, %c0_i32_0 : i32, i32
  }
  func.func @transform_4(%arg0: i32) -> (i32, i32) {
    %c0_i32 = arith.constant 0 : i32
    %c0_i32_0 = arith.constant 0 : i32
    %c0_i32_1 = arith.constant 0 : i32
    return %c0_i32, %c0_i32_0 : i32, i32
  }
  func.func @transform_5(%arg0: i32) -> (i32, i32) {
    %c0_i32 = arith.constant 0 : i32
    %c0_i32_0 = arith.constant 0 : i32
    %c0_i32_1 = arith.constant 0 : i32
    return %c0_i32, %c0_i32_0 : i32, i32
  }
  func.func @transform_6(%arg0: i32) -> (i32, i32) {
    %c0_i32 = arith.constant 0 : i32
    %c0_i32_0 = arith.constant 0 : i32
    %c0_i32_1 = arith.constant 0 : i32
    return %c0_i32, %c0_i32_0 : i32, i32
  }
  func.func @transform_7(%arg0: i32) -> (i32, i32) {
    %c0_i32 = arith.constant 0 : i32
    %c0_i32_0 = arith.constant 0 : i32
    %c0_i32_1 = arith.constant 0 : i32
    return %c0_i32, %c0_i32_0 : i32, i32
  }
  func.func @transform_8(%arg0: i32) -> (i32, i32) {
    %c0_i32 = arith.constant 0 : i32
    %c0_i32_0 = arith.constant 0 : i32
    %c0_i32_1 = arith.constant 0 : i32
    return %c0_i32, %c0_i32_0 : i32, i32
  }
  func.func @transform_9(%arg0: i32) -> (i32, i32, i32) {
    %c0_i32 = arith.constant 0 : i32
    %c0_i32_0 = arith.constant 0 : i32
    %c0_i32_1 = arith.constant 0 : i32
    return %arg0, %c0_i32, %c0_i32_0 : i32, i32, i32
  }
}

</mosaic_0001>

<bundles_post_ra>
// kernel: tpu_custom_call.1
= control target key start
LH: loop header
LB: loop body
LE: loop exit
PB: predicated region body
PF: predicated region fallthrough
CT: control target
= control target key end

     0   :  { %14 = vsyncpa [#allocation3], 0  ;;  %s18497_s0 = inlined_call_operand.vmem [shape: f32[2,10,10,128], index: 0, kind: input, shape index: {}]   ;;  %s18498_s1 = inlined_call_operand.vmem [shape: f32[128,128], index: 1, kind: input, shape index: {}]   ;;  %s18499_s2 = inlined_call_operand.hbm [shape: f32[1152,128], index: 2, kind: input, shape index: {}]   ;;  %s18500_s3 = inlined_call_operand.vmem [shape: f32[2,128], index: 3, kind: input, shape index: {}]   ;;  %s18501_s4 = inlined_call_operand.vmem [shape: f32[2,128], index: 4, kind: input, shape index: {}]   ;;  %s18502_s5 = inlined_call_operand.vmem [shape: f32[128,32], index: 5, kind: input, shape index: {}]   ;;  %s18503_s6 = inlined_call_operand.vmem [shape: f32[1,32], index: 6, kind: input, shape index: {}]   ;;  %s18504_s7 = inlined_call_operand.vmem [shape: f32[32,256], index: 7, kind: input, shape index: {}]   ;;  %s18505_s8 = inlined_call_operand.vmem [shape: f32[1,256], index: 8, kind: input, shape index: {}]   ;;  %s18506_s9 = inlined_call_operand.hbm [shape: f32[2,64,128], index: 9, kind: output, shape index: {}]  }
   0x1   :  { %15 = vsyncpa [#allocation4], 0 }
   0x2   :  { %17 = vsyncpa [#allocation4 + $0x1], 0  ;;  %s13164_s30 = smov 0   ;;  %s13166_s10 = smov 0  }
   0x3   :  { %s13168_s11 = smov 0   ;;  %s13170_s12 = smov 0  }
   0x4 LB: > { %s13185_s13 = sadd.s32 4294967295, %s13103_s12   ;;  %s8984_s14 = sadd.s32 4294967294, %s13103_s12   ;;  %s13103_s12 = sphi %s13170_s12, %s20734_s12   ;;  %s13099_s11 = sphi %s13168_s11, %s20733_s11   ;;  %s13095_s10 = sphi %s13166_s10, %s20732_s10   ;;  %s13091_s30 = sphi %s13164_s30, %s20731_s30  }
   0x5   : > { %s13189_s15 = sadd.s32 1, %s13103_s12   ;;  %s224_s16 = sadd.s32 1, %s13099_s11 }
   0x6   : > { %s221_s17 = ssub.s32 %s13103_s12, %s13189_s15  ;;  %p234_p0 = scmp.ne.s32.totalorder %s13099_s11, %s13095_s10 }
   0x7   : > { %p222_p1 = scmp.eq.s32.totalorder %s221_s17, 0  ;;  %p235_p2 = scmp.eq.s32.totalorder %s13185_s13, 1 }
   0x8   : > { %p240_p3 = scmp.ne.s32.totalorder %s13095_s10, %s13091_s30  ;;  %p241_p4 = scmp.eq.s32.totalorder %s8984_s14, 1 }
   0x9   : > { %s13200_s18 = scalar_select %p222_p1, %s13099_s11, %s224_s16  }
   0xa   : > { %p13202_p5 = por %p235_p2, %p234_p0  ;;  %p13206_p6 = por %p241_p4, %p240_p3 }
   0xb   : > { %p8985_p7 = scmp.ge.s32.totalorder %s13103_s12, 1  ;;  %p248_p8 = scmp.lt.s32.totalorder %s13103_s12, 3 }
   0xc   : > { %s19204_s19 = scalar_select %p13202_p5, 1, 0 }
   0xd   : > { %s19205_s20 = scalar_select %p13206_p6, 1, 0 }
   0xe   : > { %p18507_p9 = scmp.eq.s32.totalorder %s13185_s13, 0  ;;  %p13213_p10 = pnand %p8985_p7, %p248_p8 }
   0xf   : > { %s13105_s22 = smov [#allocation2]   ;;  %s13009_s27 = scalar_lea.hbm %s18499_s2, 18432 }
  0x10   : > { %s19206_s21 = scalar_select %p13213_p10, 1, 0 }
  0x11   : > { %s263_s23 = sshll.u32 %s13105_s22, 4  ;;  %p12935_p11 = pneg %p13213_p10  ;;  %s264_s23 = int_to_ptr.vmem [resolvable:$true] %s263_s23 }
  0x12   : > { %p13010_p13 = scmp.ne.s32.totalorder %s18499_s2, %s13009_s27  ;;  %p13016_p3 = scmp.lt.u32.totalorder %s13009_s27, %s18499_s2 }
  0x13   : > { %p13221_p12 = pnand %p18507_p9, %p12935_p11 }
  0x15   : > { %p13011_p0 = pneg %p13221_p12 }
  0x17   : > { %p13012_p1 = pnand %p13011_p0, %p13010_p13 }
  0x19   : > { %p13013_p2 = pneg %p13012_p1 }
  0x1b   : > { %p13018_p4 = pnand %p13016_p3, %p13013_p2 }
  0x1d   : > { %13021 = shalt.err (!%p13018_p4)
}
  0x1e   : > { %s13022_s17 = scalar_lea.vmem %s264_s23, 18432  ;;  %p13030_p9 = scmp.lt.s32.totalorder %s264_s23, %s264_s23 }
  0x1f   : > { %p13023_p7 = scmp.ne.s32.totalorder %s264_s23, %s13022_s17  ;;  %p13031_p6 = scmp.lt.s32.totalorder %s13022_s17, %s13022_s17 }
  0x21   : > { %p13025_p8 = pnand %p13023_p7, %p13011_p0  ;;  %p13032_p5 = por %p13031_p6, %p13030_p9 }
  0x23   : > { %p13026_p11 = pneg %p13025_p8 }
  0x25   : > { %p13033_p10 = pnand %p13032_p5, %p13026_p11 }
  0x27   : > { %13036 = shalt.err (!%p13033_p10)
}
  0x28   : > { %s13106_s22 = smov 128   ;;  %s13107_s25 = smov 8  }
  0x29   : > { %12938 = dma.hbm_to_vmem [thread:$0]  (!%p13221_p12), %s18499_s2, 18432, %s264_s23, [#allocation3], %s13106_s22, %s13106_s22, %s13107_s25  }
  0x2a   : > { %p19208_p13 = scmp.ne.s32.totalorder %s19206_s21, 0 }
  0x2c   : > { %305 = sbr.rel (%p19208_p13) target bundleno = 1753 (0x6d9), region = 56 }
  0x33   : > { %p19209_p1 = scmp.eq.s32.totalorder %s13185_s13, 0 }
  0x35   : > { %13082 = dma.done.wait (%p19209_p1), [#allocation3], 18432   ;;  %p19210_p0 = pmov %p19209_p1 }
  0x36   : > { %v13250_v0 = vld [vmem:[%s18498_s1] sm:$0xff]  ;;  %v13255_v1 = vld [vmem:[%s18498_s1 + $0x8] sm:$0xff]  ;;  %v13262_v12 = vld [vmem:[%s18498_s1 + $0x10] sm:$0xff]  ;;  %p341_p5 = scmp.lt.s32.totalorder %s13185_s13, 1  ;;  %vm382_vm0 = vcmask 1046528   ;;  %vm415_vm1 = vcmask 1045504  }
  0x37   : > { %13084 = vsyncadd (%p19210_p0), [#allocation3], 4294948864  ;;  %v1476_v2 = vld [vmem:[#allocation2 + $0x80] sm:$0xff]  ;;  %v18519_v3 = vand.u32 4294901760, %v13250_v0  ;;  %v18518_v4 = vand.u32 4294901760, %v13255_v1  ;;  %v1477_v5 = vld [vmem:[#allocation2 + $0x88] sm:$0xff] }
  0x38   : > { %v1653_v6 = vand.u32 4294901760, %v1476_v2  ;;  %v1460_v7 = vld [vmem:[#allocation2] sm:$0xff]  ;;  %v1461_v8 = vld [vmem:[#allocation2 + $0x8] sm:$0xff]  ;;  %v1656_v9 = vand.u32 4294901760, %v1477_v5  ;;  %v13267_v13 = vld [vmem:[%s18498_s1 + $0x18] sm:$0xff]  ;;  %v18517_v16 = vand.u32 4294901760, %v13262_v12 }
  0x39   : > { %v1605_v10 = vand.u32 4294901760, %v1460_v7  ;;  %v1608_v11 = vand.u32 4294901760, %v1461_v8  ;;  %v1478_v14 = vld [vmem:[#allocation2 + $0x90] sm:$0xff]  ;;  %v13273_v15 = vpack.c.bf16 %v18518_v4, %v18519_v3  ;;  %v18516_v17 = vand.u32 4294901760, %v13267_v13  ;;  %v1479_v18 = vld [vmem:[#allocation2 + $0x98] sm:$0xff]  ;;  %v13288_v25 = vld [vmem:[%s18498_s1 + $0x20] sm:$0xff] }
  0x3a   : > { %v1462_v19 = vld [vmem:[#allocation2 + $0x10] sm:$0xff]  ;;  %v1463_v20 = vld [vmem:[#allocation2 + $0x18] sm:$0xff]  ;;  %v13277_v21 = vpack.c.bf16 %v1656_v9, %v1653_v6  ;;  %v13279_v22 = vsub.f32 %v1476_v2, %v1653_v6  ;;  %v13281_v23 = vsub.f32 %v1477_v5, %v1656_v9  ;;  %v13293_v26 = vld [vmem:[%s18498_s1 + $0x28] sm:$0xff]  ;;  %v1659_v30 = vand.u32 4294901760, %v1478_v14  ;;  %s13378_s22 = scalar_select %p341_p5, %s13185_s13, 1 }
  0x3b   : > { %19211 = vst [vmem:[#allocation8_spill] sm:$0xff] %v13273_v15  ;;  %v13283_v24 = vpack.c.bf16 %v1608_v11, %v1605_v10  ;;  %v1480_v27 = vld [vmem:[#allocation2 + $0xa0] sm:$0xff]  ;;  %11475 = vmatprep.subr.bf16.mxu0 %v13273_v15  ;;  %v13296_v28 = vsub.f32 %v1460_v7, %v1605_v10  ;;  %v13302_v29 = vpack.c.bf16 %v18516_v17, %v18517_v16  ;;  %v1662_v31 = vand.u32 4294901760, %v1479_v18  ;;  %v1481_v32 = vld [vmem:[#allocation2 + $0xa8] sm:$0xff]  ;;  %v13311_v39 = vld [vmem:[%s18498_s1 + $0x30] sm:$0xff]  ;;  %s9001_s24 = sshll.u32 %s13185_s13, 10 }
  0x3c   : > { %19212 = vst [vmem:[#allocation9_spill] sm:$0xff] %v13277_v21  ;;  %v1464_v33 = vld [vmem:[#allocation2 + $0x20] sm:$0xff]  ;;  %11477 = vmatpush3.bf16.msra.mxu0 %v13273_v15  ;;  %11667 = vmatprep.subr.bf16.mxu1 %v13277_v21  ;;  %v1611_v34 = vand.u32 4294901760, %v1462_v19  ;;  %v1614_v35 = vand.u32 4294901760, %v1463_v20  ;;  %v18513_v36 = vand.u32 4294901760, %v13288_v25  ;;  %v18512_v37 = vand.u32 4294901760, %v13293_v26  ;;  %s18450_s17 = scalar_lea.hbm %s18506_s9, %s9001_s24 }
  0x3d   : > { %19213 = vst [vmem:[#allocation10_spill] sm:$0xff] %v13283_v24  ;;  %19214 = vst [vmem:[#allocation11_spill] sm:$0xff] %v13302_v29  ;;  %v1465_v38 = vld [vmem:[#allocation2 + $0x28] sm:$0xff]  ;;  %11669 = vmatpush3.bf16.msra.mxu1 %v13283_v24  ;;  %v13314_v40 = vsub.f32 %v1461_v8, %v1608_v11  ;;  %11479 = vmatprep.subr.bf16.mxu0 %v13302_v29  ;;  %v13317_v41 = vpack.c.bf16 %v1662_v31, %v1659_v30  ;;  %v1665_v43 = vand.u32 4294901760, %v1480_v27  ;;  %v13324_v44 = vld [vmem:[%s18498_s1 + $0x38] sm:$0xff]  ;;  %s12928_s23 = smul.u32 160, %s13378_s22 }
  0x3e   : > { %v13319_v42 = vsub.f32 %v1478_v14, %v1659_v30  ;;  %v1482_v45 = vld [vmem:[#allocation2 + $0xb0] sm:$0xff]  ;;  %v1483_v46 = vld [vmem:[#allocation2 + $0xb8] sm:$0xff]  ;;  %v13326_v47 = vsub.f32 %v1479_v18, %v1662_v31  ;;  %v13328_v48 = vpack.c.bf16 %v1614_v35, %v1611_v34  ;;  %v13330_v49 = vsub.f32 %v1462_v19, %v1611_v34  ;;  %v13348_v61 = vld [vmem:[%s18498_s1 + $0x40] sm:$0xff]  ;;  %s338_s22 = sand.u32 1, %s13095_s10   ;;  %p20729_p9 = scmp.ne.s32.totalorder %s19204_s19, 0 }
  0x3f   : > { %19215 = vst [vmem:[#allocation12_spill] sm:$0xff] %v13317_v41  ;;  %v13336_v50 = vpack.c.bf16 %v18512_v37, %v18513_v36  ;;  %v1466_v51 = vld [vmem:[#allocation2 + $0x30] sm:$0xff]  ;;  %11671 = vmatprep.subr.bf16.mxu1 %v13317_v41  ;;  %v13340_v52 = vsub.f32 %v1463_v20, %v1614_v35  ;;  %v1668_v53 = vand.u32 4294901760, %v1481_v32  ;;  %v1617_v54 = vand.u32 4294901760, %v1464_v33  ;;  %v1467_v60 = vld [vmem:[#allocation2 + $0x38] sm:$0xff]  ;;  %v13361_v6 = vld [vmem:[%s18498_s1 + $0x48] sm:$0xff]  ;;  %s13471_s29 = scalar_lea.vmem %s18497_s0, %s12928_s23 }
  0x40   : > { %19216 = vst [vmem:[#allocation13_spill] sm:$0xff] %v13328_v48  ;;  %v1620_v55 = vand.u32 4294901760, %v1465_v38  ;;  %11481 = vmatpush3.bf16.msra.mxu0 %v13302_v29  ;;  %v18511_v56 = vand.u32 4294901760, %v13311_v39  ;;  %v18510_v57 = vand.u32 4294901760, %v13324_v44  ;;  %v1671_v58 = vand.u32 4294901760, %v1482_v45  ;;  %v1484_v7 = vld [vmem:[#allocation2 + $0xc0] sm:$0xff] }
  0x41   : > { %19217 = vst [vmem:[#allocation14_spill] sm:$0xff] %v13336_v50  ;;  %19218 = vst [vmem:[#allocation15_spill] sm:$0xff] %v13340_v52  ;;  %v1674_v59 = vand.u32 4294901760, %v1483_v46  ;;  %11673 = vmatpush3.bf16.msra.mxu1 %v13328_v48  ;;  %11483 = vmatprep.subr.bf16.mxu0 %v13336_v50  ;;  %v13352_v62 = vpack.c.bf16 %v1668_v53, %v1665_v43  ;;  %v13354_v63 = vsub.f32 %v1480_v27, %v1665_v43  ;;  %v1485_v8 = vld [vmem:[#allocation2 + $0xc8] sm:$0xff]  ;;  %v1468_v18 = vld [vmem:[#allocation2 + $0x40] sm:$0xff]  ;;  %vm13109_vm2 = vmmov 0  }
  0x42   : > { %v13356_v2 = vpack.c.bf16 %v1620_v55, %v1617_v54  ;;  %v1623_v5 = vand.u32 4294901760, %v1466_v51  ;;  %v13363_v9 = vsub.f32 %v1481_v32, %v1668_v53  ;;  %v13365_v10 = vsub.f32 %v1464_v33, %v1617_v54  ;;  %v1469_v19 = vld [vmem:[#allocation2 + $0x48] sm:$0xff]  ;;  %v13393_v43 = vld [vmem:[%s18498_s1 + $0x50] sm:$0xff]  ;;  %v1491_v48 = vld [vmem:[#allocation2 + $0xf8] sm:$0xff]  ;;  %s8990_s14 = sshll.u32 %s338_s22, 6  ;;  %s18456_s25 = scalar_lea.sflag [#allocation4], %s338_s22 }
  0x43   : > { %19219 = vst [vmem:[#allocation16_spill] sm:$0xff] %v13352_v62  ;;  %v13371_v11 = vpack.c.bf16 %v18510_v57, %v18511_v56  ;;  %v13373_v14 = vpack.c.bf16 %v1674_v59, %v1671_v58  ;;  %11675 = vmatprep.subr.bf16.mxu1 %v13352_v62  ;;  %v13381_v20 = vsub.f32 %v1465_v38, %v1620_v55  ;;  %v1626_v31 = vand.u32 4294901760, %v1467_v60  ;;  %v13398_v38 = vld [vmem:[%s18498_s1 + $0x58] sm:$0xff]  ;;  %v1486_v55 = vld [vmem:[#allocation2 + $0xd0] sm:$0xff]  ;;  %s340_s21 = scalar_lea.vmem [#allocation5], %s8990_s14  ;;  %s13111_s28 = smov [#allocation5]  }
  0x44   : > { %19220 = vst [vmem:[#allocation17_spill] sm:$0xff] %v13356_v2  ;;  %v13383_v27 = vsub.f32 %v1482_v45, %v1671_v58  ;;  %v13385_v30 = vsub.f32 %v1483_v46, %v1674_v59  ;;  %11485 = vmatpush3.bf16.msra.mxu0 %v13336_v50  ;;  %v18515_v32 = vand.u32 4294901760, %v13348_v61  ;;  %v18514_v33 = vand.u32 4294901760, %v13361_v6  ;;  %v1487_v58 = vld [vmem:[#allocation2 + $0xd8] sm:$0xff]  ;;  %v1470_v59 = vld [vmem:[#allocation2 + $0x50] sm:$0xff]  ;;  %s8910_s23 = sshll.u32 %s340_s21, 4  ;;  %s18452_s23 = int_to_ptr.vmem [resolvable:$true] %s8910_s23 }
  0x45   : > { %19221 = vst [vmem:[#allocation18_spill] sm:$0xff] %v13371_v11  ;;  %19222 = vst [vmem:[#allocation19_spill] sm:$0xff] %v13373_v14  ;;  %v1677_v34 = vand.u32 4294901760, %v1484_v7  ;;  %v1680_v35 = vand.u32 4294901760, %v1485_v8  ;;  %11677 = vmatpush3.bf16.msra.mxu1 %v13356_v2  ;;  %11487 = vmatprep.subr.bf16.mxu0 %v13371_v11  ;;  %v13402_v45 = vpack.c.bf16 %v1626_v31, %v1623_v5  ;;  %v1629_v53 = vand.u32 4294901760, %v1468_v18  ;;  %v13448_v17 = vld [vmem:[%s18498_s1 + $0x70] sm:$0xff] }
  0x46   : > { %v13404_v46 = vsub.f32 %v1466_v51, %v1623_v5  ;;  %v1632_v54 = vand.u32 4294901760, %v1469_v19  ;;  %11679 = vmatprep.subr.bf16.mxu1 %v13373_v14  ;;  %v13407_v57 = vsub.f32 %v1467_v60, %v1626_v31  ;;  %v13413_v56 = vpack.c.bf16 %v18514_v33, %v18515_v32  ;;  %v1471_v51 = vld [vmem:[#allocation2 + $0x58] sm:$0xff]  ;;  %v13422_v5 = vld [vmem:[%s18498_s1 + $0x60] sm:$0xff]  ;;  %v13427_v60 = vld [vmem:[%s18498_s1 + $0x68] sm:$0xff]  ;;  %s13037_s26 = scalar_lea.vmem %s18452_s23, 1024  ;;  %s13041_s27 = sshll.u32 %s13111_s28, 4  ;;  %s13042_s27 = int_to_ptr.vmem [resolvable:$false] %s13041_s27 }
  0x47   : > { %19223 = vst [vmem:[#allocation20_spill] sm:$0xff] %v13402_v45  ;;  %v13415_v37 = vpack.c.bf16 %v1680_v35, %v1677_v34  ;;  %v13417_v36 = vsub.f32 %v1484_v7, %v1677_v34  ;;  %19226 = vst [vmem:[#allocation23_spill] sm:$0xff] %v13422_v5  ;;  %v13430_v31 = vsub.f32 %v1485_v8, %v1680_v35  ;;  %v1488_v34 = vld [vmem:[#allocation2 + $0xe0] sm:$0xff]  ;;  %v1683_v16 = vand.u32 4294901760, %v1486_v55  ;;  %v1489_v14 = vld [vmem:[#allocation2 + $0xe8] sm:$0xff]  ;;  %p13038_p6 = scmp.ne.s32.totalorder %s18452_s23, %s13037_s26  ;;  %p13044_p2 = scmp.lt.s32.totalorder %s18452_s23, %s13042_s27 }
  0x48   : > { %19224 = vst [vmem:[#allocation21_spill] sm:$0xff] %v13413_v56  ;;  %19227 = vst [vmem:[#allocation24_spill] sm:$0xff] %v13427_v60  ;;  %v13432_v33 = vpack.c.bf16 %v1632_v54, %v1629_v53  ;;  %v13434_v32 = vsub.f32 %v1468_v18, %v1629_v53  ;;  %11489 = vmatpush3.bf16.msra.mxu0 %v13371_v11  ;;  %v1686_v4 = vand.u32 4294901760, %v1487_v58  ;;  %v1635_v3 = vand.u32 4294901760, %v1470_v59  ;;  %v1472_v7 = vld [vmem:[#allocation2 + $0x60] sm:$0xff]  ;;  %v1473_v11 = vld [vmem:[#allocation2 + $0x68] sm:$0xff] }
  0x49   : > { %19225 = vst [vmem:[#allocation22_spill] sm:$0xff] %v13415_v37  ;;  %11681 = vmatpush3.bf16.msra.mxu1 %v13402_v45  ;;  %11491 = vmatprep.subr.bf16.mxu0 %v13413_v56  ;;  %v13441_v8 = vsub.f32 %v1469_v19, %v1632_v54  ;;  %v1638_v18 = vand.u32 4294901760, %v1471_v51  ;;  %v19229_v45 = vand.u32 4294901760, %v13393_v43  ;;  %v19230_v2 = vand.u32 4294901760, %v13398_v38  ;;  %v13464_v62 = vld [vmem:[%s18498_s1 + $0x78] sm:$0xff]  ;;  %v1490_v50 = vld [vmem:[#allocation2 + $0xf0] sm:$0xff]  ;;  %p13039_p10 = pnand %p13038_p6, %p20729_p9 }
  0x4a   : > { %19228 = vst [vmem:[#allocation25_spill] sm:$0xff] %v13432_v33  ;;  %11683 = vmatprep.subr.bf16.mxu1 %v13415_v37  ;;  %v13457_v54 = vpack.c.bf16 %v1686_v4, %v1683_v16  ;;  %v13459_v35 = vsub.f32 %v1486_v55, %v1683_v16  ;;  %v1689_v53 = vand.u32 4294901760, %v1488_v34  ;;  %19234 = vst [vmem:[#allocation29_spill] sm:$0xff] %v13464_v62  ;;  %v19239_v37 = vand.u32 4294901760, %v13422_v5 }
  0x4b   : > { %v13455_v19 = vpack.c.bf16 %v19230_v2, %v19229_v45  ;;  %v13473_v2 = vsub.f32 %v1487_v58, %v1686_v4  ;;  %v13475_v45 = vpack.c.bf16 %v1638_v18, %v1635_v3  ;;  %v13477_v16 = vsub.f32 %v1470_v59, %v1635_v3  ;;  %v1474_v4 = vld [vmem:[#allocation2 + $0x70] sm:$0xff]  ;;  %v349_v3 = vld [vmem:[%s13471_s29 + $0x18] sm:$0x3]  ;;  %p13040_p12 = pneg %p13039_p10 }
  0x4c   : > { %19232 = vst [vmem:[#allocation27_spill] sm:$0xff] %v13457_v54  ;;  %19233 = vst [vmem:[#allocation28_spill] sm:$0xff] %v13459_v35  ;;  %v13479_v55 = vsub.f32 %v1471_v51, %v1638_v18  ;;  %11493 = vmatpush3.bf16.msra.mxu0 %v13413_v56  ;;  %v19240_v41 = vand.u32 4294901760, %v13427_v60  ;;  %v1692_v24 = vand.u32 4294901760, %v1489_v14  ;;  %v1641_v21 = vand.u32 4294901760, %v1472_v7  ;;  %v1475_v18 = vld [vmem:[#allocation2 + $0x78] sm:$0xff] }
  0x4d   : > { %19231 = vst [vmem:[#allocation26_spill] sm:$0xff] %v13455_v19  ;;  %19235 = vst [vmem:[#allocation30_spill] sm:$0xff] %v13473_v2  ;;  %v1644_v15 = vand.u32 4294901760, %v1473_v11  ;;  %11685 = vmatpush3.bf16.msra.mxu1 %v13432_v33  ;;  %11495 = vmatprep.subr.bf16.mxu0 %v13455_v19  ;;  %v1695_v59 = vand.u32 4294901760, %v1490_v50  ;;  %v1698_v51 = vand.u32 4294901760, %v1491_v48  ;;  %v13493_v56 = vld [vmem:[%s13471_s29 + $0x10] sm:$0xff] }
  0x4e   : > { %19236 = vst [vmem:[#allocation31_spill] sm:$0xff] %v13475_v45  ;;  %19237 = vst [vmem:[#allocation32_spill] sm:$0xff] %v13477_v16  ;;  %v13486_v29 = vpack.c.bf16 %v19240_v41, %v19239_v37  ;;  %11687 = vmatprep.subr.bf16.mxu1 %v13457_v54  ;;  %v13496_v37 = vpack.c.bf16 %v1692_v24, %v1689_v53  ;;  %v13498_v41 = vsub.f32 %v1488_v34, %v1689_v53  ;;  %v13518_v34 = vld [vmem:[%s13471_s29 + $0x20] sm:$0xff]  ;;  %vm8297_vm3 = vcmask 261120  }
  0x4f   : > { %19238 = vst [vmem:[#allocation33_spill] sm:$0xff] %v13479_v55  ;;  %v13500_v33 = vsub.f32 %v1489_v14, %v1692_v24  ;;  %v13502_v60 = vpack.c.bf16 %v1644_v15, %v1641_v21  ;;  %v13505_v58 = vsub.f32 %v1472_v7, %v1641_v21  ;;  %v13507_v5 = vsub.f32 %v1473_v11, %v1644_v15  ;;  %v351_v11 = vld [vmem:[%s13471_s29 + $0x28] sm:$0x3] }
  0x50   : > { %19241 = vst [vmem:[#allocation34_spill] sm:$0xff] %v13486_v29  ;;  %19242 = vst [vmem:[#allocation35_spill] sm:$0xff] %v13496_v37  ;;  %v19247_v55 = vand.u32 4294901760, %v13448_v17  ;;  %v19248_v16 = vand.u32 4294901760, %v13464_v62  ;;  %v13515_v2 = vsub.f32 %v1490_v50, %v1695_v59  ;;  %11497 = vmatpush3.bf16.msra.mxu0 %v13455_v19  ;;  %v13521_v24 = vsub.f32 %v1491_v48, %v1698_v51  ;;  %v346_v19 = vld [vmem:[%s13471_s29] sm:$0xff] }
  0x51   : > { %19243 = vst [vmem:[#allocation36_spill] sm:$0xff] %v13498_v41  ;;  %19244 = vst [vmem:[#allocation37_spill] sm:$0xff] %v13500_v33  ;;  %v1647_v21 = vand.u32 4294901760, %v1474_v4  ;;  %v1650_v14 = vand.u32 4294901760, %v1475_v18  ;;  %v386_v15 = vrot.slane %v13493_v56, 1  ;;  %11689 = vmatpush3.bf16.msra.mxu1 %v13475_v45  ;;  %11499 = vmatprep.subr.bf16.mxu0 %v13486_v29  ;;  %v13527_v7 = vpack.c.bf16 %v1698_v51, %v1695_v59 }
  0x52   : > { %19245 = vst [vmem:[#allocation38_spill] sm:$0xff] %v13502_v60  ;;  %19246 = vst [vmem:[#allocation39_spill] sm:$0xff] %v13505_v58  ;;  %v13513_v54 = vpack.c.bf16 %v19248_v16, %v19247_v55  ;;  %v387_v53 = vrot.slane %v349_v3, 1  ;;  %v19253_v50 = vand.u32 4294901760, %v13250_v0  ;;  %v19255_v48 = vand.u32 4294901760, %v13255_v1  ;;  %11691 = vmatprep.subr.bf16.mxu1 %v13496_v37 }
  0x53   : > { %19250 = vst [vmem:[#allocation41_spill] sm:$0xff] %v13515_v2  ;;  %19251 = vst [vmem:[#allocation42_spill] sm:$0xff] %v13521_v24  ;;  %v347_v24 = vld [vmem:[%s13471_s29 + $0x8] sm:$0x3]  ;;  %v13542_v45 = vsub.f32 %v1474_v4, %v1647_v21  ;;  %v13544_v2 = vsub.f32 %v1475_v18, %v1650_v14  ;;  %v13547_v3 = vand.u32 4294901760, %v13493_v56  ;;  %v389_v59 = vrot.slane %v13518_v34, 1 }
  0x54   : > { %19249 = vst [vmem:[#allocation40_spill] sm:$0xff] %v13513_v54  ;;  %19252 = vst [vmem:[#allocation43_spill] sm:$0xff] %v13527_v7  ;;  %v13532_v16 = vsub.f32 %v13250_v0, %v19253_v50  ;;  %v13537_v55 = vsub.f32 %v13255_v1, %v19255_v48  ;;  %v388_v0 = vsel %vm382_vm0, %v386_v15, %v387_v53  ;;  %v390_v50 = vrot.slane %v351_v11, 1 }
  0x55   : > { %19257 = vst [vmem:[#allocation46_spill] sm:$0xff] %v13542_v45  ;;  %19258 = vst [vmem:[#allocation47_spill] sm:$0xff] %v13544_v2  ;;  %11501 = vmatpush3.bf16.msra.mxu0 %v13486_v29  ;;  %v13554_v48 = vpack.c.bf16 %v1650_v14, %v1647_v21  ;;  %v13556_v4 = vand.u32 4294901760, %v388_v0  ;;  %v383_v18 = vrot.slane %v346_v19, 1  ;;  %v384_v37 = vrot.slane %v347_v24, 1  ;;  %11693 = vmatpush3.bf16.msra.mxu1 %v13502_v60 }
  0x56   : > { %19254 = vst [vmem:[#allocation44_spill] sm:$0xff] %v13532_v16  ;;  %19256 = vst [vmem:[#allocation45_spill] sm:$0xff] %v13537_v55  ;;  %v18575_v51 = vand.u32 4294901760, %v13532_v16  ;;  %v18578_v1 = vand.u32 4294901760, %v13537_v55  ;;  %11503 = vmatprep.subr.bf16.mxu0 %v13513_v54  ;;  %v391_v53 = vsel %vm382_vm0, %v389_v59, %v390_v50  ;;  %v416_v21 = vrot.slane %v346_v19, 2  ;;  %11695 = vmatprep.subr.bf16.mxu1 %v13527_v7 }
  0x57   : > { %19259 = vst [vmem:[#allocation48_spill] sm:$0xff] %v13547_v3  ;;  %19260 = vst [vmem:[#allocation49_spill] sm:$0xff] %v13554_v48  ;;  %v13569_v14 = vsub.f32 %v388_v0, %v13556_v4  ;;  %v13571_v29 = vand.u32 4294901760, %v391_v53  ;;  %v385_v60 = vsel %vm382_vm0, %v383_v18, %v384_v37  ;;  %v417_v2 = vrot.slane %v347_v24, 2 }
  0x58   : > { %19261 = vst [vmem:[#allocation50_spill] sm:$0xff] %v13556_v4  ;;  %v649_v15 = vsub.f32 %v13532_v16, %v18575_v51  ;;  %v656_v11 = vsub.f32 %v13537_v55, %v18578_v1  ;;  %v13574_v51 = vand.u32 4294901760, %v385_v60  ;;  %v13576_v16 = vand.u32 4294901760, %v346_v19 }
  0x59   : > { %19262 = vst [vmem:[#allocation51_spill] sm:$0xff] %v13569_v14  ;;  %19263 = vst [vmem:[#allocation52_spill] sm:$0xff] %v13571_v29  ;;  %11505 = vmatpush3.bf16.msra.mxu0 %v13513_v54  ;;  %v13580_v59 = vand.u32 4294901760, %v13569_v14  ;;  %v13583_v50 = vsub.f32 %v391_v53, %v13571_v29  ;;  %v13586_v0 = vsel %vm415_vm1, %v416_v21, %v417_v2  ;;  %v18584_v37 = vand.u32 4294901760, %v13279_v22 }
  0x5a   : > { %v650_v45 = vand.u32 4294901760, %v649_v15  ;;  %v657_v62 = vand.u32 4294901760, %v656_v11  ;;  %19264 = vst [vmem:[#allocation53_spill] sm:$0xff] %v13574_v51  ;;  %19265 = vst [vmem:[#allocation54_spill] sm:$0xff] %v13576_v16  ;;  %11697 = vmatpush3.bf16.msra.mxu1 %v13554_v48  ;;  %v13591_v18 = vand.u32 4294901760, %v13518_v34  ;;  %v13594_v15 = vsub.f32 %v385_v60, %v13574_v51 }
  0x5b   : > { %19266 = vst [vmem:[#allocation55_spill] sm:$0xff] %v13580_v59  ;;  %19267 = vst [vmem:[#allocation56_spill] sm:$0xff] %v13583_v50  ;;  %v13597_v11 = vsub.f32 %v346_v19, %v13576_v16  ;;  %v568_v53 = vsub.f32 %v13569_v14, %v13580_v59  ;;  %v13602_v2 = vand.u32 4294901760, %v13583_v50  ;;  %v1937_v21 = vsub.f32 %v13279_v22, %v18584_v37 }
  0x5c   : > { %19268 = vst [vmem:[#allocation57_spill] sm:$0xff] %v13586_v0  ;;  %v11506_v24 = vpack.c.bf16 %v657_v62, %v650_v45  ;;  %19269 = vst [vmem:[#allocation58_spill] sm:$0xff] %v13591_v18  ;;  %v18591_v62 = vand.u32 4294901760, %v13281_v23  ;;  %v18594_v45 = vand.u32 4294901760, %v13594_v15  ;;  %v19274_v1 = vand.u32 4294901760, %v13296_v28 }
  0x5d   : > { %19270 = vst [vmem:[#allocation59_spill] sm:$0xff] %v13594_v15  ;;  %19271 = vst [vmem:[#allocation60_spill] sm:$0xff] %v13597_v11  ;;  %v18595_v60 = vand.u32 4294901760, %v13597_v11  ;;  %v13612_v0 = vand.u32 4294901760, %v568_v53  ;;  %v578_v48 = vsub.f32 %v13583_v50, %v13602_v2  ;;  %v1938_v7 = vand.u32 4294901760, %v1937_v21 }
  0x5e   : > { %19272 = vst [vmem:[#allocation61_spill] sm:$0xff] %v13602_v2  ;;  %11507 = vmatprep.subr.bf16.mxu0 %v11506_v24  ;;  %v1944_v37 = vsub.f32 %v13281_v23, %v18591_v62  ;;  %v1703_v54 = vsub.f32 %v13594_v15, %v18594_v45  ;;  %v1825_v53 = vsub.f32 %v13296_v28, %v19274_v1  ;;  %v19275_v59 = vand.u32 4294901760, %v13314_v40 }
  0x5f   : > { %19273 = vst [vmem:[#allocation62_spill] sm:$0xff] %v13612_v0  ;;  %v1709_v19 = vsub.f32 %v13597_v11, %v18595_v60  ;;  %10768 = vmatprep.mubr.f32.mxu0 %v13612_v0  ;;  %v13632_v2 = vand.u32 4294901760, %v578_v48  ;;  %v19277_v50 = vand.u32 4294901760, %v13262_v12  ;;  %v19278_v60 = vand.u32 4294901760, %v13267_v13 }
  0x60   : > { %v1832_v21 = vsub.f32 %v13314_v40, %v19275_v59  ;;  %v1945_v62 = vand.u32 4294901760, %v1944_v37  ;;  %v1704_v1 = vand.u32 4294901760, %v1703_v54  ;;  %v1826_v14 = vand.u32 4294901760, %v1825_v53 }
  0x61   : > { %19276 = vst [vmem:[#allocation63_spill] sm:$0xff] %v13632_v2  ;;  %v13637_v45 = vsub.f32 %v13262_v12, %v19277_v50  ;;  %v13642_v11 = vsub.f32 %v13267_v13, %v19278_v60  ;;  %v1710_v15 = vand.u32 4294901760, %v1709_v19  ;;  %10769 = vmatmul.mubr.f32.vlgmr.msra.gmra.mrb[0].mxu0 %v13632_v2  ;;  %v13649_v12 = vsub.f32 %v13493_v56, %v13547_v3 }
  0x62   : > { %v1833_v16 = vand.u32 4294901760, %v1832_v21  ;;  %v11698_v59 = vpack.c.bf16 %v1945_v62, %v1938_v7  ;;  %11509 = vmatpush3.bf16.msra.mxu0 %v11506_v24  ;;  %1705 = vmatprep.mubr.f32.mxu1 %v1704_v1  ;;  %v18604_v13 = vand.u32 4294901760, %v13319_v42  ;;  %v18606_v54 = vand.u32 4294901760, %v13326_v47 }
  0x63   : > { %v18607_v48 = vand.u32 4294901760, %v13637_v45  ;;  %v18605_v37 = vand.u32 4294901760, %v13642_v11  ;;  %19279 = vst [vmem:[#allocation64_spill] sm:$0xff] %v13649_v12  ;;  %v18608_v60 = vand.u32 4294901760, %v13330_v49  ;;  %1711 = vmatmul.mubr.f32.vlgmr.msra.gmra.mrb[0].mxu1 %v1710_v15  ;;  %v13661_v24 = vand.u32 4294901760, %v13649_v12 }
  0x64   : > { %v11700_v50 = vpack.c.bf16 %v1833_v16, %v1826_v14  ;;  %11699 = vmatprep.subr.bf16.mxu1 %v11698_v59  ;;  %v18612_v16 = vand.u32 4294901760, %v13340_v52  ;;  %1720 = vmatprep.mubr.f32.mxu1 %v13612_v0  ;;  %v1951_v14 = vsub.f32 %v13319_v42, %v18604_v13  ;;  %v1958_v15 = vsub.f32 %v13326_v47, %v18606_v54 }
  0x65   : > { %v663_v7 = vsub.f32 %v13637_v45, %v18607_v48  ;;  %v670_v56 = vsub.f32 %v13642_v11, %v18605_v37  ;;  %19280 = vst [vmem:[#allocation65_spill] sm:$0xff] %v13661_v24  ;;  %v1839_v62 = vsub.f32 %v13330_v49, %v18608_v60  ;;  %v1724_v1 = vsub.f32 %v13649_v12, %v13661_v24 }
  0x66   : > { %11701 = vmatpush3.bf16.msra.mxu1 %v11700_v50  ;;  %v1846_v59 = vsub.f32 %v13340_v52, %v18612_v16  ;;  %v1952_v50 = vand.u32 4294901760, %v1951_v14  ;;  %v1959_v13 = vand.u32 4294901760, %v1958_v15  ;;  %v19281_v54 = vand.u32 4294901760, %v13288_v25 }
  0x67   : > { %v664_v53 = vand.u32 4294901760, %v663_v7  ;;  %v671_v21 = vand.u32 4294901760, %v670_v56  ;;  %v1840_v37 = vand.u32 4294901760, %v1839_v62  ;;  %v13685_v19 = vand.u32 4294901760, %v1724_v1 }
  0x68   : > { %v13683_v48 = vsub.f32 %v13288_v25, %v19281_v54  ;;  %v1847_v7 = vand.u32 4294901760, %v1846_v59  ;;  %v19283_v56 = vand.u32 4294901760, %v13293_v26  ;;  %v11702_v24 = vpack.c.bf16 %v1959_v13, %v1952_v50  ;;  %v352_v54 = vld [vmem:[%s13471_s29 + $0x30] sm:$0xff]  ;;  %v353_v50 = vld [vmem:[%s13471_s29 + $0x38] sm:$0x3] }
  0x69   : > { %v11510_v60 = vpack.c.bf16 %v671_v21, %v664_v53  ;;  %19282 = vst [vmem:[#allocation66_spill] sm:$0xff] %v13685_v19  ;;  %v13695_v14 = vsub.f32 %v13518_v34, %v13591_v18  ;;  %v19285_v15 = vand.u32 4294901760, %v13354_v63  ;;  %1726 = vmatmul.mubr.f32.gmra.mrb[2].mxu1 %v13685_v19  ;;  %v18614_v13 = vand.u32 4294901760, %v13363_v9 }
  0x6a   : > { %v13690_v0 = vsub.f32 %v13293_v26, %v19283_v56  ;;  %v18615_v16 = vand.u32 4294901760, %v13683_v48  ;;  %v11704_v62 = vpack.c.bf16 %v1847_v7, %v1840_v37  ;;  %v18618_v53 = vand.u32 4294901760, %v13365_v10  ;;  %11703 = vmatprep.subr.bf16.mxu1 %v11702_v24  ;;  %1735 = vmatprep.mubr.f32.mxu1 %v13632_v2 }
  0x6b   : > { %19284 = vst [vmem:[#allocation67_spill] sm:$0xff] %v13695_v14  ;;  %v1965_v25 = vsub.f32 %v13354_v63, %v19285_v15  ;;  %11511 = vmatprep.subr.bf16.mxu0 %v11510_v60  ;;  %v13709_v21 = vand.u32 4294901760, %v13695_v14  ;;  %v18626_v59 = vand.u32 4294901760, %v13381_v20  ;;  %v392_v7 = vrot.slane %v352_v54, 1 }
  0x6c   : > { %v18613_v26 = vand.u32 4294901760, %v13690_v0  ;;  %11513 = vmatpush3.bf16.msra.mxu0 %v11510_v60  ;;  %v677_v34 = vsub.f32 %v13683_v48, %v18615_v16  ;;  %11705 = vmatpush3.bf16.msra.mxu1 %v11704_v62  ;;  %v1972_v60 = vsub.f32 %v13363_v9, %v18614_v13  ;;  %v1853_v24 = vsub.f32 %v13365_v10, %v18618_v53 }
  0x6d   : > { %19286 = vst [vmem:[#allocation68_spill] sm:$0xff] %v13709_v21  ;;  %v1966_v1 = vand.u32 4294901760, %v1965_v25  ;;  %v1739_v15 = vsub.f32 %v13695_v14, %v13709_v21  ;;  %v1860_v25 = vsub.f32 %v13381_v20, %v18626_v59  ;;  %v19287_v62 = vand.u32 4294901760, %v13311_v39 }
  0x6e   : > { %v684_v37 = vsub.f32 %v13690_v0, %v18613_v26  ;;  %v678_v56 = vand.u32 4294901760, %v677_v34  ;;  %v1973_v16 = vand.u32 4294901760, %v1972_v60  ;;  %v1854_v2 = vand.u32 4294901760, %v1853_v24 }
  0x6f   : > { %v13731_v26 = vsub.f32 %v13311_v39, %v19287_v62  ;;  %v19288_v53 = vand.u32 4294901760, %v13324_v44  ;;  %v13738_v34 = vand.u32 4294901760, %v1739_v15  ;;  %v1861_v21 = vand.u32 4294901760, %v1860_v25 }
  0x70   : > { %v685_v13 = vand.u32 4294901760, %v684_v37  ;;  %v393_v12 = vrot.slane %v353_v50, 1  ;;  %v11706_v18 = vpack.c.bf16 %v1973_v16, %v1966_v1  ;;  %v13742_v39 = vand.u32 4294901760, %v352_v54 }
  0x71   : > { %v13736_v19 = vsub.f32 %v13324_v44, %v19288_v53  ;;  %19289 = vst [vmem:[#allocation69_spill] sm:$0xff] %v13738_v34  ;;  %v18635_v14 = vand.u32 4294901760, %v13731_v26  ;;  %1741 = vmatmul.mubr.f32.gmra.mrb[4].mxu1 %v13738_v34  ;;  %v11708_v37 = vpack.c.bf16 %v1861_v21, %v1854_v2  ;;  %v18632_v60 = vand.u32 4294901760, %v13383_v27 }
  0x72   : > { %v11514_v59 = vpack.c.bf16 %v685_v13, %v678_v56  ;;  %19290 = vst [vmem:[#allocation70_spill] sm:$0xff] %v13742_v39  ;;  %v394_v53 = vsel %vm382_vm0, %v392_v7, %v393_v12  ;;  %11707 = vmatprep.subr.bf16.mxu1 %v11706_v18  ;;  %v13756_v1 = vsub.f32 %v352_v54, %v13742_v39  ;;  %v18631_v2 = vand.u32 4294901760, %v13385_v30 }
  0x73   : > { %v18634_v3 = vand.u32 4294901760, %v13736_v19  ;;  %v691_v44 = vsub.f32 %v13731_v26, %v18635_v14  ;;  %v13753_v13 = vand.u32 4294901760, %v394_v53  ;;  %11709 = vmatpush3.bf16.msra.mxu1 %v11708_v37  ;;  %v1979_v12 = vsub.f32 %v13383_v27, %v18632_v60  ;;  %v355_v60 = vld [vmem:[%s13471_s29 + $0x48] sm:$0x3] }
  0x74   : > { %11515 = vmatprep.subr.bf16.mxu0 %v11514_v59  ;;  %19292 = vst [vmem:[#allocation72_spill] sm:$0xff] %v13756_v1  ;;  %v18633_v18 = vand.u32 4294901760, %v13404_v46  ;;  %v18636_v24 = vand.u32 4294901760, %v13407_v57  ;;  %v13768_v54 = vand.u32 4294901760, %v13756_v1  ;;  %v19295_v62 = vand.u32 4294901760, %v13348_v61 }
  0x75   : > { %v698_v16 = vsub.f32 %v13736_v19, %v18634_v3  ;;  %19291 = vst [vmem:[#allocation71_spill] sm:$0xff] %v13753_v13  ;;  %11517 = vmatpush3.bf16.msra.mxu0 %v11514_v59  ;;  %v692_v21 = vand.u32 4294901760, %v691_v44  ;;  %v13765_v7 = vsub.f32 %v394_v53, %v13753_v13  ;;  %v1986_v59 = vsub.f32 %v13385_v30, %v18631_v2  ;;  %v354_v44 = vld [vmem:[%s13471_s29 + $0x40] sm:$0xff] }
  0x76   : > { %19294 = vst [vmem:[#allocation74_spill] sm:$0xff] %v13768_v54  ;;  %v1980_v56 = vand.u32 4294901760, %v1979_v12  ;;  %v1867_v15 = vsub.f32 %v13404_v46, %v18633_v18  ;;  %v1874_v25 = vsub.f32 %v13407_v57, %v18636_v24  ;;  %v13782_v37 = vsub.f32 %v13348_v61, %v19295_v62 }
  0x77   : > { %v699_v50 = vand.u32 4294901760, %v698_v16  ;;  %19293 = vst [vmem:[#allocation73_spill] sm:$0xff] %v13765_v7  ;;  %v13786_v16 = vand.u32 4294901760, %v13765_v7  ;;  %v1754_v12 = vsub.f32 %v13756_v1, %v13768_v54  ;;  %v1987_v2 = vand.u32 4294901760, %v1986_v59 }
  0x78   : > { %v1868_v18 = vand.u32 4294901760, %v1867_v15  ;;  %v1875_v3 = vand.u32 4294901760, %v1874_v25  ;;  %v18646_v14 = vand.u32 4294901760, %v13782_v37  ;;  %v19297_v24 = vand.u32 4294901760, %v13361_v6 }
  0x79   : > { %v11518_v53 = vpack.c.bf16 %v699_v50, %v692_v21  ;;  %19296 = vst [vmem:[#allocation75_spill] sm:$0xff] %v13786_v16  ;;  %v588_v61 = vsub.f32 %v13765_v7, %v13786_v16  ;;  %v13799_v21 = vand.u32 4294901760, %v1754_v12  ;;  %v11710_v50 = vpack.c.bf16 %v1987_v2, %v1980_v56 }
  0x7a   : > { %v13795_v34 = vsub.f32 %v13361_v6, %v19297_v24  ;;  %v395_v62 = vrot.slane %v354_v44, 1  ;;  %v11712_v59 = vpack.c.bf16 %v1875_v3, %v1868_v18  ;;  %v705_v15 = vsub.f32 %v13782_v37, %v18646_v14 }
  0x7b   : > { %11519 = vmatprep.subr.bf16.mxu0 %v11518_v53  ;;  %19298 = vst [vmem:[#allocation76_spill] sm:$0xff] %v13799_v21  ;;  %v396_v54 = vrot.slane %v355_v60, 1  ;;  %v13805_v1 = vand.u32 4294901760, %v588_v61  ;;  %11711 = vmatprep.subr.bf16.mxu1 %v11710_v50  ;;  %v13807_v6 = vand.u32 4294901760, %v354_v44  ;;  %v18643_v24 = vand.u32 4294901760, %v13417_v36 }
  0x7c   : > { %11521 = vmatpush3.bf16.msra.mxu0 %v11518_v53  ;;  %v18645_v25 = vand.u32 4294901760, %v13795_v34  ;;  %v18644_v12 = vand.u32 4294901760, %v13430_v31  ;;  %11713 = vmatpush3.bf16.msra.mxu1 %v11712_v59  ;;  %v706_v2 = vand.u32 4294901760, %v705_v15  ;;  %v18653_v56 = vand.u32 4294901760, %v13434_v32 }
  0x7d   : > { %19299 = vst [vmem:[#allocation77_spill] sm:$0xff] %v13805_v1  ;;  %19300 = vst [vmem:[#allocation78_spill] sm:$0xff] %v13807_v6  ;;  %v397_v18 = vsel %vm382_vm0, %v395_v62, %v396_v54  ;;  %1750 = vmatprep.mubr.f32.mxu1 %v13805_v1  ;;  %v13820_v53 = vsub.f32 %v354_v44, %v13807_v6  ;;  %v1993_v61 = vsub.f32 %v13417_v36, %v18643_v24 }
  0x7e   : > { %v712_v3 = vsub.f32 %v13795_v34, %v18645_v25  ;;  %v13817_v60 = vand.u32 4294901760, %v397_v18  ;;  %v2000_v50 = vsub.f32 %v13430_v31, %v18644_v12  ;;  %10771 = vmatprep.mubr.f32.mxu0 %v13805_v1  ;;  %1756 = vmatmul.mubr.f32.gmra.mrb[6].mxu1 %v13799_v21  ;;  %v1881_v62 = vsub.f32 %v13434_v32, %v18653_v56  ;;  %v357_v1 = vld [vmem:[%s13471_s29 + $0x58] sm:$0x3] }
  0x7f   : > { %19302 = vst [vmem:[#allocation80_spill] sm:$0xff] %v13820_v53  ;;  %v18656_v44 = vand.u32 4294901760, %v13441_v8  ;;  %v19303_v59 = vand.u32 4294901760, %v13393_v43  ;;  %v13843_v12 = vand.u32 4294901760, %v13820_v53  ;;  %v1994_v25 = vand.u32 4294901760, %v1993_v61 }
  0x80   : > { %19301 = vst [vmem:[#allocation79_spill] sm:$0xff] %v13817_v60  ;;  %v713_v54 = vand.u32 4294901760, %v712_v3  ;;  %v13840_v24 = vsub.f32 %v397_v18, %v13817_v60  ;;  %v2001_v14 = vand.u32 4294901760, %v2000_v50  ;;  %v356_v3 = vld [vmem:[%s13471_s29 + $0x50] sm:$0xff]  ;;  %v1882_v16 = vand.u32 4294901760, %v1881_v62 }
  0x81   : > { %v13837_v15 = vsub.f32 %v13393_v43, %v19303_v59  ;;  %19305 = vst [vmem:[#allocation82_spill] sm:$0xff] %v13843_v12  ;;  %v1888_v56 = vsub.f32 %v13441_v8, %v18656_v44  ;;  %v1769_v18 = vsub.f32 %v13820_v53, %v13843_v12  ;;  %v19307_v61 = vand.u32 4294901760, %v13398_v38 }
  0x82   : > { %19304 = vst [vmem:[#allocation81_spill] sm:$0xff] %v13840_v24  ;;  %v11522_v21 = vpack.c.bf16 %v713_v54, %v706_v2  ;;  %v13852_v43 = vand.u32 4294901760, %v13840_v24  ;;  %v11714_v59 = vpack.c.bf16 %v2001_v14, %v1994_v25  ;;  %v398_v62 = vrot.slane %v356_v3, 1 }
  0x83   : > { %v18663_v7 = vand.u32 4294901760, %v13837_v15  ;;  %v13859_v50 = vsub.f32 %v13398_v38, %v19307_v61  ;;  %v1889_v2 = vand.u32 4294901760, %v1888_v56  ;;  %v399_v44 = vrot.slane %v357_v1, 1 }
  0x84   : > { %19306 = vst [vmem:[#allocation83_spill] sm:$0xff] %v13852_v43  ;;  %11523 = vmatprep.subr.bf16.mxu0 %v11522_v21  ;;  %v598_v6 = vsub.f32 %v13840_v24, %v13852_v43  ;;  %v13866_v39 = vand.u32 4294901760, %v1769_v18  ;;  %11715 = vmatprep.subr.bf16.mxu1 %v11714_v59  ;;  %v13869_v25 = vand.u32 4294901760, %v356_v3  ;;  %v18667_v12 = vand.u32 4294901760, %v13459_v35  ;;  %v19319_v43 = vld [vmem:[#allocation23_spill] sm:$0xff] }
  0x85   : > { %19308 = vst [vmem:[#allocation84_spill] sm:$0xff] %v13859_v50  ;;  %v719_v54 = vsub.f32 %v13837_v15, %v18663_v7  ;;  %11525 = vmatpush3.bf16.msra.mxu0 %v11522_v21  ;;  %v18664_v14 = vand.u32 4294901760, %v13859_v50  ;;  %v11716_v38 = vpack.c.bf16 %v1889_v2, %v1882_v16  ;;  %v400_v56 = vsel %vm382_vm0, %v398_v62, %v399_v44  ;;  %v19314_v44 = vld [vmem:[#allocation30_spill] sm:$0xff]  ;;  %v19315_v2 = vld [vmem:[#allocation32_spill] sm:$0xff] }
  0x86   : > { %19309 = vst [vmem:[#allocation85_spill] sm:$0xff] %v13866_v39  ;;  %19310 = vst [vmem:[#allocation86_spill] sm:$0xff] %v13869_v25  ;;  %v13873_v7 = vand.u32 4294901760, %v598_v6  ;;  %v13878_v21 = vand.u32 4294901760, %v400_v56  ;;  %v13881_v18 = vsub.f32 %v356_v3, %v13869_v25  ;;  %v2007_v16 = vsub.f32 %v13459_v35, %v18667_v12  ;;  %v358_v25 = vld [vmem:[%s13471_s29 + $0x60] sm:$0xff] }
  0x87   : > { %v720_v61 = vand.u32 4294901760, %v719_v54  ;;  %v726_v1 = vsub.f32 %v13859_v50, %v18664_v14  ;;  %11717 = vmatpush3.bf16.msra.mxu1 %v11716_v38  ;;  %v19316_v54 = vld [vmem:[#allocation33_spill] sm:$0xff]  ;;  %v19320_v12 = vand.u32 4294901760, %v19319_v43  ;;  %v19321_v6 = vand.u32 4294901760, %v19314_v44  ;;  %v19325_v50 = vld [vmem:[#allocation24_spill] sm:$0xff] }
  0x88   : > { %19311 = vst [vmem:[#allocation87_spill] sm:$0xff] %v13873_v7  ;;  %19312 = vst [vmem:[#allocation88_spill] sm:$0xff] %v13878_v21  ;;  %1765 = vmatprep.mubr.f32.mxu1 %v13873_v7  ;;  %10772 = vmatmul.mubr.f32.gmra.mrb[2].mxu0 %v13873_v7  ;;  %v13892_v3 = vsub.f32 %v400_v56, %v13878_v21  ;;  %v13895_v38 = vand.u32 4294901760, %v13881_v18  ;;  %v2008_v62 = vand.u32 4294901760, %v2007_v16  ;;  %v19322_v7 = vand.u32 4294901760, %v19315_v2 }
  0x89   : > { %19313 = vst [vmem:[#allocation89_spill] sm:$0xff] %v13881_v18  ;;  %v727_v14 = vand.u32 4294901760, %v726_v1  ;;  %v13900_v59 = vsub.f32 %v19319_v43, %v19320_v12  ;;  %1771 = vmatmul.mubr.f32.gmra.mrb[8].mxu1 %v13866_v39  ;;  %v2014_v1 = vsub.f32 %v19314_v44, %v19321_v6  ;;  %v19323_v53 = vand.u32 4294901760, %v19316_v54  ;;  %v359_v39 = vld [vmem:[%s13471_s29 + $0x68] sm:$0x3] }
  0x8a   : > { %19317 = vst [vmem:[#allocation90_spill] sm:$0xff] %v13892_v3  ;;  %19318 = vst [vmem:[#allocation91_spill] sm:$0xff] %v13895_v38  ;;  %v1895_v56 = vsub.f32 %v19315_v2, %v19322_v7  ;;  %v13914_v12 = vand.u32 4294901760, %v13892_v3  ;;  %v1784_v43 = vsub.f32 %v13881_v18, %v13895_v38  ;;  %v19326_v7 = vand.u32 4294901760, %v19325_v50 }
  0x8b   : > { %v1902_v24 = vsub.f32 %v19316_v54, %v19323_v53  ;;  %v11526_v21 = vpack.c.bf16 %v727_v14, %v720_v61  ;;  %v18693_v16 = vand.u32 4294901760, %v13900_v59  ;;  %v2015_v6 = vand.u32 4294901760, %v2014_v1 }
  0x8c   : > { %19324 = vst [vmem:[#allocation23_spill] sm:$0xff] %v13914_v12  ;;  %v1896_v44 = vand.u32 4294901760, %v1895_v56  ;;  %v13923_v2 = vsub.f32 %v19325_v50, %v19326_v7  ;;  %v608_v53 = vsub.f32 %v13892_v3, %v13914_v12  ;;  %v13927_v14 = vand.u32 4294901760, %v1784_v43  ;;  %v360_v12 = vld [vmem:[%s13471_s29 + $0x70] sm:$0xff] }
  0x8d   : > { %v1903_v35 = vand.u32 4294901760, %v1902_v24  ;;  %11527 = vmatprep.subr.bf16.mxu0 %v11526_v21  ;;  %v733_v61 = vsub.f32 %v13900_v59, %v18693_v16  ;;  %v401_v38 = vrot.slane %v358_v25, 1  ;;  %v11718_v1 = vpack.c.bf16 %v2015_v6, %v2008_v62 }
  0x8e   : > { %19327 = vst [vmem:[#allocation24_spill] sm:$0xff] %v13927_v14  ;;  %11529 = vmatpush3.bf16.msra.mxu0 %v11526_v21  ;;  %v18695_v56 = vand.u32 4294901760, %v13923_v2  ;;  %v402_v18 = vrot.slane %v359_v39, 1  ;;  %v13933_v54 = vand.u32 4294901760, %v608_v53  ;;  %v13935_v7 = vand.u32 4294901760, %v358_v25 }
  0x8f   : > { %v11720_v24 = vpack.c.bf16 %v1903_v35, %v1896_v44  ;;  %v734_v50 = vand.u32 4294901760, %v733_v61  ;;  %v18694_v43 = vand.u32 4294901760, %v13498_v41  ;;  %11719 = vmatprep.subr.bf16.mxu1 %v11718_v1  ;;  %v18700_v35 = vand.u32 4294901760, %v13500_v33  ;;  %v361_v61 = vld [vmem:[%s13471_s29 + $0x78] sm:$0x3] }
  0x90   : > { %19328 = vst [vmem:[#allocation92_spill] sm:$0xff] %v13933_v54  ;;  %19329 = vst [vmem:[#allocation93_spill] sm:$0xff] %v13935_v7  ;;  %v740_v16 = vsub.f32 %v13923_v2, %v18695_v56  ;;  %v403_v21 = vsel %vm382_vm0, %v401_v38, %v402_v18  ;;  %v18705_v39 = vand.u32 4294901760, %v13505_v58  ;;  %1780 = vmatprep.mubr.f32.mxu1 %v13933_v54  ;;  %v18714_v53 = vand.u32 4294901760, %v13507_v5 }
  0x91   : > { %11721 = vmatpush3.bf16.msra.mxu1 %v11720_v24  ;;  %v13946_v44 = vand.u32 4294901760, %v403_v21  ;;  %v13949_v62 = vsub.f32 %v358_v25, %v13935_v7  ;;  %v2021_v6 = vsub.f32 %v13498_v41, %v18694_v43  ;;  %10774 = vmatprep.mubr.f32.mxu0 %v13933_v54  ;;  %v2028_v38 = vsub.f32 %v13500_v33, %v18700_v35  ;;  %v363_v33 = vld [vmem:[%s13471_s29 + $0x88] sm:$0x3] }
  0x92   : > { %1786 = vmatmul.mubr.f32.gmra.mrb[10].mxu1 %v13927_v14  ;;  %v741_v18 = vand.u32 4294901760, %v740_v16  ;;  %v1909_v25 = vsub.f32 %v13505_v58, %v18705_v39  ;;  %v404_v1 = vrot.slane %v360_v12, 1  ;;  %v1916_v16 = vsub.f32 %v13507_v5, %v18714_v53  ;;  %v362_v58 = vld [vmem:[%s13471_s29 + $0x80] sm:$0xff] }
  0x93   : > { %19330 = vst [vmem:[#allocation94_spill] sm:$0xff] %v13946_v44  ;;  %19331 = vst [vmem:[#allocation95_spill] sm:$0xff] %v13949_v62  ;;  %v13965_v24 = vsub.f32 %v403_v21, %v13946_v44  ;;  %v13968_v43 = vand.u32 4294901760, %v13949_v62  ;;  %v2022_v56 = vand.u32 4294901760, %v2021_v6  ;;  %v2029_v14 = vand.u32 4294901760, %v2028_v38 }
  0x94   : > { %v11530_v54 = vpack.c.bf16 %v741_v18, %v734_v50  ;;  %v1910_v35 = vand.u32 4294901760, %v1909_v25  ;;  %v405_v3 = vrot.slane %v361_v61, 1  ;;  %v1917_v21 = vand.u32 4294901760, %v1916_v16  ;;  %v19337_v61 = vld [vmem:[#allocation29_spill] sm:$0xff] }
  0x95   : > { %19332 = vst [vmem:[#allocation96_spill] sm:$0xff] %v13965_v24  ;;  %19333 = vst [vmem:[#allocation97_spill] sm:$0xff] %v13968_v43  ;;  %v13974_v7 = vand.u32 4294901760, %v13965_v24  ;;  %v1799_v39 = vsub.f32 %v13949_v62, %v13968_v43  ;;  %v13978_v44 = vand.u32 4294901760, %v360_v12  ;;  %v11722_v6 = vpack.c.bf16 %v2029_v14, %v2022_v56 }
  0x96   : > { %11531 = vmatprep.subr.bf16.mxu0 %v11530_v54  ;;  %v406_v41 = vsel %vm382_vm0, %v404_v1, %v405_v3  ;;  %v19336_v50 = vand.u32 4294901760, %v13448_v17  ;;  %v19338_v38 = vand.u32 4294901760, %v19337_v61  ;;  %v11724_v43 = vpack.c.bf16 %v1917_v21, %v1910_v35 }
  0x97   : > { %19334 = vst [vmem:[#allocation98_spill] sm:$0xff] %v13974_v7  ;;  %19335 = vst [vmem:[#allocation99_spill] sm:$0xff] %v13978_v44  ;;  %v618_v16 = vsub.f32 %v13965_v24, %v13974_v7  ;;  %11533 = vmatpush3.bf16.msra.mxu0 %v11530_v54  ;;  %v13995_v53 = vand.u32 4294901760, %v1799_v39  ;;  %v13997_v14 = vand.u32 4294901760, %v406_v41  ;;  %11723 = vmatprep.subr.bf16.mxu1 %v11722_v6  ;;  %v450_v56 = vrot.slane %v362_v58, 1  ;;  %v19348_v6 = vld [vmem:[#allocation42_spill] sm:$0xff] }
  0x98   : > { %v13986_v18 = vsub.f32 %v13448_v17, %v19336_v50  ;;  %v13991_v25 = vsub.f32 %v19337_v61, %v19338_v38  ;;  %v451_v1 = vrot.slane %v363_v33, 1  ;;  %11725 = vmatpush3.bf16.msra.mxu1 %v11724_v43  ;;  %v14007_v54 = vsub.f32 %v360_v12, %v13978_v44  ;;  %v19344_v33 = vld [vmem:[#allocation41_spill] sm:$0xff]  ;;  %v19351_v24 = vld [vmem:[#allocation47_spill] sm:$0xff] }
  0x99   : > { %19339 = vst [vmem:[#allocation29_spill] sm:$0xff] %v13995_v53  ;;  %19340 = vst [vmem:[#allocation100_spill] sm:$0xff] %v13997_v14  ;;  %v14001_v50 = vand.u32 4294901760, %v618_v16  ;;  %v14004_v61 = vsub.f32 %v406_v41, %v13997_v14  ;;  %v18727_v21 = vand.u32 4294901760, %v19344_v33  ;;  %v18742_v38 = vand.u32 4294901760, %v19348_v6 }
  0x9a   : > { %v18718_v3 = vand.u32 4294901760, %v13986_v18  ;;  %v18717_v17 = vand.u32 4294901760, %v13991_v25  ;;  %19343 = vst [vmem:[#allocation103_spill] sm:$0xff] %v14007_v54  ;;  %v452_v58 = vsel %vm382_vm0, %v450_v56, %v451_v1  ;;  %v14025_v43 = vand.u32 4294901760, %v14007_v54 }
  0x9b   : > { %19341 = vst [vmem:[#allocation101_spill] sm:$0xff] %v14001_v50  ;;  %19342 = vst [vmem:[#allocation102_spill] sm:$0xff] %v14004_v61  ;;  %10775 = vmatmul.mubr.f32.gmra.mrb[4].mxu0 %v14001_v50  ;;  %1795 = vmatprep.mubr.f32.mxu1 %v14001_v50  ;;  %v14020_v41 = vand.u32 4294901760, %v14004_v61  ;;  %v14022_v12 = vand.u32 4294901760, %v452_v58  ;;  %v2035_v1 = vsub.f32 %v19344_v33, %v18727_v21  ;;  %v18741_v44 = vand.u32 4294901760, %v19351_v24 }
  0x9c   : > { %v747_v35 = vsub.f32 %v13986_v18, %v18718_v3  ;;  %v754_v39 = vsub.f32 %v13991_v25, %v18717_v17  ;;  %19347 = vst [vmem:[#allocation105_spill] sm:$0xff] %v14025_v43  ;;  %1801 = vmatmul.mubr.f32.gmra.mrb[12].mxu1 %v13995_v53  ;;  %v19349_v17 = vld [vmem:[#allocation46_spill] sm:$0xff]  ;;  %v1814_v62 = vsub.f32 %v14007_v54, %v14025_v43 }
  0x9d   : > { %19345 = vst [vmem:[#allocation41_spill] sm:$0xff] %v14020_v41  ;;  %19346 = vst [vmem:[#allocation104_spill] sm:$0xff] %v14022_v12  ;;  %v18740_v3 = vand.u32 4294901760, %v19349_v17  ;;  %v628_v50 = vsub.f32 %v14004_v61, %v14020_v41  ;;  %v14036_v7 = vsub.f32 %v452_v58, %v14022_v12  ;;  %v2036_v53 = vand.u32 4294901760, %v2035_v1 }
  0x9e   : > { %v748_v16 = vand.u32 4294901760, %v747_v35  ;;  %v755_v56 = vand.u32 4294901760, %v754_v39  ;;  %v2042_v35 = vsub.f32 %v19348_v6, %v18742_v38  ;;  %v14052_v41 = vand.u32 4294901760, %v1814_v62 }
  0x9f   : > { %19350 = vst [vmem:[#allocation42_spill] sm:$0xff] %v14036_v7  ;;  %v1923_v21 = vsub.f32 %v19349_v17, %v18740_v3  ;;  %v14047_v14 = vand.u32 4294901760, %v628_v50  ;;  %v14050_v58 = vand.u32 4294901760, %v14036_v7  ;;  %v11730_v62 = vpack.c.bf16 %v13281_v23, %v13279_v22 }
  0xa0   : > { %v11534_v39 = vpack.c.bf16 %v755_v56, %v748_v16  ;;  %19354 = vst [vmem:[#allocation106_spill] sm:$0xff] %v14052_v41  ;;  %v2043_v43 = vand.u32 4294901760, %v2042_v35  ;;  %v1930_v16 = vsub.f32 %v19351_v24, %v18741_v44  ;;  %v19355_v56 = vld [vmem:[#allocation44_spill] sm:$0xff]  ;;  %v11542_v35 = vpack.c.bf16 %v13642_v11, %v13637_v45 }
  0xa1   : > { %19352 = vst [vmem:[#allocation46_spill] sm:$0xff] %v14047_v14  ;;  %19353 = vst [vmem:[#allocation47_spill] sm:$0xff] %v14050_v58  ;;  %v1924_v54 = vand.u32 4294901760, %v1923_v21  ;;  %v11538_v1 = vpack.c.bf16 %v13537_v55, %v19355_v56  ;;  %10777 = vmatprep.mubr.f32.mxu0 %v14047_v14  ;;  %v638_v50 = vsub.f32 %v14036_v7, %v14050_v58  ;;  %1810 = vmatprep.mubr.f32.mxu1 %v14047_v14 }
  0xa2   : > { %11535 = vmatprep.subr.bf16.mxu0 %v11534_v39  ;;  %v11726_v3 = vpack.c.bf16 %v2043_v43, %v2036_v53  ;;  %v1931_v21 = vand.u32 4294901760, %v1930_v16  ;;  %v11734_v44 = vpack.c.bf16 %v13326_v47, %v13319_v42  ;;  %v11736_v38 = vpack.c.bf16 %v13340_v52, %v13330_v49  ;;  %1816 = vmatmul.mubr.f32.gmra.mrb[14].mxu1 %v14052_v41 }
  0xa3   : > { %11537 = vmatpush3.bf16.msra.mxu0 %v11534_v39  ;;  %v14071_v55 = vand.u32 4294901760, %v638_v50  ;;  %v11546_v53 = vpack.c.bf16 %v13690_v0, %v13683_v48  ;;  %v11738_v43 = vpack.c.bf16 %v13363_v9, %v13354_v63  ;;  %v11740_v39 = vpack.c.bf16 %v13381_v20, %v13365_v10  ;;  %2046 = vmatprep.mubr.f32.mxu1 %v13574_v51 }
  0xa4   : > { %11539 = vmatprep.subr.bf16.mxu0 %v11538_v1  ;;  %11727 = vmatprep.subr.bf16.mxu1 %v11726_v3  ;;  %v11728_v16 = vpack.c.bf16 %v1931_v21, %v1924_v54  ;;  %v11732_v3 = vpack.c.bf16 %v13314_v40, %v13296_v28  ;;  %v14087_v50 = vpack.c.bf16 %v13991_v25, %v13986_v18  ;;  %v19357_v21 = vld [vmem:[#allocation54_spill] sm:$0xff]  ;;  %v19360_v14 = vand.u32 4294901760, %v13354_v63 }
  0xa5   : > { %19356 = vst [vmem:[#allocation44_spill] sm:$0xff] %v14071_v55  ;;  %10778 = vmatmul.mubr.f32.gmra.mrb[6].mxu0 %v14071_v55  ;;  %v19359_v55 = vand.u32 4294901760, %v13690_v0  ;;  %v19361_v51 = vand.u32 4294901760, %v13363_v9  ;;  %v19362_v58 = vand.u32 4294901760, %v13365_v10  ;;  %v19368_v63 = vand.u32 4294901760, %v13383_v27 }
  0xa6   : > { %11729 = vmatpush3.bf16.msra.mxu1 %v11728_v16  ;;  %10812 = vmatprep.mubr.f32.mxu0 %v13556_v4  ;;  %v11550_v16 = vpack.c.bf16 %v13736_v19, %v13731_v26  ;;  %v19369_v9 = vand.u32 4294901760, %v13385_v30  ;;  %v19371_v10 = vand.u32 4294901760, %v13404_v46 }
  0xa7   : > { %11731 = vmatprep.subr.bf16.mxu1 %v11730_v62  ;;  %v19358_v62 = vand.u32 4294901760, %v13683_v48  ;;  %v14107_v54 = vpack.c.bf16 %v19361_v51, %v19360_v14  ;;  %v19365_v48 = vand.u32 4294901760, %v13731_v26  ;;  %v19374_v26 = vand.u32 4294901760, %v13782_v37 }
  0xa8   : > { %v14126_v51 = vpack.c.bf16 %v19369_v9, %v19368_v63  ;;  %v19384_v63 = vand.u32 4294901760, %v13837_v15  ;;  %v19385_v9 = vld [vmem:[#allocation84_spill] sm:$0xff] }
  0xa9   : > { %10813 = vmatmul.mubr.f32.vlgmr.msra.gmra.mrb[0].mxu0 %v13571_v29  ;;  %2048 = vmatmul.mubr.f32.vlgmr.msra.gmra.mrb[16].mxu1 %v19357_v21  ;;  %v14101_v41 = vpack.c.bf16 %v19359_v55, %v19358_v62  ;;  %v19363_v21 = vand.u32 4294901760, %v13381_v20  ;;  %v19366_v55 = vand.u32 4294901760, %v13736_v19  ;;  %v19372_v20 = vand.u32 4294901760, %v13407_v57 }
  0xaa   : > { %11541 = vmatpush3.bf16.msra.mxu0 %v11538_v1  ;;  %11733 = vmatpush3.bf16.msra.mxu1 %v11732_v3  ;;  %19370 = vst [vmem:[#allocation109_spill] sm:$0xff] %v14126_v51  ;;  %v19375_v19 = vand.u32 4294901760, %v13795_v34  ;;  %v19377_v1 = vand.u32 4294901760, %v13417_v36  ;;  %v19378_v3 = vand.u32 4294901760, %v13430_v31  ;;  %v19380_v62 = vand.u32 4294901760, %v13434_v32  ;;  %v19401_v51 = vld [vmem:[#allocation37_spill] sm:$0xff] }
  0xab   : > { %v14113_v52 = vpack.c.bf16 %v19363_v21, %v19362_v58  ;;  %11543 = vmatprep.subr.bf16.mxu0 %v11542_v35  ;;  %2053 = vmatprep.mubr.f32.mxu1 %v13556_v4  ;;  %v14120_v0 = vpack.c.bf16 %v19366_v55, %v19365_v48  ;;  %v14132_v14 = vpack.c.bf16 %v19372_v20, %v19371_v10  ;;  %v19381_v48 = vand.u32 4294901760, %v13441_v8 }
  0xac   : > { %11735 = vmatprep.subr.bf16.mxu1 %v11734_v44  ;;  %10815 = vmatprep.mubr.f32.mxu0 %v13753_v13  ;;  %v14139_v58 = vpack.c.bf16 %v19375_v19, %v19374_v26  ;;  %v14145_v21 = vpack.c.bf16 %v19378_v3, %v19377_v1  ;;  %v19383_v44 = vld [vmem:[#allocation48_spill] sm:$0xff]  ;;  %v19386_v10 = vand.u32 4294901760, %v19385_v9  ;;  %v19390_v1 = vld [vmem:[#allocation30_spill] sm:$0xff] }
  0xad   : > { %19364 = vst [vmem:[#allocation107_spill] sm:$0xff] %v14113_v52  ;;  %19367 = vst [vmem:[#allocation108_spill] sm:$0xff] %v14120_v0  ;;  %v14151_v55 = vpack.c.bf16 %v19381_v48, %v19380_v62  ;;  %2055 = vmatmul.mubr.f32.gmra.mrb[18].mxu1 %v19383_v44  ;;  %10816 = vmatmul.mubr.f32.gmra.mrb[2].mxu0 %v13817_v60  ;;  %v19388_v26 = vld [vmem:[#allocation28_spill] sm:$0xff]  ;;  %v19391_v3 = vand.u32 4294901760, %v19390_v1  ;;  %v19395_v62 = vld [vmem:[#allocation33_spill] sm:$0xff]  ;;  %v19397_v44 = vand.u32 4294901760, %v13900_v59 }
  0xae   : > { %19373 = vst [vmem:[#allocation110_spill] sm:$0xff] %v14132_v14  ;;  %19376 = vst [vmem:[#allocation111_spill] sm:$0xff] %v14139_v58  ;;  %v14159_v20 = vpack.c.bf16 %v19386_v10, %v19384_v63  ;;  %v19389_v19 = vand.u32 4294901760, %v19388_v26  ;;  %v19396_v48 = vand.u32 4294901760, %v19395_v62  ;;  %11545 = vmatpush3.bf16.msra.mxu0 %v11542_v35  ;;  %11737 = vmatpush3.bf16.msra.mxu1 %v11736_v38  ;;  %v19398_v14 = vand.u32 4294901760, %v13923_v2  ;;  %v19399_v10 = vld [vmem:[#allocation36_spill] sm:$0xff] }
  0xaf   : > { %19379 = vst [vmem:[#allocation112_spill] sm:$0xff] %v14145_v21  ;;  %19382 = vst [vmem:[#allocation113_spill] sm:$0xff] %v14151_v55  ;;  %v19393_v21 = vld [vmem:[#allocation32_spill] sm:$0xff]  ;;  %v19402_v0 = vand.u32 4294901760, %v19401_v51  ;;  %v19405_v52 = vand.u32 4294901760, %v13507_v5  ;;  %11547 = vmatprep.subr.bf16.mxu0 %v11546_v53  ;;  %2060 = vmatprep.mubr.f32.mxu1 %v13571_v29  ;;  %v19406_v38 = vand.u32 4294901760, %v13986_v18  ;;  %v11742_v18 = vpack.c.bf16 %v13385_v30, %v13383_v27 }
  0xb0   : > { %19387 = vst [vmem:[#allocation84_spill] sm:$0xff] %v14159_v20  ;;  %v14165_v4 = vpack.c.bf16 %v19391_v3, %v19389_v19  ;;  %v19394_v58 = vand.u32 4294901760, %v19393_v21  ;;  %v14177_v63 = vpack.c.bf16 %v19398_v14, %v19397_v44  ;;  %v19400_v20 = vand.u32 4294901760, %v19399_v10  ;;  %v19403_v3 = vld [vmem:[#allocation39_spill] sm:$0xff]  ;;  %11739 = vmatprep.subr.bf16.mxu1 %v11738_v43  ;;  %v19412_v29 = vld [vmem:[#allocation88_spill] sm:$0xff] }
  0xb1   : > { %v19407_v35 = vand.u32 4294901760, %v13991_v25  ;;  %v19408_v44 = vand.u32 4294901760, %v19344_v33  ;;  %10818 = vmatprep.mubr.f32.mxu0 %v19412_v29  ;;  %v19413_v25 = vld [vmem:[#allocation58_spill] sm:$0xff]  ;;  %v11554_v43 = vpack.c.bf16 %v13795_v34, %v13782_v37  ;;  %v11746_v27 = vpack.c.bf16 %v13430_v31, %v13417_v36  ;;  %v19415_v30 = vld [vmem:[#allocation100_spill] sm:$0xff]  ;;  %v19417_v31 = vld [vmem:[#allocation51_spill] sm:$0xff] }
  0xb2   : > { %19392 = vst [vmem:[#allocation28_spill] sm:$0xff] %v14165_v4  ;;  %v14171_v55 = vpack.c.bf16 %v19396_v48, %v19394_v58  ;;  %v14183_v19 = vpack.c.bf16 %v19402_v0, %v19400_v20  ;;  %v19404_v4 = vand.u32 4294901760, %v19403_v3  ;;  %v19409_v0 = vand.u32 4294901760, %v19348_v6  ;;  %2062 = vmatmul.mubr.f32.gmra.mrb[20].mxu1 %v19413_v25  ;;  %11549 = vmatpush3.bf16.msra.mxu0 %v11546_v53  ;;  %v19418_v34 = vld [vmem:[#allocation78_spill] sm:$0xff] }
  0xb3   : > { %v14196_v14 = vpack.c.bf16 %v19407_v35, %v19406_v38  ;;  %v19410_v48 = vand.u32 4294901760, %v19349_v17  ;;  %v19414_v38 = vld [vmem:[#allocation94_spill] sm:$0xff]  ;;  %11741 = vmatpush3.bf16.msra.mxu1 %v11740_v39  ;;  %v11744_v35 = vpack.c.bf16 %v13407_v57, %v13404_v46  ;;  %11551 = vmatprep.subr.bf16.mxu0 %v11550_v16  ;;  %v11748_v57 = vpack.c.bf16 %v13441_v8, %v13434_v32  ;;  %v19420_v39 = vld [vmem:[#allocation93_spill] sm:$0xff] }
  0xb4   : > { %v14189_v58 = vpack.c.bf16 %v19405_v52, %v19404_v4  ;;  %v14202_v20 = vpack.c.bf16 %v19409_v0, %v19408_v44  ;;  %v19411_v52 = vand.u32 4294901760, %v19351_v24  ;;  %10819 = vmatmul.mubr.f32.gmra.mrb[4].mxu0 %v19414_v38  ;;  %2067 = vmatprep.mubr.f32.mxu1 %v13753_v13  ;;  %v19416_v44 = vld [vmem:[#allocation70_spill] sm:$0xff]  ;;  %v11558_v46 = vpack.c.bf16 %v19385_v9, %v13837_v15  ;;  %v19427_v9 = vld [vmem:[#allocation56_spill] sm:$0xff] }
  0xb5   : > { %11743 = vmatprep.subr.bf16.mxu1 %v11742_v18  ;;  %10821 = vmatprep.mubr.f32.mxu0 %v19415_v30  ;;  %v11750_v36 = vpack.c.bf16 %v19390_v1, %v19388_v26  ;;  %v11752_v37 = vpack.c.bf16 %v19395_v62, %v19393_v21  ;;  %v11562_v32 = vpack.c.bf16 %v13923_v2, %v13900_v59  ;;  %v19419_v15 = vld [vmem:[#allocation86_spill] sm:$0xff]  ;;  %v19422_v2 = vld [vmem:[#allocation99_spill] sm:$0xff]  ;;  %v19426_v21 = vld [vmem:[#allocation9_spill] sm:$0xff] }
  0xb6   : > { %v14208_v4 = vpack.c.bf16 %v19411_v52, %v19410_v48  ;;  %2069 = vmatmul.mubr.f32.gmra.mrb[22].mxu1 %v19416_v44  ;;  %11553 = vmatpush3.bf16.msra.mxu0 %v11550_v16  ;;  %v11754_v8 = vpack.c.bf16 %v19401_v51, %v19399_v10  ;;  %v11756_v53 = vpack.c.bf16 %v13507_v5, %v19403_v3  ;;  %v19424_v16 = vld [vmem:[#allocation8_spill] sm:$0xff]  ;;  %v19425_v51 = vld [vmem:[#allocation59_spill] sm:$0xff]  ;;  %v19434_v1 = vld [vmem:[#allocation81_spill] sm:$0xff] }
  0xb7   : > { %11745 = vmatpush3.bf16.msra.mxu1 %v11744_v35  ;;  %11555 = vmatprep.subr.bf16.mxu0 %v11554_v43  ;;  %v19421_v59 = vpack.c.bf16 %v19348_v6, %v19344_v33  ;;  %v19423_v5 = vpack.c.bf16 %v19351_v24, %v19349_v17  ;;  %v19428_v26 = vld [vmem:[#allocation60_spill] sm:$0xff]  ;;  %v19429_v33 = vld [vmem:[#allocation10_spill] sm:$0xff]  ;;  %v19430_v6 = vld [vmem:[#allocation11_spill] sm:$0xff] }
  0xb8   : > { %10822 = vmatmul.mubr.f32.gmra.mrb[6].mxu0 %v14022_v12  ;;  %2074 = vmatprep.mubr.f32.mxu1 %v13817_v60  ;;  %v19431_v24 = vld [vmem:[#allocation12_spill] sm:$0xff]  ;;  %v19432_v17 = vld [vmem:[#allocation73_spill] sm:$0xff]  ;;  %v19436_v10 = vld [vmem:[#allocation14_spill] sm:$0xff] }
  0xb9   : > { %11747 = vmatprep.subr.bf16.mxu1 %v11746_v27  ;;  %10856 = vmatprep.mubr.f32.mxu0 %v19417_v31  ;;  %v19435_v62 = vld [vmem:[#allocation13_spill] sm:$0xff]  ;;  %v19437_v3 = vld [vmem:[#allocation16_spill] sm:$0xff]  ;;  %v19438_v0 = vld [vmem:[#allocation90_spill] sm:$0xff] }
  0xba   : > { %2076 = vmatmul.mubr.f32.gmra.mrb[24].mxu1 %v19418_v34  ;;  %11557 = vmatpush3.bf16.msra.mxu0 %v11554_v43  ;;  %v19439_v48 = vld [vmem:[#allocation67_spill] sm:$0xff]  ;;  %v19440_v52 = vld [vmem:[#allocation96_spill] sm:$0xff]  ;;  %v19441_v18 = vld [vmem:[#allocation17_spill] sm:$0xff]  ;;  %v19471_v34 = vand.u32 4294901760, %v13281_v23 }
  0xbb   : > { %11749 = vmatpush3.bf16.msra.mxu1 %v11748_v57  ;;  %11559 = vmatprep.subr.bf16.mxu0 %v11558_v46  ;;  %v19442_v35 = vld [vmem:[#allocation18_spill] sm:$0xff]  ;;  %v19443_v43 = vld [vmem:[#allocation19_spill] sm:$0xff]  ;;  %v19444_v27 = vld [vmem:[#allocation72_spill] sm:$0xff] }
  0xbc   : > { %2081 = vmatprep.mubr.f32.mxu1 %v19412_v29  ;;  %11751 = vmatprep.subr.bf16.mxu1 %v11750_v36  ;;  %v19445_v57 = vld [vmem:[#allocation20_spill] sm:$0xff]  ;;  %v19447_v36 = vld [vmem:[#allocation22_spill] sm:$0xff]  ;;  %v14337_v12 = vld [vmem:[#allocation2 + $0x128] sm:$0xff] }
  0xbd   : > { %19474 = vst [vmem:[#allocation11_spill] sm:$0xff] %v14337_v12 }
  0xbe   : > { %2083 = vmatmul.mubr.f32.gmra.mrb[26].mxu1 %v19419_v15  ;;  %11561 = vmatpush3.bf16.msra.mxu0 %v11558_v46  ;;  %v19446_v46 = vld [vmem:[#allocation21_spill] sm:$0xff] }
  0xbf   : > { %11753 = vmatpush3.bf16.msra.mxu1 %v11752_v37  ;;  %11563 = vmatprep.subr.bf16.mxu0 %v11562_v32  ;;  %v19448_v37 = vld [vmem:[#allocation55_spill] sm:$0xff]  ;;  %v19468_v15 = vld [vmem:[#allocation45_spill] sm:$0xff] }
  0xc0   : > { %2088 = vmatprep.mubr.f32.mxu1 %v19414_v38  ;;  %11755 = vmatprep.subr.bf16.mxu1 %v11754_v8  ;;  %v19450_v8 = vld [vmem:[#allocation25_spill] sm:$0xff] }
  0xc2   : > { %2090 = vmatmul.mubr.f32.gmra.mrb[28].mxu1 %v19420_v39  ;;  %11565 = vmatpush3.bf16.msra.mxu0 %v11562_v32  ;;  %v19449_v32 = vld [vmem:[#allocation80_spill] sm:$0xff] }
  0xc3   : > { %11757 = vmatpush3.bf16.msra.mxu1 %v11756_v53  ;;  %11567 = vmatprep.subr.bf16.mxu0 %v14087_v50  ;;  %v19451_v53 = vld [vmem:[#allocation26_spill] sm:$0xff]  ;;  %v14320_v39 = vld [vmem:[#allocation2 + $0x1a0] sm:$0xff] }
  0xc4   : > { %2095 = vmatprep.mubr.f32.mxu1 %v19415_v30  ;;  %11759 = vmatprep.subr.bf16.mxu1 %v19421_v59  ;;  %v19452_v59 = vld [vmem:[#allocation27_spill] sm:$0xff]  ;;  %19465 = vst [vmem:[#allocation9_spill] sm:$0xff] %v14320_v39 }
  0xc6   : > { %2097 = vmatmul.mubr.f32.gmra.mrb[30].mxu1 %v19422_v2  ;;  %11569 = vmatpush3.bf16.msra.mxu0 %v14087_v50  ;;  %v19433_v50 = vld [vmem:[#allocation64_spill] sm:$0xff]  ;;  %v14318_v2 = vld [vmem:[#allocation2 + $0x118] sm:$0xff] }
  0xc7   : > { %11761 = vmatpush3.bf16.msra.mxu1 %v19423_v5  ;;  %11571 = vmatprep.subr.bf16.mxu0 %v19424_v16  ;;  %v19453_v5 = vld [vmem:[#allocation89_spill] sm:$0xff]  ;;  %19464 = vst [vmem:[#allocation59_spill] sm:$0xff] %v14318_v2 }
  0xc8   : > { %2232 = vmatprep.mubr.f32.mxu1 %v19425_v51  ;;  %11763 = vmatprep.subr.bf16.mxu1 %v19426_v21 }
  0xc9   : > { %10857 = vmatmul.mubr.f32.vlgmr.msra.gmra.mrb[0].mxu0 %v19427_v9 }
  0xca   : > { %2235 = vmatmul.mubr.f32.vlgmr.msra.gmra.mrb[32].mxu1 %v19428_v26  ;;  %11573 = vmatpush3.bf16.msra.mxu0 %v19424_v16 }
  0xcb   : > { %11765 = vmatpush3.bf16.msra.mxu1 %v19429_v33  ;;  %11575 = vmatprep.subr.bf16.mxu0 %v19430_v6 }
  0xcc   : > { %2241 = vmatprep.mubr.f32.mxu1 %v19417_v31  ;;  %11767 = vmatprep.subr.bf16.mxu1 %v19431_v24  ;;  %v19458_v31 = vld [vmem:[#allocation34_spill] sm:$0xff] }
  0xcd   : > { %10859 = vmatprep.mubr.f32.mxu0 %v19432_v17 }
  0xce   : > { %2244 = vmatmul.mubr.f32.gmra.mrb[34].mxu1 %v19433_v50  ;;  %10860 = vmatmul.mubr.f32.gmra.mrb[2].mxu0 %v19434_v1  ;;  %v14316_v50 = vld [vmem:[#allocation2 + $0x110] sm:$0xff] }
  0xcf   : > { %11577 = vmatpush3.bf16.msra.mxu0 %v19430_v6  ;;  %11769 = vmatpush3.bf16.msra.mxu1 %v19435_v62  ;;  %19463 = vst [vmem:[#allocation8_spill] sm:$0xff] %v14316_v50 }
  0xd0   : > { %11579 = vmatprep.subr.bf16.mxu0 %v19436_v10  ;;  %2250 = vmatprep.mubr.f32.mxu1 %v19427_v9  ;;  %v14304_v9 = vld [vmem:[#allocation2 + $0x100] sm:$0xff] }
  0xd1   : > { %11771 = vmatprep.subr.bf16.mxu1 %v19437_v3  ;;  %10862 = vmatprep.mubr.f32.mxu0 %v19438_v0  ;;  %19457 = vst [vmem:[#allocation33_spill] sm:$0xff] %v14304_v9 }
  0xd2   : > { %2253 = vmatmul.mubr.f32.gmra.mrb[36].mxu1 %v19439_v48  ;;  %10863 = vmatmul.mubr.f32.gmra.mrb[4].mxu0 %v19440_v52  ;;  %v19480_v48 = vld [vmem:[#allocation40_spill] sm:$0xff] }
  0xd3   : > { %11581 = vmatpush3.bf16.msra.mxu0 %v19436_v10  ;;  %11773 = vmatpush3.bf16.msra.mxu1 %v19441_v18 }
  0xd4   : > { %11583 = vmatprep.subr.bf16.mxu0 %v19442_v35  ;;  %2259 = vmatprep.mubr.f32.mxu1 %v19432_v17  ;;  %v14302_v17 = vld [vmem:[#allocation2 + $0x188] sm:$0xff] }
  0xd5   : > { %11775 = vmatprep.subr.bf16.mxu1 %v19443_v43  ;;  %10865 = vmatprep.mubr.f32.mxu0 %v14004_v61  ;;  %19456 = vst [vmem:[#allocation32_spill] sm:$0xff] %v14302_v17 }
  0xd6   : > { %2262 = vmatmul.mubr.f32.gmra.mrb[38].mxu1 %v19444_v27  ;;  %10866 = vmatmul.mubr.f32.gmra.mrb[6].mxu0 %v14036_v7  ;;  %v14298_v7 = vld [vmem:[#allocation2 + $0x180] sm:$0xff]  ;;  %v14312_v27 = vld [vmem:[#allocation2 + $0x198] sm:$0xff] }
  0xd7   : > { %11585 = vmatpush3.bf16.msra.mxu0 %v19442_v35  ;;  %11777 = vmatpush3.bf16.msra.mxu1 %v19445_v57  ;;  %19454 = vst [vmem:[#allocation30_spill] sm:$0xff] %v14298_v7  ;;  %19461 = vst [vmem:[#allocation39_spill] sm:$0xff] %v14312_v27  ;;  %v14335_v57 = vld [vmem:[#allocation2 + $0x120] sm:$0xff] }
  0xd8   : > { %11587 = vmatprep.subr.bf16.mxu0 %v19446_v46  ;;  %2268 = vmatprep.mubr.f32.mxu1 %v19434_v1  ;;  %v19455_v1 = vld [vmem:[#allocation31_spill] sm:$0xff]  ;;  %19473 = vst [vmem:[#allocation10_spill] sm:$0xff] %v14335_v57 }
  0xd9   : > { %11779 = vmatprep.subr.bf16.mxu1 %v19447_v36  ;;  %10900 = vmatprep.mubr.f32.mxu0 %v19448_v37  ;;  %v19492_v36 = vand.u32 4294901760, %v14302_v17 }
  0xda   : > { %2271 = vmatmul.mubr.f32.gmra.mrb[40].mxu1 %v19449_v32  ;;  %v14308_v32 = vld [vmem:[#allocation2 + $0x108] sm:$0xff] }
  0xdb   : > { %11589 = vmatpush3.bf16.msra.mxu0 %v19446_v46  ;;  %11781 = vmatpush3.bf16.msra.mxu1 %v19450_v8  ;;  %19459 = vst [vmem:[#allocation36_spill] sm:$0xff] %v14308_v32  ;;  %v19470_v8 = vand.u32 4294901760, %v13279_v22  ;;  %v14333_v46 = vld [vmem:[#allocation2 + $0x1a8] sm:$0xff]  ;;  %v19477_v22 = vand.u32 4294901760, %v13314_v40 }
  0xdc   : > { %11591 = vmatprep.subr.bf16.mxu0 %v19451_v53  ;;  %2277 = vmatprep.mubr.f32.mxu1 %v19438_v0  ;;  %v14310_v0 = vld [vmem:[#allocation2 + $0x190] sm:$0xff]  ;;  %19472 = vst [vmem:[#allocation60_spill] sm:$0xff] %v14333_v46 }
  0xdd   : > { %11783 = vmatprep.subr.bf16.mxu1 %v19452_v59  ;;  %19460 = vst [vmem:[#allocation37_spill] sm:$0xff] %v14310_v0  ;;  %v19469_v59 = vand.u32 4294901760, %v19468_v15  ;;  %v19476_v15 = vand.u32 4294901760, %v13296_v28  ;;  %v19482_v28 = vand.u32 4294901760, %v13326_v47 }
  0xde   : > { %2280 = vmatmul.mubr.f32.gmra.mrb[42].mxu1 %v19453_v5  ;;  %v19462_v5 = vld [vmem:[#allocation35_spill] sm:$0xff] }
  0xdf   : > { %11593 = vmatpush3.bf16.msra.mxu0 %v19451_v53  ;;  %11785 = vmatpush3.bf16.msra.mxu1 %v19455_v1  ;;  %v19466_v1 = vld [vmem:[#allocation95_spill] sm:$0xff]  ;;  %v11796_v23 = vpack.c.bf16 %v19477_v22, %v19476_v15  ;;  %v14362_v22 = vld [vmem:[#allocation2 + $0x1b0] sm:$0xff] }
  0xe0   : > { %11595 = vmatprep.subr.bf16.mxu0 %v19458_v31  ;;  %2286 = vmatprep.mubr.f32.mxu1 %v19440_v52  ;;  %v19467_v52 = vand.u32 4294901760, %v19355_v56  ;;  %v19475_v56 = vld [vmem:[#allocation38_spill] sm:$0xff]  ;;  %19483 = vst [vmem:[#allocation12_spill] sm:$0xff] %v14362_v22 }
  0xe1   : > { %11787 = vmatprep.subr.bf16.mxu1 %v19462_v5  ;;  %v11794_v5 = vpack.c.bf16 %v19471_v34, %v19470_v8  ;;  %v19478_v34 = vand.u32 4294901760, %v13637_v45  ;;  %v19488_v45 = vld [vmem:[#allocation15_spill] sm:$0xff] }
  0xe2   : > { %2289 = vmatmul.mubr.f32.gmra.mrb[44].mxu1 %v19466_v1  ;;  %v11602_v53 = vpack.c.bf16 %v19469_v59, %v19467_v52  ;;  %v19479_v52 = vand.u32 4294901760, %v13642_v11  ;;  %v19481_v1 = vand.u32 4294901760, %v13319_v42  ;;  %v19489_v11 = vand.u32 4294901760, %v19488_v45 }
  0xe3   : > { %11597 = vmatpush3.bf16.msra.mxu0 %v19458_v31  ;;  %11789 = vmatpush3.bf16.msra.mxu1 %v19475_v56  ;;  %v14384_v59 = vsub.f32 %v14302_v17, %v19492_v36  ;;  %v19494_v42 = vand.u32 4294901760, %v14304_v9  ;;  %v19497_v45 = vand.u32 4294901760, %v14308_v32  ;;  %v14504_v17 = vld [vmem:[#allocation2 + $0x158] sm:$0xff] }
  0xe4   : > { %v14349_v8 = vpack.c.bf16 %v19479_v52, %v19478_v34  ;;  %11599 = vmatprep.subr.bf16.mxu0 %v19480_v48  ;;  %2295 = vmatprep.mubr.f32.mxu1 %v14004_v61  ;;  %v11798_v40 = vpack.c.bf16 %v19482_v28, %v19481_v1  ;;  %v14364_v34 = vld [vmem:[#allocation2 + $0x1b8] sm:$0xff]  ;;  %v19487_v28 = vand.u32 4294901760, %v13330_v49  ;;  %v19490_v61 = vand.u32 4294901760, %v14298_v7  ;;  %v19496_v49 = vld [vmem:[#allocation49_spill] sm:$0xff]  ;;  %19538 = vst [vmem:[#allocation132_spill] sm:$0xff] %v14504_v17 }
  0xe5   : > { %19484 = vst [vmem:[#allocation13_spill] sm:$0xff] %v14364_v34  ;;  %v19485_v52 = vld [vmem:[#allocation43_spill] sm:$0xff]  ;;  %19493 = vst [vmem:[#allocation16_spill] sm:$0xff] %v14384_v59  ;;  %v14389_v47 = vsub.f32 %v14304_v9, %v19494_v42  ;;  %v14405_v42 = vld [vmem:[#allocation2 + $0x130] sm:$0xff] }
  0xe6   : > { %11791 = vmatprep.subr.bf16.mxu1 %v19485_v52  ;;  %v19486_v1 = vld [vmem:[#allocation103_spill] sm:$0xff]  ;;  %v11800_v15 = vpack.c.bf16 %v19489_v11, %v19487_v28  ;;  %v14379_v56 = vsub.f32 %v14298_v7, %v19490_v61  ;;  %v14396_v11 = vsub.f32 %v14308_v32, %v19497_v45  ;;  %v19499_v61 = vand.u32 4294901760, %v14310_v0  ;;  %19501 = vst [vmem:[#allocation45_spill] sm:$0xff] %v14405_v42 }
  0xe7   : > { %2298 = vmatmul.mubr.f32.gmra.mrb[46].mxu1 %v19486_v1  ;;  %19495 = vst [vmem:[#allocation17_spill] sm:$0xff] %v14389_v47  ;;  %11601 = vmatpush3.bf16.msra.mxu0 %v19480_v48  ;;  %v14407_v52 = vld [vmem:[#allocation2 + $0x138] sm:$0xff]  ;;  %v19504_v45 = vand.u32 4294901760, %v14312_v27  ;;  %v19508_v1 = vand.u32 4294901760, %v14318_v2 }
  0xe8   : > { %19491 = vst [vmem:[#allocation14_spill] sm:$0xff] %v14379_v56  ;;  %11793 = vmatpush3.bf16.msra.mxu1 %v19496_v49  ;;  %19498 = vst [vmem:[#allocation18_spill] sm:$0xff] %v14396_v11  ;;  %v14401_v28 = vsub.f32 %v14310_v0, %v19499_v61  ;;  %11603 = vmatprep.subr.bf16.mxu0 %v11602_v53  ;;  %v19503_v49 = vand.u32 4294901760, %v19425_v51  ;;  %v19506_v61 = vand.u32 4294901760, %v14316_v50  ;;  %v19510_v0 = vand.u32 4294901760, %v14320_v39  ;;  %v19533_v32 = vld [vmem:[#allocation83_spill] sm:$0xff] }
  0xe9   : > { %19502 = vst [vmem:[#allocation15_spill] sm:$0xff] %v14407_v52  ;;  %v14414_v48 = vsub.f32 %v14312_v27, %v19504_v45  ;;  %v14424_v36 = vsub.f32 %v14318_v2, %v19508_v1  ;;  %11795 = vmatprep.subr.bf16.mxu1 %v11794_v5  ;;  %v19514_v27 = vand.u32 4294901760, %v14335_v57  ;;  %v19518_v5 = vld [vmem:[#allocation61_spill] sm:$0xff]  ;;  %v14479_v2 = vld [vmem:[#allocation2 + $0x1d0] sm:$0xff]  ;;  %v19542_v7 = vld [vmem:[#allocation23_spill] sm:$0xff] }
  0xea   : > { %19500 = vst [vmem:[#allocation19_spill] sm:$0xff] %v14401_v28  ;;  %2402 = vmatprep.mubr.f32.mxu1 %v19503_v49  ;;  %v14419_v31 = vsub.f32 %v14316_v50, %v19506_v61  ;;  %v14429_v51 = vsub.f32 %v14320_v39, %v19510_v0  ;;  %v19512_v49 = vand.u32 4294901760, %v14333_v46  ;;  %v19516_v50 = vand.u32 4294901760, %v14337_v12  ;;  %10901 = vmatmul.mubr.f32.vlgmr.msra.gmra.mrb[0].mxu0 %v19518_v5  ;;  %v14467_v39 = vld [vmem:[#allocation2 + $0x1c8] sm:$0xff] }
  0xeb   : > { %19505 = vst [vmem:[#allocation114_spill] sm:$0xff] %v14414_v48  ;;  %19509 = vst [vmem:[#allocation116_spill] sm:$0xff] %v14424_v36  ;;  %v14439_v61 = vsub.f32 %v14335_v57, %v19514_v27  ;;  %v19519_v0 = vand.u32 4294901760, %v19428_v26  ;;  %11605 = vmatpush3.bf16.msra.mxu0 %v11602_v53  ;;  %v19522_v26 = vand.u32 4294901760, %v14364_v34  ;;  %v14469_v53 = vld [vmem:[#allocation2 + $0x140] sm:$0xff]  ;;  %v19532_v27 = vld [vmem:[#allocation65_spill] sm:$0xff] }
  0xec   : > { %19507 = vst [vmem:[#allocation115_spill] sm:$0xff] %v14419_v31  ;;  %19511 = vst [vmem:[#allocation117_spill] sm:$0xff] %v14429_v51  ;;  %v14434_v45 = vsub.f32 %v14333_v46, %v19512_v49  ;;  %v14444_v1 = vsub.f32 %v14337_v12, %v19516_v50  ;;  %v19520_v12 = vand.u32 4294901760, %v14362_v22  ;;  %v14465_v49 = vld [vmem:[#allocation2 + $0x1c0] sm:$0xff]  ;;  %11607 = vmatprep.subr.bf16.mxu0 %v14349_v8  ;;  %v19529_v46 = vld [vmem:[#allocation75_spill] sm:$0xff] }
  0xed   : > { %19515 = vst [vmem:[#allocation119_spill] sm:$0xff] %v14439_v61  ;;  %2406 = vmatmul.mubr.f32.vlgmr.msra.gmra.mrb[48].mxu1 %v19519_v0  ;;  %v14463_v0 = vsub.f32 %v14364_v34, %v19522_v26  ;;  %19524 = vst [vmem:[#allocation123_spill] sm:$0xff] %v14465_v49  ;;  %v14477_v26 = vld [vmem:[#allocation2 + $0x148] sm:$0xff]  ;;  %10903 = vmatprep.mubr.f32.mxu0 %v19529_v46  ;;  %v14488_v50 = vld [vmem:[#allocation2 + $0x150] sm:$0xff]  ;;  %v19536_v34 = vand.u32 4294901760, %v14407_v52 }
  0xee   : > { %19513 = vst [vmem:[#allocation118_spill] sm:$0xff] %v14434_v45  ;;  %19517 = vst [vmem:[#allocation120_spill] sm:$0xff] %v14444_v1  ;;  %11797 = vmatpush3.bf16.msra.mxu1 %v11796_v23  ;;  %v14458_v57 = vsub.f32 %v14362_v22, %v19520_v12  ;;  %2413 = vmatprep.mubr.f32.mxu1 %v19448_v37  ;;  %v14486_v12 = vld [vmem:[#allocation2 + $0x1d8] sm:$0xff]  ;;  %v19546_v23 = vand.u32 4294901760, %v14401_v28  ;;  %v19547_v37 = vand.u32 4294901760, %v14414_v48 }
  0xef   : > { %19523 = vst [vmem:[#allocation122_spill] sm:$0xff] %v14463_v0  ;;  %19525 = vst [vmem:[#allocation124_spill] sm:$0xff] %v14467_v39  ;;  %11799 = vmatprep.subr.bf16.mxu1 %v11798_v40  ;;  %10904 = vmatmul.mubr.f32.gmra.mrb[2].mxu0 %v19533_v32  ;;  %v19534_v40 = vand.u32 4294901760, %v14405_v42  ;;  %v14500_v22 = vsub.f32 %v14407_v52, %v19536_v34  ;;  %v19544_v34 = vand.u32 4294901760, %v14396_v11  ;;  %v19570_v11 = vld [vmem:[#allocation108_spill] sm:$0xff] }
  0xf0   : > { %19521 = vst [vmem:[#allocation121_spill] sm:$0xff] %v14458_v57  ;;  %19526 = vst [vmem:[#allocation125_spill] sm:$0xff] %v14469_v53  ;;  %11609 = vmatpush3.bf16.msra.mxu0 %v14349_v8  ;;  %v19539_v8 = vand.u32 4294901760, %v14379_v56  ;;  %10906 = vmatprep.mubr.f32.mxu0 %v19542_v7  ;;  %v14535_v52 = vpack.c.bf16 %v19547_v37, %v19546_v23  ;;  %v19556_v37 = vand.u32 4294901760, %v14467_v39 }
  0xf1   : > { %19527 = vst [vmem:[#allocation126_spill] sm:$0xff] %v14477_v26  ;;  %19528 = vst [vmem:[#allocation127_spill] sm:$0xff] %v14479_v2  ;;  %2417 = vmatmul.mubr.f32.gmra.mrb[50].mxu1 %v19532_v27  ;;  %v14495_v9 = vsub.f32 %v14405_v42, %v19534_v40  ;;  %11611 = vmatprep.subr.bf16.mxu0 %v14101_v41  ;;  %v19543_v40 = vand.u32 4294901760, %v14389_v47  ;;  %v19553_v42 = vld [vmem:[#allocation98_spill] sm:$0xff] }
  0xf2   : > { %19530 = vst [vmem:[#allocation128_spill] sm:$0xff] %v14486_v12  ;;  %19531 = vst [vmem:[#allocation129_spill] sm:$0xff] %v14488_v50  ;;  %11801 = vmatpush3.bf16.msra.mxu1 %v11800_v15  ;;  %2424 = vmatprep.mubr.f32.mxu1 %v19518_v5  ;;  %v19540_v15 = vand.u32 4294901760, %v14384_v59  ;;  %v14554_v23 = vsub.f32 %v14467_v39, %v19556_v37  ;;  %v19563_v37 = vand.u32 4294901760, %v14477_v26  ;;  %v14575_v39 = vld [vmem:[#allocation2 + $0x1e0] sm:$0xff] }
  0xf3   : > { %19535 = vst [vmem:[#allocation130_spill] sm:$0xff] %v14495_v9  ;;  %19537 = vst [vmem:[#allocation131_spill] sm:$0xff] %v14500_v22  ;;  %11803 = vmatprep.subr.bf16.mxu1 %v14107_v54  ;;  %v14529_v5 = vpack.c.bf16 %v19544_v34, %v19543_v40  ;;  %v19550_v54 = vand.u32 4294901760, %v14424_v36  ;;  %10907 = vmatmul.mubr.f32.gmra.mrb[4].mxu0 %v19553_v42  ;;  %v19554_v40 = vand.u32 4294901760, %v14465_v49 }
  0xf4   : > { %v14520_v27 = vpack.c.bf16 %v19540_v15, %v19539_v8  ;;  %19548 = vst [vmem:[#allocation135_spill] sm:$0xff] %v14535_v52  ;;  %v19549_v8 = vand.u32 4294901760, %v14419_v31  ;;  %v19557_v52 = vand.u32 4294901760, %v14429_v51  ;;  %11613 = vmatpush3.bf16.msra.mxu0 %v14101_v41  ;;  %19565 = vst [vmem:[#allocation140_spill] sm:$0xff] %v14575_v39  ;;  %v19567_v41 = vand.u32 4294901760, %v14439_v61  ;;  %v14644_v61 = vld [vmem:[#allocation2 + $0x170] sm:$0xff] }
  0xf5   : > { %19545 = vst [vmem:[#allocation134_spill] sm:$0xff] %v14529_v5  ;;  %v14549_v34 = vsub.f32 %v14465_v49, %v19554_v40  ;;  %v19561_v40 = vand.u32 4294901760, %v14469_v53  ;;  %v14573_v5 = vsub.f32 %v14477_v26, %v19563_v37  ;;  %11615 = vmatprep.subr.bf16.mxu0 %v19570_v11  ;;  %v19573_v37 = vand.u32 4294901760, %v14486_v12  ;;  %v14599_v49 = vld [vmem:[#allocation2 + $0x168] sm:$0xff] }
  0xf6   : > { %19541 = vst [vmem:[#allocation133_spill] sm:$0xff] %v14520_v27  ;;  %v14541_v15 = vpack.c.bf16 %v19550_v54, %v19549_v8  ;;  %v19552_v27 = vld [vmem:[#allocation68_spill] sm:$0xff]  ;;  %v19558_v8 = vand.u32 4294901760, %v14434_v45  ;;  %19576 = vst [vmem:[#allocation145_spill] sm:$0xff] %v14599_v49 }
  0xf7   : > { %2428 = vmatmul.mubr.f32.gmra.mrb[52].mxu1 %v19552_v27  ;;  %19555 = vst [vmem:[#allocation137_spill] sm:$0xff] %v14549_v34  ;;  %v14568_v27 = vsub.f32 %v14469_v53, %v19561_v40  ;;  %19564 = vst [vmem:[#allocation139_spill] sm:$0xff] %v14573_v5  ;;  %v19571_v40 = vand.u32 4294901760, %v14479_v2  ;;  %v14595_v26 = vsub.f32 %v14486_v12, %v19573_v37  ;;  %v14597_v53 = vld [vmem:[#allocation2 + $0x160] sm:$0xff]  ;;  %v19583_v37 = vand.u32 4294901760, %v14504_v17 }
  0xf8   : > { %19551 = vst [vmem:[#allocation136_spill] sm:$0xff] %v14541_v15  ;;  %v14560_v54 = vpack.c.bf16 %v19558_v8, %v19557_v52  ;;  %v19560_v15 = vld [vmem:[#allocation107_spill] sm:$0xff]  ;;  %v14577_v52 = vld [vmem:[#allocation2 + $0x1e8] sm:$0xff]  ;;  %2435 = vmatprep.mubr.f32.mxu1 %v19529_v46  ;;  %19575 = vst [vmem:[#allocation144_spill] sm:$0xff] %v14597_v53  ;;  %11617 = vmatpush3.bf16.msra.mxu0 %v19570_v11 }
  0xf9   : > { %11805 = vmatpush3.bf16.msra.mxu1 %v19560_v15  ;;  %19562 = vst [vmem:[#allocation107_spill] sm:$0xff] %v14568_v27  ;;  %19566 = vst [vmem:[#allocation141_spill] sm:$0xff] %v14577_v52  ;;  %v19568_v15 = vand.u32 4294901760, %v14444_v1  ;;  %v19580_v46 = vld [vmem:[#allocation109_spill] sm:$0xff]  ;;  %v14617_v12 = vsub.f32 %v14504_v17, %v19583_v37  ;;  %v19589_v37 = vld [vmem:[#allocation110_spill] sm:$0xff] }
  0xfa   : > { %19559 = vst [vmem:[#allocation138_spill] sm:$0xff] %v14560_v54  ;;  %v14590_v54 = vsub.f32 %v14479_v2, %v19571_v40  ;;  %19574 = vst [vmem:[#allocation143_spill] sm:$0xff] %v14595_v26  ;;  %11807 = vmatprep.subr.bf16.mxu1 %v19580_v46  ;;  %v19581_v1 = vld [vmem:[#allocation41_spill] sm:$0xff]  ;;  %v19582_v40 = vand.u32 4294901760, %v14488_v50  ;;  %v19588_v46 = vld [vmem:[#allocation47_spill] sm:$0xff] }
  0xfb   : > { %v14583_v8 = vpack.c.bf16 %v19568_v15, %v19567_v41  ;;  %v19577_v41 = vand.u32 4294901760, %v14458_v57  ;;  %v19578_v15 = vand.u32 4294901760, %v14463_v0  ;;  %10909 = vmatprep.mubr.f32.mxu0 %v19581_v1  ;;  %v19584_v57 = vand.u32 4294901760, %v14495_v9  ;;  %v19598_v17 = vld [vmem:[#allocation50_spill] sm:$0xff] }
  0xfc   : > { %19572 = vst [vmem:[#allocation108_spill] sm:$0xff] %v14590_v54  ;;  %v14612_v2 = vsub.f32 %v14488_v50, %v19582_v40  ;;  %v19585_v0 = vand.u32 4294901760, %v14500_v22  ;;  %10910 = vmatmul.mubr.f32.gmra.mrb[6].mxu0 %v19588_v46  ;;  %v19591_v40 = vld [vmem:[#allocation111_spill] sm:$0xff]  ;;  %v19594_v50 = vand.u32 4294901760, %v14549_v34  ;;  %v19597_v46 = vld [vmem:[#allocation112_spill] sm:$0xff]  ;;  %v19599_v22 = vand.u32 4294901760, %v14568_v27 }
  0xfd   : > { %19569 = vst [vmem:[#allocation142_spill] sm:$0xff] %v14583_v8  ;;  %v14605_v8 = vpack.c.bf16 %v19578_v15, %v19577_v41  ;;  %v19587_v15 = vld [vmem:[#allocation74_spill] sm:$0xff]  ;;  %11809 = vmatpush3.bf16.msra.mxu1 %v19589_v37  ;;  %11619 = vmatprep.subr.bf16.mxu0 %v19591_v40  ;;  %19592 = vst [vmem:[#allocation111_spill] sm:$0xff] %v14644_v61  ;;  %v14646_v37 = vld [vmem:[#allocation2 + $0x178] sm:$0xff]  ;;  %v19600_v9 = vand.u32 4294901760, %v14573_v5 }
  0xfe   : > { %v14623_v41 = vpack.c.bf16 %v19585_v0, %v19584_v57  ;;  %2439 = vmatmul.mubr.f32.gmra.mrb[54].mxu1 %v19587_v15  ;;  %19593 = vst [vmem:[#allocation147_spill] sm:$0xff] %v14646_v37  ;;  %v19595_v0 = vand.u32 4294901760, %v14554_v23  ;;  %11811 = vmatprep.subr.bf16.mxu1 %v19597_v46  ;;  %v19602_v34 = vld [vmem:[#allocation82_spill] sm:$0xff] }
  0xff   : > { %19579 = vst [vmem:[#allocation146_spill] sm:$0xff] %v14605_v8  ;;  %v14639_v8 = vld [vmem:[#allocation2 + $0x1f8] sm:$0xff]  ;;  %2446 = vmatprep.mubr.f32.mxu1 %v19533_v32  ;;  %10944 = vmatprep.mubr.f32.mxu0 %v19598_v17  ;;  %v14663_v45 = vpack.c.bf16 %v19600_v9, %v19599_v22  ;;  %v19607_v9 = vld [vmem:[#allocation113_spill] sm:$0xff]  ;;  %v19608_v22 = vand.u32 4294901760, %v14597_v53 }
 0x100   : > { %19586 = vst [vmem:[#allocation109_spill] sm:$0xff] %v14623_v41  ;;  %v14637_v41 = vld [vmem:[#allocation2 + $0x1f0] sm:$0xff]  ;;  %19590 = vst [vmem:[#allocation110_spill] sm:$0xff] %v14639_v8  ;;  %v14652_v57 = vpack.c.bf16 %v19595_v0, %v19594_v50  ;;  %v19603_v50 = vand.u32 4294901760, %v14575_v39  ;;  %v19605_v0 = vand.u32 4294901760, %v14577_v52  ;;  %11621 = vmatpush3.bf16.msra.mxu0 %v19591_v40  ;;  %v19613_v40 = vand.u32 4294901760, %v14590_v54 }
 0x101   : > { %19601 = vst [vmem:[#allocation112_spill] sm:$0xff] %v14663_v45  ;;  %11813 = vmatpush3.bf16.msra.mxu1 %v19607_v9  ;;  %v14683_v45 = vsub.f32 %v14597_v53, %v19608_v22  ;;  %v19614_v9 = vand.u32 4294901760, %v14595_v26  ;;  %v19616_v22 = vld [vmem:[#allocation28_spill] sm:$0xff]  ;;  %v19617_v53 = vand.u32 4294901760, %v14612_v2 }
 0x102   : > { %19596 = vst [vmem:[#allocation148_spill] sm:$0xff] %v14652_v57  ;;  %2450 = vmatmul.mubr.f32.gmra.mrb[56].mxu1 %v19602_v34  ;;  %v14669_v46 = vsub.f32 %v14575_v39, %v19603_v50  ;;  %v14674_v15 = vsub.f32 %v14577_v52, %v19605_v0  ;;  %v19610_v50 = vand.u32 4294901760, %v14599_v49  ;;  %v19612_v34 = vld [vmem:[#allocation84_spill] sm:$0xff]  ;;  %11815 = vmatprep.subr.bf16.mxu1 %v19616_v22  ;;  %v19620_v0 = vld [vmem:[#allocation91_spill] sm:$0xff]  ;;  %v19621_v52 = vand.u32 4294901760, %v14637_v41 }
 0x103   : > { %19609 = vst [vmem:[#allocation113_spill] sm:$0xff] %v14683_v45  ;;  %11623 = vmatprep.subr.bf16.mxu0 %v19612_v34  ;;  %2457 = vmatprep.mubr.f32.mxu1 %v19542_v7  ;;  %v14698_v32 = vpack.c.bf16 %v19614_v9, %v19613_v40  ;;  %v19623_v40 = vand.u32 4294901760, %v14639_v8 }
 0x104   : > { %19604 = vst [vmem:[#allocation149_spill] sm:$0xff] %v14669_v46  ;;  %19606 = vst [vmem:[#allocation150_spill] sm:$0xff] %v14674_v15  ;;  %v14688_v57 = vsub.f32 %v14599_v49, %v19610_v50  ;;  %v19618_v50 = vand.u32 4294901760, %v14617_v12  ;;  %v14713_v39 = vsub.f32 %v14637_v41, %v19621_v52  ;;  %11625 = vmatpush3.bf16.msra.mxu0 %v19612_v34  ;;  %v19627_v52 = vand.u32 4294901760, %v14646_v37 }
 0x105   : > { %19615 = vst [vmem:[#allocation84_spill] sm:$0xff] %v14698_v32  ;;  %v14718_v9 = vsub.f32 %v14639_v8, %v19623_v40  ;;  %11817 = vmatpush3.bf16.msra.mxu1 %v14171_v55  ;;  %11627 = vmatprep.subr.bf16.mxu0 %v14177_v63  ;;  %v19629_v55 = vand.u32 4294901760, %v14669_v46  ;;  %v19630_v34 = vand.u32 4294901760, %v14674_v15  ;;  %v19719_v8 = vld [vmem:[#allocation99_spill] sm:$0xff] }
 0x106   : > { %19611 = vst [vmem:[#allocation151_spill] sm:$0xff] %v14688_v57  ;;  %v14705_v49 = vpack.c.bf16 %v19618_v50, %v19617_v53  ;;  %2461 = vmatmul.mubr.f32.gmra.mrb[58].mxu1 %v19620_v0  ;;  %19622 = vst [vmem:[#allocation152_spill] sm:$0xff] %v14713_v39  ;;  %v18835_v53 = vand.u32 4294901760, %v14683_v45  ;;  %v18830_v22 = vand.u32 4294901760, %v14688_v57  ;;  %v19625_v50 = vand.u32 4294901760, %v14644_v61  ;;  %11819 = vmatprep.subr.bf16.mxu1 %v14183_v19 }
 0x107   : > { %19624 = vst [vmem:[#allocation153_spill] sm:$0xff] %v14718_v9  ;;  %v14732_v11 = vsub.f32 %v14646_v37, %v19627_v52  ;;  %2468 = vmatprep.mubr.f32.mxu1 %v19553_v42  ;;  %v14740_v40 = vpack.c.bf16 %v19630_v34, %v19629_v55  ;;  %v19633_v52 = vld [vmem:[#allocation97_spill] sm:$0xff]  ;;  %v18831_v42 = vand.u32 4294901760, %v14718_v9 }
 0x108   : > { %19619 = vst [vmem:[#allocation28_spill] sm:$0xff] %v14705_v49  ;;  %v14727_v7 = vsub.f32 %v14644_v61, %v19625_v50  ;;  %v14747_v50 = vpack.c.bf16 %v18830_v22, %v18835_v53  ;;  %v18834_v49 = vand.u32 4294901760, %v14713_v39  ;;  %11629 = vmatpush3.bf16.msra.mxu0 %v14177_v63  ;;  %v19637_v22 = vld [vmem:[#allocation53_spill] sm:$0xff] }
 0x109   : > { %19628 = vst [vmem:[#allocation155_spill] sm:$0xff] %v14732_v11  ;;  %19631 = vst [vmem:[#allocation156_spill] sm:$0xff] %v14740_v40  ;;  %11821 = vmatpush3.bf16.msra.mxu1 %v14189_v58  ;;  %v18832_v19 = vand.u32 4294901760, %v14732_v11  ;;  %11631 = vmatprep.subr.bf16.mxu0 %v14196_v14  ;;  %v19636_v58 = vld [vmem:[#allocation105_spill] sm:$0xff] }
 0x10a   : > { %19626 = vst [vmem:[#allocation154_spill] sm:$0xff] %v14727_v7  ;;  %19632 = vst [vmem:[#allocation157_spill] sm:$0xff] %v14747_v50  ;;  %2472 = vmatmul.mubr.f32.gmra.mrb[60].mxu1 %v19633_v52  ;;  %v18833_v55 = vand.u32 4294901760, %v14727_v7  ;;  %v14762_v34 = vpack.c.bf16 %v18831_v42, %v18834_v49  ;;  %11823 = vmatprep.subr.bf16.mxu1 %v14202_v20  ;;  %v19638_v42 = vld [vmem:[#allocation52_spill] sm:$0xff]  ;;  %v19639_v20 = vld [vmem:[#allocation54_spill] sm:$0xff] }
 0x10b   : > { %2479 = vmatprep.mubr.f32.mxu1 %v19581_v1  ;;  %v19652_v49 = vld [vmem:[#allocation78_spill] sm:$0xff]  ;;  %v19661_v52 = vld [vmem:[#allocation32_spill] sm:$0xff] }
 0x10c   : > { %19634 = vst [vmem:[#allocation158_spill] sm:$0xff] %v14762_v34  ;;  %v14769_v63 = vpack.c.bf16 %v18832_v19, %v18833_v55  ;;  %11633 = vmatpush3.bf16.msra.mxu0 %v14196_v14  ;;  %v19640_v14 = vld [vmem:[#allocation48_spill] sm:$0xff]  ;;  %v19651_v19 = vand.u32 4294901760, %v14414_v48  ;;  %v19654_v1 = vld [vmem:[#allocation26_spill] sm:$0xff]  ;;  %v19655_v34 = vld [vmem:[#allocation27_spill] sm:$0xff]  ;;  %v19662_v32 = vand.u32 4294901760, %v19661_v52 }
 0x10d   : > { %11825 = vmatpush3.bf16.msra.mxu1 %v14208_v4  ;;  %11635 = vmatprep.subr.bf16.mxu0 %v19424_v16  ;;  %v19641_v4 = vld [vmem:[#allocation104_spill] sm:$0xff] }
 0x10e   : > { %19635 = vst [vmem:[#allocation159_spill] sm:$0xff] %v14769_v63  ;;  %2483 = vmatmul.mubr.f32.gmra.mrb[62].mxu1 %v19636_v58  ;;  %11827 = vmatprep.subr.bf16.mxu1 %v19426_v21  ;;  %v19643_v21 = vand.u32 4294901760, %v14379_v56  ;;  %v3212_v55 = vsub.f32 %v14414_v48, %v19651_v19  ;;  %v19656_v19 = vand.u32 4294901760, %v14419_v31  ;;  %v19673_v52 = vld [vmem:[#allocation8_spill] sm:$0xff] }
 0x10f   : > { %2649 = vmatprep.mubr.f32.mxu1 %v19637_v22  ;;  %10945 = vmatmul.mubr.f32.vlgmr.msra.gmra.mrb[0].mxu0 %v19638_v42 }
 0x110   : > { %11637 = vmatpush3.bf16.msra.mxu0 %v19424_v16  ;;  %10947 = vmatprep.mubr.f32.mxu0 %v13753_v13  ;;  %v19642_v16 = vld [vmem:[#allocation20_spill] sm:$0xff]  ;;  %v3213_v50 = vand.u32 4294901760, %v3212_v55  ;;  %v3093_v58 = vsub.f32 %v14419_v31, %v19656_v19  ;;  %v19668_v19 = vld [vmem:[#allocation31_spill] sm:$0xff] }
 0x111   : > { %11639 = vmatprep.subr.bf16.mxu0 %v19430_v6 }
 0x112   : > { %2651 = vmatmul.mubr.f32.vlgmr.msra.gmra.mrb[64].mxu1 %v19639_v20 }
 0x113   : > { %11829 = vmatpush3.bf16.msra.mxu1 %v19429_v33  ;;  %2656 = vmatprep.mubr.f32.mxu1 %v19598_v17  ;;  %v3191_v33 = vsub.f32 %v14379_v56, %v19643_v21  ;;  %v19650_v21 = vand.u32 4294901760, %v14401_v28  ;;  %v19711_v56 = vld [vmem:[#allocation43_spill] sm:$0xff] }
 0x114   : > { %11831 = vmatprep.subr.bf16.mxu1 %v19431_v24  ;;  %10948 = vmatmul.mubr.f32.gmra.mrb[2].mxu0 %v13817_v60 }
 0x115   : > { %11641 = vmatpush3.bf16.msra.mxu0 %v19430_v6  ;;  %10950 = vmatprep.mubr.f32.mxu0 %v19412_v29  ;;  %v19644_v6 = vand.u32 4294901760, %v14384_v59  ;;  %v3192_v53 = vand.u32 4294901760, %v3191_v33  ;;  %v19658_v33 = vld [vmem:[#allocation86_spill] sm:$0xff] }
 0x116   : > { %2658 = vmatmul.mubr.f32.gmra.mrb[66].mxu1 %v19640_v14  ;;  %11643 = vmatprep.subr.bf16.mxu0 %v19436_v10 }
 0x117   : > { %11833 = vmatpush3.bf16.msra.mxu1 %v19435_v62  ;;  %2663 = vmatprep.mubr.f32.mxu1 %v19638_v42  ;;  %v3198_v24 = vsub.f32 %v14384_v59, %v19644_v6  ;;  %v19645_v62 = vld [vmem:[#allocation21_spill] sm:$0xff]  ;;  %v3205_v6 = vsub.f32 %v14401_v28, %v19650_v21 }
 0x118   : > { %11835 = vmatprep.subr.bf16.mxu1 %v19437_v3  ;;  %10951 = vmatmul.mubr.f32.gmra.mrb[4].mxu0 %v19414_v38 }
 0x119   : > { %11645 = vmatpush3.bf16.msra.mxu0 %v19436_v10  ;;  %10953 = vmatprep.mubr.f32.mxu0 %v19415_v30  ;;  %v19646_v10 = vand.u32 4294901760, %v14389_v47  ;;  %v3206_v21 = vand.u32 4294901760, %v3205_v6  ;;  %v19666_v6 = vld [vmem:[#allocation36_spill] sm:$0xff] }
 0x11a   : > { %2665 = vmatmul.mubr.f32.gmra.mrb[68].mxu1 %v19413_v25  ;;  %11647 = vmatprep.subr.bf16.mxu0 %v19442_v35  ;;  %v19667_v55 = vand.u32 4294901760, %v19666_v6  ;;  %v19678_v6 = vld [vmem:[#allocation34_spill] sm:$0xff] }
 0x11b   : > { %11837 = vmatpush3.bf16.msra.mxu1 %v19441_v18  ;;  %2670 = vmatprep.mubr.f32.mxu1 %v13753_v13  ;;  %v3079_v3 = vsub.f32 %v14389_v47, %v19646_v10  ;;  %v19647_v18 = vld [vmem:[#allocation18_spill] sm:$0xff]  ;;  %v19653_v10 = vld [vmem:[#allocation25_spill] sm:$0xff] }
 0x11c   : > { %11839 = vmatprep.subr.bf16.mxu1 %v19443_v43  ;;  %10954 = vmatmul.mubr.f32.gmra.mrb[6].mxu0 %v19641_v4 }
 0x11d   : > { %11649 = vmatpush3.bf16.msra.mxu0 %v19442_v35  ;;  %v19648_v35 = vand.u32 4294901760, %v19647_v18  ;;  %10988 = vmatprep.mubr.f32.mxu0 %v19598_v17 }
 0x11e   : > { %2672 = vmatmul.mubr.f32.gmra.mrb[70].mxu1 %v19416_v44  ;;  %11651 = vmatprep.subr.bf16.mxu0 %v19645_v62 }
 0x11f   : > { %11841 = vmatpush3.bf16.msra.mxu1 %v19642_v16  ;;  %2677 = vmatprep.mubr.f32.mxu1 %v13817_v60  ;;  %v3086_v43 = vsub.f32 %v19647_v18, %v19648_v35  ;;  %v19649_v16 = vld [vmem:[#allocation22_spill] sm:$0xff]  ;;  %v3199_v35 = vand.u32 4294901760, %v3198_v24 }
 0x120   : > { %11843 = vmatprep.subr.bf16.mxu1 %v19649_v16  ;;  %v3080_v16 = vand.u32 4294901760, %v3079_v3  ;;  %v19659_v24 = vld [vmem:[#allocation30_spill] sm:$0xff] }
 0x121   : > { %11653 = vmatpush3.bf16.msra.mxu0 %v19645_v62  ;;  %v3087_v63 = vand.u32 4294901760, %v3086_v43  ;;  %v19657_v62 = vand.u32 4294901760, %v14424_v36  ;;  %v19660_v40 = vand.u32 4294901760, %v19659_v24  ;;  %v19664_v43 = vld [vmem:[#allocation33_spill] sm:$0xff]  ;;  %v11890_v31 = vpack.c.bf16 %v3199_v35, %v3192_v53 }
 0x122   : > { %2679 = vmatmul.mubr.f32.gmra.mrb[72].mxu1 %v19652_v49  ;;  %11655 = vmatprep.subr.bf16.mxu0 %v19654_v1 }
 0x123   : > { %11845 = vmatpush3.bf16.msra.mxu1 %v19653_v10  ;;  %2684 = vmatprep.mubr.f32.mxu1 %v19412_v29  ;;  %v3100_v10 = vsub.f32 %v14424_v36, %v19657_v62  ;;  %v14844_v3 = vpack.c.bf16 %v19662_v32, %v19660_v40  ;;  %v19669_v62 = vld [vmem:[#allocation37_spill] sm:$0xff]  ;;  %v19674_v32 = vand.u32 4294901760, %v19673_v52  ;;  %v19675_v40 = vld [vmem:[#allocation59_spill] sm:$0xff]  ;;  %v11892_v52 = vpack.c.bf16 %v3087_v63, %v3080_v16 }
 0x124   : > { %11847 = vmatprep.subr.bf16.mxu1 %v19655_v34  ;;  %v19665_v34 = vand.u32 4294901760, %v19664_v43  ;;  %v19670_v36 = vand.u32 4294901760, %v19669_v62  ;;  %v19676_v28 = vand.u32 4294901760, %v19675_v40  ;;  %v3094_v40 = vand.u32 4294901760, %v3093_v58 }
 0x125   : > { %19663 = vst [vmem:[#allocation53_spill] sm:$0xff] %v14844_v3  ;;  %11657 = vmatpush3.bf16.msra.mxu0 %v19654_v1  ;;  %v19679_v1 = vld [vmem:[#allocation9_spill] sm:$0xff]  ;;  %v3101_v18 = vand.u32 4294901760, %v3100_v10  ;;  %v19701_v10 = vld [vmem:[#allocation122_spill] sm:$0xff] }
 0x126   : > { %2686 = vmatmul.mubr.f32.gmra.mrb[74].mxu1 %v19658_v33  ;;  %v14850_v0 = vpack.c.bf16 %v19667_v55, %v19665_v34  ;;  %v19671_v33 = vld [vmem:[#allocation39_spill] sm:$0xff]  ;;  %v14864_v43 = vpack.c.bf16 %v19676_v28, %v19674_v32  ;;  %11659 = vmatprep.subr.bf16.mxu0 %v19678_v6  ;;  %v19680_v34 = vand.u32 4294901760, %v19679_v1  ;;  %v19681_v55 = vld [vmem:[#allocation60_spill] sm:$0xff]  ;;  %v14881_v32 = vpack.c.bf16 %v3213_v50, %v3206_v21  ;;  %v19688_v1 = vld [vmem:[#allocation93_spill] sm:$0xff] }
 0x127   : > { %11849 = vmatpush3.bf16.msra.mxu1 %v19668_v19  ;;  %v19672_v48 = vand.u32 4294901760, %v19671_v33  ;;  %2691 = vmatprep.mubr.f32.mxu1 %v19414_v38  ;;  %v19682_v53 = vand.u32 4294901760, %v19681_v55  ;;  %v19684_v33 = vand.u32 4294901760, %v14429_v51  ;;  %v19687_v28 = vld [vmem:[#allocation35_spill] sm:$0xff]  ;;  %v19689_v55 = vld [vmem:[#allocation10_spill] sm:$0xff]  ;;  %v19698_v50 = vld [vmem:[#allocation121_spill] sm:$0xff] }
 0x128   : > { %19677 = vst [vmem:[#allocation54_spill] sm:$0xff] %v14864_v43  ;;  %11851 = vmatprep.subr.bf16.mxu1 %v19687_v28  ;;  %v19699_v16 = vand.u32 4294901760, %v19698_v50  ;;  %v19700_v21 = vld [vmem:[#allocation38_spill] sm:$0xff]  ;;  %v19702_v28 = vand.u32 4294901760, %v19701_v10 }
 0x129   : > { %v14858_v24 = vpack.c.bf16 %v19672_v48, %v19670_v36  ;;  %v14872_v35 = vpack.c.bf16 %v19682_v53, %v19680_v34  ;;  %v3219_v48 = vsub.f32 %v14429_v51, %v19684_v33  ;;  %v19685_v36 = vld [vmem:[#allocation118_spill] sm:$0xff]  ;;  %v19690_v34 = vand.u32 4294901760, %v19689_v55  ;;  %v19691_v53 = vld [vmem:[#allocation11_spill] sm:$0xff]  ;;  %11661 = vmatpush3.bf16.msra.mxu0 %v19678_v6 }
 0x12a   : > { %v19686_v19 = vand.u32 4294901760, %v19685_v36  ;;  %2693 = vmatmul.mubr.f32.gmra.mrb[76].mxu1 %v19688_v1  ;;  %v19692_v47 = vand.u32 4294901760, %v19691_v53  ;;  %v19694_v33 = vld [vmem:[#allocation119_spill] sm:$0xff]  ;;  %v3233_v58 = vsub.f32 %v19698_v50, %v19699_v16  ;;  %v19703_v55 = vld [vmem:[#allocation130_spill] sm:$0xff]  ;;  %v19708_v50 = vld [vmem:[#allocation137_spill] sm:$0xff] }
 0x12b   : > { %19683 = vst [vmem:[#allocation20_spill] sm:$0xff] %v14872_v35  ;;  %v19695_v51 = vand.u32 4294901760, %v19694_v33  ;;  %11853 = vmatpush3.bf16.msra.mxu1 %v19700_v21  ;;  %v19705_v53 = vld [vmem:[#allocation131_spill] sm:$0xff]  ;;  %2698 = vmatprep.mubr.f32.mxu1 %v19415_v30  ;;  %v3220_v16 = vand.u32 4294901760, %v3219_v48  ;;  %v19709_v21 = vand.u32 4294901760, %v19708_v50  ;;  %v19717_v48 = vand.u32 4294901760, %v14568_v27 }
 0x12c   : > { %v3226_v62 = vsub.f32 %v19685_v36, %v19686_v19  ;;  %v14888_v49 = vpack.c.bf16 %v19692_v47, %v19690_v34  ;;  %v19696_v19 = vld [vmem:[#allocation120_spill] sm:$0xff]  ;;  %v3240_v47 = vsub.f32 %v19701_v10, %v19702_v28  ;;  %v19704_v34 = vand.u32 4294901760, %v19703_v55  ;;  %11855 = vmatprep.subr.bf16.mxu1 %v19711_v56 }
 0x12d   : > { %v3107_v59 = vsub.f32 %v19694_v33, %v19695_v51  ;;  %v19697_v36 = vand.u32 4294901760, %v19696_v19  ;;  %v19706_v1 = vand.u32 4294901760, %v19705_v53  ;;  %v3247_v33 = vsub.f32 %v19708_v50, %v19709_v21 }
 0x12e   : > { %19693 = vst [vmem:[#allocation21_spill] sm:$0xff] %v14888_v49  ;;  %v3121_v51 = vsub.f32 %v19703_v55, %v19704_v34  ;;  %v3227_v6 = vand.u32 4294901760, %v3226_v62  ;;  %v19710_v28 = vand.u32 4294901760, %v14554_v23  ;;  %v14919_v34 = vpack.c.bf16 %v3101_v18, %v3094_v40  ;;  %v19712_v55 = vld [vmem:[#allocation12_spill] sm:$0xff]  ;;  %2700 = vmatmul.mubr.f32.gmra.mrb[78].mxu1 %v19719_v8 }
 0x12f   : > { %v3114_v63 = vsub.f32 %v19696_v19, %v19697_v36  ;;  %v3128_v36 = vsub.f32 %v19705_v53, %v19706_v1  ;;  %v19707_v19 = vld [vmem:[#allocation40_spill] sm:$0xff]  ;;  %v19713_v1 = vand.u32 4294901760, %v19712_v55  ;;  %v19714_v53 = vld [vmem:[#allocation13_spill] sm:$0xff]  ;;  %v3135_v62 = vsub.f32 %v14568_v27, %v19717_v48  ;;  %2802 = vmatprep.mubr.f32.mxu1 %v19637_v22 }
 0x130   : > { %11663 = vmatprep.subr.bf16.mxu0 %v19707_v19  ;;  %v3254_v10 = vsub.f32 %v14554_v23, %v19710_v28  ;;  %v19715_v37 = vand.u32 4294901760, %v19714_v53  ;;  %v19718_v21 = vand.u32 4294901760, %v14573_v5  ;;  %v3108_v28 = vand.u32 4294901760, %v3107_v59  ;;  %v19722_v53 = vld [vmem:[#allocation49_spill] sm:$0xff] }
 0x131   : > { %v3115_v56 = vand.u32 4294901760, %v3114_v63  ;;  %v19720_v18 = vand.u32 4294901760, %v14590_v54  ;;  %v19721_v55 = vand.u32 4294901760, %v14595_v26  ;;  %11665 = vmatpush3.bf16.msra.mxu0 %v19707_v19  ;;  %11857 = vmatpush3.bf16.msra.mxu1 %v19722_v53  ;;  %v3241_v48 = vand.u32 4294901760, %v3240_v47  ;;  %v19723_v63 = vld [vmem:[#allocation45_spill] sm:$0xff] }
 0x132   : > { %v14925_v61 = vpack.c.bf16 %v19715_v37, %v19713_v1  ;;  %v3142_v50 = vsub.f32 %v14573_v5, %v19718_v21  ;;  %v3234_v1 = vand.u32 4294901760, %v3233_v58  ;;  %v3122_v27 = vand.u32 4294901760, %v3121_v51  ;;  %11859 = vmatprep.subr.bf16.mxu0 %v14844_v3  ;;  %11891 = vmatprep.subr.bf16.mxu1 %v11890_v31 }
 0x133   : > { %v3261_v40 = vsub.f32 %v14590_v54, %v19720_v18  ;;  %v3268_v37 = vsub.f32 %v14595_v26, %v19721_v55  ;;  %v3129_v21 = vand.u32 4294901760, %v3128_v36  ;;  %v11898_v59 = vpack.c.bf16 %v3227_v6, %v3220_v16  ;;  %v19725_v18 = vld [vmem:[#allocation15_spill] sm:$0xff] }
 0x134   : > { %19716 = vst [vmem:[#allocation22_spill] sm:$0xff] %v14925_v61  ;;  %v19724_v8 = vand.u32 4294901760, %v19723_v63  ;;  %v19726_v54 = vand.u32 4294901760, %v19725_v18  ;;  %v3248_v55 = vand.u32 4294901760, %v3247_v33  ;;  %v3255_v26 = vand.u32 4294901760, %v3254_v10  ;;  %10989 = vmatmul.mubr.f32.vlgmr.msra.gmra.mrb[0].mxu0 %v19638_v42  ;;  %2804 = vmatmul.mubr.f32.vlgmr.msra.gmra.mrb[80].mxu1 %v19639_v20  ;;  %v19732_v33 = vld [vmem:[#allocation124_spill] sm:$0xff] }
 0x135   : > { %v3136_v19 = vand.u32 4294901760, %v3135_v62  ;;  %v3143_v53 = vand.u32 4294901760, %v3142_v50  ;;  %v19728_v58 = vand.u32 4294901760, %v14612_v2  ;;  %v19729_v51 = vand.u32 4294901760, %v14617_v12  ;;  %11861 = vmatpush3.bf16.msra.mxu0 %v14850_v0  ;;  %10991 = vmatprep.mubr.f32.mxu0 %v13753_v13  ;;  %v19735_v63 = vld [vmem:[#allocation125_spill] sm:$0xff]  ;;  %v19737_v20 = vld [vmem:[#allocation126_spill] sm:$0xff] }
 0x136   : > { %v14948_v5 = vpack.c.bf16 %v19726_v54, %v19724_v8  ;;  %v14958_v36 = vpack.c.bf16 %v3115_v56, %v3108_v28  ;;  %v19730_v54 = vld [vmem:[#allocation123_spill] sm:$0xff]  ;;  %v19733_v31 = vand.u32 4294901760, %v19732_v33  ;;  %v3262_v50 = vand.u32 4294901760, %v3261_v40  ;;  %11893 = vmatpush3.bf16.msra.mxu1 %v11892_v52  ;;  %11863 = vmatprep.subr.bf16.mxu0 %v14858_v24  ;;  %v19749_v33 = vld [vmem:[#allocation132_spill] sm:$0xff] }
 0x137   : > { %v3149_v47 = vsub.f32 %v14612_v2, %v19728_v58  ;;  %v3156_v22 = vsub.f32 %v14617_v12, %v19729_v51  ;;  %v19731_v8 = vand.u32 4294901760, %v19730_v54  ;;  %v3269_v16 = vand.u32 4294901760, %v3268_v37  ;;  %v19740_v58 = vld [vmem:[#allocation57_spill] sm:$0xff]  ;;  %v19742_v37 = vld [vmem:[#allocation127_spill] sm:$0xff]  ;;  %2809 = vmatprep.mubr.f32.mxu1 %v19598_v17  ;;  %11895 = vmatprep.subr.bf16.mxu1 %v14881_v32 }
 0x138   : > { %19727 = vst [vmem:[#allocation25_spill] sm:$0xff] %v14948_v5  ;;  %v11902_v6 = vpack.c.bf16 %v3241_v48, %v3234_v1  ;;  %v14968_v62 = vpack.c.bf16 %v3129_v21, %v3122_v27  ;;  %v19736_v18 = vand.u32 4294901760, %v19735_v63  ;;  %v19738_v28 = vand.u32 4294901760, %v19737_v20  ;;  %v19744_v27 = vld [vmem:[#allocation128_spill] sm:$0xff]  ;;  %v19747_v54 = vld [vmem:[#allocation129_spill] sm:$0xff]  ;;  %10992 = vmatmul.mubr.f32.gmra.mrb[2].mxu0 %v13817_v60  ;;  %2811 = vmatmul.mubr.f32.gmra.mrb[82].mxu1 %v19640_v14 }
 0x139   : > { %v14964_v10 = vpack.c.bf16 %v19733_v31, %v19731_v8  ;;  %v14977_v51 = vand.u32 4294901760, %v19740_v58  ;;  %v14980_v40 = vpack.c.bf16 %v3255_v26, %v3248_v55  ;;  %v19743_v1 = vand.u32 4294901760, %v19742_v37  ;;  %11865 = vmatpush3.bf16.msra.mxu0 %v14864_v43  ;;  %10994 = vmatprep.mubr.f32.mxu0 %v19412_v29 }
 0x13a   : > { %v14974_v56 = vpack.c.bf16 %v19738_v28, %v19736_v18  ;;  %v19745_v48 = vand.u32 4294901760, %v19744_v27  ;;  %v19748_v8 = vand.u32 4294901760, %v19747_v54  ;;  %v19750_v31 = vand.u32 4294901760, %v19749_v33  ;;  %v19752_v18 = vld [vmem:[#allocation140_spill] sm:$0xff]  ;;  %v19754_v28 = vld [vmem:[#allocation141_spill] sm:$0xff]  ;;  %11897 = vmatpush3.bf16.msra.mxu1 %v14919_v34  ;;  %11867 = vmatprep.subr.bf16.mxu0 %v14872_v35 }
 0x13b   : > { %19734 = vst [vmem:[#allocation26_spill] sm:$0xff] %v14964_v10  ;;  %19741 = vst [vmem:[#allocation30_spill] sm:$0xff] %v14977_v51  ;;  %v14996_v52 = vpack.c.bf16 %v3143_v53, %v3136_v19  ;;  %v3150_v26 = vand.u32 4294901760, %v3149_v47  ;;  %v3157_v55 = vand.u32 4294901760, %v3156_v22  ;;  %v19753_v20 = vand.u32 4294901760, %v19752_v18  ;;  %v12992_v53 = vld [vmem:[%s13471_s29 + $0x10] sm:$0xff]  ;;  %2816 = vmatprep.mubr.f32.mxu1 %v19638_v42  ;;  %11899 = vmatprep.subr.bf16.mxu1 %v11898_v59 }
 0x13c   : > { %19739 = vst [vmem:[#allocation27_spill] sm:$0xff] %v14974_v56  ;;  %v14986_v21 = vpack.c.bf16 %v19745_v48, %v19743_v1  ;;  %v14992_v63 = vpack.c.bf16 %v19750_v31, %v19748_v8  ;;  %v19755_v37 = vand.u32 4294901760, %v19754_v28  ;;  %v15006_v27 = vpack.c.bf16 %v3269_v16, %v3262_v50  ;;  %v12993_v22 = vld [vmem:[%s13471_s29 + $0x18] sm:$0x3]  ;;  %v12994_v54 = vld [vmem:[%s13471_s29 + $0x20] sm:$0xff]  ;;  %v12996_v50 = vld [vmem:[%s13471_s29 + $0x30] sm:$0xff]  ;;  %10995 = vmatmul.mubr.f32.gmra.mrb[4].mxu0 %v19414_v38 }
 0x13d   : > { %v19757_v32 = vand.u32 4294901760, %v14669_v46  ;;  %v419_v47 = vrot.slane %v12992_v53, 2  ;;  %v420_v48 = vrot.slane %v12993_v22, 2  ;;  %v422_v8 = vrot.slane %v12994_v54, 2  ;;  %v12995_v33 = vld [vmem:[%s13471_s29 + $0x28] sm:$0x3]  ;;  %2818 = vmatmul.mubr.f32.gmra.mrb[84].mxu1 %v19413_v25  ;;  %11869 = vmatpush3.bf16.msra.mxu0 %v14888_v49 }
 0x13e   : > { %19746 = vst [vmem:[#allocation32_spill] sm:$0xff] %v14986_v21  ;;  %19751 = vst [vmem:[#allocation33_spill] sm:$0xff] %v14992_v63  ;;  %v15002_v1 = vpack.c.bf16 %v19755_v37, %v19753_v20  ;;  %v423_v31 = vrot.slane %v12995_v33, 2  ;;  %v425_v16 = vrot.slane %v12996_v50, 2  ;;  %v12997_v18 = vld [vmem:[%s13471_s29 + $0x38] sm:$0x3]  ;;  %v15033_v33 = vpack.c.bf16 %v3157_v55, %v3150_v26  ;;  %10997 = vmatprep.mubr.f32.mxu0 %v19415_v30 }
 0x13f   : > { %v15011_v19 = vsub.f32 %v14669_v46, %v19757_v32  ;;  %v426_v20 = vrot.slane %v12997_v18, 2  ;;  %v19758_v28 = vand.u32 4294901760, %v14674_v15  ;;  %v19759_v32 = vand.u32 4294901760, %v14683_v45  ;;  %v19761_v34 = vld [vmem:[#allocation144_spill] sm:$0xff]  ;;  %v19763_v18 = vld [vmem:[#allocation145_spill] sm:$0xff]  ;;  %11901 = vmatpush3.bf16.msra.mxu1 %v14958_v36  ;;  %11871 = vmatprep.subr.bf16.mxu0 %v14925_v61  ;;  %v19781_v42 = vld [vmem:[#allocation14_spill] sm:$0xff] }
 0x140   : > { %19756 = vst [vmem:[#allocation36_spill] sm:$0xff] %v15002_v1  ;;  %v19760_v22 = vand.u32 4294901760, %v14688_v57  ;;  %v19762_v50 = vand.u32 4294901760, %v19761_v34  ;;  %v19764_v17 = vand.u32 4294901760, %v19763_v18  ;;  %v12999_v35 = vld [vmem:[%s13471_s29 + $0x48] sm:$0x3]  ;;  %v15050_v26 = vsub.f32 %v19740_v58, %v14977_v51  ;;  %2823 = vmatprep.mubr.f32.mxu1 %v13753_v13  ;;  %11903 = vmatprep.subr.bf16.mxu1 %v11902_v6 }
 0x141   : > { %v3282_v37 = vsub.f32 %v14674_v15, %v19758_v28  ;;  %v3163_v53 = vsub.f32 %v14683_v45, %v19759_v32  ;;  %v12998_v28 = vld [vmem:[%s13471_s29 + $0x40] sm:$0xff]  ;;  %v429_v43 = vrot.slane %v12999_v35, 2  ;;  %v19766_v32 = vand.u32 4294901760, %v14713_v39  ;;  %10998 = vmatmul.mubr.f32.gmra.mrb[6].mxu0 %v19641_v4  ;;  %2825 = vmatmul.mubr.f32.gmra.mrb[86].mxu1 %v19416_v44  ;;  %v19773_v6 = vld [vmem:[#allocation110_spill] sm:$0xff]  ;;  %v15209_v49 = vld [vmem:[#allocation2 + $0x2a8] sm:$0xff] }
 0x142   : > { %v3170_v54 = vsub.f32 %v14688_v57, %v19760_v22  ;;  %v15039_v46 = vpack.c.bf16 %v19764_v17, %v19762_v50  ;;  %v428_v15 = vrot.slane %v12998_v28, 2  ;;  %19767 = vst [vmem:[#allocation37_spill] sm:$0xff] %v15050_v26  ;;  %v421_v55 = vsel %vm415_vm1, %v419_v47, %v420_v48  ;;  %11873 = vmatpush3.bf16.msra.mxu0 %v14948_v5  ;;  %v19802_v57 = vld [vmem:[#allocation120_spill] sm:$0xff]  ;;  %v15152_v45 = vld [vmem:[#allocation2 + $0x290] sm:$0xff]  ;;  %v15185_v5 = vld [vmem:[#allocation2 + $0x218] sm:$0xff] }
 0x143   : > { %v3289_v59 = vsub.f32 %v14713_v39, %v19766_v32  ;;  %v19768_v17 = vand.u32 4294901760, %v14718_v9  ;;  %v424_v22 = vsel %vm415_vm1, %v422_v8, %v423_v31  ;;  %v427_v34 = vsel %vm415_vm1, %v425_v16, %v426_v20  ;;  %2830 = vmatprep.mubr.f32.mxu1 %v13817_v60  ;;  %11905 = vmatpush3.bf16.msra.mxu1 %v14968_v62  ;;  %v19782_v60 = vld [vmem:[#allocation16_spill] sm:$0xff]  ;;  %v19784_v62 = vld [vmem:[#allocation66_spill] sm:$0xff] }
 0x144   : > { %19765 = vst [vmem:[#allocation31_spill] sm:$0xff] %v15039_v46  ;;  %v3276_v58 = vand.u32 4294901760, %v15011_v19  ;;  %v3283_v50 = vand.u32 4294901760, %v3282_v37  ;;  %v3164_v47 = vand.u32 4294901760, %v3163_v53  ;;  %v3171_v48 = vand.u32 4294901760, %v3170_v54  ;;  %11875 = vmatprep.subr.bf16.mxu0 %v14964_v10  ;;  %v19779_v53 = vld [vmem:[#allocation147_spill] sm:$0xff]  ;;  %11907 = vmatprep.subr.bf16.mxu1 %v14980_v40 }
 0x145   : > { %v3296_v35 = vsub.f32 %v14718_v9, %v19768_v17  ;;  %v19769_v18 = vand.u32 4294901760, %v14727_v7  ;;  %v19770_v8 = vand.u32 4294901760, %v14732_v11  ;;  %v15070_v31 = vand.u32 4294901760, %v421_v55  ;;  %v13000_v17 = vld [vmem:[%s13471_s29 + $0x50] sm:$0xff]  ;;  %2959 = vmatprep.mubr.f32.mxu0 %v19784_v62  ;;  %v19793_v62 = vld [vmem:[#allocation19_spill] sm:$0xff]  ;;  %v13003_v9 = vld [vmem:[%s13471_s29 + $0x60] sm:$0xff] }
 0x146   : > { %v430_v19 = vsel %vm415_vm1, %v428_v15, %v429_v43  ;;  %v19772_v16 = vand.u32 4294901760, %v14637_v41  ;;  %v19774_v20 = vand.u32 4294901760, %v19773_v6  ;;  %v15082_v54 = vand.u32 4294901760, %v424_v22  ;;  %v19777_v6 = vld [vmem:[#allocation111_spill] sm:$0xff]  ;;  %11877 = vmatpush3.bf16.msra.mxu0 %v14974_v56  ;;  %19803 = vst [vmem:[#allocation40_spill] sm:$0xff] %v15152_v45  ;;  %v19811_v10 = vld [vmem:[#allocation130_spill] sm:$0xff] }
 0x147   : > { %v3177_v28 = vsub.f32 %v14727_v7, %v19769_v18  ;;  %v3184_v36 = vsub.f32 %v14732_v11, %v19770_v8  ;;  %19771 = vst [vmem:[#allocation39_spill] sm:$0xff] %v15070_v31  ;;  %v15084_v32 = vand.u32 4294901760, %v427_v34  ;;  %v3290_v15 = vand.u32 4294901760, %v3289_v59  ;;  %v13001_v8 = vld [vmem:[%s13471_s29 + $0x58] sm:$0x3]  ;;  %11909 = vmatpush3.bf16.msra.mxu1 %v14996_v52  ;;  %11879 = vmatprep.subr.bf16.mxu0 %v14986_v21  ;;  %v19799_v52 = vld [vmem:[#allocation117_spill] sm:$0xff] }
 0x148   : > { %v15079_v37 = vpack.c.bf16 %v19774_v20, %v19772_v16  ;;  %19775 = vst [vmem:[#allocation8_spill] sm:$0xff] %v15082_v54  ;;  %v3297_v43 = vand.u32 4294901760, %v3296_v35  ;;  %v431_v18 = vrot.slane %v13000_v17, 2  ;;  %v432_v41 = vrot.slane %v13001_v8, 2  ;;  %11911 = vmatprep.subr.bf16.mxu1 %v15006_v27  ;;  %v19801_v21 = vld [vmem:[#allocation119_spill] sm:$0xff]  ;;  %v9178_v59 = vpop.f32.mrb[0].mxu1 }
 0x149   : > { %19776 = vst [vmem:[#allocation59_spill] sm:$0xff] %v15084_v32  ;;  %v11914_v16 = vpack.c.bf16 %v3283_v50, %v3276_v58  ;;  %v19778_v20 = vand.u32 4294901760, %v19777_v6  ;;  %v19780_v4 = vand.u32 4294901760, %v19779_v53  ;;  %v15100_v35 = vand.u32 4294901760, %v430_v19  ;;  %v19786_v50 = vld [vmem:[#allocation78_spill] sm:$0xff]  ;;  %v19788_v6 = vld [vmem:[#allocation17_spill] sm:$0xff] }
 0x14a   : > { %v15103_v17 = vpack.c.bf16 %v3171_v48, %v3164_v47  ;;  %v3178_v8 = vand.u32 4294901760, %v3177_v28  ;;  %v3185_v11 = vand.u32 4294901760, %v3184_v36  ;;  %v15107_v58 = vsub.f32 %v421_v55, %v15070_v31  ;;  %2832 = vmatmul.mubr.f32.gmra.mrb[88].mxu1 %v19786_v50  ;;  %v13002_v55 = vld [vmem:[%s13471_s29 + $0x80] sm:$0xff]  ;;  %11881 = vmatpush3.bf16.msra.mxu0 %v14992_v63  ;;  %v15183_v27 = vld [vmem:[#allocation2 + $0x210] sm:$0xff]  ;;  %19818 = vst [vmem:[#allocation123_spill] sm:$0xff] %v15185_v5  ;;  %v19821_v50 = vld [vmem:[#allocation143_spill] sm:$0xff] }
 0x14b   : > { %v15096_v13 = vpack.c.bf16 %v19780_v4, %v19778_v20  ;;  %19783 = vst [vmem:[#allocation34_spill] sm:$0xff] %v15100_v35  ;;  %v19787_v4 = vand.u32 4294901760, %v15050_v26  ;;  %v19789_v20 = vld [vmem:[#allocation18_spill] sm:$0xff]  ;;  %v15118_v47 = vsub.f32 %v424_v22, %v15082_v54  ;;  %v15121_v48 = vsub.f32 %v427_v34, %v15084_v32  ;;  %2837 = vmatprep.mubr.f32.mxu1 %v19412_v29  ;;  %v19795_v22 = vld [vmem:[#allocation115_spill] sm:$0xff]  ;;  %v19796_v34 = vld [vmem:[#allocation116_spill] sm:$0xff] }
 0x14c   : > { %19785 = vst [vmem:[#allocation9_spill] sm:$0xff] %v15107_v58  ;;  %v15124_v28 = vand.u32 4294901760, %v13002_v55  ;;  %v15128_v36 = vpack.c.bf16 %v3297_v43, %v3290_v15  ;;  %v433_v40 = vsel %vm415_vm1, %v431_v18, %v432_v41  ;;  %v15138_v7 = vsub.f32 %v430_v19, %v15100_v35  ;;  %v13004_v29 = vld [vmem:[%s13471_s29 + $0x68] sm:$0x3]  ;;  %v19800_v41 = vld [vmem:[#allocation118_spill] sm:$0xff]  ;;  %v15165_v35 = vld [vmem:[#allocation2 + $0x298] sm:$0xff]  ;;  %11913 = vmatpush3.bf16.msra.mxu1 %v15033_v33 }
 0x14d   : > { %v15113_v53 = vsub.f32 %v15050_v26, %v19787_v4  ;;  %19790 = vst [vmem:[#allocation60_spill] sm:$0xff] %v15118_v47  ;;  %19791 = vst [vmem:[#allocation35_spill] sm:$0xff] %v15121_v48  ;;  %v19794_v4 = vld [vmem:[#allocation114_spill] sm:$0xff]  ;;  %v434_v39 = vrot.slane %v13003_v9, 2  ;;  %v435_v15 = vrot.slane %v13004_v29, 2  ;;  %v15143_v43 = vpack.c.bf16 %v3185_v11, %v3178_v8  ;;  %v9179_v11 = vpop.f32.mrb[1].mxu1  ;;  %11883 = vmatprep.subr.bf16.mxu0 %v15002_v1 }
 0x14e   : > { %19792 = vst [vmem:[#allocation10_spill] sm:$0xff] %v15124_v28  ;;  %19797 = vst [vmem:[#allocation11_spill] sm:$0xff] %v15138_v7  ;;  %v15146_v18 = vand.u32 4294901760, %v15107_v58  ;;  %v19804_v19 = vld [vmem:[#allocation86_spill] sm:$0xff]  ;;  %v15156_v9 = vand.u32 4294901760, %v15118_v47  ;;  %v15159_v29 = vand.u32 4294901760, %v15121_v48  ;;  %v15187_v61 = vadd.f32 %v9179_v11, %v9178_v59  ;;  %11915 = vmatprep.subr.bf16.mxu1 %v11914_v16  ;;  %11885 = vmatpush3.bf16.msra.mxu0 %v15039_v46 }
 0x14f   : > { %2839 = vmatmul.mubr.f32.gmra.mrb[90].mxu1 %v19804_v19  ;;  %v15163_v56 = vand.u32 4294901760, %v433_v40  ;;  %19810 = vst [vmem:[#allocation49_spill] sm:$0xff] %v15165_v35  ;;  %v19812_v19 = vld [vmem:[#allocation131_spill] sm:$0xff]  ;;  %v15179_v63 = vand.u32 4294901760, %v15138_v7  ;;  %19817 = vst [vmem:[#allocation15_spill] sm:$0xff] %v15183_v27  ;;  %v19820_v33 = vld [vmem:[#allocation108_spill] sm:$0xff]  ;;  %v15205_v11 = vsub.f32 %v13002_v55, %v15124_v28  ;;  %11887 = vmatprep.subr.bf16.mxu0 %v15079_v37 }
 0x150   : > { %19798 = vst [vmem:[#allocation38_spill] sm:$0xff] %v15146_v18  ;;  %19805 = vst [vmem:[#allocation43_spill] sm:$0xff] %v15156_v9  ;;  %2844 = vmatprep.mubr.f32.mxu1 %v19414_v38  ;;  %v436_v38 = vsel %vm415_vm1, %v434_v39, %v435_v15  ;;  %v2978_v8 = vsub.f32 %v15107_v58, %v15146_v18  ;;  %v9181_v15 = vpop.f32.mrb[2].mxu1  ;;  %v19822_v26 = vld [vmem:[#allocation93_spill] sm:$0xff]  ;;  %v2993_v32 = vsub.f32 %v15118_v47, %v15156_v9  ;;  %v15207_v1 = vld [vmem:[#allocation2 + $0x2a0] sm:$0xff] }
 0x151   : > { %19806 = vst [vmem:[#allocation12_spill] sm:$0xff] %v15159_v29  ;;  %19809 = vst [vmem:[#allocation13_spill] sm:$0xff] %v15163_v56  ;;  %v3008_v16 = vsub.f32 %v15121_v48, %v15159_v29  ;;  %v15202_v59 = vsub.f32 %v433_v40, %v15163_v56  ;;  %v15211_v39 = vld [vmem:[#allocation2 + $0x220] sm:$0xff]  ;;  %v15215_v29 = vand.u32 4294901760, %v436_v38  ;;  %v15219_v55 = vld [vmem:[#allocation2 + $0x228] sm:$0xff]  ;;  %11917 = vmatpush3.bf16.msra.mxu1 %v15103_v17  ;;  %v19831_v46 = vand.u32 4294901760, %v15152_v45 }
 0x152   : > { %19816 = vst [vmem:[#allocation45_spill] sm:$0xff] %v15179_v63  ;;  %19819 = vst [vmem:[#allocation124_spill] sm:$0xff] %v15187_v61  ;;  %v9182_v61 = vpop.f32.mrb[3].mxu1  ;;  %v3023_v47 = vsub.f32 %v15138_v7, %v15179_v63  ;;  %v13005_v18 = vld [vmem:[%s13471_s29 + $0x70] sm:$0xff]  ;;  %11919 = vmatprep.subr.bf16.mxu1 %v15128_v36  ;;  %v15246_v63 = vand.u32 4294901760, %v2993_v32  ;;  %11889 = vmatpush3.bf16.msra.mxu0 %v15096_v13  ;;  %v19842_v32 = vand.u32 4294901760, %v15185_v5 }
 0x153   : > { %2846 = vmatmul.mubr.f32.gmra.mrb[92].mxu1 %v19822_v26  ;;  %19823 = vst [vmem:[#allocation125_spill] sm:$0xff] %v15202_v59  ;;  %19824 = vst [vmem:[#allocation126_spill] sm:$0xff] %v15205_v11  ;;  %v15221_v9 = vadd.f32 %v9182_v61, %v9181_v15  ;;  %v437_v58 = vrot.slane %v13005_v18, 2  ;;  %v15232_v40 = vsub.f32 %v15152_v45, %v19831_v46  ;;  %v19833_v61 = vand.u32 4294901760, %v15165_v35  ;;  %v15269_v36 = vld [vmem:[#allocation2 + $0x2b0] sm:$0xff]  ;;  %v15288_v45 = vld [vmem:[#allocation2 + $0x238] sm:$0xff] }
 0x154   : > { %19825 = vst [vmem:[#allocation57_spill] sm:$0xff] %v15207_v1  ;;  %19826 = vst [vmem:[#allocation127_spill] sm:$0xff] %v15209_v49  ;;  %2851 = vmatprep.mubr.f32.mxu1 %v19415_v30  ;;  %v13006_v30 = vld [vmem:[%s13471_s29 + $0x78] sm:$0x3]  ;;  %v15249_v46 = vand.u32 4294901760, %v15205_v11  ;;  %v15257_v48 = vand.u32 4294901760, %v15202_v59  ;;  %v15267_v15 = vsub.f32 %v15185_v5, %v19842_v32 }
 0x155   : > { %19827 = vst [vmem:[#allocation128_spill] sm:$0xff] %v15211_v39  ;;  %19828 = vst [vmem:[#allocation129_spill] sm:$0xff] %v15215_v29  ;;  %v438_v28 = vrot.slane %v13006_v30, 2  ;;  %v15238_v17 = vsub.f32 %v15165_v35, %v19833_v61  ;;  %v15244_v30 = vand.u32 4294901760, %v2978_v8  ;;  %v15254_v61 = vand.u32 4294901760, %v3008_v16  ;;  %v15271_v35 = vld [vmem:[#allocation2 + $0x2b8] sm:$0xff]  ;;  %11921 = vmatpush3.bf16.msra.mxu1 %v15143_v43 }
 0x156   : > { %19829 = vst [vmem:[#allocation132_spill] sm:$0xff] %v15219_v55  ;;  %19830 = vst [vmem:[#allocation140_spill] sm:$0xff] %v15221_v9  ;;  %v19835_v9 = vld [vmem:[#allocation99_spill] sm:$0xff]  ;;  %v19841_v18 = vand.u32 4294901760, %v15183_v27  ;;  %v19845_v16 = vpack.c.bf16 %v19782_v60, %v19781_v42  ;;  %v15286_v5 = vld [vmem:[#allocation2 + $0x230] sm:$0xff]  ;;  %v9184_v7 = vpop.f32.mrb[4].mxu1  ;;  %11955 = vmatprep.subr.bf16.mxu1 %v14844_v3 }
 0x157   : > { %19832 = vst [vmem:[#allocation141_spill] sm:$0xff] %v15232_v40  ;;  %19834 = vst [vmem:[#allocation144_spill] sm:$0xff] %v15238_v17  ;;  %2853 = vmatmul.mubr.f32.gmra.mrb[94].mxu1 %v19835_v9  ;;  %v19850_v42 = vand.u32 4294901760, %v15207_v1  ;;  %v9185_v32 = vpop.f32.mrb[5].mxu1  ;;  %v19854_v60 = vand.u32 4294901760, %v15113_v53  ;;  %v19855_v3 = vand.u32 4294901760, %v15219_v55  ;;  %v19876_v53 = vpack.c.bf16 %v19796_v34, %v19795_v22 }
 0x158   : > { %19836 = vst [vmem:[#allocation145_spill] sm:$0xff] %v15244_v30  ;;  %19837 = vst [vmem:[#allocation110_spill] sm:$0xff] %v15246_v63  ;;  %3300 = vmatprep.mubr.f32.mxu1 %v19640_v14  ;;  %v15262_v8 = vsub.f32 %v15183_v27, %v19841_v18  ;;  %11923 = vmatprep.subr.bf16.mxu0 %v19845_v16  ;;  %v15277_v14 = vand.u32 4294901760, %v3023_v47  ;;  %v15280_v18 = vsub.f32 %v436_v38, %v15215_v29  ;;  %v15307_v16 = vld [vmem:[#allocation2 + $0x2c0] sm:$0xff]  ;;  %v19883_v34 = vld [vmem:[#allocation54_spill] sm:$0xff] }
 0x159   : > { %19838 = vst [vmem:[#allocation111_spill] sm:$0xff] %v15249_v46  ;;  %19839 = vst [vmem:[#allocation147_spill] sm:$0xff] %v15254_v61  ;;  %v15283_v27 = vsel %vm415_vm1, %v437_v58, %v438_v28  ;;  %v15295_v47 = vsub.f32 %v15207_v1, %v19850_v42  ;;  %v19851_v38 = vand.u32 4294901760, %v15209_v49  ;;  %v19852_v28 = vand.u32 4294901760, %v15211_v39  ;;  %2965 = vmatmul.mubr.f32.vlgmr.msra.gmra.mrb[8].mxu0 %v19854_v60  ;;  %v19859_v1 = vld [vmem:[#allocation69_spill] sm:$0xff]  ;;  %v19882_v22 = vld [vmem:[#allocation76_spill] sm:$0xff] }
 0x15a   : > { %19840 = vst [vmem:[#allocation14_spill] sm:$0xff] %v15257_v48  ;;  %19843 = vst [vmem:[#allocation16_spill] sm:$0xff] %v15269_v36  ;;  %v15314_v42 = vsub.f32 %v15219_v55, %v19855_v3  ;;  %v15328_v55 = vld [vmem:[#allocation2 + $0x2c8] sm:$0xff]  ;;  %2974 = vmatprep.mubr.f32.mxu0 %v19859_v1  ;;  %v19863_v3 = vand.u32 4294901760, %v15232_v40  ;;  %v19866_v60 = vpack.c.bf16 %v19794_v4, %v19793_v62  ;;  %v19871_v4 = vand.u32 4294901760, %v15269_v36 }
 0x15b   : > { %19844 = vst [vmem:[#allocation66_spill] sm:$0xff] %v15271_v35  ;;  %19846 = vst [vmem:[#allocation17_spill] sm:$0xff] %v15277_v14  ;;  %v15300_v58 = vsub.f32 %v15209_v49, %v19851_v38  ;;  %v15305_v43 = vsub.f32 %v15211_v39, %v19852_v28  ;;  %v15318_v49 = vadd.f32 %v9185_v32, %v9184_v7  ;;  %3302 = vmatmul.mubr.f32.vlgmr.msra.gmra.mrb[96].mxu1 %v14977_v51  ;;  %v15338_v32 = vld [vmem:[#allocation2 + $0x240] sm:$0xff]  ;;  %v15355_v51 = vld [vmem:[#allocation2 + $0x2d0] sm:$0xff] }
 0x15c   : > { %19847 = vst [vmem:[#allocation18_spill] sm:$0xff] %v15280_v18  ;;  %19848 = vst [vmem:[#allocation19_spill] sm:$0xff] %v15286_v5  ;;  %v19857_v28 = vpack.c.bf16 %v19789_v20, %v19788_v6  ;;  %11957 = vmatpush3.bf16.msra.mxu1 %v14850_v0  ;;  %v3038_v7 = vsub.f32 %v15202_v59, %v15257_v48  ;;  %v15335_v6 = vand.u32 4294901760, %v15280_v18  ;;  %v19864_v39 = vand.u32 4294901760, %v15238_v17 }
 0x15d   : > { %19849 = vst [vmem:[#allocation114_spill] sm:$0xff] %v15288_v45  ;;  %19853 = vst [vmem:[#allocation115_spill] sm:$0xff] %v15307_v16  ;;  %3307 = vmatprep.mubr.f32.mxu1 %v19413_v25  ;;  %v19869_v17 = vand.u32 4294901760, %v15267_v15  ;;  %2980 = vmatmul.mubr.f32.gmra.mrb[10].mxu0 %v15244_v30  ;;  %v15397_v30 = vld [vmem:[#allocation2 + $0x258] sm:$0xff]  ;;  %v19887_v20 = vand.u32 4294901760, %v15295_v47  ;;  %v19918_v25 = vld [vmem:[#allocation78_spill] sm:$0xff] }
 0x15e   : > { %19856 = vst [vmem:[#allocation116_spill] sm:$0xff] %v15318_v49  ;;  %11925 = vmatpush3.bf16.msra.mxu0 %v19857_v28  ;;  %19858 = vst [vmem:[#allocation117_spill] sm:$0xff] %v15328_v55  ;;  %v15340_v28 = vld [vmem:[#allocation2 + $0x248] sm:$0xff]  ;;  %v15346_v38 = vpack.c.bf16 %v19864_v39, %v19863_v3  ;;  %v19868_v49 = vand.u32 4294901760, %v15262_v8  ;;  %11959 = vmatprep.subr.bf16.mxu1 %v14858_v24  ;;  %v19872_v3 = vand.u32 4294901760, %v15271_v35 }
 0x15f   : > { %19860 = vst [vmem:[#allocation118_spill] sm:$0xff] %v15335_v6  ;;  %19861 = vst [vmem:[#allocation119_spill] sm:$0xff] %v15338_v32  ;;  %11927 = vmatprep.subr.bf16.mxu0 %v19866_v60  ;;  %v15369_v60 = vsub.f32 %v15269_v36, %v19871_v4  ;;  %3309 = vmatmul.mubr.f32.gmra.mrb[98].mxu1 %v15070_v31  ;;  %v19877_v4 = vand.u32 4294901760, %v15286_v5 }
 0x160   : > { %19862 = vst [vmem:[#allocation120_spill] sm:$0xff] %v15340_v28  ;;  %19865 = vst [vmem:[#allocation130_spill] sm:$0xff] %v15346_v38  ;;  %v15361_v39 = vpack.c.bf16 %v19869_v17, %v19868_v49  ;;  %v15374_v1 = vsub.f32 %v15271_v35, %v19872_v3  ;;  %v15377_v49 = vld [vmem:[#allocation2 + $0x2d8] sm:$0xff]  ;;  %v15379_v17 = vld [vmem:[#allocation2 + $0x250] sm:$0xff]  ;;  %v19879_v3 = vand.u32 4294901760, %v15288_v45  ;;  %2989 = vmatprep.mubr.f32.mxu0 %v19882_v22  ;;  %11961 = vmatpush3.bf16.msra.mxu1 %v19883_v34 }
 0x161   : > { %19867 = vst [vmem:[#allocation131_spill] sm:$0xff] %v15355_v51  ;;  %19874 = vst [vmem:[#allocation160_spill] sm:$0xff] %v15377_v49  ;;  %v15388_v62 = vsub.f32 %v15286_v5, %v19877_v4  ;;  %v19885_v4 = vand.u32 4294901760, %v15307_v16  ;;  %v19888_v38 = vand.u32 4294901760, %v15300_v58  ;;  %v19890_v22 = vpack.c.bf16 %v19800_v41, %v19799_v52  ;;  %3314 = vmatprep.mubr.f32.mxu1 %v19416_v44 }
 0x162   : > { %19870 = vst [vmem:[#allocation108_spill] sm:$0xff] %v15361_v39  ;;  %19873 = vst [vmem:[#allocation143_spill] sm:$0xff] %v15374_v1  ;;  %11929 = vmatpush3.bf16.msra.mxu0 %v19876_v53  ;;  %v15393_v39 = vsub.f32 %v15288_v45, %v19879_v3  ;;  %v15402_v53 = vand.u32 4294901760, %v15283_v27  ;;  %v15420_v5 = vand.u32 4294901760, %v3038_v7  ;;  %v19892_v3 = vand.u32 4294901760, %v15305_v43 }
 0x163   : > { %19875 = vst [vmem:[#allocation161_spill] sm:$0xff] %v15379_v17  ;;  %19878 = vst [vmem:[#allocation162_spill] sm:$0xff] %v15388_v62  ;;  %v15407_v31 = vsub.f32 %v15307_v16, %v19885_v4  ;;  %v15414_v45 = vpack.c.bf16 %v19888_v38, %v19887_v20  ;;  %11931 = vmatprep.subr.bf16.mxu0 %v19890_v22  ;;  %v19893_v16 = vand.u32 4294901760, %v15314_v42  ;;  %2995 = vmatmul.mubr.f32.gmra.mrb[12].mxu0 %v15246_v63  ;;  %v19895_v38 = vld [vmem:[#allocation20_spill] sm:$0xff]  ;;  %v9187_v63 = vpop.f32.mrb[6].mxu1 }
 0x164   : > { %19880 = vst [vmem:[#allocation163_spill] sm:$0xff] %v15393_v39  ;;  %19881 = vst [vmem:[#allocation164_spill] sm:$0xff] %v15397_v30  ;;  %11963 = vmatprep.subr.bf16.mxu1 %v19895_v38  ;;  %v19896_v7 = vand.u32 4294901760, %v15328_v55  ;;  %v15440_v4 = vld [vmem:[#allocation2 + $0x2e0] sm:$0xff]  ;;  %3316 = vmatmul.mubr.f32.gmra.mrb[100].mxu1 %v15082_v54  ;;  %v19900_v41 = vand.u32 4294901760, %v15338_v32  ;;  %v19913_v54 = vand.u32 4294901760, %v15374_v1 }
 0x165   : > { %19884 = vst [vmem:[#allocation54_spill] sm:$0xff] %v15402_v53  ;;  %19886 = vst [vmem:[#allocation165_spill] sm:$0xff] %v15407_v31  ;;  %v15428_v35 = vpack.c.bf16 %v19893_v16, %v19892_v3  ;;  %v19899_v16 = vpack.c.bf16 %v19802_v57, %v19801_v21  ;;  %v19905_v57 = vld [vmem:[#allocation85_spill] sm:$0xff]  ;;  %3321 = vmatprep.mubr.f32.mxu1 %v19918_v25  ;;  %v19928_v25 = vpack.c.bf16 %v19812_v19, %v19811_v10  ;;  %v15534_v1 = vld [vmem:[#allocation2 + $0x270] sm:$0xff] }
 0x166   : > { %19889 = vst [vmem:[#allocation166_spill] sm:$0xff] %v15414_v45  ;;  %19891 = vst [vmem:[#allocation167_spill] sm:$0xff] %v15420_v5  ;;  %v15437_v20 = vsub.f32 %v15328_v55, %v19896_v7  ;;  %v15451_v52 = vsub.f32 %v15338_v32, %v19900_v41  ;;  %v19902_v7 = vand.u32 4294901760, %v15340_v28  ;;  %3004 = vmatprep.mubr.f32.mxu0 %v19905_v57  ;;  %v19906_v21 = vld [vmem:[#allocation21_spill] sm:$0xff]  ;;  %v19908_v41 = vand.u32 4294901760, %v15355_v51  ;;  %v15472_v45 = vld [vmem:[#allocation2 + $0x260] sm:$0xff] }
 0x167   : > { %19894 = vst [vmem:[#allocation168_spill] sm:$0xff] %v15428_v35  ;;  %19898 = vst [vmem:[#allocation169_spill] sm:$0xff] %v15440_v4  ;;  %11933 = vmatpush3.bf16.msra.mxu0 %v19899_v16  ;;  %v15458_v35 = vld [vmem:[#allocation2 + $0x2e8] sm:$0xff]  ;;  %11965 = vmatpush3.bf16.msra.mxu1 %v19906_v21  ;;  %v15464_v16 = vsub.f32 %v15283_v27, %v15402_v53  ;;  %v19912_v57 = vand.u32 4294901760, %v15369_v60  ;;  %v19915_v27 = vld [vmem:[#allocation122_spill] sm:$0xff]  ;;  %v19921_v55 = vand.u32 4294901760, %v15379_v17 }
 0x168   : > { %19897 = vst [vmem:[#allocation20_spill] sm:$0xff] %v15437_v20  ;;  %19901 = vst [vmem:[#allocation170_spill] sm:$0xff] %v15451_v52  ;;  %v15456_v22 = vsub.f32 %v15340_v28, %v19902_v7  ;;  %v15470_v3 = vsub.f32 %v15355_v51, %v19908_v41  ;;  %v15474_v7 = vld [vmem:[#allocation2 + $0x268] sm:$0xff]  ;;  %v19919_v41 = vand.u32 4294901760, %v15377_v49  ;;  %3010 = vmatmul.mubr.f32.gmra.mrb[14].mxu0 %v15254_v61  ;;  %v19935_v61 = vand.u32 4294901760, %v15407_v31 }
 0x169   : > { %19904 = vst [vmem:[#allocation172_spill] sm:$0xff] %v15458_v35  ;;  %19907 = vst [vmem:[#allocation21_spill] sm:$0xff] %v15464_v16  ;;  %v15480_v28 = vpack.c.bf16 %v19913_v54, %v19912_v57  ;;  %v19916_v32 = vld [vmem:[#allocation121_spill] sm:$0xff]  ;;  %v15494_v36 = vsub.f32 %v15379_v17, %v19921_v55  ;;  %v9188_v54 = vpop.f32.mrb[7].mxu1  ;;  %v19922_v57 = vand.u32 4294901760, %v15388_v62  ;;  %v15531_v10 = vand.u32 4294901760, %v15464_v16 }
 0x16a   : > { %19903 = vst [vmem:[#allocation171_spill] sm:$0xff] %v15456_v22  ;;  %19909 = vst [vmem:[#allocation173_spill] sm:$0xff] %v15470_v3  ;;  %v19917_v44 = vpack.c.bf16 %v19915_v27, %v19916_v32  ;;  %v15489_v51 = vsub.f32 %v15377_v49, %v19919_v41  ;;  %v19923_v32 = vand.u32 4294901760, %v15393_v39  ;;  %v19925_v27 = vld [vmem:[#allocation22_spill] sm:$0xff]  ;;  %v15512_v17 = vadd.f32 %v9188_v54, %v9187_v63  ;;  %v19930_v63 = vld [vmem:[#allocation24_spill] sm:$0xff] }
 0x16b   : > { %19910 = vst [vmem:[#allocation174_spill] sm:$0xff] %v15472_v45  ;;  %19911 = vst [vmem:[#allocation175_spill] sm:$0xff] %v15474_v7  ;;  %11967 = vmatprep.subr.bf16.mxu1 %v19925_v27  ;;  %3019 = vmatprep.mubr.f32.mxu0 %v19930_v63  ;;  %v19931_v54 = vld [vmem:[#allocation25_spill] sm:$0xff]  ;;  %v15536_v41 = vld [vmem:[#allocation2 + $0x278] sm:$0xff]  ;;  %v19941_v39 = vand.u32 4294901760, %v15440_v4  ;;  %v19943_v31 = vand.u32 4294901760, %v15451_v52 }
 0x16c   : > { %19914 = vst [vmem:[#allocation176_spill] sm:$0xff] %v15480_v28  ;;  %11935 = vmatprep.subr.bf16.mxu0 %v19917_v44  ;;  %19920 = vst [vmem:[#allocation122_spill] sm:$0xff] %v15489_v51  ;;  %v15501_v44 = vpack.c.bf16 %v19923_v32, %v19922_v57  ;;  %v19926_v28 = vand.u32 4294901760, %v15397_v30  ;;  %v19929_v57 = vld [vmem:[#allocation59_spill] sm:$0xff]  ;;  %11969 = vmatpush3.bf16.msra.mxu1 %v19931_v54  ;;  %v19938_v63 = vld [vmem:[#allocation137_spill] sm:$0xff] }
 0x16d   : > { %19927 = vst [vmem:[#allocation22_spill] sm:$0xff] %v15512_v17  ;;  %11937 = vmatpush3.bf16.msra.mxu0 %v19928_v25  ;;  %3323 = vmatmul.mubr.f32.gmra.mrb[102].mxu1 %v19929_v57  ;;  %v3053_v25 = vsub.f32 %v15280_v18, %v15335_v6  ;;  %19932 = vst [vmem:[#allocation25_spill] sm:$0xff] %v15531_v10  ;;  %v19939_v57 = vpack.c.bf16 %v14554_v23, %v19938_v63  ;;  %v19940_v49 = vld [vmem:[#allocation86_spill] sm:$0xff]  ;;  %v19947_v63 = vand.u32 4294901760, %v15458_v35 }
 0x16e   : > { %19924 = vst [vmem:[#allocation121_spill] sm:$0xff] %v15501_v44  ;;  %v15509_v55 = vsub.f32 %v15397_v30, %v19926_v28  ;;  %v15522_v28 = vld [vmem:[#allocation2 + $0x2f0] sm:$0xff]  ;;  %v15524_v30 = vld [vmem:[#allocation2 + $0x2f8] sm:$0xff]  ;;  %19933 = vst [vmem:[#allocation177_spill] sm:$0xff] %v15534_v1  ;;  %v19936_v44 = vand.u32 4294901760, %v15437_v20  ;;  %3328 = vmatprep.mubr.f32.mxu1 %v19940_v49  ;;  %v15553_v62 = vsub.f32 %v15440_v4, %v19941_v39  ;;  %3025 = vmatmul.mubr.f32.gmra.mrb[16].mxu0 %v15277_v14 }
 0x16f   : > { %19934 = vst [vmem:[#allocation178_spill] sm:$0xff] %v15536_v41  ;;  %11939 = vmatprep.subr.bf16.mxu0 %v19939_v57  ;;  %v19946_v23 = vld [vmem:[#allocation26_spill] sm:$0xff]  ;;  %v15567_v19 = vsub.f32 %v15458_v35, %v19947_v63  ;;  %v19950_v49 = vld [vmem:[#allocation107_spill] sm:$0xff]  ;;  %v19955_v57 = vand.u32 4294901760, %v15474_v7  ;;  %v19957_v14 = vld [vmem:[#allocation29_spill] sm:$0xff]  ;;  %v19962_v35 = vand.u32 4294901760, %v15489_v51  ;;  %v19964_v39 = vpack.c.bf16 %v19821_v50, %v19820_v33 }
 0x170   : > { %v15542_v32 = vpack.c.bf16 %v19936_v44, %v19935_v61  ;;  %19942 = vst [vmem:[#allocation137_spill] sm:$0xff] %v15553_v62  ;;  %v19944_v61 = vand.u32 4294901760, %v15456_v22  ;;  %11971 = vmatprep.subr.bf16.mxu1 %v19946_v23  ;;  %3034 = vmatprep.mubr.f32.mxu0 %v19957_v14  ;;  %v15603_v17 = vand.u32 4294901760, %v3053_v25  ;;  %v19966_v14 = vld [vmem:[#allocation113_spill] sm:$0xff]  ;;  %v19969_v51 = vand.u32 4294901760, %v15509_v55 }
 0x171   : > { %19948 = vst [vmem:[#allocation26_spill] sm:$0xff] %v15567_v19  ;;  %v15583_v63 = vsub.f32 %v15474_v7, %v19955_v57  ;;  %v19967_v7 = vld [vmem:[#allocation151_spill] sm:$0xff]  ;;  %v19972_v25 = vand.u32 4294901760, %v15522_v28  ;;  %v19984_v33 = vand.u32 4294901760, %v15553_v62  ;;  %v19985_v50 = vand.u32 4294901760, %v15567_v19 }
 0x172   : > { %19937 = vst [vmem:[#allocation179_spill] sm:$0xff] %v15542_v32  ;;  %v15559_v44 = vpack.c.bf16 %v19944_v61, %v19943_v31  ;;  %v19949_v32 = vld [vmem:[#allocation139_spill] sm:$0xff]  ;;  %v19952_v31 = vld [vmem:[#allocation34_spill] sm:$0xff]  ;;  %v19953_v61 = vand.u32 4294901760, %v15472_v45  ;;  %3040 = vmatmul.mubr.f32.gmra.mrb[18].mxu0 %v15420_v5 }
 0x173   : > { %v19951_v4 = vpack.c.bf16 %v19949_v32, %v19950_v49  ;;  %3330 = vmatmul.mubr.f32.gmra.mrb[104].mxu1 %v19952_v31  ;;  %19956 = vst [vmem:[#allocation107_spill] sm:$0xff] %v15583_v63  ;;  %v19958_v49 = vld [vmem:[#allocation27_spill] sm:$0xff]  ;;  %v19960_v32 = vld [vmem:[#allocation150_spill] sm:$0xff] }
 0x174   : > { %19945 = vst [vmem:[#allocation180_spill] sm:$0xff] %v15559_v44  ;;  %v15578_v44 = vsub.f32 %v15472_v45, %v19953_v61  ;;  %11973 = vmatpush3.bf16.msra.mxu1 %v19958_v49  ;;  %v3062_v61 = vsub.f32 %v15205_v11, %v15249_v46  ;;  %v19961_v45 = vand.u32 4294901760, %v15470_v3  ;;  %3335 = vmatprep.mubr.f32.mxu1 %v19822_v26  ;;  %v19968_v3 = vand.u32 4294901760, %v15494_v36  ;;  %v19981_v26 = vld [vmem:[#allocation106_spill] sm:$0xff] }
 0x175   : > { %11941 = vmatpush3.bf16.msra.mxu0 %v19951_v4  ;;  %v19959_v4 = vld [vmem:[#allocation149_spill] sm:$0xff]  ;;  %3049 = vmatprep.mubr.f32.mxu0 %v19981_v26 }
 0x176   : > { %19954 = vst [vmem:[#allocation139_spill] sm:$0xff] %v15578_v44  ;;  %v11946_v31 = vpack.c.bf16 %v19960_v32, %v19959_v4  ;;  %v15597_v57 = vpack.c.bf16 %v19962_v35, %v19961_v45  ;;  %11943 = vmatprep.subr.bf16.mxu0 %v19964_v39  ;;  %19965 = vst [vmem:[#allocation149_spill] sm:$0xff] %v15603_v17  ;;  %v11948_v4 = vpack.c.bf16 %v19967_v7, %v19966_v14  ;;  %v19971_v35 = vld [vmem:[#allocation32_spill] sm:$0xff] }
 0x177   : > { %v3068_v32 = vsub.f32 %v15464_v16, %v15531_v10  ;;  %v15613_v45 = vpack.c.bf16 %v19969_v51, %v19968_v3  ;;  %11975 = vmatprep.subr.bf16.mxu1 %v19971_v35  ;;  %v15622_v14 = vsub.f32 %v15522_v28, %v19972_v25  ;;  %v19974_v7 = vand.u32 4294901760, %v15524_v30  ;;  %v9190_v51 = vpop.f32.mrb[8].mxu1  ;;  %3337 = vmatmul.mubr.f32.gmra.mrb[106].mxu1 %v15163_v56  ;;  %v19988_v56 = vld [vmem:[#allocation153_spill] sm:$0xff] }
 0x178   : > { %19963 = vst [vmem:[#allocation27_spill] sm:$0xff] %v15597_v57  ;;  %v19976_v3 = vpack.c.bf16 %v14617_v12, %v14612_v2  ;;  %v19979_v57 = vand.u32 4294901760, %v15536_v41  ;;  %v9191_v5 = vpop.f32.mrb[9].mxu1  ;;  %v19982_v2 = vld [vmem:[#allocation33_spill] sm:$0xff]  ;;  %v15647_v12 = vand.u32 4294901760, %v3062_v61  ;;  %3342 = vmatprep.mubr.f32.mxu1 %v19835_v9  ;;  %v19989_v26 = vand.u32 4294901760, %v15578_v44  ;;  %3055 = vmatmul.mubr.f32.gmra.mrb[20].mxu0 %v15603_v17 }
 0x179   : > { %19970 = vst [vmem:[#allocation150_spill] sm:$0xff] %v15613_v45  ;;  %19973 = vst [vmem:[#allocation113_spill] sm:$0xff] %v15622_v14  ;;  %v15627_v39 = vsub.f32 %v15524_v30, %v19974_v7  ;;  %v19977_v45 = vand.u32 4294901760, %v15534_v1  ;;  %11977 = vmatpush3.bf16.msra.mxu1 %v19982_v2 }
 0x17a   : > { %11945 = vmatpush3.bf16.msra.mxu0 %v19976_v3  ;;  %v15643_v7 = vsub.f32 %v15536_v41, %v19979_v57  ;;  %19983 = vst [vmem:[#allocation33_spill] sm:$0xff] %v15647_v12  ;;  %v15649_v3 = vadd.f32 %v9191_v5, %v9190_v51  ;;  %v19987_v57 = vld [vmem:[#allocation152_spill] sm:$0xff]  ;;  %v15668_v51 = vand.u32 4294901760, %v3068_v32  ;;  %3064 = vmatprep.mubr.f32.mxu0 %v15647_v12 }
 0x17b   : > { %19975 = vst [vmem:[#allocation151_spill] sm:$0xff] %v15627_v39  ;;  %v15638_v25 = vsub.f32 %v15534_v1, %v19977_v45  ;;  %v15655_v45 = vpack.c.bf16 %v19985_v50, %v19984_v33  ;;  %11947 = vmatprep.subr.bf16.mxu0 %v11946_v31  ;;  %v11950_v41 = vpack.c.bf16 %v19988_v56, %v19987_v57  ;;  %v19990_v1 = vand.u32 4294901760, %v15583_v63  ;;  %v19992_v5 = vld [vmem:[#allocation36_spill] sm:$0xff]  ;;  %v19994_v56 = vld [vmem:[#allocation154_spill] sm:$0xff]  ;;  %v19995_v33 = vld [vmem:[#allocation155_spill] sm:$0xff] }
 0x17c   : > { %19980 = vst [vmem:[#allocation181_spill] sm:$0xff] %v15643_v7  ;;  %11979 = vmatprep.subr.bf16.mxu1 %v19992_v5  ;;  %19993 = vst [vmem:[#allocation153_spill] sm:$0xff] %v15668_v51  ;;  %v19001_v50 = vand.u32 4294901760, %v15622_v14  ;;  %v19000_v31 = vand.u32 4294901760, %v15627_v39  ;;  %3344 = vmatmul.mubr.f32.gmra.mrb[108].mxu1 %v15215_v29  ;;  %v11952_v57 = vpack.c.bf16 %v19995_v33, %v19994_v56  ;;  %v9193_v33 = vpop.f32.mrb[10].mxu1  ;;  %v20048_v29 = vld [vmem:[#allocation144_spill] sm:$0xff] }
 0x17d   : > { %19978 = vst [vmem:[#allocation32_spill] sm:$0xff] %v15638_v25  ;;  %19986 = vst [vmem:[#allocation182_spill] sm:$0xff] %v15655_v45  ;;  %v15664_v61 = vpack.c.bf16 %v19990_v1, %v19989_v26  ;;  %v19003_v45 = vand.u32 4294901760, %v15638_v25  ;;  %v19002_v1 = vand.u32 4294901760, %v15643_v7  ;;  %v19996_v26 = vld [vmem:[#allocation31_spill] sm:$0xff]  ;;  %3070 = vmatmul.mubr.f32.gmra.mrb[22].mxu0 %v15668_v51  ;;  %v9194_v12 = vpop.f32.mrb[11].mxu1 }
 0x17e   : > { %11949 = vmatpush3.bf16.msra.mxu0 %v11948_v4  ;;  %11981 = vmatpush3.bf16.msra.mxu1 %v19996_v26  ;;  %v15683_v32 = vpack.c.bf16 %v19000_v31, %v19001_v50  ;;  %v19998_v4 = vld [vmem:[#allocation10_spill] sm:$0xff]  ;;  %v20000_v31 = vld [vmem:[#allocation64_spill] sm:$0xff]  ;;  %v20001_v50 = vld [vmem:[#allocation133_spill] sm:$0xff]  ;;  %v9196_v17 = vpop.f32.mrb[12].mxu1 }
 0x17f   : > { %19991 = vst [vmem:[#allocation152_spill] sm:$0xff] %v15664_v61  ;;  %11951 = vmatprep.subr.bf16.mxu0 %v11950_v41  ;;  %3349 = vmatprep.mubr.f32.mxu1 %v19998_v4  ;;  %v15690_v56 = vpack.c.bf16 %v19002_v1, %v19003_v45  ;;  %v15697_v41 = vadd.f32 %v9194_v12, %v9193_v33  ;;  %v20003_v1 = vld [vmem:[#allocation37_spill] sm:$0xff]  ;;  %v15706_v61 = vld [vmem:[#allocation2 + $0x280] sm:$0xff] }
 0x180   : > { %19997 = vst [vmem:[#allocation36_spill] sm:$0xff] %v15683_v32  ;;  %11983 = vmatprep.subr.bf16.mxu1 %v15079_v37  ;;  %3351 = vmatmul.mubr.f32.gmra.mrb[110].mxu1 %v15402_v53  ;;  %v20002_v32 = vld [vmem:[#allocation65_spill] sm:$0xff]  ;;  %v15714_v33 = vld [vmem:[#allocation2 + $0x200] sm:$0xff] }
 0x181   : > { %19999 = vst [vmem:[#allocation154_spill] sm:$0xff] %v15690_v56  ;;  %3486 = vmatprep.mubr.f32.mxu0 %v20000_v31  ;;  %3656 = vmatprep.mubr.f32.mxu1 %v20002_v32  ;;  %v20004_v45 = vld [vmem:[#allocation53_spill] sm:$0xff]  ;;  %v20005_v56 = vld [vmem:[#allocation134_spill] sm:$0xff]  ;;  %v20007_v31 = vld [vmem:[#allocation67_spill] sm:$0xff] }
 0x182   : > { %11953 = vmatpush3.bf16.msra.mxu0 %v11952_v57  ;;  %11985 = vmatpush3.bf16.msra.mxu1 %v15096_v13  ;;  %v20006_v57 = vand.u32 4294901760, %v20003_v1  ;;  %v15710_v12 = vld [vmem:[#allocation2 + $0x288] sm:$0xff]  ;;  %v20009_v32 = vld [vmem:[#allocation68_spill] sm:$0xff] }
 0x183   : > { %11987 = vmatprep.subr.bf16.mxu0 %v20001_v50  ;;  %12019 = vmatprep.subr.bf16.mxu1 %v20004_v45  ;;  %v20008_v50 = vld [vmem:[#allocation135_spill] sm:$0xff]  ;;  %v15716_v45 = vld [vmem:[#allocation2 + $0x208] sm:$0xff]  ;;  %v20013_v51 = vld [vmem:[#allocation72_spill] sm:$0xff] }
 0x184   : > { %v20016_v53 = vld [vmem:[#allocation60_spill] sm:$0xff]  ;;  %v20032_v4 = vld [vmem:[#allocation89_spill] sm:$0xff] }
 0x185   : > { %3489 = vmatmul.mubr.f32.vlgmr.msra.gmra.mrb[24].mxu0 %v20003_v1  ;;  %3660 = vmatmul.mubr.f32.vlgmr.msra.gmra.mrb[112].mxu1 %v20006_v57  ;;  %v20011_v57 = vld [vmem:[#allocation136_spill] sm:$0xff]  ;;  %v9197_v1 = vpop.f32.mrb[13].mxu1 }
 0x186   : > { %11989 = vmatpush3.bf16.msra.mxu0 %v20005_v56  ;;  %3495 = vmatprep.mubr.f32.mxu0 %v20007_v31  ;;  %v20010_v56 = vld [vmem:[#allocation9_spill] sm:$0xff]  ;;  %v20012_v31 = vld [vmem:[#allocation38_spill] sm:$0xff] }
 0x187   : > { %12021 = vmatpush3.bf16.msra.mxu1 %v14850_v0  ;;  %11991 = vmatprep.subr.bf16.mxu0 %v20008_v50  ;;  %v20018_v50 = vld [vmem:[#allocation142_spill] sm:$0xff] }
 0x188   : > { %3667 = vmatprep.mubr.f32.mxu1 %v20009_v32  ;;  %12023 = vmatprep.subr.bf16.mxu1 %v14858_v24  ;;  %v20015_v24 = vld [vmem:[#allocation74_spill] sm:$0xff]  ;;  %v20019_v32 = vld [vmem:[#allocation43_spill] sm:$0xff] }
 0x189   : > { %3498 = vmatmul.mubr.f32.gmra.mrb[26].mxu0 %v20010_v56  ;;  %3671 = vmatmul.mubr.f32.gmra.mrb[114].mxu1 %v20012_v31  ;;  %v20014_v56 = vld [vmem:[#allocation138_spill] sm:$0xff]  ;;  %v9199_v31 = vpop.f32.mrb[14].mxu1 }
 0x18a   : > { %11993 = vmatpush3.bf16.msra.mxu0 %v20011_v57  ;;  %3504 = vmatprep.mubr.f32.mxu0 %v20013_v51  ;;  %v20017_v57 = vand.u32 4294901760, %v15706_v61  ;;  %v20022_v51 = vld [vmem:[#allocation80_spill] sm:$0xff] }
 0x18b   : > { %12025 = vmatpush3.bf16.msra.mxu1 %v19883_v34  ;;  %11995 = vmatprep.subr.bf16.mxu0 %v20014_v56  ;;  %v15737_v34 = vadd.f32 %v9197_v1, %v9196_v17  ;;  %v20020_v56 = vand.u32 4294901760, %v15710_v12  ;;  %v20025_v17 = vand.u32 4294901760, %v15716_v45 }
 0x18c   : > { %3678 = vmatprep.mubr.f32.mxu1 %v20015_v24  ;;  %12027 = vmatprep.subr.bf16.mxu1 %v19895_v38  ;;  %v15735_v0 = vsub.f32 %v15706_v61, %v20017_v57  ;;  %v20023_v38 = vand.u32 4294901760, %v15714_v33 }
 0x18d   : > { %3507 = vmatmul.mubr.f32.gmra.mrb[28].mxu0 %v20016_v53  ;;  %3682 = vmatmul.mubr.f32.gmra.mrb[116].mxu1 %v20019_v32  ;;  %v15744_v24 = vsub.f32 %v15710_v12, %v20020_v56  ;;  %v15756_v1 = vsub.f32 %v15716_v45, %v20025_v17  ;;  %v20028_v32 = vld [vmem:[#allocation82_spill] sm:$0xff]  ;;  %v20029_v56 = vld [vmem:[#allocation35_spill] sm:$0xff]  ;;  %v20031_v53 = vld [vmem:[#allocation12_spill] sm:$0xff] }
 0x18e   : > { %11997 = vmatpush3.bf16.msra.mxu0 %v20018_v50  ;;  %3513 = vmatprep.mubr.f32.mxu0 %v20022_v51  ;;  %v15751_v57 = vsub.f32 %v15714_v33, %v20023_v38  ;;  %v20027_v50 = vld [vmem:[#allocation146_spill] sm:$0xff]  ;;  %v20030_v51 = vld [vmem:[#allocation109_spill] sm:$0xff]  ;;  %v20037_v38 = vand.u32 4294901760, %v15735_v0 }
 0x18f   : > { %20021 = vst [vmem:[#allocation155_spill] sm:$0xff] %v15744_v24  ;;  %12029 = vmatpush3.bf16.msra.mxu1 %v19906_v21  ;;  %20026 = vst [vmem:[#allocation64_spill] sm:$0xff] %v15756_v1  ;;  %11999 = vmatprep.subr.bf16.mxu0 %v20027_v50  ;;  %v20039_v17 = vld [vmem:[#allocation45_spill] sm:$0xff]  ;;  %v20040_v50 = vand.u32 4294901760, %v15744_v24 }
 0x190   : > { %20024 = vst [vmem:[#allocation31_spill] sm:$0xff] %v15751_v57  ;;  %3689 = vmatprep.mubr.f32.mxu1 %v20028_v32  ;;  %12031 = vmatprep.subr.bf16.mxu1 %v19925_v27  ;;  %v9200_v32 = vpop.f32.mrb[15].mxu1  ;;  %v20034_v27 = vld [vmem:[#allocation91_spill] sm:$0xff] }
 0x191   : > { %3516 = vmatmul.mubr.f32.gmra.mrb[30].mxu0 %v20029_v56  ;;  %3693 = vmatmul.mubr.f32.gmra.mrb[118].mxu1 %v20031_v53  ;;  %v20033_v56 = vld [vmem:[#allocation148_spill] sm:$0xff]  ;;  %v15772_v21 = vadd.f32 %v9200_v32, %v9199_v31  ;;  %v20041_v53 = vld [vmem:[#allocation95_spill] sm:$0xff]  ;;  %v20042_v31 = vand.u32 4294901760, %v15751_v57  ;;  %v20043_v32 = vand.u32 4294901760, %v15756_v1 }
 0x192   : > { %12001 = vmatpush3.bf16.msra.mxu0 %v20030_v51  ;;  %3522 = vmatprep.mubr.f32.mxu0 %v20032_v4  ;;  %v20036_v51 = vld [vmem:[#allocation11_spill] sm:$0xff]  ;;  %v4445_v4 = vsub.f32 %v15735_v0, %v20037_v38 }
 0x193   : > { %12033 = vmatpush3.bf16.msra.mxu1 %v19931_v54  ;;  %12003 = vmatprep.subr.bf16.mxu0 %v20033_v56  ;;  %20035 = vst [vmem:[#allocation133_spill] sm:$0xff] %v15772_v21  ;;  %v20038_v54 = vld [vmem:[#allocation112_spill] sm:$0xff]  ;;  %v4452_v56 = vsub.f32 %v15744_v24, %v20040_v50  ;;  %v4340_v38 = vsub.f32 %v15756_v1, %v20043_v32  ;;  %v20050_v21 = vld [vmem:[#allocation103_spill] sm:$0xff] }
 0x194   : > { %3700 = vmatprep.mubr.f32.mxu1 %v20034_v27  ;;  %12035 = vmatprep.subr.bf16.mxu1 %v19946_v23  ;;  %v4333_v23 = vsub.f32 %v15751_v57, %v20042_v31  ;;  %v20044_v27 = vld [vmem:[#allocation84_spill] sm:$0xff]  ;;  %v4446_v50 = vand.u32 4294901760, %v4445_v4 }
 0x195   : > { %3525 = vmatmul.mubr.f32.gmra.mrb[32].mxu0 %v20036_v51  ;;  %3704 = vmatmul.mubr.f32.gmra.mrb[120].mxu1 %v20039_v17  ;;  %v9234_v17 = vpop.f32.mrb[16].mxu1  ;;  %v4453_v31 = vand.u32 4294901760, %v4452_v56  ;;  %v20047_v51 = vand.u32 4294901760, %v15232_v40  ;;  %v4341_v4 = vand.u32 4294901760, %v4340_v38  ;;  %v20052_v56 = vand.u32 4294901760, %v15267_v15 }
 0x196   : > { %12005 = vmatpush3.bf16.msra.mxu0 %v20038_v54  ;;  %3531 = vmatprep.mubr.f32.mxu0 %v20041_v53  ;;  %v20045_v54 = vld [vmem:[#allocation97_spill] sm:$0xff]  ;;  %v9235_v53 = vpop.f32.mrb[17].mxu1 }
 0x197   : > { %12037 = vmatpush3.bf16.msra.mxu1 %v19958_v49  ;;  %12007 = vmatprep.subr.bf16.mxu0 %v20044_v27  ;;  %v20046_v49 = vld [vmem:[#allocation28_spill] sm:$0xff]  ;;  %v4459_v32 = vsub.f32 %v15232_v40, %v20047_v51  ;;  %v20049_v27 = vand.u32 4294901760, %v20048_v29  ;;  %v9236_v9 = vadd.f32 %v9235_v53, %v9234_v17  ;;  %v20054_v40 = vld [vmem:[#allocation105_spill] sm:$0xff]  ;;  %v9237_v17 = vpop.f32.mrb[18].mxu1 }
 0x198   : > { %3711 = vmatprep.mubr.f32.mxu1 %v20045_v54  ;;  %12039 = vmatprep.subr.bf16.mxu1 %v19971_v35  ;;  %v4334_v35 = vand.u32 4294901760, %v4333_v23  ;;  %v20053_v51 = vld [vmem:[#allocation156_spill] sm:$0xff]  ;;  %v20058_v23 = vand.u32 4294901760, %v15710_v12 }
 0x199   : > { %3534 = vmatmul.mubr.f32.gmra.mrb[34].mxu0 %v15202_v59  ;;  %3715 = vmatmul.mubr.f32.gmra.mrb[122].mxu1 %v15257_v48  ;;  %v4466_v54 = vsub.f32 %v20048_v29, %v20049_v27  ;;  %v4354_v59 = vsub.f32 %v15267_v15, %v20052_v56  ;;  %v20055_v27 = vld [vmem:[#allocation124_spill] sm:$0xff]  ;;  %v20060_v56 = vld [vmem:[#allocation157_spill] sm:$0xff] }
 0x19a   : > { %12009 = vmatpush3.bf16.msra.mxu0 %v20046_v49  ;;  %3540 = vmatprep.mubr.f32.mxu0 %v20050_v21  ;;  %v20051_v49 = vand.u32 4294901760, %v15262_v8  ;;  %v15815_v53 = vadd.f32 %v9236_v9, %v20055_v27  ;;  %v20062_v9 = vand.u32 4294901760, %v15716_v45  ;;  %v12084_v12 = vpack.c.bf16 %v4341_v4, %v4334_v35 }
 0x19b   : > { %12041 = vmatpush3.bf16.msra.mxu1 %v19982_v2  ;;  %12011 = vmatprep.subr.bf16.mxu0 %v20053_v51  ;;  %v20057_v2 = vand.u32 4294901760, %v15706_v61  ;;  %v20061_v51 = vand.u32 4294901760, %v15714_v33  ;;  %v4467_v21 = vand.u32 4294901760, %v4466_v54  ;;  %v12082_v61 = vpack.c.bf16 %v4453_v31, %v4446_v50  ;;  %v20071_v50 = vld [vmem:[#allocation49_spill] sm:$0xff] }
 0x19c   : > { %v4347_v48 = vsub.f32 %v15262_v8, %v20051_v49  ;;  %3722 = vmatprep.mubr.f32.mxu1 %v20054_v40  ;;  %20056 = vst [vmem:[#allocation65_spill] sm:$0xff] %v15815_v53  ;;  %12043 = vmatprep.subr.bf16.mxu1 %v19992_v5  ;;  %v9238_v49 = vpop.f32.mrb[19].mxu1  ;;  %v4460_v40 = vand.u32 4294901760, %v4459_v32  ;;  %v20065_v33 = vand.u32 4294901760, %v15295_v47  ;;  %v20066_v32 = vand.u32 4294901760, %v15300_v58 }
 0x19d   : > { %3543 = vmatmul.mubr.f32.gmra.mrb[36].mxu0 %v15280_v18  ;;  %v15823_v38 = vpack.c.bf16 %v20058_v23, %v20057_v2  ;;  %3726 = vmatmul.mubr.f32.gmra.mrb[124].mxu1 %v15335_v6  ;;  %v15831_v27 = vpack.c.bf16 %v20062_v9, %v20061_v51  ;;  %v9239_v5 = vadd.f32 %v9238_v49, %v9237_v17  ;;  %v4355_v23 = vand.u32 4294901760, %v4354_v59  ;;  %v20067_v17 = vld [vmem:[#allocation140_spill] sm:$0xff] }
 0x19e   : > { %12013 = vmatpush3.bf16.msra.mxu0 %v20060_v56  ;;  %3549 = vmatprep.mubr.f32.mxu0 %v15205_v11  ;;  %v4348_v2 = vand.u32 4294901760, %v4347_v48  ;;  %v20064_v56 = vld [vmem:[#allocation158_spill] sm:$0xff]  ;;  %v4473_v45 = vsub.f32 %v15295_v47, %v20065_v33  ;;  %v4480_v54 = vsub.f32 %v15300_v58, %v20066_v32  ;;  %v20069_v48 = vld [vmem:[#allocation40_spill] sm:$0xff]  ;;  %v20072_v31 = vand.u32 4294901760, %v20071_v50  ;;  %v20076_v33 = vld [vmem:[#allocation159_spill] sm:$0xff] }
 0x19f   : > { %20059 = vst [vmem:[#allocation37_spill] sm:$0xff] %v15823_v38  ;;  %20063 = vst [vmem:[#allocation53_spill] sm:$0xff] %v15831_v27  ;;  %12045 = vmatpush3.bf16.msra.mxu1 %v19996_v26  ;;  %12015 = vmatprep.subr.bf16.mxu0 %v20064_v56  ;;  %v15844_v49 = vadd.f32 %v9239_v5, %v20067_v17  ;;  %v9240_v26 = vpop.f32.mrb[20].mxu1  ;;  %v20070_v59 = vand.u32 4294901760, %v20069_v48  ;;  %v20074_v4 = vand.u32 4294901760, %v15305_v43  ;;  %v20075_v9 = vand.u32 4294901760, %v15314_v42 }
 0x1a0   : > { %3733 = vmatprep.mubr.f32.mxu1 %v15249_v46  ;;  %12047 = vmatprep.subr.bf16.mxu1 %v15079_v37  ;;  %v9241_v56 = vpop.f32.mrb[21].mxu1  ;;  %v20077_v37 = vld [vmem:[#allocation15_spill] sm:$0xff]  ;;  %v20082_v46 = vld [vmem:[#allocation48_spill] sm:$0xff]  ;;  %v20083_v11 = vld [vmem:[#allocation57_spill] sm:$0xff] }
 0x1a1   : > { %20068 = vst [vmem:[#allocation134_spill] sm:$0xff] %v15844_v49  ;;  %3552 = vmatmul.mubr.f32.gmra.mrb[38].mxu0 %v15464_v16  ;;  %v15852_v35 = vpack.c.bf16 %v20072_v31, %v20070_v59  ;;  %v4361_v51 = vsub.f32 %v15305_v43, %v20074_v4  ;;  %v4368_v5 = vsub.f32 %v15314_v42, %v20075_v9  ;;  %v20078_v32 = vand.u32 4294901760, %v20077_v37  ;;  %v20079_v17 = vld [vmem:[#allocation123_spill] sm:$0xff]  ;;  %v20090_v37 = vld [vmem:[#allocation132_spill] sm:$0xff] }
 0x1a2   : > { %12017 = vmatpush3.bf16.msra.mxu0 %v20076_v33  ;;  %3737 = vmatmul.mubr.f32.gmra.mrb[126].mxu1 %v15531_v10  ;;  %v20080_v48 = vand.u32 4294901760, %v20079_v17  ;;  %v12086_v59 = vpack.c.bf16 %v4467_v21, %v4460_v40  ;;  %v9242_v31 = vadd.f32 %v9241_v56, %v9240_v26  ;;  %v12088_v4 = vpack.c.bf16 %v4355_v23, %v4348_v2  ;;  %v20085_v16 = vld [vmem:[#allocation127_spill] sm:$0xff]  ;;  %v20088_v10 = vld [vmem:[#allocation128_spill] sm:$0xff]  ;;  %v20095_v23 = vld [vmem:[#allocation66_spill] sm:$0xff] }
 0x1a3   : > { %20073 = vst [vmem:[#allocation135_spill] sm:$0xff] %v15852_v35  ;;  %3903 = vmatprep.mubr.f32.mxu0 %v20082_v46  ;;  %12049 = vmatpush3.bf16.msra.mxu1 %v15096_v13  ;;  %v20084_v9 = vand.u32 4294901760, %v20083_v11  ;;  %v20086_v6 = vand.u32 4294901760, %v20085_v16  ;;  %v20089_v18 = vand.u32 4294901760, %v20088_v10  ;;  %v20091_v49 = vand.u32 4294901760, %v20090_v37  ;;  %v20093_v13 = vld [vmem:[#allocation16_spill] sm:$0xff] }
 0x1a4   : > { %v15866_v50 = vpack.c.bf16 %v20080_v48, %v20078_v32  ;;  %12051 = vmatprep.subr.bf16.mxu0 %v15823_v38  ;;  %4056 = vmatprep.mubr.f32.mxu1 %v20082_v46  ;;  %v4474_v40 = vand.u32 4294901760, %v4473_v45  ;;  %v4481_v21 = vand.u32 4294901760, %v4480_v54  ;;  %v20094_v2 = vand.u32 4294901760, %v20093_v13  ;;  %v9243_v10 = vpop.f32.mrb[22].mxu1  ;;  %v20099_v56 = vld [vmem:[#allocation30_spill] sm:$0xff]  ;;  %v20101_v45 = vld [vmem:[#allocation143_spill] sm:$0xff] }
 0x1a5   : > { %v15874_v33 = vpack.c.bf16 %v20086_v6, %v20084_v9  ;;  %v15880_v17 = vpack.c.bf16 %v20091_v49, %v20089_v18  ;;  %v20096_v11 = vand.u32 4294901760, %v20095_v23  ;;  %v20097_v6 = vld [vmem:[#allocation116_spill] sm:$0xff]  ;;  %3905 = vmatmul.mubr.f32.vlgmr.msra.gmra.mrb[40].mxu0 %v20099_v56  ;;  %12083 = vmatprep.subr.bf16.mxu1 %v12082_v61  ;;  %v4362_v18 = vand.u32 4294901760, %v4361_v51  ;;  %v9244_v9 = vpop.f32.mrb[23].mxu1  ;;  %v20105_v61 = vld [vmem:[#allocation163_spill] sm:$0xff]  ;;  %v20107_v23 = vld [vmem:[#allocation58_spill] sm:$0xff] }
 0x1a6   : > { %20081 = vst [vmem:[#allocation136_spill] sm:$0xff] %v15866_v50  ;;  %v15891_v16 = vadd.f32 %v9242_v31, %v20097_v6  ;;  %v4369_v49 = vand.u32 4294901760, %v4368_v5  ;;  %v20100_v32 = vand.u32 4294901760, %v15369_v60  ;;  %v20102_v54 = vand.u32 4294901760, %v20101_v45  ;;  %12053 = vmatpush3.bf16.msra.mxu0 %v15831_v27  ;;  %4058 = vmatmul.mubr.f32.vlgmr.msra.gmra.mrb[128].mxu1 %v20099_v56  ;;  %v20103_v31 = vld [vmem:[#allocation162_spill] sm:$0xff]  ;;  %v20113_v27 = vld [vmem:[#allocation165_spill] sm:$0xff] }
 0x1a7   : > { %20087 = vst [vmem:[#allocation138_spill] sm:$0xff] %v15874_v33  ;;  %20092 = vst [vmem:[#allocation142_spill] sm:$0xff] %v15880_v17  ;;  %v15888_v26 = vpack.c.bf16 %v20096_v11, %v20094_v2  ;;  %v20104_v37 = vand.u32 4294901760, %v20103_v31  ;;  %v20106_v51 = vand.u32 4294901760, %v20105_v61  ;;  %v9245_v2 = vadd.f32 %v9244_v9, %v9243_v10  ;;  %3910 = vmatprep.mubr.f32.mxu0 %v20107_v23  ;;  %v20108_v11 = vld [vmem:[#allocation19_spill] sm:$0xff] }
 0x1a8   : > { %20098 = vst [vmem:[#allocation146_spill] sm:$0xff] %v15891_v16  ;;  %v4487_v46 = vsub.f32 %v15369_v60, %v20100_v32  ;;  %v4494_v48 = vsub.f32 %v20101_v45, %v20102_v54  ;;  %12085 = vmatpush3.bf16.msra.mxu1 %v12084_v12  ;;  %v20109_v6 = vand.u32 4294901760, %v20108_v11  ;;  %v20110_v32 = vld [vmem:[#allocation114_spill] sm:$0xff]  ;;  %v20114_v56 = vand.u32 4294901760, %v20113_v27  ;;  %12055 = vmatprep.subr.bf16.mxu0 %v15852_v35 }
 0x1a9   : > { %v4375_v13 = vsub.f32 %v20103_v31, %v20104_v37  ;;  %v4382_v5 = vsub.f32 %v20105_v61, %v20106_v51  ;;  %v20111_v54 = vand.u32 4294901760, %v20110_v32  ;;  %v20115_v37 = vand.u32 4294901760, %v15437_v20  ;;  %4063 = vmatprep.mubr.f32.mxu1 %v20107_v23  ;;  %v20118_v11 = vld [vmem:[#allocation22_spill] sm:$0xff]  ;;  %v9246_v32 = vpop.f32.mrb[24].mxu1  ;;  %12087 = vmatprep.subr.bf16.mxu1 %v12086_v59  ;;  %v20126_v59 = vld [vmem:[#allocation119_spill] sm:$0xff] }
 0x1aa   : > { %v4501_v16 = vsub.f32 %v20113_v27, %v20114_v56  ;;  %v20116_v12 = vand.u32 4294901760, %v15451_v52  ;;  %v20117_v9 = vand.u32 4294901760, %v15456_v22  ;;  %v12090_v56 = vpack.c.bf16 %v4481_v21, %v4474_v40  ;;  %v9247_v23 = vpop.f32.mrb[25].mxu1  ;;  %12057 = vmatpush3.bf16.msra.mxu0 %v15866_v50  ;;  %v20121_v27 = vld [vmem:[#allocation115_spill] sm:$0xff]  ;;  %v20125_v61 = vld [vmem:[#allocation70_spill] sm:$0xff]  ;;  %v20128_v21 = vld [vmem:[#allocation120_spill] sm:$0xff] }
 0x1ab   : > { %v15913_v38 = vpack.c.bf16 %v20111_v54, %v20109_v6  ;;  %v4508_v53 = vsub.f32 %v15437_v20, %v20115_v37  ;;  %v15930_v6 = vadd.f32 %v9245_v2, %v20118_v11  ;;  %v20120_v54 = vld [vmem:[#allocation39_spill] sm:$0xff]  ;;  %v12092_v37 = vpack.c.bf16 %v4369_v49, %v4362_v18  ;;  %12059 = vmatprep.subr.bf16.mxu0 %v15874_v33 }
 0x1ac   : > { %v4389_v10 = vsub.f32 %v15451_v52, %v20116_v12  ;;  %v4396_v51 = vsub.f32 %v15456_v22, %v20117_v9  ;;  %3912 = vmatmul.mubr.f32.gmra.mrb[42].mxu0 %v20120_v54  ;;  %v4488_v35 = vand.u32 4294901760, %v4487_v46  ;;  %v4495_v20 = vand.u32 4294901760, %v4494_v48  ;;  %4065 = vmatmul.mubr.f32.gmra.mrb[130].mxu1 %v20120_v54  ;;  %v20123_v22 = vld [vmem:[#allocation117_spill] sm:$0xff] }
 0x1ad   : > { %20112 = vst [vmem:[#allocation109_spill] sm:$0xff] %v15913_v38  ;;  %20119 = vst [vmem:[#allocation148_spill] sm:$0xff] %v15930_v6  ;;  %v4376_v12 = vand.u32 4294901760, %v4375_v13  ;;  %v4383_v52 = vand.u32 4294901760, %v4382_v5  ;;  %v20122_v9 = vand.u32 4294901760, %v20121_v27  ;;  %v20124_v2 = vand.u32 4294901760, %v20123_v22  ;;  %3917 = vmatprep.mubr.f32.mxu0 %v20125_v61  ;;  %12089 = vmatpush3.bf16.msra.mxu1 %v12088_v4 }
 0x1ae   : > { %v9248_v6 = vadd.f32 %v9247_v23, %v9246_v32  ;;  %v20127_v40 = vand.u32 4294901760, %v20126_v59  ;;  %v20129_v18 = vand.u32 4294901760, %v20128_v21  ;;  %v4502_v46 = vand.u32 4294901760, %v4501_v16  ;;  %v20130_v48 = vld [vmem:[#allocation173_spill] sm:$0xff]  ;;  %v20132_v27 = vld [vmem:[#allocation122_spill] sm:$0xff]  ;;  %4070 = vmatprep.mubr.f32.mxu1 %v20125_v61  ;;  %v20134_v16 = vld [vmem:[#allocation8_spill] sm:$0xff]  ;;  %12091 = vmatprep.subr.bf16.mxu1 %v12090_v56 }
 0x1af   : > { %v15939_v11 = vpack.c.bf16 %v20124_v2, %v20122_v9  ;;  %v20131_v13 = vand.u32 4294901760, %v20130_v48  ;;  %v20133_v50 = vand.u32 4294901760, %v20132_v27  ;;  %v4509_v4 = vand.u32 4294901760, %v4508_v53  ;;  %v9249_v2 = vpop.f32.mrb[26].mxu1  ;;  %12061 = vmatpush3.bf16.msra.mxu0 %v15880_v17  ;;  %v20137_v53 = vld [vmem:[#allocation131_spill] sm:$0xff] }
 0x1b0   : > { %v15946_v49 = vpack.c.bf16 %v20129_v18, %v20127_v40  ;;  %v4390_v23 = vand.u32 4294901760, %v4389_v10  ;;  %v4397_v32 = vand.u32 4294901760, %v4396_v51  ;;  %v15957_v9 = vadd.f32 %v9248_v6, %v15649_v3  ;;  %3919 = vmatmul.mubr.f32.gmra.mrb[44].mxu0 %v20134_v16  ;;  %4072 = vmatmul.mubr.f32.gmra.mrb[132].mxu1 %v20134_v16  ;;  %v20139_v51 = vld [vmem:[#allocation160_spill] sm:$0xff] }
 0x1b1   : > { %v4515_v5 = vsub.f32 %v20130_v48, %v20131_v13  ;;  %v4522_v22 = vsub.f32 %v20132_v27, %v20133_v50  ;;  %v12094_v59 = vpack.c.bf16 %v4495_v20, %v4488_v35  ;;  %v20135_v40 = vand.u32 4294901760, %v15494_v36  ;;  %v9250_v13 = vpop.f32.mrb[27].mxu1  ;;  %v20141_v35 = vld [vmem:[#allocation78_spill] sm:$0xff]  ;;  %12093 = vmatpush3.bf16.msra.mxu1 %v12092_v37  ;;  %12063 = vmatprep.subr.bf16.mxu0 %v15888_v26 }
 0x1b2   : > { %v20136_v50 = vand.u32 4294901760, %v15509_v55  ;;  %v12096_v3 = vpack.c.bf16 %v4383_v52, %v4376_v12  ;;  %v20138_v10 = vand.u32 4294901760, %v20137_v53  ;;  %v20140_v6 = vand.u32 4294901760, %v20139_v51  ;;  %3924 = vmatprep.mubr.f32.mxu0 %v20141_v35  ;;  %4077 = vmatprep.mubr.f32.mxu1 %v20141_v35  ;;  %v9252_v37 = vpop.f32.mrb[28].mxu1 }
 0x1b3   : > { %v4403_v21 = vsub.f32 %v15494_v36, %v20135_v40  ;;  %v9251_v20 = vadd.f32 %v9250_v13, %v9249_v2  ;;  %v4516_v40 = vand.u32 4294901760, %v4515_v5  ;;  %v4523_v61 = vand.u32 4294901760, %v4522_v22  ;;  %v20144_v5 = vld [vmem:[#allocation59_spill] sm:$0xff]  ;;  %12095 = vmatprep.subr.bf16.mxu1 %v12094_v59  ;;  %12065 = vmatpush3.bf16.msra.mxu0 %v15913_v38  ;;  %v20152_v59 = vld [vmem:[#allocation169_spill] sm:$0xff] }
 0x1b4   : > { %v4410_v18 = vsub.f32 %v15509_v55, %v20136_v50  ;;  %v15972_v56 = vpack.c.bf16 %v20140_v6, %v20138_v10  ;;  %v20142_v50 = vand.u32 4294901760, %v15553_v62  ;;  %v20143_v17 = vand.u32 4294901760, %v15567_v19  ;;  %3926 = vmatmul.mubr.f32.gmra.mrb[46].mxu0 %v20144_v5  ;;  %4079 = vmatmul.mubr.f32.gmra.mrb[134].mxu1 %v20144_v5 }
 0x1b5   : > { %v12098_v12 = vpack.c.bf16 %v4509_v4, %v4502_v46  ;;  %v12100_v53 = vpack.c.bf16 %v4397_v32, %v4390_v23  ;;  %v15984_v2 = vadd.f32 %v9251_v20, %v15697_v41  ;;  %v4404_v22 = vand.u32 4294901760, %v4403_v21  ;;  %v20147_v41 = vld [vmem:[#allocation161_spill] sm:$0xff]  ;;  %v20149_v4 = vld [vmem:[#allocation164_spill] sm:$0xff]  ;;  %12097 = vmatpush3.bf16.msra.mxu1 %v12096_v3  ;;  %12067 = vmatprep.subr.bf16.mxu0 %v15939_v11 }
 0x1b6   : > { %v4529_v33 = vsub.f32 %v15553_v62, %v20142_v50  ;;  %v4536_v52 = vsub.f32 %v15567_v19, %v20143_v17  ;;  %v4411_v13 = vand.u32 4294901760, %v4410_v18  ;;  %v20145_v10 = vand.u32 4294901760, %v15578_v44  ;;  %v9253_v50 = vpop.f32.mrb[29].mxu1  ;;  %v20154_v18 = vld [vmem:[#allocation172_spill] sm:$0xff]  ;;  %v20160_v62 = vld [vmem:[#allocation175_spill] sm:$0xff] }
 0x1b7   : > { %v20146_v17 = vand.u32 4294901760, %v15583_v63  ;;  %v20148_v46 = vand.u32 4294901760, %v20147_v41  ;;  %v20150_v23 = vand.u32 4294901760, %v20149_v4  ;;  %v20153_v21 = vand.u32 4294901760, %v20152_v59  ;;  %12099 = vmatprep.subr.bf16.mxu1 %v12098_v12  ;;  %12069 = vmatpush3.bf16.msra.mxu0 %v15946_v49 }
 0x1b8   : > { %v4417_v51 = vsub.f32 %v15578_v44, %v20145_v10  ;;  %v20155_v20 = vand.u32 4294901760, %v20154_v18  ;;  %v9254_v35 = vadd.f32 %v9253_v50, %v9252_v37  ;;  %v20157_v44 = vld [vmem:[#allocation86_spill] sm:$0xff]  ;;  %v20161_v38 = vand.u32 4294901760, %v20160_v62  ;;  %v9255_v62 = vpop.f32.mrb[30].mxu1  ;;  %12071 = vmatprep.subr.bf16.mxu0 %v15972_v56 }
 0x1b9   : > { %v4424_v6 = vsub.f32 %v15583_v63, %v20146_v17  ;;  %v15999_v32 = vpack.c.bf16 %v20150_v23, %v20148_v46  ;;  %3931 = vmatprep.mubr.f32.mxu0 %v20157_v44  ;;  %v12102_v17 = vpack.c.bf16 %v4523_v61, %v4516_v40  ;;  %v20158_v63 = vld [vmem:[#allocation174_spill] sm:$0xff]  ;;  %v4530_v4 = vand.u32 4294901760, %v4529_v33  ;;  %4084 = vmatprep.mubr.f32.mxu1 %v20157_v44 }
 0x1ba   : > { %v16005_v10 = vpack.c.bf16 %v20155_v20, %v20153_v21  ;;  %v20159_v19 = vand.u32 4294901760, %v20158_v63  ;;  %v4537_v46 = vand.u32 4294901760, %v4536_v52  ;;  %v20163_v23 = vand.u32 4294901760, %v15622_v14  ;;  %v9256_v21 = vpop.f32.mrb[31].mxu1  ;;  %12101 = vmatpush3.bf16.msra.mxu1 %v12100_v53  ;;  %v20174_v18 = vld [vmem:[#allocation178_spill] sm:$0xff] }
 0x1bb   : > { %20151 = vst [vmem:[#allocation112_spill] sm:$0xff] %v15999_v32  ;;  %v20164_v50 = vand.u32 4294901760, %v15627_v39  ;;  %v16023_v63 = vadd.f32 %v9254_v35, %v15737_v34  ;;  %v4418_v33 = vand.u32 4294901760, %v4417_v51  ;;  %v4425_v3 = vand.u32 4294901760, %v4424_v6  ;;  %v20171_v51 = vld [vmem:[#allocation93_spill] sm:$0xff]  ;;  %12103 = vmatprep.subr.bf16.mxu1 %v12102_v17  ;;  %12073 = vmatpush3.bf16.msra.mxu0 %v15999_v32  ;;  %v16065_v17 = vld [vmem:[#allocation2 + $0x390] sm:$0xff] }
 0x1bc   : > { %20156 = vst [vmem:[#allocation84_spill] sm:$0xff] %v16005_v10  ;;  %v16012_v41 = vpack.c.bf16 %v20161_v38, %v20159_v19  ;;  %v4543_v37 = vsub.f32 %v15622_v14, %v20163_v23  ;;  %v20165_v19 = vld [vmem:[#allocation34_spill] sm:$0xff]  ;;  %v12104_v38 = vpack.c.bf16 %v4411_v13, %v4404_v22  ;;  %v20166_v40 = vand.u32 4294901760, %v15522_v28  ;;  %v20172_v28 = vld [vmem:[#allocation177_spill] sm:$0xff]  ;;  %20180 = vst [vmem:[#allocation124_spill] sm:$0xff] %v16065_v17 }
 0x1bd   : > { %v4550_v61 = vsub.f32 %v15627_v39, %v20164_v50  ;;  %3933 = vmatmul.mubr.f32.gmra.mrb[48].mxu0 %v20165_v19  ;;  %v20167_v52 = vand.u32 4294901760, %v15524_v30  ;;  %4086 = vmatmul.mubr.f32.gmra.mrb[136].mxu1 %v20165_v19  ;;  %v20169_v34 = vand.u32 4294901760, %v15638_v25  ;;  %v20170_v12 = vand.u32 4294901760, %v15643_v7  ;;  %v20196_v39 = vld [vmem:[#allocation170_spill] sm:$0xff] }
 0x1be   : > { %20162 = vst [vmem:[#allocation28_spill] sm:$0xff] %v16012_v41  ;;  %v9257_v13 = vadd.f32 %v9256_v21, %v9255_v62  ;;  %3938 = vmatprep.mubr.f32.mxu0 %v20171_v51  ;;  %v12106_v30 = vpack.c.bf16 %v4537_v46, %v4530_v4  ;;  %v20173_v6 = vand.u32 4294901760, %v20172_v28  ;;  %v20175_v20 = vand.u32 4294901760, %v20174_v18  ;;  %4091 = vmatprep.mubr.f32.mxu1 %v20171_v51  ;;  %v20177_v4 = vld [vmem:[#allocation133_spill] sm:$0xff]  ;;  %v16121_v14 = vld [vmem:[#allocation2 + $0x3b0] sm:$0xff] }
 0x1bf   : > { %v16030_v59 = vpack.c.bf16 %v20167_v52, %v20166_v40  ;;  %v4431_v35 = vsub.f32 %v15638_v25, %v20169_v34  ;;  %v4438_v22 = vsub.f32 %v15643_v7, %v20170_v12  ;;  %v4544_v62 = vand.u32 4294901760, %v4543_v37  ;;  %v9290_v52 = vpop.f32.mrb[32].mxu1  ;;  %v20178_v21 = vld [vmem:[#allocation13_spill] sm:$0xff]  ;;  %12105 = vmatpush3.bf16.msra.mxu1 %v12104_v38  ;;  %12075 = vmatprep.subr.bf16.mxu0 %v16005_v10  ;;  %v20186_v38 = vld [vmem:[#allocation163_spill] sm:$0xff]  ;;  %v16091_v7 = vld [vmem:[#allocation2 + $0x320] sm:$0xff] }
 0x1c0   : > { %v16045_v23 = vpack.c.bf16 %v20175_v20, %v20173_v6  ;;  %v4551_v40 = vand.u32 4294901760, %v4550_v61  ;;  %v16054_v46 = vadd.f32 %v9257_v13, %v20177_v4  ;;  %v12108_v34 = vpack.c.bf16 %v4425_v3, %v4418_v33  ;;  %v20179_v12 = vld [vmem:[#allocation141_spill] sm:$0xff]  ;;  %v13007_v6 = vld [vmem:[%s13471_s29 + $0x80] sm:$0xff]  ;;  %v9291_v37 = vpop.f32.mrb[33].mxu1  ;;  %v16067_v33 = vld [vmem:[#allocation2 + $0x398] sm:$0xff]  ;;  %20190 = vst [vmem:[#allocation15_spill] sm:$0xff] %v16091_v7  ;;  %12107 = vmatprep.subr.bf16.mxu1 %v12106_v30 }
 0x1c1   : > { %20168 = vst [vmem:[#allocation144_spill] sm:$0xff] %v16030_v59  ;;  %3940 = vmatmul.mubr.f32.gmra.mrb[50].mxu0 %v20178_v21  ;;  %v454_v18 = vrot.slane %v13007_v6, 2  ;;  %v13008_v20 = vld [vmem:[%s13471_s29 + $0x88] sm:$0x3]  ;;  %4093 = vmatmul.mubr.f32.gmra.mrb[138].mxu1 %v20178_v21  ;;  %v4432_v61 = vand.u32 4294901760, %v4431_v35  ;;  %v4439_v13 = vand.u32 4294901760, %v4438_v22  ;;  %v9292_v53 = vadd.f32 %v9291_v37, %v9290_v52 }
 0x1c2   : > { %20176 = vst [vmem:[#allocation156_spill] sm:$0xff] %v16045_v23  ;;  %v455_v50 = vrot.slane %v13008_v20, 2  ;;  %20181 = vst [vmem:[#allocation157_spill] sm:$0xff] %v16067_v33  ;;  %v16069_v3 = vld [vmem:[#allocation2 + $0x310] sm:$0xff]  ;;  %v20183_v6 = vld [vmem:[#allocation99_spill] sm:$0xff]  ;;  %v12110_v37 = vpack.c.bf16 %v4551_v40, %v4544_v62  ;;  %v9293_v44 = vpop.f32.mrb[34].mxu1  ;;  %12077 = vmatpush3.bf16.msra.mxu0 %v16012_v41 }
 0x1c3   : > { %20182 = vst [vmem:[#allocation158_spill] sm:$0xff] %v16069_v3  ;;  %3945 = vmatprep.mubr.f32.mxu0 %v20183_v6  ;;  %v16078_v4 = vld [vmem:[#allocation2 + $0x318] sm:$0xff]  ;;  %v16080_v52 = vld [vmem:[#allocation2 + $0x3a0] sm:$0xff]  ;;  %4098 = vmatprep.mubr.f32.mxu1 %v20183_v6  ;;  %v20187_v51 = vld [vmem:[#allocation65_spill] sm:$0xff]  ;;  %v9294_v10 = vpop.f32.mrb[35].mxu1  ;;  %v20203_v30 = vand.u32 4294901760, %v16065_v17 }
 0x1c4   : > { %20184 = vst [vmem:[#allocation140_spill] sm:$0xff] %v16078_v4  ;;  %20185 = vst [vmem:[#allocation40_spill] sm:$0xff] %v16080_v52  ;;  %v16087_v20 = vadd.f32 %v9292_v53, %v20187_v51  ;;  %v16089_v35 = vld [vmem:[#allocation2 + $0x3a8] sm:$0xff]  ;;  %v456_v25 = vsel %vm415_vm1, %v454_v18, %v455_v50  ;;  %v12112_v51 = vpack.c.bf16 %v4439_v13, %v4432_v61  ;;  %v20193_v50 = vld [vmem:[#allocation10_spill] sm:$0xff]  ;;  %12109 = vmatpush3.bf16.msra.mxu1 %v12108_v34  ;;  %v9296_v13 = vpop.f32.mrb[36].mxu1 }
 0x1c5   : > { %20189 = vst [vmem:[#allocation159_spill] sm:$0xff] %v16089_v35  ;;  %v20191_v22 = vld [vmem:[#allocation129_spill] sm:$0xff]  ;;  %v9295_v53 = vadd.f32 %v9294_v10, %v9293_v44  ;;  %v20195_v6 = vld [vmem:[#allocation20_spill] sm:$0xff]  ;;  %v20197_v40 = vld [vmem:[#allocation171_spill] sm:$0xff]  ;;  %12079 = vmatprep.subr.bf16.mxu0 %v16030_v59  ;;  %v16115_v10 = vand.u32 4294901760, %v456_v25  ;;  %12111 = vmatprep.subr.bf16.mxu1 %v12110_v37  ;;  %v9297_v41 = vpop.f32.mrb[37].mxu1 }
 0x1c6   : > { %20188 = vst [vmem:[#allocation49_spill] sm:$0xff] %v16087_v20  ;;  %3947 = vmatmul.mubr.f32.gmra.mrb[52].mxu0 %v20191_v22  ;;  %v16098_v28 = vld [vmem:[#allocation2 + $0x328] sm:$0xff]  ;;  %4100 = vmatmul.mubr.f32.gmra.mrb[140].mxu1 %v20191_v22  ;;  %v20199_v34 = vld [vmem:[#allocation134_spill] sm:$0xff]  ;;  %20201 = vst [vmem:[#allocation127_spill] sm:$0xff] %v16121_v14  ;;  %v16127_v20 = vsub.f32 %v16065_v17, %v20203_v30  ;;  %v20205_v44 = vand.u32 4294901760, %v16067_v33  ;;  %v9298_v37 = vadd.f32 %v9297_v41, %v9296_v13 }
 0x1c7   : > { %20192 = vst [vmem:[#allocation123_spill] sm:$0xff] %v16098_v28  ;;  %3952 = vmatprep.mubr.f32.mxu0 %v20193_v50  ;;  %v20194_v18 = vld [vmem:[#allocation165_spill] sm:$0xff]  ;;  %4105 = vmatprep.mubr.f32.mxu1 %v20193_v50  ;;  %20198 = vst [vmem:[#allocation48_spill] sm:$0xff] %v16115_v10  ;;  %v16118_v61 = vadd.f32 %v9295_v53, %v20199_v34  ;;  %v20202_v32 = vld [vmem:[#allocation54_spill] sm:$0xff]  ;;  %v20207_v53 = vand.u32 4294901760, %v16069_v3  ;;  %v20210_v30 = vand.u32 4294901760, %v16078_v4 }
 0x1c8   : > { %20204 = vst [vmem:[#allocation128_spill] sm:$0xff] %v16127_v20  ;;  %v16132_v50 = vsub.f32 %v16067_v33, %v20205_v44  ;;  %v16139_v62 = vld [vmem:[#allocation2 + $0x3b8] sm:$0xff]  ;;  %12081 = vmatpush3.bf16.msra.mxu0 %v16045_v23  ;;  %v20212_v44 = vand.u32 4294901760, %v16080_v52  ;;  %v16153_v59 = vld [vmem:[#allocation2 + $0x330] sm:$0xff]  ;;  %12113 = vmatpush3.bf16.msra.mxu1 %v12112_v51  ;;  %v20216_v41 = vand.u32 4294901760, %v16089_v35  ;;  %v20219_v51 = vpack.c.bf16 %v15744_v24, %v15735_v0  ;;  %v20233_v24 = vld [vmem:[#allocation53_spill] sm:$0xff] }
 0x1c9   : > { %20200 = vst [vmem:[#allocation57_spill] sm:$0xff] %v16118_v61  ;;  %v16137_v34 = vsub.f32 %v16069_v3, %v20207_v53  ;;  %20209 = vst [vmem:[#allocation66_spill] sm:$0xff] %v16139_v62  ;;  %v16146_v17 = vsub.f32 %v16078_v4, %v20210_v30  ;;  %v20215_v53 = vld [vmem:[#allocation145_spill] sm:$0xff]  ;;  %v20217_v30 = vand.u32 4294901760, %v16091_v7  ;;  %v20225_v23 = vld [vmem:[#allocation62_spill] sm:$0xff] }
 0x1ca   : > { %3954 = vmatmul.mubr.f32.gmra.mrb[54].mxu0 %v20202_v32  ;;  %20206 = vst [vmem:[#allocation132_spill] sm:$0xff] %v16132_v50  ;;  %4107 = vmatmul.mubr.f32.gmra.mrb[142].mxu1 %v20202_v32  ;;  %v16151_v33 = vsub.f32 %v16080_v52, %v20212_v44  ;;  %20214 = vst [vmem:[#allocation143_spill] sm:$0xff] %v16153_v59  ;;  %v16161_v13 = vsub.f32 %v16089_v35, %v20216_v41  ;;  %v16169_v52 = vld [vmem:[#allocation2 + $0x338] sm:$0xff]  ;;  %v20221_v41 = vld [vmem:[#allocation146_spill] sm:$0xff]  ;;  %v9299_v35 = vpop.f32.mrb[38].mxu1 }
 0x1cb   : > { %20208 = vst [vmem:[#allocation16_spill] sm:$0xff] %v16137_v34  ;;  %20211 = vst [vmem:[#allocation116_spill] sm:$0xff] %v16146_v17  ;;  %4213 = vmatprep.mubr.f32.mxu0 %v20215_v53  ;;  %v16166_v4 = vsub.f32 %v16091_v7, %v20217_v30  ;;  %12115 = vmatprep.subr.bf16.mxu0 %v20219_v51  ;;  %v16176_v53 = vsub.f32 %v456_v25, %v16115_v10  ;;  %v20223_v30 = vand.u32 4294901760, %v16098_v28  ;;  %v20226_v61 = vld [vmem:[#allocation37_spill] sm:$0xff]  ;;  %v9300_v51 = vpop.f32.mrb[39].mxu1 }
 0x1cc   : > { %20213 = vst [vmem:[#allocation30_spill] sm:$0xff] %v16151_v33  ;;  %20218 = vst [vmem:[#allocation162_spill] sm:$0xff] %v16169_v52  ;;  %4554 = vmatprep.mubr.f32.mxu1 %v20120_v54  ;;  %v16179_v3 = vadd.f32 %v9298_v37, %v20221_v41  ;;  %12147 = vmatprep.subr.bf16.mxu1 %v20226_v61  ;;  %v9301_v44 = vadd.f32 %v9300_v51, %v9299_v35  ;;  %v16200_v54 = vld [vmem:[#allocation2 + $0x3c0] sm:$0xff]  ;;  %v16202_v25 = vld [vmem:[#allocation2 + $0x3c8] sm:$0xff]  ;;  %v20234_v51 = vand.u32 4294901760, %v16121_v14 }
 0x1cd   : > { %20220 = vst [vmem:[#allocation19_spill] sm:$0xff] %v16176_v53  ;;  %v16184_v7 = vsub.f32 %v16098_v28, %v20223_v30  ;;  %v20228_v30 = vld [vmem:[#allocation50_spill] sm:$0xff]  ;;  %20229 = vst [vmem:[#allocation115_spill] sm:$0xff] %v16200_v54  ;;  %v16204_v37 = vld [vmem:[#allocation2 + $0x340] sm:$0xff] }
 0x1ce   : > { %20222 = vst [vmem:[#allocation114_spill] sm:$0xff] %v16179_v3  ;;  %4219 = vmatmul.mubr.f32.vlgmr.msra.gmra.mrb[56].mxu0 %v20225_v23  ;;  %v20227_v3 = vpack.c.bf16 %v15756_v1, %v15751_v57  ;;  %4556 = vmatmul.mubr.f32.vlgmr.msra.gmra.mrb[144].mxu1 %v20228_v30  ;;  %20230 = vst [vmem:[#allocation117_spill] sm:$0xff] %v16202_v25  ;;  %v20232_v41 = vld [vmem:[#allocation110_spill] sm:$0xff]  ;;  %v16213_v28 = vsub.f32 %v16121_v14, %v20234_v51  ;;  %v16215_v61 = vld [vmem:[#allocation2 + $0x348] sm:$0xff]  ;;  %v20237_v30 = vand.u32 4294901760, %v16127_v20  ;;  %v9302_v51 = vpop.f32.mrb[40].mxu1 }
 0x1cf   : > { %20224 = vst [vmem:[#allocation22_spill] sm:$0xff] %v16184_v7  ;;  %20231 = vst [vmem:[#allocation119_spill] sm:$0xff] %v16204_v37  ;;  %4228 = vmatprep.mubr.f32.mxu0 %v20232_v41  ;;  %12149 = vmatpush3.bf16.msra.mxu1 %v20233_v24  ;;  %v16217_v23 = vld [vmem:[#allocation2 + $0x3d0] sm:$0xff]  ;;  %v20238_v1 = vand.u32 4294901760, %v16132_v50  ;;  %v20241_v35 = vld [vmem:[#allocation148_spill] sm:$0xff]  ;;  %v20242_v57 = vand.u32 4294901760, %v16139_v62 }
 0x1d0   : > { %12117 = vmatpush3.bf16.msra.mxu0 %v20227_v3  ;;  %20235 = vst [vmem:[#allocation120_spill] sm:$0xff] %v16215_v61  ;;  %20236 = vst [vmem:[#allocation173_spill] sm:$0xff] %v16217_v23  ;;  %v20240_v3 = vpack.c.bf16 %v20048_v29, %v20179_v12  ;;  %4561 = vmatprep.mubr.f32.mxu1 %v20134_v16  ;;  %v16230_v24 = vadd.f32 %v9301_v44, %v20241_v35  ;;  %v16238_v50 = vld [vmem:[#allocation2 + $0x3d8] sm:$0xff]  ;;  %v20246_v29 = vand.u32 4294901760, %v16137_v34  ;;  %v9303_v35 = vpop.f32.mrb[41].mxu1  ;;  %v20257_v16 = vld [vmem:[#allocation136_spill] sm:$0xff] }
 0x1d1   : > { %v16223_v41 = vpack.c.bf16 %v20238_v1, %v20237_v30  ;;  %v16236_v20 = vsub.f32 %v16139_v62, %v20242_v57  ;;  %20244 = vst [vmem:[#allocation160_spill] sm:$0xff] %v16238_v50  ;;  %v16240_v1 = vld [vmem:[#allocation2 + $0x350] sm:$0xff]  ;;  %v20247_v12 = vand.u32 4294901760, %v16146_v17  ;;  %v20249_v44 = vld [vmem:[#allocation63_spill] sm:$0xff]  ;;  %v20251_v14 = vand.u32 4294901760, %v16153_v59  ;;  %v9305_v17 = vpop.f32.mrb[42].mxu1 }
 0x1d2   : > { %12119 = vmatprep.subr.bf16.mxu0 %v20240_v3  ;;  %20245 = vst [vmem:[#allocation161_spill] sm:$0xff] %v16240_v1  ;;  %4234 = vmatmul.mubr.f32.gmra.mrb[58].mxu0 %v20249_v44  ;;  %v20250_v3 = vld [vmem:[#allocation135_spill] sm:$0xff]  ;;  %v20255_v44 = vand.u32 4294901760, %v16169_v52 }
 0x1d3   : > { %20239 = vst [vmem:[#allocation122_spill] sm:$0xff] %v16223_v41  ;;  %20243 = vst [vmem:[#allocation131_spill] sm:$0xff] %v16236_v20  ;;  %v16246_v30 = vpack.c.bf16 %v20247_v12, %v20246_v29  ;;  %12151 = vmatprep.subr.bf16.mxu1 %v20250_v3  ;;  %v16253_v57 = vsub.f32 %v16153_v59, %v20251_v14  ;;  %v16258_v34 = vld [vmem:[#allocation2 + $0x358] sm:$0xff]  ;;  %v20253_v29 = vpack.c.bf16 %v15267_v15, %v15262_v8  ;;  %v20254_v12 = vld [vmem:[#allocation52_spill] sm:$0xff] }
 0x1d4   : > { %20252 = vst [vmem:[#allocation169_spill] sm:$0xff] %v16258_v34  ;;  %4563 = vmatmul.mubr.f32.gmra.mrb[146].mxu1 %v20254_v12  ;;  %v16267_v14 = vsub.f32 %v16169_v52, %v20255_v44  ;;  %v20256_v59 = vld [vmem:[#allocation147_spill] sm:$0xff]  ;;  %v20262_v41 = vand.u32 4294901760, %v16166_v4  ;;  %v20268_v8 = vand.u32 4294901760, %v16202_v25  ;;  %v16334_v52 = vld [vmem:[#allocation2 + $0x360] sm:$0xff] }
 0x1d5   : > { %20248 = vst [vmem:[#allocation164_spill] sm:$0xff] %v16246_v30  ;;  %12121 = vmatpush3.bf16.msra.mxu0 %v20253_v29  ;;  %v9304_v30 = vadd.f32 %v9303_v35, %v9302_v51  ;;  %4243 = vmatprep.mubr.f32.mxu0 %v20256_v59  ;;  %v20258_v51 = vand.u32 4294901760, %v16151_v33  ;;  %v20259_v35 = vand.u32 4294901760, %v16161_v13  ;;  %v20261_v29 = vpack.c.bf16 %v15300_v58, %v15295_v47  ;;  %v20266_v47 = vld [vmem:[#allocation138_spill] sm:$0xff]  ;;  %v9306_v58 = vpop.f32.mrb[43].mxu1 }
 0x1d6   : > { %12153 = vmatpush3.bf16.msra.mxu1 %v20257_v16  ;;  %4568 = vmatprep.mubr.f32.mxu1 %v20144_v5  ;;  %v20263_v59 = vand.u32 4294901760, %v16184_v7  ;;  %v16308_v15 = vsub.f32 %v16202_v25, %v20268_v8  ;;  %v20277_v25 = vand.u32 4294901760, %v16217_v23  ;;  %20280 = vst [vmem:[#allocation65_spill] sm:$0xff] %v16334_v52  ;;  %v20298_v5 = vpack.c.bf16 %v20186_v38, %v20103_v31  ;;  %v20324_v31 = vld [vmem:[#allocation26_spill] sm:$0xff] }
 0x1d7   : > { %v16280_v44 = vpack.c.bf16 %v20259_v35, %v20258_v51  ;;  %12123 = vmatprep.subr.bf16.mxu0 %v20261_v29  ;;  %v16287_v62 = vadd.f32 %v9304_v30, %v15957_v9  ;;  %v20265_v35 = vld [vmem:[#allocation77_spill] sm:$0xff]  ;;  %12155 = vmatprep.subr.bf16.mxu1 %v20266_v47  ;;  %v20267_v9 = vand.u32 4294901760, %v16200_v54  ;;  %v20273_v29 = vpack.c.bf16 %v15314_v42, %v15305_v43  ;;  %v20282_v42 = vld [vmem:[#allocation142_spill] sm:$0xff] }
 0x1d8   : > { %v16295_v51 = vpack.c.bf16 %v20263_v59, %v20262_v41  ;;  %4249 = vmatmul.mubr.f32.gmra.mrb[60].mxu0 %v20265_v35  ;;  %20269 = vst [vmem:[#allocation175_spill] sm:$0xff] %v16308_v15  ;;  %v20270_v59 = vand.u32 4294901760, %v16204_v37  ;;  %v20281_v43 = vld [vmem:[#allocation17_spill] sm:$0xff] }
 0x1d9   : > { %20260 = vst [vmem:[#allocation172_spill] sm:$0xff] %v16280_v44  ;;  %v16303_v30 = vsub.f32 %v16200_v54, %v20267_v9  ;;  %12125 = vmatpush3.bf16.msra.mxu0 %v20273_v29  ;;  %v20274_v44 = vld [vmem:[#allocation71_spill] sm:$0xff]  ;;  %v9307_v9 = vadd.f32 %v9306_v58, %v9305_v17  ;;  %v20275_v54 = vand.u32 4294901760, %v16215_v61  ;;  %4258 = vmatprep.mubr.f32.mxu0 %v20281_v43  ;;  %v16339_v17 = vand.u32 4294901760, %v16176_v53  ;;  %v16351_v35 = vld [vmem:[#allocation2 + $0x368] sm:$0xff] }
 0x1da   : > { %20264 = vst [vmem:[#allocation174_spill] sm:$0xff] %v16295_v51  ;;  %v16313_v41 = vsub.f32 %v16204_v37, %v20270_v59  ;;  %v16315_v51 = vld [vmem:[#allocation2 + $0x3e0] sm:$0xff]  ;;  %4570 = vmatmul.mubr.f32.gmra.mrb[148].mxu1 %v20274_v44  ;;  %v16330_v59 = vsub.f32 %v16217_v23, %v20277_v25  ;;  %v16332_v37 = vld [vmem:[#allocation2 + $0x3e8] sm:$0xff]  ;;  %v20284_v58 = vand.u32 4294901760, %v16238_v50  ;;  %v20286_v29 = vand.u32 4294901760, %v16240_v1  ;;  %20288 = vst [vmem:[#allocation171_spill] sm:$0xff] %v16351_v35 }
 0x1db   : > { %20272 = vst [vmem:[#allocation178_spill] sm:$0xff] %v16315_v51  ;;  %v16325_v8 = vsub.f32 %v16215_v61, %v20275_v54  ;;  %20279 = vst [vmem:[#allocation163_spill] sm:$0xff] %v16332_v37  ;;  %12157 = vmatpush3.bf16.msra.mxu1 %v20282_v42  ;;  %v20289_v23 = vand.u32 4294901760, %v16213_v28  ;;  %v20290_v43 = vand.u32 4294901760, %v16236_v20  ;;  %v20292_v44 = vpack.c.bf16 %v20101_v45, %v15369_v60  ;;  %v20297_v60 = vld [vmem:[#allocation87_spill] sm:$0xff] }
 0x1dc   : > { %20271 = vst [vmem:[#allocation177_spill] sm:$0xff] %v16313_v41  ;;  %20278 = vst [vmem:[#allocation141_spill] sm:$0xff] %v16330_v59  ;;  %v16344_v54 = vsub.f32 %v16238_v50, %v20284_v58  ;;  %v16349_v25 = vsub.f32 %v16240_v1, %v20286_v29  ;;  %4575 = vmatprep.mubr.f32.mxu1 %v20165_v19  ;;  %v16364_v58 = vadd.f32 %v9307_v9, %v15984_v2  ;;  %v9308_v50 = vpop.f32.mrb[44].mxu1  ;;  %v16391_v2 = vld [vmem:[#allocation2 + $0x3f0] sm:$0xff]  ;;  %v20302_v9 = vld [vmem:[#allocation167_spill] sm:$0xff] }
 0x1dd   : > { %20276 = vst [vmem:[#allocation133_spill] sm:$0xff] %v16325_v8  ;;  %20283 = vst [vmem:[#allocation165_spill] sm:$0xff] %v16339_v17  ;;  %v16357_v61 = vpack.c.bf16 %v20290_v43, %v20289_v23  ;;  %12127 = vmatprep.subr.bf16.mxu0 %v20292_v44  ;;  %v20293_v29 = vand.u32 4294901760, %v16258_v34  ;;  %v20294_v23 = vand.u32 4294901760, %v16253_v57  ;;  %v20295_v43 = vand.u32 4294901760, %v16267_v14  ;;  %4264 = vmatmul.mubr.f32.gmra.mrb[62].mxu0 %v20297_v60  ;;  %v9309_v45 = vpop.f32.mrb[45].mxu1 }
 0x1de   : > { %20285 = vst [vmem:[#allocation20_spill] sm:$0xff] %v16344_v54  ;;  %20287 = vst [vmem:[#allocation170_spill] sm:$0xff] %v16349_v25  ;;  %12159 = vmatprep.subr.bf16.mxu1 %v15888_v26  ;;  %12129 = vmatpush3.bf16.msra.mxu0 %v20298_v5  ;;  %v16393_v44 = vld [vmem:[#allocation2 + $0x3f8] sm:$0xff]  ;;  %v20306_v60 = vand.u32 4294901760, %v16303_v30  ;;  %v9311_v38 = vpop.f32.mrb[46].mxu1 }
 0x1df   : > { %20291 = vst [vmem:[#allocation134_spill] sm:$0xff] %v16357_v61  ;;  %v16369_v1 = vsub.f32 %v16258_v34, %v20293_v29  ;;  %v16376_v61 = vpack.c.bf16 %v20295_v43, %v20294_v23  ;;  %v20299_v34 = vld [vmem:[#allocation79_spill] sm:$0xff]  ;;  %v9310_v23 = vadd.f32 %v9309_v45, %v9308_v50  ;;  %20300 = vst [vmem:[#allocation146_spill] sm:$0xff] %v16391_v2  ;;  %4273 = vmatprep.mubr.f32.mxu0 %v20302_v9  ;;  %v20303_v29 = vld [vmem:[#allocation109_spill] sm:$0xff] }
 0x1e0   : > { %4577 = vmatmul.mubr.f32.gmra.mrb[150].mxu1 %v20299_v34  ;;  %20301 = vst [vmem:[#allocation62_spill] sm:$0xff] %v16393_v44  ;;  %v16400_v50 = vld [vmem:[#allocation2 + $0x370] sm:$0xff]  ;;  %v16402_v45 = vld [vmem:[#allocation2 + $0x378] sm:$0xff]  ;;  %v20309_v9 = vpack.c.bf16 %v20195_v6, %v20194_v18  ;;  %v20310_v34 = vand.u32 4294901760, %v16315_v51  ;;  %v20314_v6 = vld [vmem:[#allocation92_spill] sm:$0xff]  ;;  %v20315_v18 = vand.u32 4294901760, %v16332_v37 }
 0x1e1   : > { %20296 = vst [vmem:[#allocation145_spill] sm:$0xff] %v16376_v61  ;;  %12161 = vmatpush3.bf16.msra.mxu1 %v20303_v29  ;;  %20304 = vst [vmem:[#allocation148_spill] sm:$0xff] %v16400_v50  ;;  %v20307_v61 = vand.u32 4294901760, %v16308_v15  ;;  %4582 = vmatprep.mubr.f32.mxu1 %v20178_v21  ;;  %v16415_v5 = vadd.f32 %v9310_v23, %v16023_v63  ;;  %v9312_v63 = vpop.f32.mrb[47].mxu1  ;;  %v20316_v23 = vand.u32 4294901760, %v16334_v52 }
 0x1e2   : > { %20305 = vst [vmem:[#allocation135_spill] sm:$0xff] %v16402_v45  ;;  %12131 = vmatprep.subr.bf16.mxu0 %v20309_v9  ;;  %v16421_v19 = vsub.f32 %v16315_v51, %v20310_v34  ;;  %4279 = vmatmul.mubr.f32.gmra.mrb[64].mxu0 %v20314_v6  ;;  %v16434_v9 = vsub.f32 %v16332_v37, %v20315_v18  ;;  %v20320_v51 = vand.u32 4294901760, %v16351_v35  ;;  %v20330_v37 = vld [vmem:[#allocation107_spill] sm:$0xff] }
 0x1e3   : > { %v16408_v43 = vpack.c.bf16 %v20307_v61, %v20306_v60  ;;  %v20311_v61 = vand.u32 4294901760, %v16313_v41  ;;  %v20312_v60 = vand.u32 4294901760, %v16325_v8  ;;  %12163 = vmatprep.subr.bf16.mxu1 %v15939_v11  ;;  %v16439_v34 = vsub.f32 %v16334_v52, %v20316_v23  ;;  %v20322_v52 = vld [vmem:[#allocation149_spill] sm:$0xff]  ;;  %v20329_v23 = vld [vmem:[#allocation139_spill] sm:$0xff] }
 0x1e4   : > { %v9313_v6 = vadd.f32 %v9312_v63, %v9311_v38  ;;  %v16450_v18 = vsub.f32 %v16351_v35, %v20320_v51  ;;  %4288 = vmatprep.mubr.f32.mxu0 %v20322_v52  ;;  %v20325_v38 = vand.u32 4294901760, %v16330_v59  ;;  %v20326_v63 = vand.u32 4294901760, %v16344_v54 }
 0x1e5   : > { %20308 = vst [vmem:[#allocation52_spill] sm:$0xff] %v16408_v43  ;;  %v16427_v43 = vpack.c.bf16 %v20312_v60, %v20311_v61  ;;  %20317 = vst [vmem:[#allocation138_spill] sm:$0xff] %v16439_v34  ;;  %v20318_v60 = vpack.c.bf16 %v20197_v40, %v20196_v39  ;;  %12165 = vmatpush3.bf16.msra.mxu1 %v15946_v49  ;;  %v20323_v61 = vld [vmem:[#allocation137_spill] sm:$0xff]  ;;  %v4316_v40 = vsub.f32 %v16176_v53, %v16339_v17 }
 0x1e6   : > { %20321 = vst [vmem:[#allocation142_spill] sm:$0xff] %v16450_v18  ;;  %v12138_v39 = vpack.c.bf16 %v20324_v31, %v20323_v61  ;;  %v16464_v51 = vpack.c.bf16 %v20326_v63, %v20325_v38  ;;  %v12140_v52 = vpack.c.bf16 %v20330_v37, %v20329_v23  ;;  %v16473_v31 = vadd.f32 %v9313_v6, %v16054_v46  ;;  %v9346_v61 = vpop.f32.mrb[48].mxu1 }
 0x1e7   : > { %20313 = vst [vmem:[#allocation136_spill] sm:$0xff] %v16427_v43  ;;  %12133 = vmatpush3.bf16.msra.mxu0 %v20318_v60  ;;  %v20319_v43 = vld [vmem:[#allocation88_spill] sm:$0xff]  ;;  %v20328_v60 = vpack.c.bf16 %v20132_v27, %v20130_v48  ;;  %v20332_v38 = vand.u32 4294901760, %v16369_v1  ;;  %12167 = vmatprep.subr.bf16.mxu1 %v15972_v56  ;;  %v9347_v48 = vpop.f32.mrb[49].mxu1  ;;  %v20335_v46 = vand.u32 4294901760, %v16391_v2  ;;  %v20337_v23 = vand.u32 4294901760, %v16393_v44 }
 0x1e8   : > { %4584 = vmatmul.mubr.f32.gmra.mrb[152].mxu1 %v20319_v43  ;;  %20327 = vst [vmem:[#allocation109_spill] sm:$0xff] %v16464_v51  ;;  %v20331_v43 = vand.u32 4294901760, %v16349_v25  ;;  %v20334_v51 = vld [vmem:[#allocation101_spill] sm:$0xff]  ;;  %v9348_v35 = vadd.f32 %v9347_v48, %v9346_v61  ;;  %v20341_v37 = vand.u32 4294901760, %v16400_v50  ;;  %v20349_v61 = vand.u32 4294901760, %v16434_v9 }
 0x1e9   : > { %12135 = vmatprep.subr.bf16.mxu0 %v20328_v60  ;;  %4589 = vmatprep.mubr.f32.mxu1 %v20191_v22  ;;  %v16489_v6 = vsub.f32 %v16391_v2, %v20335_v46  ;;  %v16494_v60 = vsub.f32 %v16393_v44, %v20337_v23  ;;  %v20343_v46 = vand.u32 4294901760, %v16402_v45  ;;  %v20345_v23 = vld [vmem:[#allocation153_spill] sm:$0xff]  ;;  %v20346_v44 = vld [vmem:[#allocation112_spill] sm:$0xff] }
 0x1ea   : > { %v16480_v63 = vpack.c.bf16 %v20332_v38, %v20331_v43  ;;  %4294 = vmatmul.mubr.f32.gmra.mrb[66].mxu0 %v20334_v51  ;;  %v20339_v43 = vpack.c.bf16 %v15509_v55, %v15494_v36  ;;  %v20340_v38 = vld [vmem:[#allocation94_spill] sm:$0xff]  ;;  %12169 = vmatpush3.bf16.msra.mxu1 %v20346_v44  ;;  %v16513_v36 = vand.u32 4294901760, %v4316_v40  ;;  %v20348_v55 = vand.u32 4294901760, %v16421_v19 }
 0x1eb   : > { %20336 = vst [vmem:[#allocation26_spill] sm:$0xff] %v16489_v6  ;;  %20338 = vst [vmem:[#allocation139_spill] sm:$0xff] %v16494_v60  ;;  %v16509_v51 = vsub.f32 %v16402_v45, %v20343_v46  ;;  %4303 = vmatprep.mubr.f32.mxu0 %v20345_v23  ;;  %v20353_v46 = vld [vmem:[#allocation49_spill] sm:$0xff]  ;;  %v9349_v23 = vpop.f32.mrb[50].mxu1  ;;  %v20355_v40 = vand.u32 4294901760, %v16450_v18 }
 0x1ec   : > { %20333 = vst [vmem:[#allocation137_spill] sm:$0xff] %v16480_v63  ;;  %12137 = vmatpush3.bf16.msra.mxu0 %v20339_v43  ;;  %4591 = vmatmul.mubr.f32.gmra.mrb[154].mxu1 %v20340_v38  ;;  %v16504_v63 = vsub.f32 %v16400_v50, %v20341_v37  ;;  %20347 = vst [vmem:[#allocation112_spill] sm:$0xff] %v16513_v36  ;;  %v16519_v48 = vpack.c.bf16 %v20349_v61, %v20348_v55  ;;  %v20351_v37 = vld [vmem:[#allocation113_spill] sm:$0xff]  ;;  %v20352_v43 = vld [vmem:[#allocation151_spill] sm:$0xff]  ;;  %v20354_v50 = vand.u32 4294901760, %v16439_v34 }
 0x1ed   : > { %20344 = vst [vmem:[#allocation183_spill] sm:$0xff] %v16509_v51  ;;  %12139 = vmatprep.subr.bf16.mxu0 %v12138_v39  ;;  %4596 = vmatprep.mubr.f32.mxu1 %v20202_v32  ;;  %v12142_v27 = vpack.c.bf16 %v20352_v43, %v20351_v37  ;;  %v16525_v45 = vadd.f32 %v9348_v35, %v20353_v46  ;;  %v20357_v38 = vld [vmem:[#allocation46_spill] sm:$0xff]  ;;  %v20358_v55 = vld [vmem:[#allocation84_spill] sm:$0xff]  ;;  %v9350_v39 = vpop.f32.mrb[51].mxu1  ;;  %v19123_v61 = vand.u32 4294901760, %v16489_v6  ;;  %v20361_v43 = vld [vmem:[#allocation181_spill] sm:$0xff] }
 0x1ee   : > { %20342 = vst [vmem:[#allocation107_spill] sm:$0xff] %v16504_v63  ;;  %20350 = vst [vmem:[#allocation184_spill] sm:$0xff] %v16519_v48  ;;  %v16531_v2 = vpack.c.bf16 %v20355_v40, %v20354_v50  ;;  %4309 = vmatmul.mubr.f32.gmra.mrb[68].mxu0 %v20357_v38  ;;  %12171 = vmatprep.subr.bf16.mxu1 %v20358_v55  ;;  %v19122_v48 = vand.u32 4294901760, %v16494_v60  ;;  %v20359_v37 = vld [vmem:[#allocation100_spill] sm:$0xff]  ;;  %v9351_v32 = vadd.f32 %v9350_v39, %v9349_v23  ;;  %v20365_v23 = vld [vmem:[#allocation155_spill] sm:$0xff]  ;;  %v9352_v22 = vpop.f32.mrb[52].mxu1 }
 0x1ef   : > { %v20360_v35 = vld [vmem:[#allocation32_spill] sm:$0xff]  ;;  %4318 = vmatprep.mubr.f32.mxu0 %v16513_v36  ;;  %v20366_v39 = vand.u32 4294901760, %v20365_v23  ;;  %v20368_v36 = vand.u32 4294901760, %v16504_v63  ;;  %v20369_v38 = vand.u32 4294901760, %v16509_v51  ;;  %v20374_v23 = vld [vmem:[#allocation31_spill] sm:$0xff] }
 0x1f0   : > { %20356 = vst [vmem:[#allocation113_spill] sm:$0xff] %v16531_v2  ;;  %12141 = vmatpush3.bf16.msra.mxu0 %v12140_v52  ;;  %4598 = vmatmul.mubr.f32.gmra.mrb[156].mxu1 %v20359_v37  ;;  %v12144_v46 = vpack.c.bf16 %v20361_v43, %v20360_v35  ;;  %v20362_v40 = vld [vmem:[#allocation28_spill] sm:$0xff]  ;;  %v16548_v2 = vpack.c.bf16 %v19122_v48, %v19123_v61  ;;  %v20364_v52 = vand.u32 4294901760, %v15735_v0  ;;  %v20367_v43 = vld [vmem:[#allocation57_spill] sm:$0xff]  ;;  %v9353_v61 = vpop.f32.mrb[53].mxu1 }
 0x1f1   : > { %12173 = vmatpush3.bf16.msra.mxu1 %v20362_v40  ;;  %12143 = vmatprep.subr.bf16.mxu0 %v12142_v27  ;;  %v16556_v50 = vadd.f32 %v9351_v32, %v20367_v43  ;;  %v16562_v37 = vpack.c.bf16 %v20369_v38, %v20368_v36  ;;  %v20371_v48 = vld [vmem:[#allocation44_spill] sm:$0xff]  ;;  %v20380_v38 = vld [vmem:[#allocation38_spill] sm:$0xff] }
 0x1f2   : > { %20363 = vst [vmem:[#allocation151_spill] sm:$0xff] %v16548_v2  ;;  %4603 = vmatprep.mubr.f32.mxu1 %v16115_v10  ;;  %v12178_v35 = vpack.c.bf16 %v20366_v39, %v20364_v52  ;;  %4324 = vmatmul.mubr.f32.gmra.mrb[70].mxu0 %v20371_v48  ;;  %v20372_v27 = vld [vmem:[#allocation144_spill] sm:$0xff]  ;;  %v20375_v52 = vand.u32 4294901760, %v20374_v23  ;;  %v9354_v2 = vadd.f32 %v9353_v61, %v9352_v22  ;;  %v20378_v10 = vld [vmem:[#allocation9_spill] sm:$0xff]  ;;  %v20381_v36 = vld [vmem:[#allocation114_spill] sm:$0xff]  ;;  %v9355_v48 = vpop.f32.mrb[54].mxu1 }
 0x1f3   : > { %20370 = vst [vmem:[#allocation49_spill] sm:$0xff] %v16562_v37  ;;  %12175 = vmatprep.subr.bf16.mxu1 %v20372_v27  ;;  %v20373_v0 = vld [vmem:[#allocation104_spill] sm:$0xff]  ;;  %4740 = vmatprep.mubr.f32.mxu0 %v20378_v10  ;;  %v9356_v23 = vpop.f32.mrb[55].mxu1  ;;  %v20386_v10 = vld [vmem:[#allocation53_spill] sm:$0xff] }
 0x1f4   : > { %12145 = vmatpush3.bf16.msra.mxu0 %v12144_v46  ;;  %4605 = vmatmul.mubr.f32.gmra.mrb[158].mxu1 %v20373_v0  ;;  %v20376_v39 = vld [vmem:[#allocation64_spill] sm:$0xff]  ;;  %v16575_v37 = vadd.f32 %v9354_v2, %v20381_v36  ;;  %v20382_v46 = vld [vmem:[#allocation51_spill] sm:$0xff]  ;;  %v20383_v0 = vld [vmem:[#allocation37_spill] sm:$0xff]  ;;  %v9357_v22 = vadd.f32 %v9356_v23, %v9355_v48 }
 0x1f5   : > { %v20377_v32 = vand.u32 4294901760, %v20376_v39  ;;  %v20379_v63 = vld [vmem:[#allocation156_spill] sm:$0xff]  ;;  %12179 = vmatprep.subr.bf16.mxu0 %v12178_v35  ;;  %4910 = vmatprep.mubr.f32.mxu1 %v20380_v38  ;;  %v20384_v39 = vld [vmem:[#allocation55_spill] sm:$0xff]  ;;  %v20387_v35 = vld [vmem:[#allocation130_spill] sm:$0xff] }
 0x1f6   : > { %12177 = vmatpush3.bf16.msra.mxu1 %v20379_v63  ;;  %v20385_v61 = vld [vmem:[#allocation60_spill] sm:$0xff]  ;;  %v16585_v2 = vadd.f32 %v9357_v22, %v16230_v24  ;;  %v20391_v48 = vld [vmem:[#allocation61_spill] sm:$0xff]  ;;  %v20393_v24 = vld [vmem:[#allocation166_spill] sm:$0xff] }
 0x1f7   : > { %v12180_v43 = vpack.c.bf16 %v20377_v32, %v20375_v52  ;;  %4743 = vmatmul.mubr.f32.vlgmr.msra.gmra.mrb[72].mxu0 %v20382_v46  ;;  %12211 = vmatprep.subr.bf16.mxu1 %v20383_v0  ;;  %v20388_v52 = vld [vmem:[#allocation43_spill] sm:$0xff]  ;;  %v9358_v32 = vpop.f32.mrb[56].mxu1  ;;  %v20389_v38 = vld [vmem:[#allocation56_spill] sm:$0xff]  ;;  %v16593_v46 = vld [vmem:[#allocation2 + $0x388] sm:$0xff] }
 0x1f8   : > { %4749 = vmatprep.mubr.f32.mxu0 %v20385_v61  ;;  %v9359_v0 = vpop.f32.mrb[57].mxu1  ;;  %v16591_v36 = vld [vmem:[#allocation2 + $0x380] sm:$0xff]  ;;  %v20398_v61 = vld [vmem:[#allocation11_spill] sm:$0xff] }
 0x1f9   : > { %12181 = vmatpush3.bf16.msra.mxu0 %v12180_v43  ;;  %4914 = vmatmul.mubr.f32.vlgmr.msra.gmra.mrb[160].mxu1 %v20384_v39  ;;  %v20390_v43 = vld [vmem:[#allocation108_spill] sm:$0xff]  ;;  %v9360_v23 = vadd.f32 %v9359_v0, %v9358_v32  ;;  %v20392_v39 = vld [vmem:[#allocation35_spill] sm:$0xff] }
 0x1fa   : > { %12213 = vmatpush3.bf16.msra.mxu1 %v20386_v10  ;;  %12183 = vmatprep.subr.bf16.mxu0 %v20387_v35  ;;  %v20394_v22 = vld [vmem:[#allocation12_spill] sm:$0xff] }
 0x1fb   : > { %4921 = vmatprep.mubr.f32.mxu1 %v20388_v52  ;;  %4752 = vmatmul.mubr.f32.gmra.mrb[74].mxu0 %v20389_v38  ;;  %v16599_v10 = vld [vmem:[#allocation2 + $0x300] sm:$0xff]  ;;  %v16604_v35 = vadd.f32 %v9360_v23, %v16287_v62  ;;  %v20395_v52 = vld [vmem:[#allocation73_spill] sm:$0xff] }
 0x1fc   : > { %12215 = vmatprep.subr.bf16.mxu1 %v20250_v3  ;;  %4758 = vmatprep.mubr.f32.mxu0 %v20392_v39  ;;  %v16601_v3 = vld [vmem:[#allocation2 + $0x308] sm:$0xff]  ;;  %v20432_v38 = vld [vmem:[#allocation132_spill] sm:$0xff] }
 0x1fd   : > { %12185 = vmatpush3.bf16.msra.mxu0 %v20390_v43  ;;  %4925 = vmatmul.mubr.f32.gmra.mrb[162].mxu1 %v20391_v48  ;;  %v9361_v43 = vpop.f32.mrb[58].mxu1  ;;  %v20404_v62 = vld [vmem:[#allocation121_spill] sm:$0xff]  ;;  %v20416_v48 = vld [vmem:[#allocation18_spill] sm:$0xff] }
 0x1fe   : > { %12217 = vmatpush3.bf16.msra.mxu1 %v20257_v16  ;;  %12187 = vmatprep.subr.bf16.mxu0 %v20393_v24  ;;  %v9362_v0 = vpop.f32.mrb[59].mxu1  ;;  %v20396_v24 = vld [vmem:[#allocation168_spill] sm:$0xff] }
 0x1ff   : > { %4932 = vmatprep.mubr.f32.mxu1 %v20394_v22  ;;  %4761 = vmatmul.mubr.f32.gmra.mrb[76].mxu0 %v20395_v52  ;;  %v20397_v22 = vld [vmem:[#allocation75_spill] sm:$0xff]  ;;  %v9363_v39 = vadd.f32 %v9362_v0, %v9361_v43  ;;  %v20399_v52 = vld [vmem:[#allocation176_spill] sm:$0xff]  ;;  %v9364_v32 = vpop.f32.mrb[60].mxu1  ;;  %v20402_v43 = vand.u32 4294901760, %v16591_v36  ;;  %v20403_v0 = vand.u32 4294901760, %v16593_v46 }
 0x200   : > { %12219 = vmatprep.subr.bf16.mxu1 %v20266_v47  ;;  %4767 = vmatprep.mubr.f32.mxu0 %v20398_v61  ;;  %v20400_v47 = vld [vmem:[#allocation45_spill] sm:$0xff]  ;;  %v20409_v61 = vand.u32 4294901760, %v16601_v3 }
 0x201   : > { %12189 = vmatpush3.bf16.msra.mxu0 %v20396_v24  ;;  %4936 = vmatmul.mubr.f32.gmra.mrb[164].mxu1 %v20397_v22  ;;  %v16619_v16 = vadd.f32 %v9363_v39, %v16364_v58  ;;  %v20401_v24 = vld [vmem:[#allocation81_spill] sm:$0xff]  ;;  %v16631_v23 = vsub.f32 %v16593_v46, %v20403_v0  ;;  %v20405_v58 = vld [vmem:[#allocation83_spill] sm:$0xff]  ;;  %v20414_v22 = vld [vmem:[#allocation180_spill] sm:$0xff] }
 0x202   : > { %12221 = vmatpush3.bf16.msra.mxu1 %v20282_v42  ;;  %12191 = vmatprep.subr.bf16.mxu0 %v20399_v52  ;;  %v16626_v42 = vsub.f32 %v16591_v36, %v20402_v43  ;;  %v9365_v52 = vpop.f32.mrb[61].mxu1  ;;  %v16645_v0 = vsub.f32 %v16601_v3, %v20409_v61  ;;  %v20415_v61 = vld [vmem:[#allocation23_spill] sm:$0xff] }
 0x203   : > { %4943 = vmatprep.mubr.f32.mxu1 %v20400_v47  ;;  %4770 = vmatmul.mubr.f32.gmra.mrb[78].mxu0 %v20401_v24  ;;  %v9366_v39 = vadd.f32 %v9365_v52, %v9364_v32  ;;  %v20406_v47 = vld [vmem:[#allocation125_spill] sm:$0xff]  ;;  %v20411_v24 = vld [vmem:[#allocation179_spill] sm:$0xff]  ;;  %v9367_v52 = vpop.f32.mrb[62].mxu1 }
 0x204   : > { %12223 = vmatprep.subr.bf16.mxu1 %v15888_v26  ;;  %4776 = vmatprep.mubr.f32.mxu0 %v20406_v47  ;;  %v20407_v26 = vand.u32 4294901760, %v16599_v10  ;;  %20410 = vst [vmem:[#allocation32_spill] sm:$0xff] %v16645_v0  ;;  %v20413_v47 = vld [vmem:[#allocation90_spill] sm:$0xff] }
 0x205   : > { %12193 = vmatpush3.bf16.msra.mxu0 %v20404_v62  ;;  %4947 = vmatmul.mubr.f32.gmra.mrb[166].mxu1 %v20405_v58  ;;  %v20412_v62 = vld [vmem:[#allocation14_spill] sm:$0xff]  ;;  %v16650_v32 = vadd.f32 %v9366_v39, %v16415_v5  ;;  %v9368_v58 = vpop.f32.mrb[63].mxu1 }
 0x206   : > { %12225 = vmatpush3.bf16.msra.mxu1 %v20303_v29  ;;  %v16640_v43 = vsub.f32 %v16599_v10, %v20407_v26  ;;  %12195 = vmatprep.subr.bf16.mxu0 %v20411_v24  ;;  %v9369_v24 = vadd.f32 %v9368_v58, %v9367_v52  ;;  %v9402_v29 = vpop.f32.mrb[64].mxu1  ;;  %v20420_v58 = vand.u32 4294901760, %v16626_v42  ;;  %v20421_v52 = vand.u32 4294901760, %v16631_v23 }
 0x207   : > { %4954 = vmatprep.mubr.f32.mxu1 %v20412_v62  ;;  %4779 = vmatmul.mubr.f32.gmra.mrb[80].mxu0 %v20413_v47  ;;  %v20417_v62 = vld [vmem:[#allocation27_spill] sm:$0xff]  ;;  %v9403_v5 = vpop.f32.mrb[65].mxu1 }
 0x208   : > { %20408 = vst [vmem:[#allocation84_spill] sm:$0xff] %v16640_v43  ;;  %12227 = vmatprep.subr.bf16.mxu1 %v15939_v11  ;;  %4785 = vmatprep.mubr.f32.mxu0 %v20416_v48  ;;  %v20418_v11 = vld [vmem:[#allocation118_spill] sm:$0xff]  ;;  %v16665_v26 = vadd.f32 %v9369_v24, %v16473_v31  ;;  %v5706_v39 = vsub.f32 %v16631_v23, %v20421_v52  ;;  %v20424_v24 = vld [vmem:[#allocation21_spill] sm:$0xff] }
 0x209   : > { %12197 = vmatpush3.bf16.msra.mxu0 %v20414_v22  ;;  %4958 = vmatmul.mubr.f32.gmra.mrb[168].mxu1 %v20415_v61  ;;  %v20419_v22 = vld [vmem:[#allocation96_spill] sm:$0xff]  ;;  %v9404_v31 = vadd.f32 %v9403_v5, %v9402_v29  ;;  %v20427_v61 = vld [vmem:[#allocation182_spill] sm:$0xff]  ;;  %v20428_v52 = vld [vmem:[#allocation25_spill] sm:$0xff]  ;;  %v9405_v29 = vpop.f32.mrb[66].mxu1 }
 0x20a   : > { %12229 = vmatpush3.bf16.msra.mxu1 %v15946_v49  ;;  %12199 = vmatprep.subr.bf16.mxu0 %v20417_v62  ;;  %v5699_v49 = vsub.f32 %v16626_v42, %v20420_v58  ;;  %v20422_v62 = vld [vmem:[#allocation150_spill] sm:$0xff]  ;;  %v20426_v58 = vand.u32 4294901760, %v16645_v0 }
 0x20b   : > { %4965 = vmatprep.mubr.f32.mxu1 %v20418_v11  ;;  %4788 = vmatmul.mubr.f32.gmra.mrb[82].mxu0 %v20419_v22  ;;  %v20423_v11 = vld [vmem:[#allocation98_spill] sm:$0xff] }
 0x20c   : > { %12231 = vmatprep.subr.bf16.mxu1 %v15972_v56  ;;  %4794 = vmatprep.mubr.f32.mxu0 %v20424_v24  ;;  %v20425_v56 = vand.u32 4294901760, %v16640_v43  ;;  %v5594_v22 = vsub.f32 %v16645_v0, %v20426_v58  ;;  %v20429_v5 = vld [vmem:[#allocation102_spill] sm:$0xff]  ;;  %v5707_v24 = vand.u32 4294901760, %v5706_v39  ;;  %v20433_v58 = vand.u32 4294901760, %v20432_v38  ;;  %v9406_v0 = vpop.f32.mrb[67].mxu1 }
 0x20d   : > { %12201 = vmatpush3.bf16.msra.mxu0 %v20422_v62  ;;  %4969 = vmatmul.mubr.f32.gmra.mrb[170].mxu1 %v20423_v11  ;;  %v16688_v62 = vadd.f32 %v9404_v31, %v16525_v45  ;;  %v20430_v11 = vld [vmem:[#allocation128_spill] sm:$0xff]  ;;  %v20435_v45 = vld [vmem:[#allocation41_spill] sm:$0xff]  ;;  %v20436_v31 = vand.u32 4294901760, %v16591_v36  ;;  %v9407_v39 = vadd.f32 %v9406_v0, %v9405_v29  ;;  %v9408_v29 = vpop.f32.mrb[68].mxu1 }
 0x20e   : > { %12233 = vmatpush3.bf16.msra.mxu1 %v20346_v44  ;;  %v5587_v48 = vsub.f32 %v16640_v43, %v20425_v56  ;;  %12203 = vmatprep.subr.bf16.mxu0 %v20427_v61  ;;  %v5700_v44 = vand.u32 4294901760, %v5699_v49  ;;  %v20431_v56 = vand.u32 4294901760, %v20430_v11  ;;  %v5720_v61 = vsub.f32 %v20432_v38, %v20433_v58  ;;  %v20442_v36 = vld [vmem:[#allocation36_spill] sm:$0xff] }
 0x20f   : > { %4976 = vmatprep.mubr.f32.mxu1 %v20428_v52  ;;  %4797 = vmatmul.mubr.f32.gmra.mrb[84].mxu0 %v20429_v5  ;;  %v20434_v52 = vld [vmem:[#allocation152_spill] sm:$0xff]  ;;  %v20437_v5 = vand.u32 4294901760, %v16593_v46  ;;  %v20443_v46 = vand.u32 4294901760, %v16151_v33 }
 0x210   : > { %12235 = vmatprep.subr.bf16.mxu1 %v20358_v55  ;;  %v5713_v47 = vsub.f32 %v20430_v11, %v20431_v56  ;;  %4803 = vmatprep.mubr.f32.mxu0 %v16176_v53  ;;  %v5588_v49 = vand.u32 4294901760, %v5587_v48  ;;  %v5595_v56 = vand.u32 4294901760, %v5594_v22  ;;  %v20438_v11 = vld [vmem:[#allocation16_spill] sm:$0xff]  ;;  %v16723_v22 = vadd.f32 %v9407_v39, %v16556_v50  ;;  %v9409_v53 = vpop.f32.mrb[69].mxu1 }
 0x211   : > { %12205 = vmatpush3.bf16.msra.mxu0 %v20434_v52  ;;  %4980 = vmatmul.mubr.f32.gmra.mrb[172].mxu1 %v20435_v45  ;;  %v16704_v55 = vpack.c.bf16 %v20437_v5, %v20436_v31  ;;  %v20439_v58 = vand.u32 4294901760, %v20438_v11  ;;  %v20440_v52 = vld [vmem:[#allocation116_spill] sm:$0xff]  ;;  %v5727_v0 = vsub.f32 %v16151_v33, %v20443_v46  ;;  %v20445_v5 = vld [vmem:[#allocation42_spill] sm:$0xff]  ;;  %v20447_v31 = vand.u32 4294901760, %v16601_v3  ;;  %v20452_v3 = vld [vmem:[#allocation39_spill] sm:$0xff] }
 0x212   : > { %12237 = vmatpush3.bf16.msra.mxu1 %v20362_v40  ;;  %v20441_v43 = vand.u32 4294901760, %v20440_v52  ;;  %12207 = vmatprep.subr.bf16.mxu0 %v20442_v36  ;;  %v20444_v40 = vand.u32 4294901760, %v16161_v13  ;;  %v12274_v36 = vpack.c.bf16 %v5707_v24, %v5700_v44  ;;  %v5714_v46 = vand.u32 4294901760, %v5713_v47  ;;  %v20448_v33 = vld [vmem:[#allocation154_spill] sm:$0xff]  ;;  %v20453_v24 = vld [vmem:[#allocation124_spill] sm:$0xff] }
 0x213   : > { %v5601_v38 = vsub.f32 %v20438_v11, %v20439_v58  ;;  %4987 = vmatprep.mubr.f32.mxu1 %v16339_v17  ;;  %4806 = vmatmul.mubr.f32.gmra.mrb[86].mxu0 %v20445_v5  ;;  %v5721_v17 = vand.u32 4294901760, %v5720_v61  ;;  %v20450_v50 = vand.u32 4294901760, %v16166_v4  ;;  %v9410_v5 = vadd.f32 %v9409_v53, %v9408_v29  ;;  %v20455_v61 = vld [vmem:[#allocation157_spill] sm:$0xff]  ;;  %v20459_v53 = vld [vmem:[#allocation140_spill] sm:$0xff] }
 0x214   : > { %v5608_v45 = vsub.f32 %v20440_v52, %v20441_v43  ;;  %v5734_v48 = vsub.f32 %v16161_v13, %v20444_v40  ;;  %12239 = vmatprep.subr.bf16.mxu1 %v20372_v27  ;;  %v20446_v43 = vand.u32 4294901760, %v16599_v10  ;;  %v20449_v40 = vld [vmem:[#allocation47_spill] sm:$0xff]  ;;  %v20451_v27 = vand.u32 4294901760, %v16184_v7  ;;  %5157 = vmatprep.mubr.f32.mxu0 %v20452_v3 }
 0x215   : > { %12209 = vmatpush3.bf16.msra.mxu0 %v20448_v33  ;;  %4991 = vmatmul.mubr.f32.gmra.mrb[174].mxu1 %v20449_v40  ;;  %v5615_v39 = vsub.f32 %v16166_v4, %v20450_v50  ;;  %v12276_v47 = vpack.c.bf16 %v5595_v56, %v5588_v49  ;;  %v20454_v44 = vand.u32 4294901760, %v20453_v24  ;;  %v20456_v33 = vand.u32 4294901760, %v20455_v61  ;;  %v20457_v50 = vld [vmem:[#allocation158_spill] sm:$0xff]  ;;  %v9411_v24 = vpop.f32.mrb[70].mxu1 }
 0x216   : > { %v16731_v58 = vpack.c.bf16 %v20447_v31, %v20446_v43  ;;  %v5622_v10 = vsub.f32 %v16184_v7, %v20451_v27  ;;  %12241 = vmatpush3.bf16.msra.mxu1 %v20379_v63  ;;  %v5602_v31 = vand.u32 4294901760, %v5601_v38  ;;  %v5609_v40 = vand.u32 4294901760, %v5608_v45  ;;  %12243 = vmatprep.subr.bf16.mxu0 %v16704_v55 }
 0x217   : > { %v16747_v43 = vpack.c.bf16 %v20456_v33, %v20454_v44  ;;  %5310 = vmatprep.mubr.f32.mxu1 %v20452_v3  ;;  %v20458_v27 = vand.u32 4294901760, %v20457_v50  ;;  %v20460_v29 = vand.u32 4294901760, %v20459_v53  ;;  %v5728_v63 = vand.u32 4294901760, %v5727_v0  ;;  %v20461_v44 = vld [vmem:[#allocation50_spill] sm:$0xff]  ;;  %12275 = vmatprep.subr.bf16.mxu1 %v12274_v36  ;;  %v9412_v50 = vpop.f32.mrb[71].mxu1  ;;  %v20468_v53 = vld [vmem:[#allocation8_spill] sm:$0xff] }
 0x218   : > { %v5735_v49 = vand.u32 4294901760, %v5734_v48  ;;  %v16758_v56 = vadd.f32 %v9410_v5, %v16575_v37  ;;  %5159 = vmatmul.mubr.f32.vlgmr.msra.gmra.mrb[88].mxu0 %v20461_v44  ;;  %v12278_v38 = vpack.c.bf16 %v5721_v17, %v5714_v46  ;;  %v20462_v45 = vand.u32 4294901760, %v16213_v28  ;;  %v20464_v37 = vld [vmem:[#allocation40_spill] sm:$0xff]  ;;  %v20466_v48 = vld [vmem:[#allocation159_spill] sm:$0xff] }
 0x219   : > { %v16755_v7 = vpack.c.bf16 %v20460_v29, %v20458_v27  ;;  %v20463_v61 = vand.u32 4294901760, %v16236_v20  ;;  %12245 = vmatpush3.bf16.msra.mxu0 %v16731_v58  ;;  %5312 = vmatmul.mubr.f32.vlgmr.msra.gmra.mrb[176].mxu1 %v20461_v44  ;;  %v20465_v0 = vand.u32 4294901760, %v20464_v37  ;;  %v20467_v5 = vand.u32 4294901760, %v20466_v48  ;;  %v20471_v37 = vld [vmem:[#allocation15_spill] sm:$0xff] }
 0x21a   : > { %v5741_v3 = vsub.f32 %v16213_v28, %v20462_v45  ;;  %v5616_v17 = vand.u32 4294901760, %v5615_v39  ;;  %v5623_v36 = vand.u32 4294901760, %v5622_v10  ;;  %v9413_v46 = vadd.f32 %v9412_v50, %v9411_v24  ;;  %5164 = vmatprep.mubr.f32.mxu0 %v20468_v53  ;;  %12277 = vmatpush3.bf16.msra.mxu1 %v12276_v47  ;;  %v20473_v10 = vld [vmem:[#allocation123_spill] sm:$0xff] }
 0x21b   : > { %v5748_v33 = vsub.f32 %v16236_v20, %v20463_v61  ;;  %v16773_v27 = vpack.c.bf16 %v20467_v5, %v20465_v0  ;;  %v12280_v29 = vpack.c.bf16 %v5609_v40, %v5602_v31  ;;  %v20469_v45 = vand.u32 4294901760, %v16253_v57  ;;  %12247 = vmatprep.subr.bf16.mxu0 %v16747_v43  ;;  %5317 = vmatprep.mubr.f32.mxu1 %v20468_v53  ;;  %v9414_v31 = vpop.f32.mrb[72].mxu1 }
 0x21c   : > { %v20470_v20 = vand.u32 4294901760, %v16267_v14  ;;  %v20472_v39 = vand.u32 4294901760, %v20471_v37  ;;  %v20474_v24 = vand.u32 4294901760, %v20473_v10  ;;  %v12282_v47 = vpack.c.bf16 %v5735_v49, %v5728_v63  ;;  %5166 = vmatmul.mubr.f32.gmra.mrb[90].mxu0 %v20254_v12  ;;  %12279 = vmatprep.subr.bf16.mxu1 %v12278_v38  ;;  %v20477_v63 = vld [vmem:[#allocation127_spill] sm:$0xff] }
 0x21d   : > { %v5629_v61 = vsub.f32 %v16253_v57, %v20469_v45  ;;  %v16791_v40 = vadd.f32 %v9413_v46, %v16585_v2  ;;  %v5742_v0 = vand.u32 4294901760, %v5741_v3  ;;  %v20475_v48 = vand.u32 4294901760, %v16303_v30  ;;  %12249 = vmatpush3.bf16.msra.mxu0 %v16755_v7  ;;  %5319 = vmatmul.mubr.f32.gmra.mrb[178].mxu1 %v20254_v12  ;;  %v20479_v46 = vld [vmem:[#allocation66_spill] sm:$0xff]  ;;  %v20481_v10 = vld [vmem:[#allocation59_spill] sm:$0xff] }
 0x21e   : > { %v5636_v44 = vsub.f32 %v16267_v14, %v20470_v20  ;;  %v16788_v50 = vpack.c.bf16 %v20474_v24, %v20472_v39  ;;  %v5749_v20 = vand.u32 4294901760, %v5748_v33  ;;  %v20476_v45 = vand.u32 4294901760, %v16308_v15  ;;  %v9415_v39 = vpop.f32.mrb[73].mxu1  ;;  %5171 = vmatprep.mubr.f32.mxu0 %v20481_v10  ;;  %12281 = vmatpush3.bf16.msra.mxu1 %v12280_v29 }
 0x21f   : > { %v5755_v5 = vsub.f32 %v16303_v30, %v20475_v48  ;;  %v12284_v2 = vpack.c.bf16 %v5623_v36, %v5616_v17  ;;  %v20478_v49 = vand.u32 4294901760, %v20477_v63  ;;  %v20480_v38 = vand.u32 4294901760, %v20479_v46  ;;  %12251 = vmatprep.subr.bf16.mxu0 %v16773_v27  ;;  %5324 = vmatprep.mubr.f32.mxu1 %v20481_v10  ;;  %v20486_v63 = vld [vmem:[#allocation71_spill] sm:$0xff]  ;;  %v20489_v46 = vld [vmem:[#allocation162_spill] sm:$0xff] }
 0x220   : > { %v5762_v37 = vsub.f32 %v16308_v15, %v20476_v45  ;;  %v9416_v33 = vadd.f32 %v9415_v39, %v9414_v31  ;;  %v5630_v24 = vand.u32 4294901760, %v5629_v61  ;;  %v5637_v48 = vand.u32 4294901760, %v5636_v44  ;;  %v9417_v39 = vpop.f32.mrb[74].mxu1  ;;  %5173 = vmatmul.mubr.f32.gmra.mrb[92].mxu0 %v20486_v63  ;;  %12283 = vmatprep.subr.bf16.mxu1 %v12282_v47 }
 0x221   : > { %v16806_v3 = vpack.c.bf16 %v20480_v38, %v20478_v49  ;;  %v20482_v45 = vand.u32 4294901760, %v16313_v41  ;;  %v20483_v15 = vand.u32 4294901760, %v16325_v8  ;;  %v20484_v36 = vand.u32 4294901760, %v16330_v59  ;;  %12253 = vmatpush3.bf16.msra.mxu0 %v16788_v50  ;;  %5326 = vmatmul.mubr.f32.gmra.mrb[180].mxu1 %v20486_v63 }
 0x222   : > { %v20485_v29 = vand.u32 4294901760, %v16344_v54  ;;  %v16824_v44 = vadd.f32 %v9416_v33, %v16604_v35  ;;  %v20490_v38 = vand.u32 4294901760, %v20489_v46  ;;  %v12286_v10 = vpack.c.bf16 %v5749_v20, %v5742_v0  ;;  %v20493_v46 = vld [vmem:[#allocation34_spill] sm:$0xff]  ;;  %12285 = vmatpush3.bf16.msra.mxu1 %v12284_v2  ;;  %v20498_v2 = vld [vmem:[#allocation79_spill] sm:$0xff] }
 0x223   : > { %v5643_v53 = vsub.f32 %v16313_v41, %v20482_v45  ;;  %v5650_v17 = vsub.f32 %v16325_v8, %v20483_v15  ;;  %v5769_v31 = vsub.f32 %v16330_v59, %v20484_v36  ;;  %v20487_v15 = vld [vmem:[#allocation143_spill] sm:$0xff]  ;;  %v5756_v8 = vand.u32 4294901760, %v5755_v5  ;;  %v9418_v59 = vpop.f32.mrb[75].mxu1  ;;  %5178 = vmatprep.mubr.f32.mxu0 %v20493_v46  ;;  %12255 = vmatprep.subr.bf16.mxu0 %v16806_v3 }
 0x224   : > { %v5776_v61 = vsub.f32 %v16344_v54, %v20485_v29  ;;  %v20488_v49 = vand.u32 4294901760, %v20487_v15  ;;  %v5763_v36 = vand.u32 4294901760, %v5762_v37  ;;  %v20491_v35 = vand.u32 4294901760, %v16349_v25  ;;  %5331 = vmatprep.mubr.f32.mxu1 %v20493_v46  ;;  %v20494_v37 = vld [vmem:[#allocation115_spill] sm:$0xff]  ;;  %5180 = vmatmul.mubr.f32.gmra.mrb[94].mxu0 %v20498_v2 }
 0x225   : > { %v20492_v47 = vand.u32 4294901760, %v16369_v1  ;;  %v9419_v15 = vadd.f32 %v9418_v59, %v9417_v39  ;;  %v12288_v0 = vpack.c.bf16 %v5637_v48, %v5630_v24  ;;  %v5644_v20 = vand.u32 4294901760, %v5643_v53  ;;  %v9420_v39 = vpop.f32.mrb[76].mxu1  ;;  %12287 = vmatprep.subr.bf16.mxu1 %v12286_v10  ;;  %5333 = vmatmul.mubr.f32.gmra.mrb[182].mxu1 %v20498_v2 }
 0x226   : > { %v16831_v45 = vpack.c.bf16 %v20490_v38, %v20488_v49  ;;  %v5657_v33 = vsub.f32 %v16349_v25, %v20491_v35  ;;  %v5651_v5 = vand.u32 4294901760, %v5650_v17  ;;  %v20495_v49 = vand.u32 4294901760, %v20494_v37  ;;  %v20496_v38 = vld [vmem:[#allocation117_spill] sm:$0xff]  ;;  %5185 = vmatprep.mubr.f32.mxu0 %v20178_v21  ;;  %5338 = vmatprep.mubr.f32.mxu1 %v20178_v21 }
 0x227   : > { %v5664_v29 = vsub.f32 %v16369_v1, %v20492_v47  ;;  %v20497_v54 = vand.u32 4294901760, %v20496_v38  ;;  %v5770_v25 = vand.u32 4294901760, %v5769_v31  ;;  %v5777_v41 = vand.u32 4294901760, %v5776_v61  ;;  %v20503_v61 = vld [vmem:[#allocation120_spill] sm:$0xff]  ;;  %12289 = vmatpush3.bf16.msra.mxu1 %v12288_v0 }
 0x228   : > { %v16851_v59 = vadd.f32 %v9419_v15, %v16619_v16  ;;  %v12290_v53 = vpack.c.bf16 %v5763_v36, %v5756_v8  ;;  %v20499_v24 = vand.u32 4294901760, %v16421_v19  ;;  %v20500_v17 = vand.u32 4294901760, %v16434_v9  ;;  %12257 = vmatpush3.bf16.msra.mxu0 %v16831_v45  ;;  %v20501_v16 = vld [vmem:[#allocation119_spill] sm:$0xff] }
 0x229   : > { %v16848_v35 = vpack.c.bf16 %v20497_v54, %v20495_v49  ;;  %v9421_v54 = vpop.f32.mrb[77].mxu1  ;;  %v20502_v31 = vand.u32 4294901760, %v20501_v16  ;;  %v20504_v15 = vand.u32 4294901760, %v20503_v61  ;;  %v5658_v8 = vand.u32 4294901760, %v5657_v33  ;;  %v20507_v16 = vld [vmem:[#allocation173_spill] sm:$0xff] }
 0x22a   : > { %v5783_v48 = vsub.f32 %v16421_v19, %v20499_v24  ;;  %v5790_v47 = vsub.f32 %v16434_v9, %v20500_v17  ;;  %v5665_v10 = vand.u32 4294901760, %v5664_v29  ;;  %v9422_v36 = vadd.f32 %v9421_v54, %v9420_v39  ;;  %v20509_v29 = vld [vmem:[#allocation160_spill] sm:$0xff]  ;;  %12291 = vmatprep.subr.bf16.mxu1 %v12290_v53 }
 0x22b   : > { %v16866_v37 = vpack.c.bf16 %v20504_v15, %v20502_v31  ;;  %v12292_v49 = vpack.c.bf16 %v5651_v5, %v5644_v20  ;;  %v20505_v38 = vand.u32 4294901760, %v16439_v34  ;;  %v20506_v17 = vand.u32 4294901760, %v16450_v18  ;;  %12259 = vmatprep.subr.bf16.mxu0 %v16848_v35  ;;  %v9423_v5 = vpop.f32.mrb[78].mxu1  ;;  %v20511_v31 = vld [vmem:[#allocation88_spill] sm:$0xff] }
 0x22c   : > { %v20508_v33 = vand.u32 4294901760, %v20507_v16  ;;  %v20510_v39 = vand.u32 4294901760, %v20509_v29  ;;  %v12294_v0 = vpack.c.bf16 %v5777_v41, %v5770_v25  ;;  %v16884_v20 = vadd.f32 %v9422_v36, %v16650_v32  ;;  %5187 = vmatmul.mubr.f32.gmra.mrb[96].mxu0 %v20511_v31  ;;  %5340 = vmatmul.mubr.f32.gmra.mrb[184].mxu1 %v20511_v31  ;;  %v20514_v41 = vld [vmem:[#allocation161_spill] sm:$0xff] }
 0x22d   : > { %v5671_v24 = vsub.f32 %v16439_v34, %v20505_v38  ;;  %v5678_v46 = vsub.f32 %v16450_v18, %v20506_v17  ;;  %v5784_v61 = vand.u32 4294901760, %v5783_v48  ;;  %v5791_v15 = vand.u32 4294901760, %v5790_v47  ;;  %12261 = vmatpush3.bf16.msra.mxu0 %v16866_v37  ;;  %v20516_v32 = vld [vmem:[#allocation169_spill] sm:$0xff]  ;;  %12293 = vmatpush3.bf16.msra.mxu1 %v12292_v49 }
 0x22e   : > { %v16881_v54 = vpack.c.bf16 %v20510_v39, %v20508_v33  ;;  %v20512_v38 = vand.u32 4294901760, %v16489_v6  ;;  %v20513_v16 = vand.u32 4294901760, %v16494_v60  ;;  %v9424_v33 = vpop.f32.mrb[79].mxu1  ;;  %v20515_v25 = vand.u32 4294901760, %v20514_v41  ;;  %v20518_v39 = vld [vmem:[#allocation129_spill] sm:$0xff]  ;;  %v16908_v41 = vpop.f32.mrb[0].mxu0  ;;  %12295 = vmatprep.subr.bf16.mxu1 %v12294_v0 }
 0x22f   : > { %v20517_v36 = vand.u32 4294901760, %v20516_v32  ;;  %v12296_v48 = vpack.c.bf16 %v5665_v10, %v5658_v8  ;;  %v9425_v47 = vadd.f32 %v9424_v33, %v9423_v5  ;;  %5192 = vmatprep.mubr.f32.mxu0 %v20518_v39  ;;  %v5679_v21 = vand.u32 4294901760, %v5678_v46  ;;  %20522 = vst [vmem:[#allocation181_spill] sm:$0xff] %v16908_v41  ;;  %5345 = vmatprep.mubr.f32.mxu1 %v20518_v39  ;;  %v20523_v8 = vld [vmem:[#allocation178_spill] sm:$0xff]  ;;  %v20525_v5 = vld [vmem:[#allocation163_spill] sm:$0xff]  ;;  %v9458_v33 = vpop.f32.mrb[80].mxu1 }
 0x230   : > { %v5797_v17 = vsub.f32 %v16489_v6, %v20512_v38  ;;  %v5804_v29 = vsub.f32 %v16494_v60, %v20513_v16  ;;  %v5672_v38 = vand.u32 4294901760, %v5671_v24  ;;  %v20519_v6 = vld [vmem:[#allocation107_spill] sm:$0xff]  ;;  %v20521_v18 = vand.u32 4294901760, %v16509_v51  ;;  %12263 = vmatprep.subr.bf16.mxu0 %v16881_v54  ;;  %v20528_v32 = vld [vmem:[#allocation94_spill] sm:$0xff]  ;;  %v9459_v41 = vpop.f32.mrb[81].mxu1 }
 0x231   : > { %v16899_v53 = vpack.c.bf16 %v20517_v36, %v20515_v25  ;;  %v20520_v16 = vand.u32 4294901760, %v20519_v6  ;;  %v20524_v10 = vand.u32 4294901760, %v20523_v8  ;;  %v20526_v49 = vand.u32 4294901760, %v20525_v5  ;;  %v16921_v25 = vpop.f32.mrb[1].mxu0  ;;  %5194 = vmatmul.mubr.f32.gmra.mrb[98].mxu0 %v20528_v32  ;;  %5347 = vmatmul.mubr.f32.gmra.mrb[186].mxu1 %v20528_v32  ;;  %v20529_v8 = vld [vmem:[#allocation65_spill] sm:$0xff]  ;;  %v20531_v5 = vld [vmem:[#allocation171_spill] sm:$0xff] }
 0x232   : > { %v5692_v34 = vsub.f32 %v16509_v51, %v20521_v18  ;;  %v16919_v46 = vadd.f32 %v9425_v47, %v16665_v26  ;;  %20527 = vst [vmem:[#allocation28_spill] sm:$0xff] %v16921_v25  ;;  %v12298_v18 = vpack.c.bf16 %v5791_v15, %v5784_v61  ;;  %v5798_v36 = vand.u32 4294901760, %v5797_v17  ;;  %v20533_v39 = vld [vmem:[#allocation54_spill] sm:$0xff]  ;;  %12297 = vmatpush3.bf16.msra.mxu1 %v12296_v48  ;;  %v16933_v15 = vpop.f32.mrb[2].mxu0 }
 0x233   : > { %v5685_v60 = vsub.f32 %v20519_v6, %v20520_v16  ;;  %v16916_v24 = vpack.c.bf16 %v20526_v49, %v20524_v10  ;;  %v5805_v16 = vand.u32 4294901760, %v5804_v29  ;;  %12265 = vmatpush3.bf16.msra.mxu0 %v16899_v53  ;;  %v20530_v10 = vand.u32 4294901760, %v20529_v8  ;;  %5199 = vmatprep.mubr.f32.mxu0 %v20533_v39  ;;  %20534 = vst [vmem:[#allocation155_spill] sm:$0xff] %v16933_v15  ;;  %v20535_v17 = vld [vmem:[#allocation146_spill] sm:$0xff]  ;;  %v16946_v48 = vpop.f32.mrb[3].mxu0 }
 0x234   : > { %v20532_v49 = vand.u32 4294901760, %v20531_v5  ;;  %v9460_v47 = vadd.f32 %v9459_v41, %v9458_v33  ;;  %v12300_v25 = vpack.c.bf16 %v5679_v21, %v5672_v38  ;;  %v5693_v61 = vand.u32 4294901760, %v5692_v34  ;;  %5352 = vmatprep.mubr.f32.mxu1 %v20533_v39  ;;  %v20537_v8 = vld [vmem:[#allocation62_spill] sm:$0xff]  ;;  %v9461_v33 = vpop.f32.mrb[82].mxu1  ;;  %20539 = vst [vmem:[#allocation57_spill] sm:$0xff] %v16946_v48  ;;  %v20540_v21 = vld [vmem:[#allocation100_spill] sm:$0xff]  ;;  %12299 = vmatprep.subr.bf16.mxu1 %v12298_v18 }
 0x235   : > { %v5686_v0 = vand.u32 4294901760, %v5685_v60  ;;  %12267 = vmatprep.subr.bf16.mxu0 %v16916_v24  ;;  %v20536_v29 = vand.u32 4294901760, %v20535_v17  ;;  %v20538_v51 = vand.u32 4294901760, %v20537_v8  ;;  %5201 = vmatmul.mubr.f32.gmra.mrb[100].mxu0 %v20540_v21  ;;  %v12302_v34 = vpack.c.bf16 %v5805_v16, %v5798_v36  ;;  %v9462_v60 = vpop.f32.mrb[83].mxu1  ;;  %v20541_v38 = vld [vmem:[#allocation148_spill] sm:$0xff]  ;;  %v16958_v18 = vpop.f32.mrb[4].mxu0 }
 0x236   : > { %v16930_v26 = vpack.c.bf16 %v20532_v49, %v20530_v10  ;;  %v16944_v41 = vadd.f32 %v9460_v47, %v16688_v62  ;;  %5354 = vmatmul.mubr.f32.gmra.mrb[188].mxu1 %v20540_v21  ;;  %v20542_v10 = vand.u32 4294901760, %v20541_v38  ;;  %v20543_v49 = vld [vmem:[#allocation135_spill] sm:$0xff]  ;;  %v9463_v62 = vadd.f32 %v9462_v60, %v9461_v33  ;;  %v20545_v47 = vld [vmem:[#allocation48_spill] sm:$0xff]  ;;  %20546 = vst [vmem:[#allocation144_spill] sm:$0xff] %v16958_v18  ;;  %v9464_v8 = vpop.f32.mrb[84].mxu1  ;;  %v16967_v38 = vpop.f32.mrb[5].mxu0 }
 0x237   : > { %v16941_v5 = vpack.c.bf16 %v20538_v51, %v20536_v29  ;;  %v20544_v51 = vand.u32 4294901760, %v20543_v49  ;;  %5206 = vmatprep.mubr.f32.mxu0 %v20545_v47  ;;  %12301 = vmatpush3.bf16.msra.mxu1 %v12300_v25  ;;  %v12304_v29 = vpack.c.bf16 %v5693_v61, %v5686_v0  ;;  %v12306_v36 = vpack.c.bf16 %v16631_v23, %v16626_v42  ;;  %v20548_v33 = vld [vmem:[#allocation104_spill] sm:$0xff]  ;;  %v9465_v25 = vpop.f32.mrb[85].mxu1  ;;  %v16971_v0 = vld [vmem:[%s13471_s29 + $0x90] sm:$0xff]  ;;  %v16974_v61 = vld [vmem:[%s13471_s29 + $0x98] sm:$0x3] }
 0x238   : > { %12269 = vmatpush3.bf16.msra.mxu0 %v16930_v26  ;;  %5359 = vmatprep.mubr.f32.mxu1 %v20545_v47  ;;  %v16965_v16 = vadd.f32 %v9463_v62, %v16723_v22  ;;  %20547 = vst [vmem:[#allocation31_spill] sm:$0xff] %v16967_v38  ;;  %20549 = vst [vmem:[#allocation64_spill] sm:$0xff] %v16971_v0  ;;  %v20551_v60 = vld [vmem:[#allocation84_spill] sm:$0xff]  ;;  %v9466_v22 = vadd.f32 %v9465_v25, %v9464_v8  ;;  %v16981_v62 = vpop.f32.mrb[6].mxu0  ;;  %v9467_v15 = vpop.f32.mrb[86].mxu1  ;;  %v460_v47 = vrot.slane %v16971_v0, 1 }
 0x239   : > { %v16955_v17 = vpack.c.bf16 %v20544_v51, %v20542_v10  ;;  %12271 = vmatprep.subr.bf16.mxu0 %v16941_v5  ;;  %5208 = vmatmul.mubr.f32.gmra.mrb[102].mxu0 %v20548_v33  ;;  %20550 = vst [vmem:[#allocation9_spill] sm:$0xff] %v16974_v61  ;;  %v20552_v10 = vld [vmem:[#allocation32_spill] sm:$0xff]  ;;  %v20553_v51 = vld [vmem:[#allocation63_spill] sm:$0xff]  ;;  %20554 = vst [vmem:[#allocation156_spill] sm:$0xff] %v16981_v62  ;;  %v461_v39 = vrot.slane %v16974_v61, 1  ;;  %v16991_v8 = vpop.f32.mrb[7].mxu0 }
 0x23a   : > { %12303 = vmatprep.subr.bf16.mxu1 %v12302_v34  ;;  %5361 = vmatmul.mubr.f32.gmra.mrb[190].mxu1 %v20548_v33  ;;  %v12308_v49 = vpack.c.bf16 %v20552_v10, %v20551_v60  ;;  %v20555_v34 = vld [vmem:[#allocation128_spill] sm:$0xff]  ;;  %v16987_v48 = vadd.f32 %v9466_v22, %v16758_v56  ;;  %20557 = vst [vmem:[#allocation38_spill] sm:$0xff] %v16991_v8  ;;  %v20558_v25 = vld [vmem:[#allocation69_spill] sm:$0xff]  ;;  %s13043_s29 = scalar_lea.vmem %s13042_s27, 2048 }
 0x23b   : > { %5467 = vmatprep.mubr.f32.mxu0 %v20553_v51  ;;  %12305 = vmatpush3.bf16.msra.mxu1 %v12304_v29  ;;  %v20556_v18 = vld [vmem:[#allocation132_spill] sm:$0xff]  ;;  %v9468_v29 = vpop.f32.mrb[87].mxu1  ;;  %v20560_v22 = vld [vmem:[#allocation77_spill] sm:$0xff]  ;;  %v20561_v51 = vld [vmem:[#allocation30_spill] sm:$0xff]  ;;  %v462_v62 = vsel %vm382_vm0, %v460_v47, %v461_v39  ;;  %p13045_p3 = scmp.lt.s32.totalorder %s13043_s29, %s13037_s26 }
 0x23c   : > { %12273 = vmatpush3.bf16.msra.mxu0 %v16955_v17  ;;  %5808 = vmatprep.mubr.f32.mxu1 %v20254_v12  ;;  %v12310_v38 = vpack.c.bf16 %v20556_v18, %v20555_v34  ;;  %v12312_v18 = vpack.c.bf16 %v20440_v52, %v20438_v11  ;;  %v9469_v56 = vadd.f32 %v9468_v29, %v9467_v15  ;;  %v20562_v8 = vld [vmem:[#allocation76_spill] sm:$0xff]  ;;  %v20563_v52 = vld [vmem:[#allocation70_spill] sm:$0xff] }
 0x23d   : > { %12307 = vmatprep.subr.bf16.mxu0 %v12306_v36  ;;  %12339 = vmatprep.subr.bf16.mxu1 %v16704_v55  ;;  %v20559_v36 = vld [vmem:[#allocation58_spill] sm:$0xff]  ;;  %v12314_v34 = vpack.c.bf16 %v16161_v13, %v20561_v51  ;;  %v17014_v13 = vand.u32 4294901760, %v462_v62  ;;  %p13046_p4 = por %p13045_p3, %p13044_p2 }
 0x23e   : > { %5810 = vmatmul.mubr.f32.vlgmr.msra.gmra.mrb[192].mxu1 %v20559_v36  ;;  %v20564_v15 = vld [vmem:[#allocation22_spill] sm:$0xff] }
 0x23f   : > { %5473 = vmatmul.mubr.f32.vlgmr.msra.gmra.mrb[104].mxu0 %v20558_v25  ;;  %12341 = vmatpush3.bf16.msra.mxu1 %v16731_v58  ;;  %v17004_v25 = vadd.f32 %v9469_v56, %v16791_v40  ;;  %v20566_v40 = vld [vmem:[#allocation131_spill] sm:$0xff]  ;;  %v17025_v56 = vand.u32 4294901760, %v16971_v0  ;;  %v20568_v51 = vld [vmem:[#allocation78_spill] sm:$0xff]  ;;  %p13047_p7 = pnand %p13046_p4, %p13040_p12 }
 0x240   : > { %12309 = vmatpush3.bf16.msra.mxu0 %v12308_v49  ;;  %5482 = vmatprep.mubr.f32.mxu0 %v20560_v22  ;;  %v9470_v49 = vpop.f32.mrb[88].mxu1  ;;  %v20565_v22 = vld [vmem:[#allocation87_spill] sm:$0xff]  ;;  %v12318_v39 = vpack.c.bf16 %v20566_v40, %v16213_v28  ;;  %v20569_v28 = vld [vmem:[#allocation92_spill] sm:$0xff]  ;;  %v20573_v40 = vld [vmem:[#allocation177_spill] sm:$0xff] }
 0x241   : > { %12311 = vmatprep.subr.bf16.mxu0 %v12310_v38  ;;  %5815 = vmatprep.mubr.f32.mxu1 %v20486_v63  ;;  %v9471_v11 = vpop.f32.mrb[89].mxu1  ;;  %v12316_v38 = vpack.c.bf16 %v20564_v15, %v16166_v4  ;;  %v20570_v15 = vld [vmem:[#allocation175_spill] sm:$0xff] }
 0x242   : > { %12343 = vmatprep.subr.bf16.mxu1 %v16747_v43  ;;  %5817 = vmatmul.mubr.f32.gmra.mrb[194].mxu1 %v20563_v52  ;;  %v9472_v29 = vadd.f32 %v9471_v11, %v9470_v49 }
 0x243   : > { %5488 = vmatmul.mubr.f32.gmra.mrb[106].mxu0 %v20562_v8  ;;  %12345 = vmatpush3.bf16.msra.mxu1 %v16755_v7  ;;  %v9473_v8 = vpop.f32.mrb[90].mxu1 }
 0x244   : > { %12313 = vmatpush3.bf16.msra.mxu0 %v12312_v18  ;;  %5497 = vmatprep.mubr.f32.mxu0 %v20565_v22  ;;  %v17020_v47 = vadd.f32 %v9472_v29, %v16824_v44  ;;  %v20567_v18 = vld [vmem:[#allocation85_spill] sm:$0xff]  ;;  %v9474_v4 = vpop.f32.mrb[91].mxu1  ;;  %v17033_v44 = vsub.f32 %v462_v62, %v17014_v13  ;;  %v20571_v22 = vld [vmem:[#allocation24_spill] sm:$0xff]  ;;  %v20572_v62 = vld [vmem:[#allocation86_spill] sm:$0xff] }
 0x245   : > { %12315 = vmatprep.subr.bf16.mxu0 %v12314_v34  ;;  %5822 = vmatprep.mubr.f32.mxu1 %v20498_v2  ;;  %v12320_v34 = vpack.c.bf16 %v16267_v14, %v16253_v57  ;;  %v9475_v49 = vadd.f32 %v9474_v4, %v9473_v8  ;;  %v9476_v29 = vpop.f32.mrb[92].mxu1  ;;  %v17045_v14 = vsub.f32 %v16971_v0, %v17025_v56 }
 0x246   : > { %12347 = vmatprep.subr.bf16.mxu1 %v16773_v27  ;;  %5824 = vmatmul.mubr.f32.gmra.mrb[196].mxu1 %v20568_v51  ;;  %v9477_v57 = vpop.f32.mrb[93].mxu1 }
 0x247   : > { %5503 = vmatmul.mubr.f32.gmra.mrb[108].mxu0 %v20567_v18  ;;  %12349 = vmatpush3.bf16.msra.mxu1 %v16788_v50  ;;  %v17037_v11 = vadd.f32 %v9475_v49, %v16851_v59  ;;  %v9478_v8 = vadd.f32 %v9477_v57, %v9476_v29  ;;  %v20575_v18 = vld [vmem:[#allocation101_spill] sm:$0xff]  ;;  %v9479_v49 = vpop.f32.mrb[94].mxu1  ;;  %v19160_v57 = vand.u32 4294901760, %v17045_v14 }
 0x248   : > { %12317 = vmatpush3.bf16.msra.mxu0 %v12316_v38  ;;  %5512 = vmatprep.mubr.f32.mxu0 %v20569_v28  ;;  %v12322_v38 = vpack.c.bf16 %v20570_v15, %v16303_v30  ;;  %v19157_v30 = vand.u32 4294901760, %v17033_v44  ;;  %v20577_v28 = vld [vmem:[#allocation20_spill] sm:$0xff]  ;;  %v9480_v29 = vpop.f32.mrb[95].mxu1 }
 0x249   : > { %12319 = vmatprep.subr.bf16.mxu0 %v12318_v39  ;;  %5829 = vmatprep.mubr.f32.mxu1 %v20511_v31  ;;  %v20574_v39 = vld [vmem:[#allocation133_spill] sm:$0xff]  ;;  %v17055_v4 = vadd.f32 %v9478_v8, %v16884_v20  ;;  %v20581_v20 = vld [vmem:[#allocation46_spill] sm:$0xff] }
 0x24a   : > { %12351 = vmatprep.subr.bf16.mxu1 %v16806_v3  ;;  %5831 = vmatmul.mubr.f32.gmra.mrb[198].mxu1 %v20572_v62  ;;  %v12324_v59 = vpack.c.bf16 %v20574_v39, %v20573_v40  ;;  %v20579_v40 = vld [vmem:[#allocation93_spill] sm:$0xff]  ;;  %v20580_v39 = vld [vmem:[#allocation170_spill] sm:$0xff]  ;;  %v5570_v8 = vsub.f32 %v17033_v44, %v19157_v30 }
 0x24b   : > { %5518 = vmatmul.mubr.f32.gmra.mrb[110].mxu0 %v20571_v22  ;;  %12353 = vmatpush3.bf16.msra.mxu1 %v16831_v45  ;;  %v20578_v22 = vld [vmem:[#allocation29_spill] sm:$0xff] }
 0x24c   : > { %12321 = vmatpush3.bf16.msra.mxu0 %v12320_v34  ;;  %5527 = vmatprep.mubr.f32.mxu0 %v20575_v18  ;;  %v20576_v34 = vld [vmem:[#allocation141_spill] sm:$0xff]  ;;  %v12328_v18 = vpack.c.bf16 %v16369_v1, %v20580_v39  ;;  %v20582_v1 = vld [vmem:[#allocation106_spill] sm:$0xff] }
 0x24d   : > { %12323 = vmatprep.subr.bf16.mxu0 %v12322_v38  ;;  %5836 = vmatprep.mubr.f32.mxu1 %v20528_v32  ;;  %v12326_v15 = vpack.c.bf16 %v20577_v28, %v20576_v34  ;;  %v9481_v38 = vadd.f32 %v9480_v29, %v9479_v49  ;;  %v9514_v34 = vpop.f32.mrb[8].mxu0  ;;  %v5576_v29 = vsub.f32 %v17045_v14, %v19160_v57 }
 0x24e   : > { %12355 = vmatprep.subr.bf16.mxu1 %v16848_v35  ;;  %5838 = vmatmul.mubr.f32.gmra.mrb[200].mxu1 %v20579_v40  ;;  %v9515_v49 = vpop.f32.mrb[9].mxu0 }
 0x24f   : > { %5533 = vmatmul.mubr.f32.gmra.mrb[112].mxu0 %v20578_v22  ;;  %12357 = vmatpush3.bf16.msra.mxu1 %v16866_v37  ;;  %v17071_v28 = vadd.f32 %v9481_v38, %v16919_v46  ;;  %v9570_v22 = vpop.f32.mrb[96].mxu1  ;;  %v9516_v39 = vadd.f32 %v9515_v49, %v9514_v34  ;;  %v20583_v38 = vld [vmem:[#allocation99_spill] sm:$0xff]  ;;  %v9517_v61 = vpop.f32.mrb[10].mxu0  ;;  %v20587_v34 = vld [vmem:[#allocation26_spill] sm:$0xff] }
 0x250   : > { %12325 = vmatpush3.bf16.msra.mxu0 %v12324_v59  ;;  %5542 = vmatprep.mubr.f32.mxu0 %v20581_v20  ;;  %v12330_v59 = vpack.c.bf16 %v16434_v9, %v16421_v19  ;;  %v9571_v46 = vpop.f32.mrb[97].mxu1  ;;  %v20585_v20 = vld [vmem:[#allocation142_spill] sm:$0xff]  ;;  %v20586_v19 = vld [vmem:[#allocation44_spill] sm:$0xff]  ;;  %v5571_v9 = vand.u32 4294901760, %v5570_v8  ;;  %v9518_v57 = vpop.f32.mrb[11].mxu0 }
 0x251   : > { %12327 = vmatprep.subr.bf16.mxu0 %v12326_v15  ;;  %5843 = vmatprep.mubr.f32.mxu1 %v20540_v21  ;;  %v20584_v15 = vld [vmem:[#allocation138_spill] sm:$0xff]  ;;  %v9572_v21 = vadd.f32 %v9571_v46, %v9570_v22  ;;  %v9573_v0 = vpop.f32.mrb[98].mxu1  ;;  %v5577_v22 = vand.u32 4294901760, %v5576_v29 }
 0x252   : > { %12359 = vmatprep.subr.bf16.mxu1 %v16881_v54  ;;  %5845 = vmatmul.mubr.f32.gmra.mrb[202].mxu1 %v20583_v38  ;;  %v12332_v30 = vpack.c.bf16 %v20585_v20, %v20584_v15  ;;  %v20589_v38 = vld [vmem:[#allocation33_spill] sm:$0xff]  ;;  %v9519_v15 = vadd.f32 %v9518_v57, %v9517_v61  ;;  %v9574_v8 = vpop.f32.mrb[99].mxu1  ;;  %v20593_v61 = vand.u32 4294901760, %v16631_v23  ;;  %v20596_v23 = vld [vmem:[#allocation56_spill] sm:$0xff] }
 0x253   : > { %5548 = vmatmul.mubr.f32.gmra.mrb[114].mxu0 %v20582_v1  ;;  %12361 = vmatpush3.bf16.msra.mxu1 %v16899_v53  ;;  %v2967_v1 = vadd.f32 %v9516_v39, %v16944_v41  ;;  %v20590_v41 = vld [vmem:[#allocation10_spill] sm:$0xff]  ;;  %v9575_v20 = vadd.f32 %v9574_v8, %v9573_v0  ;;  %v9576_v29 = vpop.f32.mrb[100].mxu1  ;;  %v20598_v8 = vld [vmem:[#allocation67_spill] sm:$0xff] }
 0x254   : > { %12329 = vmatpush3.bf16.msra.mxu0 %v12328_v18  ;;  %5557 = vmatprep.mubr.f32.mxu0 %v20586_v19  ;;  %v20588_v18 = vld [vmem:[#allocation139_spill] sm:$0xff]  ;;  %v9520_v19 = vpop.f32.mrb[12].mxu0 }
 0x255   : > { %12331 = vmatprep.subr.bf16.mxu0 %v12330_v59  ;;  %5850 = vmatprep.mubr.f32.mxu1 %v20548_v33  ;;  %v12334_v49 = vpack.c.bf16 %v20588_v18, %v20587_v34  ;;  %v17092_v46 = vadd.f32 %v9572_v21, %v2967_v1  ;;  %v20591_v59 = vld [vmem:[#allocation183_spill] sm:$0xff]  ;;  %v20592_v21 = vand.u32 4294901760, %v16626_v42  ;;  %v9521_v57 = vpop.f32.mrb[13].mxu0  ;;  %v20595_v1 = vand.u32 4294901760, %v20552_v10 }
 0x256   : > { %12363 = vmatprep.subr.bf16.mxu1 %v16916_v24  ;;  %5852 = vmatmul.mubr.f32.gmra.mrb[204].mxu1 %v20590_v41  ;;  %v12336_v39 = vpack.c.bf16 %v20591_v59, %v20519_v6  ;;  %v9522_v0 = vadd.f32 %v9521_v57, %v9520_v19  ;;  %v20600_v19 = vld [vmem:[#allocation73_spill] sm:$0xff]  ;;  %v20603_v57 = vld [vmem:[#allocation72_spill] sm:$0xff] }
 0x257   : > { %5563 = vmatmul.mubr.f32.gmra.mrb[116].mxu0 %v20589_v38  ;;  %12365 = vmatpush3.bf16.msra.mxu1 %v16930_v26  ;;  %v2982_v38 = vadd.f32 %v9519_v15, %v16965_v16  ;;  %v20594_v16 = vand.u32 4294901760, %v20551_v60 }
 0x258   : > { %12333 = vmatpush3.bf16.msra.mxu0 %v12332_v30  ;;  %5572 = vmatprep.mubr.f32.mxu0 %v5571_v9  ;;  %v12370_v30 = vpack.c.bf16 %v20593_v61, %v20592_v21  ;;  %v9577_v9 = vpop.f32.mrb[101].mxu1  ;;  %v2997_v18 = vadd.f32 %v9522_v0, %v16987_v48  ;;  %v20601_v61 = vld [vmem:[#allocation122_spill] sm:$0xff] }
 0x259   : > { %12335 = vmatprep.subr.bf16.mxu0 %v12334_v49  ;;  %5857 = vmatprep.mubr.f32.mxu1 %v17014_v13  ;;  %v17105_v6 = vadd.f32 %v9575_v20, %v2982_v38  ;;  %v12372_v42 = vpack.c.bf16 %v20595_v1, %v20594_v16  ;;  %v9578_v34 = vadd.f32 %v9577_v9, %v9576_v29  ;;  %v9523_v49 = vpop.f32.mrb[14].mxu0  ;;  %v9579_v59 = vpop.f32.mrb[102].mxu1  ;;  %v20599_v20 = vld [vmem:[#allocation68_spill] sm:$0xff] }
 0x25a   : > { %12367 = vmatprep.subr.bf16.mxu1 %v16941_v5  ;;  %5859 = vmatmul.mubr.f32.gmra.mrb[206].mxu1 %v17025_v56  ;;  %v9524_v15 = vpop.f32.mrb[15].mxu0  ;;  %v20604_v16 = vld [vmem:[#allocation164_spill] sm:$0xff] }
 0x25b   : > { %5578 = vmatmul.mubr.f32.gmra.mrb[118].mxu0 %v5577_v22  ;;  %12369 = vmatpush3.bf16.msra.mxu1 %v16955_v17  ;;  %v20597_v22 = vld [vmem:[#allocation61_spill] sm:$0xff]  ;;  %v17118_v60 = vadd.f32 %v9578_v34, %v2997_v18  ;;  %v9525_v10 = vadd.f32 %v9524_v15, %v9523_v49  ;;  %v9526_v21 = vpop.f32.mrb[16].mxu0  ;;  %v20607_v18 = vld [vmem:[#allocation172_spill] sm:$0xff]  ;;  %v20608_v49 = vld [vmem:[#allocation83_spill] sm:$0xff] }
 0x25c   : > { %12337 = vmatpush3.bf16.msra.mxu0 %v12336_v39  ;;  %5994 = vmatprep.mubr.f32.mxu0 %v20596_v23  ;;  %v9580_v39 = vpop.f32.mrb[103].mxu1 }
 0x25d   : > { %12371 = vmatprep.subr.bf16.mxu0 %v12370_v30  ;;  %6164 = vmatprep.mubr.f32.mxu1 %v20597_v22  ;;  %v9581_v38 = vadd.f32 %v9580_v39, %v9579_v59  ;;  %v3012_v48 = vadd.f32 %v9525_v10, %v17004_v25  ;;  %v20602_v30 = vld [vmem:[#allocation75_spill] sm:$0xff]  ;;  %v9582_v29 = vpop.f32.mrb[104].mxu1  ;;  %v20609_v22 = vld [vmem:[#allocation80_spill] sm:$0xff]  ;;  %v20610_v10 = vld [vmem:[#allocation174_spill] sm:$0xff] }
 0x25e   : > { %12403 = vmatprep.subr.bf16.mxu1 %v16704_v55  ;;  %6168 = vmatmul.mubr.f32.vlgmr.msra.gmra.mrb[208].mxu1 %v20599_v20  ;;  %v9527_v55 = vpop.f32.mrb[17].mxu0  ;;  %v9583_v1 = vpop.f32.mrb[105].mxu1  ;;  %v20612_v20 = vld [vmem:[#allocation90_spill] sm:$0xff] }
 0x25f   : > { %5997 = vmatmul.mubr.f32.vlgmr.msra.gmra.mrb[120].mxu0 %v20598_v8  ;;  %12405 = vmatpush3.bf16.msra.mxu1 %v16731_v58  ;;  %v17128_v0 = vadd.f32 %v9581_v38, %v3012_v48  ;;  %v9528_v9 = vadd.f32 %v9527_v55, %v9526_v21  ;;  %v20605_v58 = vld [vmem:[#allocation74_spill] sm:$0xff]  ;;  %v9584_v25 = vadd.f32 %v9583_v1, %v9582_v29  ;;  %v9529_v23 = vpop.f32.mrb[18].mxu0  ;;  %v9585_v15 = vpop.f32.mrb[106].mxu1  ;;  %v20614_v21 = vld [vmem:[#allocation23_spill] sm:$0xff]  ;;  %v20616_v29 = vld [vmem:[#allocation145_spill] sm:$0xff] }
 0x260   : > { %12373 = vmatpush3.bf16.msra.mxu0 %v12372_v42  ;;  %6003 = vmatprep.mubr.f32.mxu0 %v20600_v19  ;;  %v20606_v42 = vld [vmem:[#allocation81_spill] sm:$0xff]  ;;  %v9586_v39 = vpop.f32.mrb[107].mxu1  ;;  %v20613_v48 = vld [vmem:[#allocation134_spill] sm:$0xff] }
 0x261   : > { %12375 = vmatprep.subr.bf16.mxu0 %v20601_v61  ;;  %6175 = vmatprep.mubr.f32.mxu1 %v20602_v30  ;;  %v3027_v34 = vadd.f32 %v9528_v9, %v17020_v47  ;;  %v9587_v47 = vadd.f32 %v9586_v39, %v9585_v15  ;;  %v20615_v61 = vld [vmem:[#allocation89_spill] sm:$0xff]  ;;  %v9588_v30 = vpop.f32.mrb[108].mxu1  ;;  %v20624_v15 = vld [vmem:[#allocation102_spill] sm:$0xff] }
 0x262   : > { %12407 = vmatprep.subr.bf16.mxu1 %v16747_v43  ;;  %6179 = vmatmul.mubr.f32.gmra.mrb[210].mxu1 %v20605_v58  ;;  %v9530_v43 = vpop.f32.mrb[19].mxu0  ;;  %v9589_v9 = vpop.f32.mrb[109].mxu1  ;;  %v20625_v39 = vld [vmem:[#allocation109_spill] sm:$0xff] }
 0x263   : > { %6006 = vmatmul.mubr.f32.gmra.mrb[122].mxu0 %v20603_v57  ;;  %12409 = vmatpush3.bf16.msra.mxu1 %v16755_v7  ;;  %v17139_v8 = vadd.f32 %v9584_v25, %v3027_v34  ;;  %v9531_v59 = vadd.f32 %v9530_v43, %v9529_v23  ;;  %v20611_v7 = vld [vmem:[#allocation82_spill] sm:$0xff]  ;;  %v9532_v19 = vpop.f32.mrb[20].mxu0  ;;  %v20619_v25 = vld [vmem:[#allocation52_spill] sm:$0xff]  ;;  %v20621_v34 = vld [vmem:[#allocation95_spill] sm:$0xff]  ;;  %v9591_v23 = vpop.f32.mrb[110].mxu1 }
 0x264   : > { %12377 = vmatpush3.bf16.msra.mxu0 %v20604_v16  ;;  %6012 = vmatprep.mubr.f32.mxu0 %v20606_v42  ;;  %v20618_v16 = vld [vmem:[#allocation96_spill] sm:$0xff]  ;;  %v20620_v42 = vld [vmem:[#allocation98_spill] sm:$0xff] }
 0x265   : > { %12379 = vmatprep.subr.bf16.mxu0 %v20607_v18  ;;  %6186 = vmatprep.mubr.f32.mxu1 %v20608_v49  ;;  %v3042_v38 = vadd.f32 %v9531_v59, %v17037_v11  ;;  %v9590_v11 = vadd.f32 %v9589_v9, %v9588_v30  ;;  %v20622_v43 = vld [vmem:[#allocation136_spill] sm:$0xff]  ;;  %v20630_v30 = vld [vmem:[#allocation42_spill] sm:$0xff]  ;;  %v20632_v9 = vld [vmem:[#allocation47_spill] sm:$0xff] }
 0x266   : > { %12411 = vmatprep.subr.bf16.mxu1 %v16773_v27  ;;  %6190 = vmatmul.mubr.f32.gmra.mrb[212].mxu1 %v20611_v7  ;;  %v9533_v27 = vpop.f32.mrb[21].mxu0  ;;  %v20626_v7 = vld [vmem:[#allocation41_spill] sm:$0xff] }
 0x267   : > { %6015 = vmatmul.mubr.f32.gmra.mrb[124].mxu0 %v20609_v22  ;;  %12413 = vmatpush3.bf16.msra.mxu1 %v16788_v50  ;;  %v17150_v55 = vadd.f32 %v9587_v47, %v3042_v38  ;;  %v9534_v57 = vadd.f32 %v9533_v27, %v9532_v19  ;;  %v20617_v50 = vld [vmem:[#allocation91_spill] sm:$0xff]  ;;  %v9535_v58 = vpop.f32.mrb[22].mxu0  ;;  %v9592_v22 = vpop.f32.mrb[111].mxu1  ;;  %v17172_v38 = vld [vmem:[#allocation2 + $0x400] sm:$0xff]  ;;  %v17174_v19 = vld [vmem:[#allocation2 + $0x408] sm:$0xff] }
 0x268   : > { %12381 = vmatpush3.bf16.msra.mxu0 %v20610_v10  ;;  %6021 = vmatprep.mubr.f32.mxu0 %v20612_v20  ;;  %v20627_v47 = vld [vmem:[#allocation103_spill] sm:$0xff]  ;;  %v9682_v20 = vpop.f32.mrb[112].mxu1  ;;  %v20629_v27 = vld [vmem:[#allocation105_spill] sm:$0xff] }
 0x269   : > { %12383 = vmatprep.subr.bf16.mxu0 %v20613_v48  ;;  %6197 = vmatprep.mubr.f32.mxu1 %v20614_v21  ;;  %v3057_v1 = vadd.f32 %v9534_v57, %v17055_v4  ;;  %v9593_v4 = vadd.f32 %v9592_v22, %v9591_v23  ;;  %v20628_v21 = vld [vmem:[#allocation137_spill] sm:$0xff]  ;;  %v20635_v23 = vld [vmem:[#allocation111_spill] sm:$0xff] }
 0x26a   : > { %12415 = vmatprep.subr.bf16.mxu1 %v16806_v3  ;;  %6201 = vmatmul.mubr.f32.gmra.mrb[214].mxu1 %v20617_v50  ;;  %v9536_v3 = vpop.f32.mrb[23].mxu0  ;;  %v6621_v50 = vand.u32 4294901760, %v17172_v38 }
 0x26b   : > { %6024 = vmatmul.mubr.f32.gmra.mrb[126].mxu0 %v20615_v61  ;;  %12417 = vmatpush3.bf16.msra.mxu1 %v16831_v45  ;;  %v17161_v18 = vadd.f32 %v9590_v11, %v3057_v1  ;;  %v9537_v49 = vadd.f32 %v9536_v3, %v9535_v58  ;;  %v20623_v45 = vld [vmem:[#allocation97_spill] sm:$0xff]  ;;  %v9626_v10 = vpop.f32.mrb[24].mxu0  ;;  %v6624_v11 = vand.u32 4294901760, %v17174_v19  ;;  %v17189_v1 = vld [vmem:[#allocation2 + $0x418] sm:$0xff] }
 0x26c   : > { %12385 = vmatpush3.bf16.msra.mxu0 %v20616_v29  ;;  %6030 = vmatprep.mubr.f32.mxu0 %v20618_v16  ;;  %v20631_v29 = vld [vmem:[#allocation184_spill] sm:$0xff]  ;;  %v17187_v16 = vld [vmem:[#allocation2 + $0x410] sm:$0xff]  ;;  %v20634_v3 = vld [vmem:[#allocation113_spill] sm:$0xff]  ;;  %v6630_v22 = vand.u32 4294901760, %v17189_v1 }
 0x26d   : > { %12387 = vmatprep.subr.bf16.mxu0 %v20619_v25  ;;  %6208 = vmatprep.mubr.f32.mxu1 %v20620_v42  ;;  %v3072_v59 = vadd.f32 %v9537_v49, %v17071_v28  ;;  %v9683_v28 = vpop.f32.mrb[113].mxu1  ;;  %v20633_v25 = vld [vmem:[#allocation126_spill] sm:$0xff] }
 0x26e   : > { %12419 = vmatprep.subr.bf16.mxu1 %v16848_v35  ;;  %6212 = vmatmul.mubr.f32.gmra.mrb[216].mxu1 %v20623_v45  ;;  %v9627_v35 = vpop.f32.mrb[25].mxu0  ;;  %v9684_v61 = vadd.f32 %v9683_v28, %v9682_v20  ;;  %v9685_v42 = vpop.f32.mrb[114].mxu1  ;;  %v20639_v20 = vand.u32 4294901760, %v17045_v14 }
 0x26f   : > { %6033 = vmatmul.mubr.f32.gmra.mrb[128].mxu0 %v20621_v34  ;;  %12421 = vmatpush3.bf16.msra.mxu1 %v16866_v37  ;;  %v17176_v48 = vadd.f32 %v9593_v4, %v3072_v59  ;;  %v9628_v37 = vadd.f32 %v9627_v35, %v9626_v10  ;;  %v9686_v34 = vpop.f32.mrb[115].mxu1  ;;  %v20636_v4 = vld [vmem:[#allocation151_spill] sm:$0xff]  ;;  %v17209_v59 = vpack.c.bf16 %v6624_v11, %v6621_v50  ;;  %v17211_v10 = vld [vmem:[#allocation2 + $0x420] sm:$0xff]  ;;  %v20638_v35 = vld [vmem:[#allocation49_spill] sm:$0xff] }
 0x270   : > { %12389 = vmatpush3.bf16.msra.mxu0 %v20622_v43  ;;  %6039 = vmatprep.mubr.f32.mxu0 %v20624_v15  ;;  %v9687_v49 = vadd.f32 %v9686_v34, %v9685_v42  ;;  %v6627_v43 = vand.u32 4294901760, %v17187_v16  ;;  %v20637_v15 = vand.u32 4294901760, %v17033_v44 }
 0x271   : > { %12391 = vmatprep.subr.bf16.mxu0 %v20625_v39  ;;  %6219 = vmatprep.mubr.f32.mxu1 %v20626_v7  ;;  %v3491_v57 = vadd.f32 %v9628_v37, %v17092_v46 }
 0x272   : > { %12423 = vmatprep.subr.bf16.mxu1 %v16881_v54  ;;  %6223 = vmatmul.mubr.f32.gmra.mrb[218].mxu1 %v20629_v27  ;;  %v9629_v54 = vpop.f32.mrb[26].mxu0 }
 0x273   : > { %6042 = vmatmul.mubr.f32.gmra.mrb[130].mxu0 %v20627_v47  ;;  %12425 = vmatpush3.bf16.msra.mxu1 %v16899_v53  ;;  %v9630_v58 = vpop.f32.mrb[27].mxu0  ;;  %v17193_v53 = vadd.f32 %v9684_v61, %v3491_v57 }
 0x274   : > { %12393 = vmatpush3.bf16.msra.mxu0 %v20628_v21  ;;  %6048 = vmatprep.mubr.f32.mxu0 %v20630_v30  ;;  %v9631_v46 = vadd.f32 %v9630_v58, %v9629_v54  ;;  %v17228_v21 = vpack.c.bf16 %v6630_v22, %v6627_v43 }
 0x275   : > { %12395 = vmatprep.subr.bf16.mxu0 %v20631_v29  ;;  %6230 = vmatprep.mubr.f32.mxu1 %v20632_v9 }
 0x276   : > { %12427 = vmatprep.subr.bf16.mxu1 %v16916_v24  ;;  %6234 = vmatmul.mubr.f32.gmra.mrb[220].mxu1 %v20635_v23  ;;  %v3500_v45 = vadd.f32 %v9631_v46, %v17105_v6  ;;  %v9632_v24 = vpop.f32.mrb[28].mxu0  ;;  %v9688_v6 = vpop.f32.mrb[116].mxu1 }
 0x277   : > { %6051 = vmatmul.mubr.f32.gmra.mrb[132].mxu0 %v20633_v25  ;;  %12429 = vmatpush3.bf16.msra.mxu1 %v16930_v26  ;;  %v17213_v26 = vld [vmem:[#allocation2 + $0x428] sm:$0xff]  ;;  %v9633_v39 = vpop.f32.mrb[29].mxu0  ;;  %v9689_v47 = vpop.f32.mrb[117].mxu1 }
 0x278   : > { %12397 = vmatpush3.bf16.msra.mxu0 %v20634_v3  ;;  %6057 = vmatprep.mubr.f32.mxu0 %v17033_v44  ;;  %v17217_v7 = vadd.f32 %v9687_v49, %v3500_v45  ;;  %v9634_v44 = vadd.f32 %v9633_v39, %v9632_v24  ;;  %v9690_v37 = vadd.f32 %v9689_v47, %v9688_v6  ;;  %v6636_v28 = vand.u32 4294901760, %v17213_v26  ;;  %v9635_v61 = vpop.f32.mrb[30].mxu0  ;;  %v9691_v57 = vpop.f32.mrb[118].mxu1  ;;  %v17258_v3 = vld [vmem:[#allocation2 + $0x448] sm:$0xff] }
 0x279   : > { %12399 = vmatprep.subr.bf16.mxu0 %v20636_v4  ;;  %6241 = vmatprep.mubr.f32.mxu1 %v20637_v15  ;;  %v9636_v30 = vpop.f32.mrb[31].mxu0  ;;  %v9692_v9 = vpop.f32.mrb[119].mxu1  ;;  %v6648_v15 = vand.u32 4294901760, %v17258_v3 }
 0x27a   : > { %12431 = vmatprep.subr.bf16.mxu1 %v16941_v5  ;;  %6245 = vmatmul.mubr.f32.gmra.mrb[222].mxu1 %v20639_v20  ;;  %v6633_v5 = vand.u32 4294901760, %v17211_v10  ;;  %v3509_v27 = vadd.f32 %v9634_v44, %v17118_v60  ;;  %v9637_v29 = vadd.f32 %v9636_v30, %v9635_v61  ;;  %v9693_v60 = vadd.f32 %v9692_v9, %v9691_v57  ;;  %v9638_v46 = vpop.f32.mrb[32].mxu0  ;;  %v9694_v23 = vpop.f32.mrb[120].mxu1  ;;  %v17279_v44 = vld [vmem:[#allocation2 + $0x458] sm:$0xff]  ;;  %v17282_v20 = vld [vmem:[#allocation2 + $0x460] sm:$0xff] }
 0x27b   : > { %6060 = vmatmul.mubr.f32.gmra.mrb[134].mxu0 %v17045_v14  ;;  %12433 = vmatpush3.bf16.msra.mxu1 %v16955_v17  ;;  %v17235_v14 = vld [vmem:[#allocation2 + $0x430] sm:$0xff]  ;;  %v17237_v17 = vld [vmem:[#allocation2 + $0x438] sm:$0xff]  ;;  %v9639_v34 = vpop.f32.mrb[33].mxu0  ;;  %v9695_v24 = vpop.f32.mrb[121].mxu1 }
 0x27c   : > { %12401 = vmatpush3.bf16.msra.mxu0 %v20638_v35  ;;  %6411 = vmatprep.mubr.f32.mxu0 %v20254_v12  ;;  %v17240_v54 = vadd.f32 %v9690_v37, %v3509_v27  ;;  %v6639_v58 = vand.u32 4294901760, %v17235_v14  ;;  %v6642_v25 = vand.u32 4294901760, %v17237_v17  ;;  %v3518_v42 = vadd.f32 %v9637_v29, %v17128_v0  ;;  %v9641_v6 = vpop.f32.mrb[34].mxu0  ;;  %v9697_v47 = vpop.f32.mrb[122].mxu1  ;;  %v17284_v37 = vld [vmem:[#allocation2 + $0x468] sm:$0xff] }
 0x27d   : > { %12435 = vmatprep.subr.bf16.mxu0 %v17209_v59  ;;  %6564 = vmatprep.mubr.f32.mxu1 %v20254_v12  ;;  %v17250_v12 = vpack.c.bf16 %v6636_v28, %v6633_v5  ;;  %v9640_v45 = vadd.f32 %v9639_v34, %v9638_v46  ;;  %v9696_v0 = vadd.f32 %v9695_v24, %v9694_v23  ;;  %v9642_v35 = vpop.f32.mrb[35].mxu0  ;;  %v9698_v30 = vpop.f32.mrb[123].mxu1  ;;  %v19162_v9 = vand.u32 4294901760, %v17284_v37  ;;  %v17315_v46 = vld [vmem:[#allocation2 + $0x470] sm:$0xff] }
 0x27e   : > { %6566 = vmatmul.mubr.f32.vlgmr.msra.gmra.mrb[224].mxu1 %v20559_v36  ;;  %v17261_v49 = vadd.f32 %v9693_v60, %v3518_v42  ;;  %v17289_v27 = vsub.f32 %v17172_v38, %v6621_v50  ;;  %v9643_v61 = vadd.f32 %v9642_v35, %v9641_v6  ;;  %v9699_v57 = vadd.f32 %v9698_v30, %v9697_v47  ;;  %v9644_v29 = vpop.f32.mrb[36].mxu0  ;;  %v9700_v42 = vpop.f32.mrb[124].mxu1 }
 0x27f   : > { %6413 = vmatmul.mubr.f32.vlgmr.msra.gmra.mrb[136].mxu0 %v20559_v36  ;;  %6571 = vmatprep.mubr.f32.mxu1 %v20486_v63  ;;  %v17256_v36 = vld [vmem:[#allocation2 + $0x440] sm:$0xff]  ;;  %v3527_v39 = vadd.f32 %v9640_v45, %v17139_v8  ;;  %v6654_v50 = vand.u32 4294901760, %v17279_v44  ;;  %v9645_v60 = vpop.f32.mrb[37].mxu0  ;;  %v9701_v24 = vpop.f32.mrb[125].mxu1  ;;  %v6663_v47 = vand.u32 4294901760, %v17315_v46 }
 0x280   : > { %12437 = vmatpush3.bf16.msra.mxu0 %v17209_v59  ;;  %6418 = vmatprep.mubr.f32.mxu0 %v20486_v63  ;;  %v17271_v63 = vpack.c.bf16 %v6642_v25, %v6639_v58  ;;  %v6645_v4 = vand.u32 4294901760, %v17256_v36  ;;  %v19163_v34 = vand.u32 4294901760, %v17289_v27  ;;  %v9646_v45 = vadd.f32 %v9645_v60, %v9644_v29  ;;  %v9647_v6 = vpop.f32.mrb[38].mxu0  ;;  %v9703_v30 = vpop.f32.mrb[126].mxu1  ;;  %v20640_v60 = vld [vmem:[#allocation64_spill] sm:$0xff] }
 0x281   : > { %12439 = vmatprep.subr.bf16.mxu0 %v17228_v21  ;;  %v17296_v8 = vadd.f32 %v9696_v0, %v3527_v39  ;;  %v17328_v0 = vld [vmem:[#allocation2 + $0x478] sm:$0xff]  ;;  %v9702_v39 = vadd.f32 %v9701_v24, %v9700_v42  ;;  %v9704_v29 = vpop.f32.mrb[127].mxu1  ;;  %v464_v42 = vrot.slane %v20640_v60, 2 }
 0x282   : > { %6573 = vmatmul.mubr.f32.gmra.mrb[226].mxu1 %v20563_v52  ;;  %v17306_v38 = vpack.c.bf16 %v6648_v15, %v6645_v4 }
 0x283   : > { %6420 = vmatmul.mubr.f32.gmra.mrb[138].mxu0 %v20563_v52  ;;  %6578 = vmatprep.mubr.f32.mxu1 %v20498_v2  ;;  %v17277_v52 = vld [vmem:[#allocation2 + $0x450] sm:$0xff] }
 0x284   : > { %12441 = vmatpush3.bf16.msra.mxu0 %v17228_v21  ;;  %6425 = vmatprep.mubr.f32.mxu0 %v20498_v2  ;;  %v17294_v2 = vsub.f32 %v17174_v19, %v6624_v11  ;;  %v6651_v19 = vand.u32 4294901760, %v17277_v52  ;;  %v3536_v11 = vadd.f32 %v9643_v61, %v17150_v55  ;;  %v17322_v55 = vsub.f32 %v17187_v16, %v6627_v43  ;;  %v9648_v61 = vpop.f32.mrb[39].mxu0 }
 0x285   : > { %12443 = vmatprep.subr.bf16.mxu0 %v17250_v12  ;;  %v17341_v43 = vsub.f32 %v17189_v1, %v6630_v22  ;;  %v6666_v1 = vand.u32 4294901760, %v17328_v0 }
 0x286   : > { %6580 = vmatmul.mubr.f32.gmra.mrb[228].mxu1 %v20568_v51  ;;  %v19164_v23 = vand.u32 4294901760, %v17294_v2  ;;  %v17336_v16 = vpack.c.bf16 %v6654_v50, %v6651_v19  ;;  %v19166_v22 = vand.u32 4294901760, %v17322_v55 }
 0x287   : > { %6427 = vmatmul.mubr.f32.gmra.mrb[140].mxu0 %v20568_v51  ;;  %6585 = vmatprep.mubr.f32.mxu1 %v20511_v31  ;;  %v6657_v51 = vand.u32 4294901760, %v17282_v20 }
 0x288   : > { %12445 = vmatpush3.bf16.msra.mxu0 %v17250_v12  ;;  %6432 = vmatprep.mubr.f32.mxu0 %v20511_v31  ;;  %v17324_v31 = vadd.f32 %v9699_v57, %v3536_v11  ;;  %v9649_v11 = vadd.f32 %v9648_v61, %v9647_v6  ;;  %v9738_v6 = vpop.f32.mrb[40].mxu0  ;;  %v17385_v61 = vsub.f32 %v17235_v14, %v6639_v58 }
 0x289   : > { %12447 = vmatprep.subr.bf16.mxu0 %v17271_v63  ;;  %v17349_v35 = vpack.c.bf16 %v19162_v9, %v6657_v51  ;;  %v9705_v9 = vadd.f32 %v9704_v29, %v9703_v30  ;;  %v20643_v30 = vld [vmem:[#allocation99_spill] sm:$0xff]  ;;  %v6799_v14 = vsub.f32 %v17322_v55, %v19166_v22 }
 0x28a   : > { %6587 = vmatmul.mubr.f32.gmra.mrb[230].mxu1 %v20572_v62 }
 0x28b   : > { %6434 = vmatmul.mubr.f32.gmra.mrb[142].mxu0 %v20572_v62  ;;  %v3545_v62 = vadd.f32 %v9646_v45, %v17161_v18  ;;  %6592 = vmatprep.mubr.f32.mxu1 %v20528_v32  ;;  %v6785_v18 = vsub.f32 %v17289_v27, %v19163_v34  ;;  %v20641_v45 = vld [vmem:[#allocation9_spill] sm:$0xff]  ;;  %v20642_v34 = vld [vmem:[#allocation100_spill] sm:$0xff] }
 0x28c   : > { %12449 = vmatpush3.bf16.msra.mxu0 %v17271_v63  ;;  %6439 = vmatprep.mubr.f32.mxu0 %v20528_v32  ;;  %v6792_v32 = vsub.f32 %v17294_v2, %v19164_v23  ;;  %v465_v24 = vrot.slane %v20641_v45, 2  ;;  %v19165_v23 = vand.u32 4294901760, %v17341_v43 }
 0x28d   : > { %12451 = vmatprep.subr.bf16.mxu0 %v17306_v38  ;;  %v17361_v57 = vadd.f32 %v9702_v39, %v3545_v62  ;;  %v17373_v39 = vsub.f32 %v17211_v10, %v6633_v5  ;;  %v3554_v62 = vadd.f32 %v9649_v11, %v17176_v48  ;;  %v17390_v10 = vsub.f32 %v17237_v17, %v6642_v25  ;;  %v9739_v5 = vpop.f32.mrb[41].mxu0 }
 0x28e   : > { %6594 = vmatmul.mubr.f32.gmra.mrb[232].mxu1 %v20579_v40  ;;  %v17397_v48 = vpack.c.bf16 %v6666_v1, %v6663_v47  ;;  %v6793_v25 = vand.u32 4294901760, %v6792_v32  ;;  %v466_v11 = vsel %vm415_vm1, %v464_v42, %v465_v24  ;;  %v19168_v32 = vand.u32 4294901760, %v17385_v61 }
 0x28f   : > { %6441 = vmatmul.mubr.f32.gmra.mrb[144].mxu0 %v20579_v40  ;;  %v17378_v40 = vsub.f32 %v17213_v26, %v6636_v28  ;;  %6599 = vmatprep.mubr.f32.mxu1 %v20642_v34  ;;  %v9794_v26 = vpop.f32.mrb[128].mxu1  ;;  %v6786_v28 = vand.u32 4294901760, %v6785_v18  ;;  %v17402_v58 = vadd.f32 %v9705_v9, %v3554_v62  ;;  %v6806_v18 = vsub.f32 %v17341_v43, %v19165_v23  ;;  %v9741_v62 = vpop.f32.mrb[42].mxu0 }
 0x290   : > { %12453 = vmatpush3.bf16.msra.mxu0 %v17306_v38  ;;  %6446 = vmatprep.mubr.f32.mxu0 %v20642_v34  ;;  %v9740_v34 = vadd.f32 %v9739_v5, %v9738_v6  ;;  %v9795_v17 = vpop.f32.mrb[129].mxu1  ;;  %v6812_v9 = vand.u32 4294901760, %v17373_v39  ;;  %v19167_v42 = vand.u32 4294901760, %v17390_v10  ;;  %v9742_v24 = vpop.f32.mrb[43].mxu0  ;;  %v17422_v5 = vsub.f32 %v17256_v36, %v6645_v4 }
 0x291   : > { %12455 = vmatprep.subr.bf16.mxu0 %v17336_v16  ;;  %v9796_v29 = vadd.f32 %v9795_v17, %v9794_v26  ;;  %v19169_v60 = vand.u32 4294901760, %v17378_v40  ;;  %v9797_v6 = vpop.f32.mrb[130].mxu1  ;;  %v9743_v26 = vadd.f32 %v9742_v24, %v9741_v62  ;;  %v12466_v17 = vpack.c.bf16 %v6793_v25, %v6786_v28 }
 0x292   : > { %6601 = vmatmul.mubr.f32.gmra.mrb[234].mxu1 %v20643_v30  ;;  %v3907_v45 = vadd.f32 %v9740_v34, %v17193_v53  ;;  %v17427_v53 = vsub.f32 %v17258_v3, %v6648_v15  ;;  %v9798_v34 = vpop.f32.mrb[131].mxu1  ;;  %v6800_v23 = vand.u32 4294901760, %v6799_v14  ;;  %v6807_v36 = vand.u32 4294901760, %v6806_v18 }
 0x293   : > { %6448 = vmatmul.mubr.f32.gmra.mrb[146].mxu0 %v20643_v30  ;;  %6606 = vmatprep.mubr.f32.mxu1 %v20548_v33  ;;  %v17429_v30 = vand.u32 4294901760, %v466_v11  ;;  %v9799_v22 = vadd.f32 %v9798_v34, %v9797_v6  ;;  %v6813_v3 = vsub.f32 %v17373_v39, %v6812_v9  ;;  %v6820_v4 = vsub.f32 %v17378_v40, %v19169_v60  ;;  %v9800_v25 = vpop.f32.mrb[132].mxu1 }
 0x294   : > { %12457 = vmatpush3.bf16.msra.mxu0 %v17336_v16  ;;  %6453 = vmatprep.mubr.f32.mxu0 %v20548_v33  ;;  %v17431_v33 = vadd.f32 %v9796_v29, %v3907_v45  ;;  %v3914_v15 = vadd.f32 %v9743_v26, %v17217_v7  ;;  %v9744_v29 = vpop.f32.mrb[44].mxu0  ;;  %v6834_v28 = vsub.f32 %v17390_v10, %v19167_v42  ;;  %v6840_v18 = vand.u32 4294901760, %v17422_v5  ;;  %v9801_v6 = vpop.f32.mrb[133].mxu1  ;;  %v20644_v42 = vld [vmem:[#allocation110_spill] sm:$0xff] }
 0x295   : > { %12459 = vmatprep.subr.bf16.mxu0 %v17349_v35  ;;  %v9745_v14 = vpop.f32.mrb[45].mxu0  ;;  %v19170_v45 = vand.u32 4294901760, %v17427_v53  ;;  %v17460_v7 = vsub.f32 %v466_v11, %v17429_v30  ;;  %v17469_v26 = vsub.f32 %v17279_v44, %v6654_v50  ;;  %v9802_v34 = vadd.f32 %v9801_v6, %v9800_v25  ;;  %v9803_v60 = vpop.f32.mrb[134].mxu1 }
 0x296   : > { %6608 = vmatmul.mubr.f32.gmra.mrb[236].mxu1 %v20590_v41  ;;  %v17462_v62 = vadd.f32 %v9799_v22, %v3914_v15  ;;  %v9746_v24 = vadd.f32 %v9745_v14, %v9744_v29  ;;  %v6821_v11 = vand.u32 4294901760, %v6820_v4  ;;  %v9747_v15 = vpop.f32.mrb[46].mxu0  ;;  %v6835_v14 = vand.u32 4294901760, %v6834_v28  ;;  %v20646_v4 = vld [vmem:[#allocation17_spill] sm:$0xff] }
 0x297   : > { %6455 = vmatmul.mubr.f32.gmra.mrb[148].mxu0 %v20590_v41  ;;  %6613 = vmatprep.mubr.f32.mxu1 %v17014_v13  ;;  %v6827_v41 = vsub.f32 %v17385_v61, %v19168_v32  ;;  %v9748_v32 = vpop.f32.mrb[47].mxu0  ;;  %v6841_v44 = vsub.f32 %v17422_v5, %v6840_v18  ;;  %v6848_v50 = vsub.f32 %v17427_v53, %v19170_v45  ;;  %v20647_v6 = vand.u32 4294901760, %v17284_v37 }
 0x298   : > { %12461 = vmatpush3.bf16.msra.mxu0 %v17349_v35  ;;  %6460 = vmatprep.mubr.f32.mxu0 %v17014_v13  ;;  %v17457_v13 = vsub.f32 %v17277_v52, %v6651_v19  ;;  %v12470_v52 = vpack.c.bf16 %v6807_v36, %v6800_v23  ;;  %v6814_v19 = vand.u32 4294901760, %v6813_v3  ;;  %v3921_v22 = vadd.f32 %v9746_v24, %v17240_v54  ;;  %v9804_v3 = vpop.f32.mrb[135].mxu1 }
 0x299   : > { %12463 = vmatprep.subr.bf16.mxu0 %v17397_v48  ;;  %v6828_v29 = vand.u32 4294901760, %v6827_v41  ;;  %v9749_v36 = vadd.f32 %v9748_v32, %v9747_v15  ;;  %v6861_v41 = vand.u32 4294901760, %v17469_v26  ;;  %v17489_v28 = vsub.f32 %v17282_v20, %v6657_v51  ;;  %v20648_v51 = vld [vmem:[#allocation167_spill] sm:$0xff] }
 0x29a   : > { %6615 = vmatmul.mubr.f32.gmra.mrb[238].mxu1 %v17025_v56  ;;  %v6854_v23 = vand.u32 4294901760, %v17457_v13  ;;  %v17482_v54 = vadd.f32 %v9802_v34, %v3921_v22  ;;  %v9805_v25 = vadd.f32 %v9804_v3, %v9803_v60  ;;  %v12474_v24 = vpack.c.bf16 %v6821_v11, %v6814_v19 }
 0x29b   : > { %6462 = vmatmul.mubr.f32.gmra.mrb[150].mxu0 %v17025_v56  ;;  %v20645_v56 = vld [vmem:[#allocation147_spill] sm:$0xff]  ;;  %v17494_v34 = vsub.f32 %v17284_v37, %v20647_v6  ;;  %v3928_v32 = vadd.f32 %v9749_v36, %v17261_v49  ;;  %v12478_v22 = vpack.c.bf16 %v6835_v14, %v6828_v29  ;;  %v6849_v45 = vand.u32 4294901760, %v6848_v50  ;;  %v20649_v29 = vld [vmem:[#allocation149_spill] sm:$0xff] }
 0x29c   : > { %12465 = vmatpush3.bf16.msra.mxu0 %v17397_v48  ;;  %11032 = vmatprep.mubr.f32.mxu0 %v20644_v42  ;;  %v6773_v42 = vand.u32 4294901760, %v17460_v7  ;;  %v6855_v20 = vsub.f32 %v17457_v13, %v6854_v23  ;;  %v6862_v11 = vsub.f32 %v17469_v26, %v6861_v41  ;;  %v19174_v14 = vand.u32 4294901760, %v17489_v28 }
 0x29d   : > { %12467 = vmatprep.subr.bf16.mxu0 %v12466_v17  ;;  %v17504_v37 = vadd.f32 %v9805_v25, %v3928_v32  ;;  %v19172_v50 = vand.u32 4294901760, %v17494_v34  ;;  %v17515_v36 = vsub.f32 %v17315_v46, %v6663_v47 }
 0x29e   : > { %v6774_v60 = vsub.f32 %v17460_v7, %v6773_v42  ;;  %v6863_v47 = vand.u32 4294901760, %v6862_v11 }
 0x29f   : > { %11033 = vmatmul.mubr.f32.vlgmr.msra.gmra.mrb[152].mxu0 %v20645_v56  ;;  %v9806_v56 = vpop.f32.mrb[136].mxu1 }
 0x2a0   : > { %12469 = vmatpush3.bf16.msra.mxu0 %v12466_v17  ;;  %11035 = vmatprep.mubr.f32.mxu0 %v20646_v4  ;;  %v9750_v17 = vpop.f32.mrb[48].mxu0  ;;  %v6842_v4 = vand.u32 4294901760, %v6841_v44  ;;  %v9807_v49 = vpop.f32.mrb[137].mxu1 }
 0x2a1   : > { %12471 = vmatprep.subr.bf16.mxu0 %v12470_v52  ;;  %v9751_v15 = vpop.f32.mrb[49].mxu0  ;;  %v9808_v44 = vadd.f32 %v9807_v49, %v9806_v56  ;;  %v9809_v32 = vpop.f32.mrb[138].mxu1  ;;  %v20650_v56 = vld [vmem:[#allocation153_spill] sm:$0xff] }
 0x2a2   : > { %v9752_v19 = vadd.f32 %v9751_v15, %v9750_v17  ;;  %v9753_v25 = vpop.f32.mrb[50].mxu0  ;;  %v12482_v17 = vpack.c.bf16 %v6849_v45, %v6842_v4  ;;  %v6856_v15 = vand.u32 4294901760, %v6855_v20  ;;  %v9810_v46 = vpop.f32.mrb[139].mxu1  ;;  %v6876_v45 = vsub.f32 %v17494_v34, %v19172_v50 }
 0x2a3   : > { %11036 = vmatmul.mubr.f32.gmra.mrb[154].mxu0 %v20648_v51  ;;  %v9754_v6 = vpop.f32.mrb[51].mxu0  ;;  %v6775_v51 = vand.u32 4294901760, %v6774_v60  ;;  %v19171_v4 = vand.u32 4294901760, %v17515_v36  ;;  %v9812_v11 = vpop.f32.mrb[140].mxu1 }
 0x2a4   : > { %12473 = vmatpush3.bf16.msra.mxu0 %v12470_v52  ;;  %11038 = vmatprep.mubr.f32.mxu0 %v20649_v29  ;;  %v17520_v52 = vsub.f32 %v17328_v0, %v6666_v1  ;;  %v3935_v3 = vadd.f32 %v9752_v19, %v17296_v8  ;;  %v9755_v29 = vadd.f32 %v9754_v6, %v9753_v25  ;;  %v20651_v1 = vld [vmem:[#allocation112_spill] sm:$0xff]  ;;  %v9756_v60 = vpop.f32.mrb[52].mxu0  ;;  %v9813_v25 = vpop.f32.mrb[141].mxu1 }
 0x2a5   : > { %12475 = vmatprep.subr.bf16.mxu0 %v12474_v24  ;;  %v6869_v0 = vsub.f32 %v17489_v28, %v19174_v14  ;;  %v9811_v8 = vadd.f32 %v9810_v46, %v9809_v32  ;;  %v9757_v19 = vpop.f32.mrb[53].mxu0  ;;  %v12486_v6 = vpack.c.bf16 %v6863_v47, %v6856_v15  ;;  %v9814_v46 = vadd.f32 %v9813_v25, %v9812_v11 }
 0x2a6   : > { %v17524_v49 = vadd.f32 %v9808_v44, %v3935_v3  ;;  %v19173_v20 = vand.u32 4294901760, %v17520_v52  ;;  %v9758_v3 = vadd.f32 %v9757_v19, %v9756_v60 }
 0x2a7   : > { %11039 = vmatmul.mubr.f32.gmra.mrb[156].mxu0 %v20650_v56  ;;  %v6870_v32 = vand.u32 4294901760, %v6869_v0  ;;  %v20652_v56 = vld [vmem:[#allocation8_spill] sm:$0xff] }
 0x2a8   : > { %12477 = vmatpush3.bf16.msra.mxu0 %v12474_v24  ;;  %11041 = vmatprep.mubr.f32.mxu0 %v20651_v1  ;;  %v3942_v24 = vadd.f32 %v9755_v29, %v17324_v31  ;;  %v6877_v1 = vand.u32 4294901760, %v6876_v45  ;;  %v6883_v31 = vsub.f32 %v17515_v36, %v19171_v4  ;;  %v3949_v29 = vadd.f32 %v9758_v3, %v17361_v57 }
 0x2a9   : > { %12479 = vmatprep.subr.bf16.mxu0 %v12478_v22 }
 0x2aa   : > { %v17536_v44 = vadd.f32 %v9811_v8, %v3942_v24  ;;  %v9759_v8 = vpop.f32.mrb[54].mxu0  ;;  %v9815_v24 = vpop.f32.mrb[142].mxu1  ;;  %v17546_v15 = vadd.f32 %v9814_v46, %v3949_v29  ;;  %v12490_v45 = vpack.c.bf16 %v6877_v1, %v6870_v32  ;;  %v6884_v19 = vand.u32 4294901760, %v6883_v31 }
 0x2ab   : > { %11042 = vmatmul.mubr.f32.gmra.mrb[158].mxu0 %v6775_v51  ;;  %v6890_v51 = vsub.f32 %v17520_v52, %v19173_v20  ;;  %v9816_v0 = vpop.f32.mrb[143].mxu1 }
 0x2ac   : > { %12481 = vmatpush3.bf16.msra.mxu0 %v12478_v22  ;;  %11076 = vmatprep.mubr.f32.mxu0 %v20652_v56  ;;  %v9760_v22 = vpop.f32.mrb[55].mxu0  ;;  %v9817_v60 = vadd.f32 %v9816_v0, %v9815_v24  ;;  %v9906_v20 = vpop.f32.mrb[144].mxu1 }
 0x2ad   : > { %12483 = vmatprep.subr.bf16.mxu0 %v12482_v17  ;;  %v9761_v47 = vadd.f32 %v9760_v22, %v9759_v8  ;;  %v6891_v11 = vand.u32 4294901760, %v6890_v51  ;;  %v9850_v4 = vpop.f32.mrb[56].mxu0  ;;  %v9907_v3 = vpop.f32.mrb[145].mxu1 }
 0x2ae   : > { %v9851_v50 = vpop.f32.mrb[57].mxu0  ;;  %v9908_v46 = vadd.f32 %v9907_v3, %v9906_v20  ;;  %v9909_v32 = vpop.f32.mrb[146].mxu1  ;;  %v20653_v3 = vld [vmem:[#allocation59_spill] sm:$0xff] }
 0x2af   : > { %v3956_v25 = vadd.f32 %v9761_v47, %v17402_v58  ;;  %v9852_v57 = vadd.f32 %v9851_v50, %v9850_v4  ;;  %v12494_v29 = vpack.c.bf16 %v6891_v11, %v6884_v19  ;;  %v9853_v8 = vpop.f32.mrb[58].mxu0  ;;  %v9910_v58 = vpop.f32.mrb[147].mxu1  ;;  %v12498_v50 = vpack.c.bf16 %v17294_v2, %v17289_v27 }
 0x2b0   : > { %12485 = vmatpush3.bf16.msra.mxu0 %v12482_v17  ;;  %v9854_v22 = vpop.f32.mrb[59].mxu0  ;;  %v9911_v51 = vadd.f32 %v9910_v58, %v9909_v32  ;;  %v9912_v24 = vpop.f32.mrb[148].mxu1 }
 0x2b1   : > { %12487 = vmatprep.subr.bf16.mxu0 %v12486_v6  ;;  %v17549_v14 = vadd.f32 %v9817_v60, %v3956_v25  ;;  %v4221_v17 = vadd.f32 %v9852_v57, %v17431_v33  ;;  %v9855_v31 = vadd.f32 %v9854_v22, %v9853_v8  ;;  %v9856_v20 = vpop.f32.mrb[60].mxu0  ;;  %v9913_v0 = vpop.f32.mrb[149].mxu1  ;;  %v20654_v8 = vld [vmem:[#allocation34_spill] sm:$0xff]  ;;  %v12506_v22 = vpack.c.bf16 %v17378_v40, %v17373_v39 }
 0x2b2   : > { %v9914_v60 = vadd.f32 %v9913_v0, %v9912_v24  ;;  %v20676_v39 = vand.u32 4294901760, %v17385_v61 }
 0x2b3   : > { %v17552_v1 = vadd.f32 %v9908_v46, %v4221_v17  ;;  %v4236_v4 = vadd.f32 %v9855_v31, %v17462_v62  ;;  %v9915_v57 = vpop.f32.mrb[150].mxu1 }
 0x2b4   : > { %12489 = vmatpush3.bf16.msra.mxu0 %v12486_v6  ;;  %v9857_v6 = vpop.f32.mrb[61].mxu0  ;;  %v9916_v17 = vpop.f32.mrb[151].mxu1 }
 0x2b5   : > { %12491 = vmatprep.subr.bf16.mxu0 %v12490_v45  ;;  %v17557_v47 = vadd.f32 %v9911_v51, %v4236_v4  ;;  %v9858_v33 = vadd.f32 %v9857_v6, %v9856_v20  ;;  %v9859_v11 = vpop.f32.mrb[62].mxu0  ;;  %v20655_v51 = vld [vmem:[#allocation13_spill] sm:$0xff] }
 0x2b6   : > { %v9860_v25 = vpop.f32.mrb[63].mxu0  ;;  %v20656_v6 = vld [vmem:[#allocation129_spill] sm:$0xff] }
 0x2b7   : > { %v4251_v19 = vadd.f32 %v9858_v33, %v17482_v54  ;;  %v9861_v46 = vadd.f32 %v9860_v25, %v9859_v11  ;;  %v9862_v54 = vpop.f32.mrb[64].mxu0  ;;  %v12510_v33 = vpack.c.bf16 %v17390_v10, %v17385_v61  ;;  %v20657_v11 = vld [vmem:[#allocation54_spill] sm:$0xff]  ;;  %v20680_v61 = vand.u32 4294901760, %v17427_v53 }
 0x2b8   : > { %12493 = vmatpush3.bf16.msra.mxu0 %v12490_v45  ;;  %v12502_v45 = vpack.c.bf16 %v17341_v43, %v17322_v55  ;;  %v9863_v31 = vpop.f32.mrb[65].mxu0 }
 0x2b9   : > { %12495 = vmatprep.subr.bf16.mxu0 %v12494_v29  ;;  %v17563_v62 = vadd.f32 %v9914_v60, %v4251_v19  ;;  %v4266_v32 = vadd.f32 %v9861_v46, %v17504_v37  ;;  %v9864_v20 = vadd.f32 %v9863_v31, %v9862_v54  ;;  %v20658_v46 = vld [vmem:[#allocation48_spill] sm:$0xff] }
 0x2bb   : > { %v9918_v58 = vpop.f32.mrb[152].mxu1  ;;  %v4281_v0 = vadd.f32 %v9864_v20, %v17524_v49 }
 0x2bc   : > { %12497 = vmatpush3.bf16.msra.mxu0 %v12494_v29  ;;  %v9917_v29 = vadd.f32 %v9916_v17, %v9915_v57 }
 0x2bd   : > { %12499 = vmatprep.subr.bf16.mxu0 %v12498_v50  ;;  %v9865_v37 = vpop.f32.mrb[66].mxu0 }
 0x2be   : > { %v17570_v4 = vadd.f32 %v9917_v29, %v4266_v32  ;;  %v9866_v60 = vpop.f32.mrb[67].mxu0  ;;  %v12514_v29 = vpack.c.bf16 %v17427_v53, %v17422_v5  ;;  %v12582_v5 = vpack.c.bf16 %v6861_v41, %v6854_v23 }
 0x2bf   : > { %11077 = vmatmul.mubr.f32.vlgmr.msra.gmra.mrb[152].mxu0 %v20653_v3  ;;  %v9867_v57 = vadd.f32 %v9866_v60, %v9865_v37 }
 0x2c0   : > { %12501 = vmatpush3.bf16.msra.mxu0 %v12498_v50  ;;  %11079 = vmatprep.mubr.f32.mxu0 %v20654_v8  ;;  %v9919_v50 = vpop.f32.mrb[153].mxu1 }
 0x2c1   : > { %12503 = vmatprep.subr.bf16.mxu0 %v12502_v45  ;;  %v9920_v24 = vadd.f32 %v9919_v50, %v9918_v58  ;;  %v9921_v19 = vpop.f32.mrb[154].mxu1  ;;  %v4296_v32 = vadd.f32 %v9867_v57, %v17536_v44  ;;  %v9868_v49 = vpop.f32.mrb[68].mxu0  ;;  %v20659_v50 = vld [vmem:[#allocation60_spill] sm:$0xff] }
 0x2c2   : > { %v9869_v54 = vpop.f32.mrb[69].mxu0 }
 0x2c3   : > { %11080 = vmatmul.mubr.f32.gmra.mrb[154].mxu0 %v20655_v51  ;;  %v17577_v25 = vadd.f32 %v9920_v24, %v4281_v0  ;;  %v9870_v20 = vadd.f32 %v9869_v54, %v9868_v49  ;;  %v12518_v0 = vpack.c.bf16 %v17469_v26, %v17457_v13 }
 0x2c4   : > { %12505 = vmatpush3.bf16.msra.mxu0 %v12502_v45  ;;  %11082 = vmatprep.mubr.f32.mxu0 %v20656_v6  ;;  %v9922_v45 = vpop.f32.mrb[155].mxu1 }
 0x2c5   : > { %12507 = vmatprep.subr.bf16.mxu0 %v12506_v22  ;;  %v9923_v17 = vadd.f32 %v9922_v45, %v9921_v19  ;;  %v9924_v31 = vpop.f32.mrb[156].mxu1  ;;  %v4311_v37 = vadd.f32 %v9870_v20, %v17546_v15  ;;  %v9871_v44 = vpop.f32.mrb[70].mxu0 }
 0x2c6   : > { %v9872_v60 = vpop.f32.mrb[71].mxu0 }
 0x2c7   : > { %11083 = vmatmul.mubr.f32.gmra.mrb[156].mxu0 %v20657_v11  ;;  %v17584_v58 = vadd.f32 %v9923_v17, %v4296_v32  ;;  %v9873_v45 = vadd.f32 %v9872_v60, %v9871_v44 }
 0x2c8   : > { %12509 = vmatpush3.bf16.msra.mxu0 %v12506_v22  ;;  %11085 = vmatprep.mubr.f32.mxu0 %v20658_v46  ;;  %v9925_v22 = vpop.f32.mrb[157].mxu1 }
 0x2c9   : > { %12511 = vmatprep.subr.bf16.mxu0 %v12510_v33  ;;  %v9926_v24 = vadd.f32 %v9925_v22, %v9924_v31  ;;  %v9927_v19 = vpop.f32.mrb[158].mxu1  ;;  %v4326_v49 = vadd.f32 %v9873_v45, %v17549_v14 }
 0x2ca   : > { %v9928_v17 = vpop.f32.mrb[159].mxu1  ;;  %v9962_v54 = vpop.f32.mrb[72].mxu0 }
 0x2cb   : > { %11086 = vmatmul.mubr.f32.gmra.mrb[158].mxu0 %v17429_v30  ;;  %v17590_v57 = vadd.f32 %v9926_v24, %v4311_v37  ;;  %v9929_v32 = vadd.f32 %v9928_v17, %v9927_v19  ;;  %v9963_v31 = vpop.f32.mrb[73].mxu0 }
 0x2cc   : > { %12513 = vmatpush3.bf16.msra.mxu0 %v12510_v33  ;;  %11120 = vmatprep.mubr.f32.mxu0 %v20659_v50  ;;  %v12522_v33 = vpack.c.bf16 %v17494_v34, %v17489_v28  ;;  %v10018_v22 = vpop.f32.mrb[160].mxu1  ;;  %v9964_v15 = vadd.f32 %v9963_v31, %v9962_v54 }
 0x2cd   : > { %12515 = vmatprep.subr.bf16.mxu0 %v12514_v29  ;;  %v17595_v50 = vadd.f32 %v9929_v32, %v4326_v49  ;;  %v10019_v20 = vpop.f32.mrb[161].mxu1 }
 0x2ce   : > { %v10020_v24 = vadd.f32 %v10019_v20, %v10018_v22  ;;  %v4745_v37 = vadd.f32 %v9964_v15, %v17552_v1  ;;  %v9965_v44 = vpop.f32.mrb[74].mxu0 }
 0x2cf   : > { %v9966_v60 = vpop.f32.mrb[75].mxu0 }
 0x2d0   : > { %12517 = vmatpush3.bf16.msra.mxu0 %v12514_v29  ;;  %v12526_v29 = vpack.c.bf16 %v17520_v52, %v17515_v36  ;;  %v10021_v19 = vpop.f32.mrb[162].mxu1  ;;  %v17600_v17 = vadd.f32 %v10020_v24, %v4745_v37  ;;  %v9967_v14 = vadd.f32 %v9966_v60, %v9965_v44  ;;  %v20660_v60 = vld [vmem:[#allocation35_spill] sm:$0xff] }
 0x2d1   : > { %12519 = vmatprep.subr.bf16.mxu0 %v12518_v0  ;;  %v10022_v45 = vpop.f32.mrb[163].mxu1 }
 0x2d2   : > { %v10023_v32 = vadd.f32 %v10022_v45, %v10021_v19  ;;  %v9968_v49 = vpop.f32.mrb[76].mxu0  ;;  %v20661_v45 = vld [vmem:[#allocation11_spill] sm:$0xff] }
 0x2d3   : > { %v9969_v54 = vpop.f32.mrb[77].mxu0 }
 0x2d4   : > { %12521 = vmatpush3.bf16.msra.mxu0 %v12518_v0  ;;  %v4754_v0 = vadd.f32 %v9967_v14, %v17557_v47  ;;  %v10024_v31 = vpop.f32.mrb[164].mxu1  ;;  %v9970_v20 = vadd.f32 %v9969_v54, %v9968_v49  ;;  %v20662_v54 = vld [vmem:[#allocation125_spill] sm:$0xff] }
 0x2d5   : > { %12523 = vmatprep.subr.bf16.mxu0 %v12522_v33  ;;  %v10025_v1 = vpop.f32.mrb[165].mxu1 }
 0x2d6   : > { %v17603_v22 = vadd.f32 %v10023_v32, %v4754_v0  ;;  %v10026_v15 = vadd.f32 %v10025_v1, %v10024_v31  ;;  %v4763_v24 = vadd.f32 %v9970_v20, %v17563_v62  ;;  %v9971_v37 = vpop.f32.mrb[78].mxu0 }
 0x2d8   : > { %12525 = vmatpush3.bf16.msra.mxu0 %v12522_v33  ;;  %v9972_v33 = vpop.f32.mrb[79].mxu0  ;;  %v10027_v44 = vpop.f32.mrb[166].mxu1  ;;  %v17608_v19 = vadd.f32 %v10026_v15, %v4763_v24  ;;  %v20663_v15 = vld [vmem:[#allocation18_spill] sm:$0xff] }
 0x2d9   : > { %12527 = vmatprep.subr.bf16.mxu0 %v12526_v29  ;;  %v9973_v47 = vadd.f32 %v9972_v33, %v9971_v37  ;;  %v10028_v14 = vpop.f32.mrb[167].mxu1 }
 0x2da   : > { %v9974_v0 = vpop.f32.mrb[80].mxu0 }
 0x2db   : > { %v4772_v32 = vadd.f32 %v9973_v47, %v17570_v4  ;;  %v9975_v62 = vpop.f32.mrb[81].mxu0 }
 0x2dc   : > { %12529 = vmatpush3.bf16.msra.mxu0 %v12526_v29  ;;  %v10029_v29 = vadd.f32 %v10028_v14, %v10027_v44  ;;  %v10030_v49 = vpop.f32.mrb[168].mxu1  ;;  %v9976_v20 = vadd.f32 %v9975_v62, %v9974_v0 }
 0x2dd   : > { %12531 = vmatprep.subr.bf16.mxu0 %v17209_v59  ;;  %v10031_v1 = vpop.f32.mrb[169].mxu1 }
 0x2de   : > { %v17615_v31 = vadd.f32 %v10029_v29, %v4772_v32  ;;  %v10032_v24 = vadd.f32 %v10031_v1, %v10030_v49  ;;  %v4781_v37 = vadd.f32 %v9976_v20, %v17577_v25  ;;  %v9977_v33 = vpop.f32.mrb[82].mxu0  ;;  %v20665_v29 = vld [vmem:[#allocation19_spill] sm:$0xff] }
 0x2df   : > { %11121 = vmatmul.mubr.f32.vlgmr.msra.gmra.mrb[152].mxu0 %v20660_v60  ;;  %v9978_v4 = vpop.f32.mrb[83].mxu0  ;;  %v20664_v60 = vld [vmem:[#allocation21_spill] sm:$0xff] }
 0x2e0   : > { %12533 = vmatpush3.bf16.msra.mxu0 %v17209_v59  ;;  %11123 = vmatprep.mubr.f32.mxu0 %v20661_v45  ;;  %v10033_v44 = vpop.f32.mrb[170].mxu1  ;;  %v17622_v47 = vadd.f32 %v10032_v24, %v4781_v37  ;;  %v9979_v14 = vadd.f32 %v9978_v4, %v9977_v33 }
 0x2e1   : > { %12535 = vmatprep.subr.bf16.mxu0 %v17228_v21  ;;  %v10034_v45 = vpop.f32.mrb[171].mxu1 }
 0x2e2   : > { %v10035_v32 = vadd.f32 %v10034_v45, %v10033_v44  ;;  %v4790_v0 = vadd.f32 %v9979_v14, %v17584_v58  ;;  %v9980_v62 = vpop.f32.mrb[84].mxu0 }
 0x2e3   : > { %11124 = vmatmul.mubr.f32.gmra.mrb[154].mxu0 %v20662_v54  ;;  %v9981_v25 = vpop.f32.mrb[85].mxu0 }
 0x2e4   : > { %12537 = vmatpush3.bf16.msra.mxu0 %v17228_v21  ;;  %11126 = vmatprep.mubr.f32.mxu0 %v20663_v15  ;;  %v10036_v49 = vpop.f32.mrb[172].mxu1  ;;  %v17629_v54 = vadd.f32 %v10035_v32, %v4790_v0  ;;  %v9982_v20 = vadd.f32 %v9981_v25, %v9980_v62  ;;  %v20666_v15 = vld [vmem:[#allocation43_spill] sm:$0xff] }
 0x2e5   : > { %12539 = vmatprep.subr.bf16.mxu0 %v17250_v12  ;;  %v10037_v1 = vpop.f32.mrb[173].mxu1 }
 0x2e6   : > { %v10038_v24 = vadd.f32 %v10037_v1, %v10036_v49  ;;  %v4799_v37 = vadd.f32 %v9982_v20, %v17590_v57  ;;  %v9983_v33 = vpop.f32.mrb[86].mxu0 }
 0x2e7   : > { %11127 = vmatmul.mubr.f32.gmra.mrb[156].mxu0 %v20664_v60  ;;  %v9984_v58 = vpop.f32.mrb[87].mxu0 }
 0x2e8   : > { %12541 = vmatpush3.bf16.msra.mxu0 %v17250_v12  ;;  %11129 = vmatprep.mubr.f32.mxu0 %v20665_v29  ;;  %v10039_v4 = vpop.f32.mrb[174].mxu1  ;;  %v17635_v44 = vadd.f32 %v10038_v24, %v4799_v37  ;;  %v9985_v60 = vadd.f32 %v9984_v58, %v9983_v33 }
 0x2e9   : > { %12543 = vmatprep.subr.bf16.mxu0 %v17271_v63  ;;  %v10040_v14 = vpop.f32.mrb[175].mxu1 }
 0x2ea   : > { %v10041_v45 = vadd.f32 %v10040_v14, %v10039_v4  ;;  %v4808_v29 = vadd.f32 %v9985_v60, %v17595_v50  ;;  %v20667_v60 = vand.u32 4294901760, %v17289_v27  ;;  %v20668_v14 = vand.u32 4294901760, %v17294_v2 }
 0x2eb   : > { %11130 = vmatmul.mubr.f32.gmra.mrb[158].mxu0 %v17460_v7  ;;  %v10074_v32 = vpop.f32.mrb[88].mxu0  ;;  %v20670_v27 = vand.u32 4294901760, %v17341_v43 }
 0x2ec   : > { %12545 = vmatpush3.bf16.msra.mxu0 %v17271_v63  ;;  %11164 = vmatprep.mubr.f32.mxu0 %v20666_v15  ;;  %v10075_v0 = vpop.f32.mrb[89].mxu0  ;;  %v10130_v62 = vpop.f32.mrb[176].mxu1  ;;  %v17640_v25 = vadd.f32 %v10041_v45, %v4808_v29  ;;  %v12562_v45 = vpack.c.bf16 %v20668_v14, %v20667_v60  ;;  %v20672_v14 = vld [vmem:[#allocation45_spill] sm:$0xff] }
 0x2ed   : > { %12547 = vmatprep.subr.bf16.mxu0 %v17306_v38  ;;  %v10076_v57 = vadd.f32 %v10075_v0, %v10074_v32  ;;  %v10131_v49 = vpop.f32.mrb[177].mxu1 }
 0x2ee   : > { %v10132_v20 = vadd.f32 %v10131_v49, %v10130_v62 }
 0x2ef   : > { %v5161_v1 = vadd.f32 %v10076_v57, %v17600_v17  ;;  %v10077_v15 = vpop.f32.mrb[90].mxu0 }
 0x2f0   : > { %12549 = vmatpush3.bf16.msra.mxu0 %v17306_v38  ;;  %v10078_v24 = vpop.f32.mrb[91].mxu0  ;;  %v10133_v37 = vpop.f32.mrb[178].mxu1 }
 0x2f1   : > { %12551 = vmatprep.subr.bf16.mxu0 %v17336_v16  ;;  %v17645_v33 = vadd.f32 %v10132_v20, %v5161_v1  ;;  %v10079_v50 = vadd.f32 %v10078_v24, %v10077_v15  ;;  %v10134_v58 = vpop.f32.mrb[179].mxu1  ;;  %v20669_v1 = vand.u32 4294901760, %v17322_v55  ;;  %v20673_v55 = vand.u32 4294901760, %v17378_v40 }
 0x2f2   : > { %v10135_v4 = vadd.f32 %v10134_v58, %v10133_v37  ;;  %v20677_v40 = vand.u32 4294901760, %v17390_v10  ;;  %v12578_v10 = vpack.c.bf16 %v20680_v61, %v6840_v18 }
 0x2f3   : > { %v5168_v29 = vadd.f32 %v10079_v50, %v17603_v22  ;;  %v10080_v17 = vpop.f32.mrb[92].mxu0  ;;  %v12566_v15 = vpack.c.bf16 %v20670_v27, %v20669_v1  ;;  %v20671_v50 = vld [vmem:[#allocation12_spill] sm:$0xff]  ;;  %v12570_v43 = vpack.c.bf16 %v20673_v55, %v6812_v9  ;;  %v20675_v1 = vld [vmem:[#allocation118_spill] sm:$0xff] }
 0x2f4   : > { %12553 = vmatpush3.bf16.msra.mxu0 %v17336_v16  ;;  %v10081_v32 = vpop.f32.mrb[93].mxu0  ;;  %v10136_v0 = vpop.f32.mrb[180].mxu1  ;;  %v12574_v9 = vpack.c.bf16 %v20677_v40, %v20676_v39 }
 0x2f5   : > { %12555 = vmatprep.subr.bf16.mxu0 %v17349_v35  ;;  %v17654_v62 = vadd.f32 %v10135_v4, %v5168_v29  ;;  %v10082_v57 = vadd.f32 %v10081_v32, %v10080_v17  ;;  %v10137_v49 = vpop.f32.mrb[181].mxu1 }
 0x2f6   : > { %v10138_v20 = vadd.f32 %v10137_v49, %v10136_v0 }
 0x2f7   : > { %v5175_v2 = vadd.f32 %v10082_v57, %v17608_v19  ;;  %v10083_v24 = vpop.f32.mrb[94].mxu0  ;;  %v20674_v57 = vld [vmem:[#allocation14_spill] sm:$0xff] }
 0x2f8   : > { %12557 = vmatpush3.bf16.msra.mxu0 %v17349_v35  ;;  %v10084_v22 = vpop.f32.mrb[95].mxu0  ;;  %v10139_v37 = vpop.f32.mrb[182].mxu1 }
 0x2f9   : > { %12559 = vmatprep.subr.bf16.mxu0 %v17397_v48  ;;  %v17663_v58 = vadd.f32 %v10138_v20, %v5175_v2  ;;  %v10085_v4 = vadd.f32 %v10084_v22, %v10083_v24  ;;  %v10140_v60 = vpop.f32.mrb[183].mxu1 }
 0x2fa   : > { %v10141_v29 = vadd.f32 %v10140_v60, %v10139_v37  ;;  %v20678_v37 = vld [vmem:[#allocation25_spill] sm:$0xff] }
 0x2fb   : > { %v5182_v19 = vadd.f32 %v10085_v4, %v17615_v31  ;;  %v20679_v60 = vld [vmem:[#allocation165_spill] sm:$0xff] }
 0x2fc   : > { %12561 = vmatpush3.bf16.msra.mxu0 %v17397_v48 }
 0x2fd   : > { %12563 = vmatprep.subr.bf16.mxu0 %v12562_v45  ;;  %v17672_v49 = vadd.f32 %v10141_v29, %v5182_v19 }
 0x2ff   : > { %11165 = vmatmul.mubr.f32.vlgmr.msra.gmra.mrb[152].mxu0 %v20671_v50  ;;  %v10086_v17 = vpop.f32.mrb[96].mxu0  ;;  %v10142_v0 = vpop.f32.mrb[184].mxu1 }
 0x300   : > { %12565 = vmatpush3.bf16.msra.mxu0 %v12562_v45  ;;  %11167 = vmatprep.mubr.f32.mxu0 %v20672_v14  ;;  %v10087_v32 = vpop.f32.mrb[97].mxu0  ;;  %v10143_v20 = vpop.f32.mrb[185].mxu1 }
 0x301   : > { %12567 = vmatprep.subr.bf16.mxu0 %v12566_v15  ;;  %v10088_v45 = vadd.f32 %v10087_v32, %v10086_v17  ;;  %v10144_v27 = vadd.f32 %v10143_v20, %v10142_v0 }
 0x303   : > { %11168 = vmatmul.mubr.f32.gmra.mrb[154].mxu0 %v20674_v57  ;;  %v5189_v31 = vadd.f32 %v10088_v45, %v17622_v47 }
 0x304   : > { %12569 = vmatpush3.bf16.msra.mxu0 %v12566_v15  ;;  %11170 = vmatprep.mubr.f32.mxu0 %v20675_v1  ;;  %v10089_v2 = vpop.f32.mrb[98].mxu0  ;;  %v10145_v22 = vpop.f32.mrb[186].mxu1  ;;  %v20681_v1 = vand.u32 4294901760, %v17489_v28 }
 0x305   : > { %12571 = vmatprep.subr.bf16.mxu0 %v12570_v43  ;;  %v10090_v24 = vpop.f32.mrb[99].mxu0  ;;  %v17681_v50 = vadd.f32 %v10144_v27, %v5189_v31  ;;  %v10146_v4 = vpop.f32.mrb[187].mxu1  ;;  %v20682_v27 = vand.u32 4294901760, %v17494_v34 }
 0x306   : > { %v10091_v15 = vadd.f32 %v10090_v24, %v10089_v2  ;;  %v10147_v14 = vadd.f32 %v10146_v4, %v10145_v22  ;;  %v20683_v2 = vand.u32 4294901760, %v17515_v36  ;;  %v20684_v24 = vand.u32 4294901760, %v17520_v52 }
 0x307   : > { %11171 = vmatmul.mubr.f32.gmra.mrb[156].mxu0 %v20678_v37  ;;  %v12586_v13 = vpack.c.bf16 %v20682_v27, %v20681_v1 }
 0x308   : > { %12573 = vmatpush3.bf16.msra.mxu0 %v12570_v43  ;;  %11173 = vmatprep.mubr.f32.mxu0 %v20679_v60  ;;  %v5196_v47 = vadd.f32 %v10091_v15, %v17629_v54  ;;  %v10092_v29 = vpop.f32.mrb[100].mxu0  ;;  %v12590_v28 = vpack.c.bf16 %v20684_v24, %v20683_v2 }
 0x309   : > { %12575 = vmatprep.subr.bf16.mxu0 %v12574_v9  ;;  %v10093_v55 = vpop.f32.mrb[101].mxu0  ;;  %v10148_v19 = vpop.f32.mrb[188].mxu1 }
 0x30a   : > { %v17691_v17 = vadd.f32 %v10147_v14, %v5196_v47  ;;  %v10094_v43 = vadd.f32 %v10093_v55, %v10092_v29  ;;  %v10149_v32 = vpop.f32.mrb[189].mxu1 }
 0x30b   : > { %11174 = vmatmul.mubr.f32.gmra.mrb[158].mxu0 %v6773_v42  ;;  %v10150_v0 = vadd.f32 %v10149_v32, %v10148_v19 }
 0x30c   : > { %12577 = vmatpush3.bf16.msra.mxu0 %v12574_v9  ;;  %11208 = vmatprep.mubr.f32.mxu0 %v20652_v56  ;;  %v5203_v53 = vadd.f32 %v10094_v43, %v17635_v44  ;;  %v10095_v18 = vpop.f32.mrb[102].mxu0 }
 0x30d   : > { %12579 = vmatprep.subr.bf16.mxu0 %v12578_v10  ;;  %v10096_v54 = vpop.f32.mrb[103].mxu0  ;;  %v10151_v7 = vpop.f32.mrb[190].mxu1 }
 0x30e   : > { %v17699_v42 = vadd.f32 %v10150_v0, %v5203_v53  ;;  %v10097_v57 = vadd.f32 %v10096_v54, %v10095_v18  ;;  %v10152_v45 = vpop.f32.mrb[191].mxu1 }
 0x30f   : > { %v10153_v20 = vadd.f32 %v10152_v45, %v10151_v7 }
 0x310   : > { %12581 = vmatpush3.bf16.msra.mxu0 %v12578_v10  ;;  %v5210_v26 = vadd.f32 %v10097_v57, %v17640_v25 }
 0x311   : > { %12583 = vmatprep.subr.bf16.mxu0 %v12582_v5  ;;  %v10242_v44 = vpop.f32.mrb[192].mxu1 }
 0x312   : > { %v10186_v23 = vpop.f32.mrb[104].mxu0  ;;  %v17706_v39 = vadd.f32 %v10153_v20, %v5210_v26  ;;  %v10243_v9 = vpop.f32.mrb[193].mxu1 }
 0x313   : > { %v10187_v41 = vpop.f32.mrb[105].mxu0  ;;  %v10244_v31 = vadd.f32 %v10243_v9, %v10242_v44 }
 0x314   : > { %v10188_v40 = vadd.f32 %v10187_v41, %v10186_v23  ;;  %12585 = vmatpush3.bf16.msra.mxu0 %v12582_v5 }
 0x315   : > { %12587 = vmatprep.subr.bf16.mxu0 %v12586_v13  ;;  %v10245_v25 = vpop.f32.mrb[194].mxu1 }
 0x316   : > { %v5475_v34 = vadd.f32 %v10188_v40, %v17645_v33  ;;  %v10189_v22 = vpop.f32.mrb[106].mxu0  ;;  %v10246_v60 = vpop.f32.mrb[195].mxu1 }
 0x317   : > { %v10190_v37 = vpop.f32.mrb[107].mxu0  ;;  %v10247_v14 = vadd.f32 %v10246_v60, %v10245_v25 }
 0x318   : > { %v17713_v15 = vadd.f32 %v10244_v31, %v5475_v34  ;;  %v10191_v4 = vadd.f32 %v10190_v37, %v10189_v22  ;;  %12589 = vmatpush3.bf16.msra.mxu0 %v12586_v13 }
 0x319   : > { %12591 = vmatprep.subr.bf16.mxu0 %v12590_v28  ;;  %v10248_v36 = vpop.f32.mrb[196].mxu1 }
 0x31a   : > { %v5490_v61 = vadd.f32 %v10191_v4, %v17654_v62  ;;  %v10192_v10 = vpop.f32.mrb[108].mxu0  ;;  %v10249_v33 = vpop.f32.mrb[197].mxu1 }
 0x31b   : > { %v10193_v47 = vpop.f32.mrb[109].mxu0  ;;  %v10250_v55 = vadd.f32 %v10249_v33, %v10248_v36 }
 0x31c   : > { %v17716_v29 = vadd.f32 %v10247_v14, %v5490_v61  ;;  %v10194_v52 = vadd.f32 %v10193_v47, %v10192_v10  ;;  %12593 = vmatpush3.bf16.msra.mxu0 %v12590_v28 }
 0x31d   : > { %12595 = vmatprep.subr.bf16.mxu0 %v17209_v59  ;;  %v10251_v0 = vpop.f32.mrb[198].mxu1 }
 0x31e   : > { %v5505_v19 = vadd.f32 %v10194_v52, %v17663_v58  ;;  %v10195_v43 = vpop.f32.mrb[110].mxu0  ;;  %v10252_v53 = vpop.f32.mrb[199].mxu1 }
 0x31f   : > { %v10196_v32 = vpop.f32.mrb[111].mxu0  ;;  %11209 = vmatmul.mubr.f32.vlgmr.msra.gmra.mrb[152].mxu0 %v20653_v3  ;;  %v10253_v18 = vadd.f32 %v10252_v53, %v10251_v0 }
 0x320   : > { %v17721_v5 = vadd.f32 %v10250_v55, %v5505_v19  ;;  %v10197_v62 = vadd.f32 %v10196_v32, %v10195_v43  ;;  %12597 = vmatpush3.bf16.msra.mxu0 %v17209_v59  ;;  %11211 = vmatprep.mubr.f32.mxu0 %v20654_v8 }
 0x321   : > { %12599 = vmatprep.subr.bf16.mxu0 %v17228_v21  ;;  %v10254_v57 = vpop.f32.mrb[200].mxu1 }
 0x322   : > { %v5520_v54 = vadd.f32 %v10197_v62, %v17672_v49  ;;  %v10198_v7 = vpop.f32.mrb[112].mxu0  ;;  %v10255_v1 = vpop.f32.mrb[201].mxu1 }
 0x323   : > { %v10199_v58 = vpop.f32.mrb[113].mxu0  ;;  %11212 = vmatmul.mubr.f32.gmra.mrb[154].mxu0 %v20655_v51  ;;  %v10256_v59 = vadd.f32 %v10255_v1, %v10254_v57 }
 0x324   : > { %v17728_v45 = vadd.f32 %v10253_v18, %v5520_v54  ;;  %v10200_v20 = vadd.f32 %v10199_v58, %v10198_v7  ;;  %12601 = vmatpush3.bf16.msra.mxu0 %v17228_v21  ;;  %11214 = vmatprep.mubr.f32.mxu0 %v20656_v6 }
 0x325   : > { %12603 = vmatprep.subr.bf16.mxu0 %v17250_v12  ;;  %v10257_v26 = vpop.f32.mrb[202].mxu1 }
 0x326   : > { %v5535_v27 = vadd.f32 %v10200_v20, %v17681_v50  ;;  %v10201_v13 = vpop.f32.mrb[114].mxu0  ;;  %v10258_v44 = vpop.f32.mrb[203].mxu1 }
 0x327   : > { %v10202_v49 = vpop.f32.mrb[115].mxu0  ;;  %11215 = vmatmul.mubr.f32.gmra.mrb[156].mxu0 %v20657_v11  ;;  %v10259_v21 = vadd.f32 %v10258_v44, %v10257_v26 }
 0x328   : > { %v17735_v23 = vadd.f32 %v10256_v59, %v5535_v27  ;;  %v10203_v41 = vadd.f32 %v10202_v49, %v10201_v13  ;;  %12605 = vmatpush3.bf16.msra.mxu0 %v17250_v12  ;;  %11217 = vmatprep.mubr.f32.mxu0 %v20658_v46 }
 0x329   : > { %12607 = vmatprep.subr.bf16.mxu0 %v17271_v63  ;;  %v10260_v31 = vpop.f32.mrb[204].mxu1 }
 0x32a   : > { %v5550_v40 = vadd.f32 %v10203_v41, %v17691_v17  ;;  %v10204_v9 = vpop.f32.mrb[116].mxu0  ;;  %v10261_v28 = vpop.f32.mrb[205].mxu1 }
 0x32b   : > { %v10205_v50 = vpop.f32.mrb[117].mxu0  ;;  %11218 = vmatmul.mubr.f32.gmra.mrb[158].mxu0 %v17429_v30  ;;  %v10262_v12 = vadd.f32 %v10261_v28, %v10260_v31 }
 0x32c   : > { %v17742_v2 = vadd.f32 %v10259_v21, %v5550_v40  ;;  %v10206_v24 = vadd.f32 %v10205_v50, %v10204_v9  ;;  %12609 = vmatpush3.bf16.msra.mxu0 %v17271_v63  ;;  %11252 = vmatprep.mubr.f32.mxu0 %v20652_v56 }
 0x32d   : > { %12611 = vmatprep.subr.bf16.mxu0 %v17306_v38  ;;  %v10263_v37 = vpop.f32.mrb[206].mxu1 }
 0x32e   : > { %v5565_v34 = vadd.f32 %v10206_v24, %v17699_v42  ;;  %v10207_v22 = vpop.f32.mrb[118].mxu0  ;;  %v10264_v60 = vpop.f32.mrb[207].mxu1 }
 0x32f   : > { %v10208_v17 = vpop.f32.mrb[119].mxu0  ;;  %v10265_v14 = vadd.f32 %v10264_v60, %v10263_v37 }
 0x330   : > { %v17748_v25 = vadd.f32 %v10262_v12, %v5565_v34  ;;  %v10209_v4 = vadd.f32 %v10208_v17, %v10207_v22  ;;  %12613 = vmatpush3.bf16.msra.mxu0 %v17306_v38 }
 0x331   : > { %12615 = vmatprep.subr.bf16.mxu0 %v17336_v16  ;;  %v10354_v10 = vpop.f32.mrb[208].mxu1 }
 0x332   : > { %v5580_v63 = vadd.f32 %v10209_v4, %v17706_v39  ;;  %v10298_v56 = vpop.f32.mrb[120].mxu0  ;;  %v10355_v36 = vpop.f32.mrb[209].mxu1 }
 0x333   : > { %v10299_v61 = vpop.f32.mrb[121].mxu0  ;;  %v10356_v52 = vadd.f32 %v10355_v36, %v10354_v10 }
 0x334   : > { %v17753_v47 = vadd.f32 %v10265_v14, %v5580_v63  ;;  %v10300_v42 = vadd.f32 %v10299_v61, %v10298_v56  ;;  %12617 = vmatpush3.bf16.msra.mxu0 %v17336_v16 }
 0x335   : > { %12619 = vmatprep.subr.bf16.mxu0 %v17349_v35  ;;  %v10357_v19 = vpop.f32.mrb[210].mxu1 }
 0x336   : > { %v5999_v38 = vadd.f32 %v10300_v42, %v17713_v15  ;;  %v10301_v33 = vpop.f32.mrb[122].mxu0  ;;  %v10358_v32 = vpop.f32.mrb[211].mxu1 }
 0x337   : > { %v10302_v55 = vpop.f32.mrb[123].mxu0  ;;  %v10359_v0 = vadd.f32 %v10358_v32, %v10357_v19 }
 0x338   : > { %v17758_v43 = vadd.f32 %v10356_v52, %v5999_v38  ;;  %v10303_v39 = vadd.f32 %v10302_v55, %v10301_v33  ;;  %12621 = vmatpush3.bf16.msra.mxu0 %v17349_v35 }
 0x339   : > { %12623 = vmatprep.subr.bf16.mxu0 %v17397_v48  ;;  %v10360_v18 = vpop.f32.mrb[212].mxu1 }
 0x33a   : > { %v6008_v16 = vadd.f32 %v10303_v39, %v17716_v29  ;;  %v10304_v62 = vpop.f32.mrb[124].mxu0  ;;  %v10361_v7 = vpop.f32.mrb[213].mxu1 }
 0x33b   : > { %v10305_v53 = vpop.f32.mrb[125].mxu0  ;;  %v10362_v58 = vadd.f32 %v10361_v7, %v10360_v18 }
 0x33c   : > { %v17763_v54 = vadd.f32 %v10359_v0, %v6008_v16  ;;  %v10306_v15 = vadd.f32 %v10305_v53, %v10304_v62  ;;  %12625 = vmatpush3.bf16.msra.mxu0 %v17397_v48 }
 0x33d   : > { %v10363_v1 = vpop.f32.mrb[214].mxu1 }
 0x33e   : > { %v6017_v57 = vadd.f32 %v10306_v15, %v17721_v5  ;;  %v10307_v20 = vpop.f32.mrb[126].mxu0  ;;  %v10364_v27 = vpop.f32.mrb[215].mxu1 }
 0x33f   : > { %v10308_v35 = vpop.f32.mrb[127].mxu0  ;;  %11253 = vmatmul.mubr.f32.vlgmr.msra.gmra.mrb[152].mxu0 %v20653_v3  ;;  %v10365_v13 = vadd.f32 %v10364_v27, %v10363_v1 }
 0x340   : > { %v17768_v59 = vadd.f32 %v10362_v58, %v6017_v57  ;;  %v10309_v29 = vadd.f32 %v10308_v35, %v10307_v20  ;;  %11255 = vmatprep.mubr.f32.mxu0 %v20654_v8 }
 0x341   : > { %v10366_v41 = vpop.f32.mrb[216].mxu1 }
 0x342   : > { %v6026_v49 = vadd.f32 %v10309_v29, %v17728_v45  ;;  %v10310_v26 = vpop.f32.mrb[128].mxu0  ;;  %v10367_v21 = vpop.f32.mrb[217].mxu1 }
 0x343   : > { %v10311_v48 = vpop.f32.mrb[129].mxu0  ;;  %11256 = vmatmul.mubr.f32.gmra.mrb[154].mxu0 %v20655_v51  ;;  %v10368_v3 = vadd.f32 %v10367_v21, %v10366_v41 }
 0x344   : > { %v17773_v5 = vadd.f32 %v10365_v13, %v6026_v49  ;;  %v10312_v44 = vadd.f32 %v10311_v48, %v10310_v26  ;;  %11258 = vmatprep.mubr.f32.mxu0 %v20656_v6 }
 0x345   : > { %v10369_v8 = vpop.f32.mrb[218].mxu1 }
 0x346   : > { %v6035_v40 = vadd.f32 %v10312_v44, %v17735_v23  ;;  %v10313_v9 = vpop.f32.mrb[130].mxu0  ;;  %v10370_v24 = vpop.f32.mrb[219].mxu1 }
 0x347   : > { %v10314_v50 = vpop.f32.mrb[131].mxu0  ;;  %11259 = vmatmul.mubr.f32.gmra.mrb[156].mxu0 %v20657_v11  ;;  %v10371_v51 = vadd.f32 %v10370_v24, %v10369_v8 }
 0x348   : > { %v6214_v45 = vadd.f32 %v10368_v3, %v6035_v40  ;;  %v10315_v31 = vadd.f32 %v10314_v50, %v10313_v9  ;;  %11261 = vmatprep.mubr.f32.mxu0 %v20658_v46 }
 0x349   : > { %v10372_v6 = vpop.f32.mrb[220].mxu1 }
 0x34a   : > { %v6044_v28 = vadd.f32 %v10315_v31, %v17742_v2  ;;  %v10316_v12 = vpop.f32.mrb[132].mxu0  ;;  %v10373_v17 = vpop.f32.mrb[221].mxu1 }
 0x34b   : > { %v10317_v34 = vpop.f32.mrb[133].mxu0  ;;  %11262 = vmatmul.mubr.f32.gmra.mrb[158].mxu0 %v17429_v30  ;;  %v10374_v37 = vadd.f32 %v10373_v17, %v10372_v6 }
 0x34c   : > { %v6225_v22 = vadd.f32 %v10371_v51, %v6044_v28  ;;  %v10318_v23 = vadd.f32 %v10317_v34, %v10316_v12 }
 0x34d   : > { %v10375_v14 = vpop.f32.mrb[222].mxu1 }
 0x34e   : > { %v6053_v11 = vadd.f32 %v10318_v23, %v17748_v25  ;;  %v10319_v4 = vpop.f32.mrb[134].mxu0  ;;  %v10376_v46 = vpop.f32.mrb[223].mxu1 }
 0x34f   : > { %v10320_v60 = vpop.f32.mrb[135].mxu0  ;;  %v10377_v61 = vadd.f32 %v10376_v46, %v10375_v14 }
 0x350   : > { %v6236_v63 = vadd.f32 %v10374_v37, %v6053_v11  ;;  %v10321_v56 = vadd.f32 %v10320_v60, %v10319_v4 }
 0x351   : > { %v10466_v36 = vpop.f32.mrb[224].mxu1 }
 0x352   : > { %v6062_v2 = vadd.f32 %v10321_v56, %v17753_v47  ;;  %v10410_v10 = vpop.f32.mrb[136].mxu0  ;;  %v10467_v38 = vpop.f32.mrb[225].mxu1 }
 0x353   : > { %v10411_v42 = vpop.f32.mrb[137].mxu0  ;;  %v10468_v33 = vadd.f32 %v10467_v38, %v10466_v36 }
 0x354   : > { %v6247_v30 = vadd.f32 %v10377_v61, %v6062_v2  ;;  %v10412_v52 = vadd.f32 %v10411_v42, %v10410_v10 }
 0x355   : > { %v10469_v39 = vpop.f32.mrb[226].mxu1 }
 0x356   : > { %v6415_v55 = vadd.f32 %v10412_v52, %v17758_v43  ;;  %v10413_v19 = vpop.f32.mrb[138].mxu0  ;;  %v10470_v0 = vpop.f32.mrb[227].mxu1 }
 0x357   : > { %v10414_v25 = vpop.f32.mrb[139].mxu0  ;;  %v10471_v62 = vadd.f32 %v10470_v0, %v10469_v39 }
 0x358   : > { %v10415_v32 = vadd.f32 %v10414_v25, %v10413_v19  ;;  %v17784_v16 = vadd.f32 %v10468_v33, %v6415_v55  ;;  %v17825_v19 = vld [vmem:[%s18502_s5 + $0x18] sm:$0xff] }
 0x359   : > { %v10472_v15 = vpop.f32.mrb[228].mxu1  ;;  %v7646_v0 = vand.u32 4294901760, %v17825_v19 }
 0x35a   : > { %v6422_v53 = vadd.f32 %v10415_v32, %v17763_v54  ;;  %v10416_v47 = vpop.f32.mrb[140].mxu0  ;;  %v10473_v58 = vpop.f32.mrb[229].mxu1 }
 0x35b   : > { %v10417_v18 = vpop.f32.mrb[141].mxu0  ;;  %v10474_v20 = vadd.f32 %v10473_v58, %v10472_v15  ;;  %v17850_v15 = vld [vmem:[%s18502_s5 + $0x20] sm:$0xff] }
 0x35c   : > { %v10418_v7 = vadd.f32 %v10417_v18, %v10416_v47  ;;  %v17787_v57 = vadd.f32 %v10471_v62, %v6422_v53  ;;  %v17845_v18 = vsub.f32 %v17825_v19, %v7646_v0 }
 0x35d   : > { %v10475_v29 = vpop.f32.mrb[230].mxu1 }
 0x35e   : > { %v6429_v43 = vadd.f32 %v10418_v7, %v17768_v59  ;;  %v10419_v35 = vpop.f32.mrb[142].mxu0  ;;  %v10476_v13 = vpop.f32.mrb[231].mxu1  ;;  %v17855_v7 = vld [vmem:[%s18502_s5 + $0x28] sm:$0xff] }
 0x35f   : > { %v10420_v1 = vpop.f32.mrb[143].mxu0  ;;  %v10477_v26 = vadd.f32 %v10476_v13, %v10475_v29  ;;  %v7652_v29 = vand.u32 4294901760, %v17855_v7 }
 0x360   : > { %v10421_v27 = vadd.f32 %v10420_v1, %v10419_v35  ;;  %v17790_v49 = vadd.f32 %v10474_v20, %v6429_v43  ;;  %v19187_v35 = vand.u32 4294901760, %v17845_v18  ;;  %v7649_v1 = vand.u32 4294901760, %v17850_v15 }
 0x361   : > { %v10478_v44 = vpop.f32.mrb[232].mxu1 }
 0x362   : > { %v6436_v54 = vadd.f32 %v10421_v27, %v17773_v5  ;;  %v10422_v48 = vpop.f32.mrb[144].mxu0  ;;  %v10479_v3 = vpop.f32.mrb[233].mxu1 }
 0x363   : > { %v10423_v41 = vpop.f32.mrb[145].mxu0  ;;  %v10480_v9 = vadd.f32 %v10479_v3, %v10478_v44  ;;  %v17882_v44 = vld [vmem:[%s18502_s5 + $0x30] sm:$0xff] }
 0x364   : > { %v10424_v21 = vadd.f32 %v10423_v41, %v10422_v48  ;;  %v17793_v40 = vadd.f32 %v10477_v26, %v6436_v54  ;;  %v7752_v26 = vsub.f32 %v17845_v18, %v19187_v35  ;;  %v13108_v54 = vmov 0.0|0.0  }
 0x365   : > { %v10481_v31 = vpop.f32.mrb[234].mxu1  ;;  %12650 = vmatprep.subr.bf16.mxu1 %v13108_v54  ;;  %12626 = vmatprep.subr.bf16.mxu0 %v13108_v54  ;;  %v17872_v48 = vsub.f32 %v17850_v15, %v7649_v1  ;;  %v17877_v41 = vsub.f32 %v17855_v7, %v7652_v29  ;;  %v7634_v15 = vld [vmem:[%s18502_s5 + $0x78] sm:$0xff] }
 0x366   : > { %v6443_v50 = vadd.f32 %v10424_v21, %v6214_v45  ;;  %v10425_v59 = vpop.f32.mrb[146].mxu0  ;;  %v10482_v51 = vpop.f32.mrb[235].mxu1  ;;  %v17887_v21 = vld [vmem:[%s18502_s5 + $0x38] sm:$0xff] }
 0x367   : > { %v10426_v8 = vpop.f32.mrb[147].mxu0  ;;  %v10483_v12 = vadd.f32 %v10482_v51, %v10481_v31  ;;  %v19185_v31 = vand.u32 4294901760, %v17877_v41 }
 0x368   : > { %v10427_v24 = vadd.f32 %v10426_v8, %v10425_v59  ;;  %v17795_v28 = vadd.f32 %v10480_v9, %v6443_v50  ;;  %v7753_v9 = vand.u32 4294901760, %v7752_v26  ;;  %v7655_v50 = vand.u32 4294901760, %v17882_v44 }
 0x369   : > { %v10484_v23 = vpop.f32.mrb[236].mxu1  ;;  %v7658_v59 = vand.u32 4294901760, %v17887_v21  ;;  %v19186_v8 = vand.u32 4294901760, %v17872_v48 }
 0x36a   : > { %v6450_v34 = vadd.f32 %v10427_v24, %v6225_v22  ;;  %v10428_v6 = vpop.f32.mrb[148].mxu0  ;;  %v10485_v37 = vpop.f32.mrb[237].mxu1  ;;  %v17806_v22 = vld [vmem:[%s18502_s5] sm:$0xff]  ;;  %v17897_v51 = vsub.f32 %v17882_v44, %v7655_v50 }
 0x36b   : > { %v10429_v5 = vpop.f32.mrb[149].mxu0  ;;  %v10486_v4 = vadd.f32 %v10485_v37, %v10484_v23  ;;  %v7637_v52 = vand.u32 4294901760, %v17806_v22  ;;  %v17918_v23 = vld [vmem:[%s18502_s5 + $0x48] sm:$0xff] }
 0x36c   : > { %v10430_v17 = vadd.f32 %v10429_v5, %v10428_v6  ;;  %v17797_v11 = vadd.f32 %v10483_v12, %v6450_v34  ;;  %v17902_v12 = vsub.f32 %v17887_v21, %v7658_v59  ;;  %v7759_v34 = vsub.f32 %v17872_v48, %v19186_v8  ;;  %v17913_v5 = vld [vmem:[%s18502_s5 + $0x40] sm:$0xff] }
 0x36d   : > { %v10487_v56 = vpop.f32.mrb[238].mxu1  ;;  %v17813_v33 = vsub.f32 %v17806_v22, %v7637_v52  ;;  %v7766_v6 = vsub.f32 %v17877_v41, %v19185_v31 }
 0x36e   : > { %v6457_v60 = vadd.f32 %v10430_v17, %v6236_v63  ;;  %v10431_v14 = vpop.f32.mrb[150].mxu0  ;;  %v10488_v61 = vpop.f32.mrb[239].mxu1  ;;  %v7620_v63 = vld [vmem:[%s18502_s5 + $0x8] sm:$0xff]  ;;  %v19184_v17 = vand.u32 4294901760, %v17897_v51  ;;  %v19179_v37 = vand.u32 4294901760, %v17902_v12 }
 0x36f   : > { %v10432_v45 = vpop.f32.mrb[151].mxu0  ;;  %v10489_v10 = vadd.f32 %v10488_v61, %v10487_v56  ;;  %v7640_v38 = vand.u32 4294901760, %v7620_v63  ;;  %v19190_v25 = vand.u32 4294901760, %v17813_v33 }
 0x370   : > { %v10433_v46 = vadd.f32 %v10432_v45, %v10431_v14  ;;  %v17799_v2 = vadd.f32 %v10486_v4, %v6457_v60  ;;  %v7661_v4 = vand.u32 4294901760, %v17913_v5  ;;  %v7664_v60 = vand.u32 4294901760, %v17918_v23 }
 0x371   : > { %v17815_v55 = vsub.f32 %v7620_v63, %v7640_v38  ;;  %v7731_v62 = vsub.f32 %v17813_v33, %v19190_v25  ;;  %v7760_v14 = vand.u32 4294901760, %v7759_v34  ;;  %v7767_v45 = vand.u32 4294901760, %v7766_v6  ;;  %v17946_v63 = vld [vmem:[%s18502_s5 + $0x50] sm:$0xff]  ;;  %v17985_v6 = vld [vmem:[%s18502_s5 + $0x60] sm:$0xff] }
 0x372   : > { %v6464_v42 = vadd.f32 %v10433_v46, %v6247_v30  ;;  %v17820_v30 = vld [vmem:[%s18502_s5 + $0x10] sm:$0xff]  ;;  %v7773_v56 = vsub.f32 %v17897_v51, %v19184_v17  ;;  %v7780_v46 = vsub.f32 %v17902_v12, %v19179_v37  ;;  %v17934_v61 = vsub.f32 %v17913_v5, %v7661_v4  ;;  %v20688_v17 = vld [vmem:[#allocation57_spill] sm:$0xff]  ;;  %v20690_v25 = vld [vmem:[#allocation144_spill] sm:$0xff] }
 0x373   : > { %v19189_v39 = vand.u32 4294901760, %v17815_v55  ;;  %v7643_v32 = vand.u32 4294901760, %v17820_v30  ;;  %v7732_v58 = vand.u32 4294901760, %v7731_v62  ;;  %v17941_v22 = vpack.c.bf16 %v7640_v38, %v7637_v52  ;;  %v17951_v62 = vld [vmem:[%s18502_s5 + $0x58] sm:$0xff] }
 0x374   : > { %v17801_v36 = vadd.f32 %v10489_v10, %v6464_v42  ;;  %v17939_v10 = vsub.f32 %v17918_v23, %v7664_v60  ;;  %v12657_v42 = vpack.c.bf16 %v7767_v45, %v7760_v14  ;;  %v7667_v52 = vand.u32 4294901760, %v17946_v63 }
 0x375   : > { %v7738_v53 = vsub.f32 %v17815_v55, %v19189_v39  ;;  %v17840_v47 = vsub.f32 %v17820_v30, %v7643_v32  ;;  %12628 = vmatpush3.bf16.msra.mxu0 %v17941_v22  ;;  %v7670_v38 = vand.u32 4294901760, %v17951_v62  ;;  %v17990_v30 = vld [vmem:[%s18502_s5 + $0x68] sm:$0xff]  ;;  %v18053_v21 = vpack.c.bf16 %v7664_v60, %v7661_v4 }
 0x376   : > { %12629 = vmatprep.subr.bf16.mxu0 %v13108_v54  ;;  %v7676_v14 = vand.u32 4294901760, %v17990_v30  ;;  %v12675_v60 = vpack.c.bf16 %v17815_v55, %v17813_v33 }
 0x377   : > { %v7739_v20 = vand.u32 4294901760, %v7738_v53  ;;  %v19188_v43 = vand.u32 4294901760, %v17840_v47  ;;  %v7774_v53 = vand.u32 4294901760, %v7773_v56  ;;  %v17980_v34 = vsub.f32 %v17951_v62, %v7670_v38 }
 0x378   : > { %v18070_v23 = vpack.c.bf16 %v7670_v38, %v7667_v52 }
 0x379   : > { %v12651_v27 = vpack.c.bf16 %v7739_v20, %v7732_v58  ;;  %v7745_v13 = vsub.f32 %v17840_v47, %v19188_v43  ;;  %v7781_v58 = vand.u32 4294901760, %v7780_v46  ;;  %v19178_v20 = vand.u32 4294901760, %v17934_v61 }
 0x37a   : > { %v19175_v56 = vand.u32 4294901760, %v17980_v34 }
 0x37b   : > { %12652 = vmatpush3.bf16.msra.mxu1 %v12651_v27  ;;  %v7746_v3 = vand.u32 4294901760, %v7745_v13  ;;  %v19177_v27 = vand.u32 4294901760, %v17939_v10  ;;  %v12660_v13 = vpack.c.bf16 %v7781_v58, %v7774_v53  ;;  %v7787_v26 = vsub.f32 %v17934_v61, %v19178_v20 }
 0x37c   : > { %12653 = vmatprep.subr.bf16.mxu1 %v13108_v54  ;;  %v18003_v53 = vsub.f32 %v17990_v30, %v7676_v14  ;;  %v18009_v58 = vpack.c.bf16 %v7652_v29, %v7649_v1 }
 0x37d   : > { %v12654_v24 = vpack.c.bf16 %v7753_v9, %v7746_v3  ;;  %v7794_v3 = vsub.f32 %v17939_v10, %v19177_v27  ;;  %v17970_v9 = vpack.c.bf16 %v7646_v0, %v7643_v32  ;;  %v7788_v19 = vand.u32 4294901760, %v7787_v26 }
 0x37e   : > { %v7673_v0 = vand.u32 4294901760, %v17985_v6  ;;  %v7808_v26 = vsub.f32 %v17980_v34, %v19175_v56  ;;  %v19180_v1 = vand.u32 4294901760, %v18003_v53 }
 0x37f   : > { %12655 = vmatpush3.bf16.msra.mxu1 %v12654_v24  ;;  %v17975_v24 = vsub.f32 %v17946_v63, %v7667_v52  ;;  %v7795_v32 = vand.u32 4294901760, %v7794_v3  ;;  %12631 = vmatpush3.bf16.msra.mxu0 %v17970_v9  ;;  %v7633_v3 = vld [vmem:[%s18502_s5 + $0x70] sm:$0xff] }
 0x380   : > { %12656 = vmatprep.subr.bf16.mxu1 %v13108_v54  ;;  %12632 = vmatprep.subr.bf16.mxu0 %v13108_v54  ;;  %v7679_v29 = vand.u32 4294901760, %v7633_v3  ;;  %v7822_v56 = vsub.f32 %v18003_v53, %v19180_v1  ;;  %v18079_v63 = vpack.c.bf16 %v7676_v14, %v7673_v0 }
 0x381   : > { %v19176_v45 = vand.u32 4294901760, %v17975_v24  ;;  %v12663_v46 = vpack.c.bf16 %v7795_v32, %v7788_v19  ;;  %v7809_v19 = vand.u32 4294901760, %v7808_v26 }
 0x382   : > { %v7823_v20 = vand.u32 4294901760, %v7822_v56  ;;  %v13110_v56 = vmov 0.0  }
 0x383   : > { %12658 = vmatpush3.bf16.msra.mxu1 %v12657_v42  ;;  %v18000_v42 = vsub.f32 %v17985_v6, %v7673_v0  ;;  %v7682_v6 = vand.u32 4294901760, %v7634_v15  ;;  %12634 = vmatpush3.bf16.msra.mxu0 %v18009_v58 }
 0x384   : > { %12659 = vmatprep.subr.bf16.mxu1 %v13108_v54  ;;  %12635 = vmatprep.subr.bf16.mxu0 %v13108_v54 }
 0x385   : > { %v19183_v7 = vand.u32 4294901760, %v18000_v42  ;;  %11331 = vmatprep.mubr.msk.f32.mxu1 %vm13109_vm2, %v13110_v56  ;;  %11296 = vmatprep.mubr.msk.f32.mxu0 %vm13109_vm2, %v13110_v56 }
 0x387   : > { %12661 = vmatpush3.bf16.msra.mxu1 %v12660_v13  ;;  %v7801_v13 = vsub.f32 %v17975_v24, %v19176_v45  ;;  %v7815_v32 = vsub.f32 %v18000_v42, %v19183_v7  ;;  %v18034_v45 = vsub.f32 %v7633_v3, %v7679_v29 }
 0x388   : > { %12662 = vmatprep.subr.bf16.mxu1 %v13108_v54 }
 0x389   : > { %v7802_v30 = vand.u32 4294901760, %v7801_v13  ;;  %v18042_v13 = vsub.f32 %v7634_v15, %v7682_v6  ;;  %v7816_v26 = vand.u32 4294901760, %v7815_v32  ;;  %v19182_v37 = vand.u32 4294901760, %v18034_v45  ;;  %v20686_v32 = vld [vmem:[#allocation28_spill] sm:$0xff] }
 0x38b   : > { %12664 = vmatpush3.bf16.msra.mxu1 %v12663_v46  ;;  %v12666_v27 = vpack.c.bf16 %v7809_v19, %v7802_v30  ;;  %v18040_v46 = vpack.c.bf16 %v7658_v59, %v7655_v50  ;;  %v19181_v1 = vand.u32 4294901760, %v18042_v13  ;;  %v12669_v44 = vpack.c.bf16 %v7823_v20, %v7816_v26  ;;  %v18107_v19 = vld [vmem:[%s18501_s4] ss:$0 sm:$0xff] }
 0x38c   : > { %12665 = vmatprep.subr.bf16.mxu1 %v13108_v54  ;;  %v7829_v50 = vsub.f32 %v18034_v45, %v19182_v37  ;;  %v18085_v20 = vpack.c.bf16 %v7682_v6, %v7679_v29  ;;  %v8992_v29 = vld [vmem:[%s18500_s3] ss:$0 sm:$0xff]  ;;  %v20685_v6 = vld [vmem:[#allocation181_spill] sm:$0xff]  ;;  %v20687_v37 = vld [vmem:[#allocation155_spill] sm:$0xff] }
 0x38d   : > { %12637 = vmatpush3.bf16.msra.mxu0 %v18040_v46  ;;  %v7836_v59 = vsub.f32 %v18042_v13, %v19181_v1  ;;  %v1433_v30 = vmul.f32 %v20685_v6, %v8992_v29  ;;  %v1432_v26 = vmul.f32 %v8992_v29, %v20686_v32  ;;  %v1435_v7 = vmul.f32 %v20687_v37, %v8992_v29 }
 0x38e   : > { %12638 = vmatprep.subr.bf16.mxu0 %v13108_v54  ;;  %v1434_v31 = vmul.f32 %v8992_v29, %v20688_v17  ;;  %v1437_v15 = vmul.f32 %v20690_v25, %v8992_v29 }
 0x38f   : > { %12667 = vmatpush3.bf16.msra.mxu1 %v12666_v27  ;;  %v7830_v27 = vand.u32 4294901760, %v7829_v50  ;;  %v7837_v5 = vand.u32 4294901760, %v7836_v59  ;;  %v8994_v50 = vld [vmem:[%s18500_s3 + $0x1] ss:$0 sm:$0xff]  ;;  %v18122_v1 = vadd.f32 %v18107_v19, %v1432_v26 }
 0x390   : > { %12668 = vmatprep.subr.bf16.mxu1 %v13108_v54 }
 0x391   : > { %12640 = vmatpush3.bf16.msra.mxu0 %v18053_v21  ;;  %v12672_v4 = vpack.c.bf16 %v7837_v5, %v7830_v27  ;;  %v18115_v5 = vadd.f32 %v18107_v19, %v1433_v30  ;;  %v19194_v26 = vmax.f32 %v18122_v1, 0.0 }
 0x392   : > { %12641 = vmatprep.subr.bf16.mxu0 %v13108_v54 }
 0x393   : > { %12670 = vmatpush3.bf16.msra.mxu1 %v12669_v44  ;;  %v19192_v43 = vmax.f32 %v18115_v5, 0.0 }
 0x394   : > { %12671 = vmatprep.subr.bf16.mxu1 %v13108_v54 }
 0x395   : > { %12643 = vmatpush3.bf16.msra.mxu0 %v18070_v23 }
 0x396   : > { %12644 = vmatprep.subr.bf16.mxu0 %v13108_v54 }
 0x397   : > { %12673 = vmatpush3.bf16.msra.mxu1 %v12672_v4  ;;  %v8995_v4 = vld [vmem:[%s18501_s4 + $0x1] ss:$0 sm:$0xff] }
 0x398   : > { %12674 = vmatprep.subr.bf16.mxu1 %v13108_v54 }
 0x399   : > { %12646 = vmatpush3.bf16.msra.mxu0 %v18079_v63 }
 0x39a   : > { %12647 = vmatprep.subr.bf16.mxu0 %v13108_v54 }
 0x39d   : > { %12649 = vmatpush3.bf16.msra.mxu0 %v18085_v20 }
 0x412   : > { %v11254_v44 = vpop.f32.mrb[152].mxu0 }
 0x413   : > { %v12818_v59 = vadd.f32 %v11254_v44, %v17787_v57  ;;  %v7516_v27 = vpop.f32.mrb[153].mxu0 }
 0x414   : > { %v12819_v6 = vadd.f32 %v7516_v27, %v17784_v16 }
 0x415   : > { %v7569_v32 = vmul.f32 %v12818_v59, %v8994_v50  ;;  %v20689_v59 = vld [vmem:[#allocation31_spill] sm:$0xff] }
 0x416   : > { %v7568_v8 = vmul.f32 %v12819_v6, %v8994_v50  ;;  %v11257_v57 = vpop.f32.mrb[154].mxu0  ;;  %v1436_v27 = vmul.f32 %v8992_v29, %v20689_v59  ;;  %v18137_v6 = vadd.f32 %v18107_v19, %v1435_v7 }
 0x417   : > { %v18126_v44 = vadd.f32 %v8995_v4, %v7569_v32  ;;  %v12820_v30 = vadd.f32 %v11257_v57, %v17793_v40  ;;  %v7528_v35 = vpop.f32.mrb[155].mxu0  ;;  %v18140_v32 = vadd.f32 %v18107_v19, %v1434_v31 }
 0x418   : > { %v18130_v39 = vadd.f32 %v8995_v4, %v7568_v8  ;;  %v12821_v16 = vadd.f32 %v7528_v35, %v17790_v49  ;;  %v18159_v25 = vadd.f32 %v18107_v19, %v1436_v27  ;;  %v19201_v14 = vmax.f32 %v18137_v6, 0.0 }
 0x419   : > { %v19191_v37 = vmax.f32 %v18126_v44, 0.0  ;;  %v7571_v17 = vmul.f32 %v12820_v30, %v8994_v50 }
 0x41a   : > { %v19193_v40 = vmax.f32 %v18130_v39, 0.0  ;;  %v7570_v57 = vmul.f32 %v12821_v16, %v8994_v50  ;;  %v11260_v8 = vpop.f32.mrb[156].mxu0 }
 0x41b   : > { %v18144_v49 = vadd.f32 %v8995_v4, %v7571_v17  ;;  %v12822_v35 = vadd.f32 %v11260_v8, %v17797_v11  ;;  %v7540_v59 = vpop.f32.mrb[157].mxu0  ;;  %v7597_v7 = vadd.f32 %v19191_v37, %v19192_v43  ;;  %v20691_v17 = vld [vmem:[#allocation38_spill] sm:$0xff]  ;;  %v1454_v37 = vmax.f32 %v18140_v32, 0.0 }
 0x41c   : > { %v7596_v31 = vadd.f32 %v19193_v40, %v19194_v26  ;;  %v18155_v30 = vadd.f32 %v8995_v4, %v7570_v57  ;;  %v12823_v16 = vadd.f32 %v7540_v59, %v17795_v28  ;;  %v1438_v11 = vmul.f32 %v8992_v29, %v20691_v17  ;;  %v20692_v28 = vld [vmem:[#allocation156_spill] sm:$0xff] }
 0x41d   : > { %v19197_v8 = vmax.f32 %v18144_v49, 0.0  ;;  %v7573_v3 = vmul.f32 %v12822_v35, %v8994_v50  ;;  %v18167_v57 = vadd.f32 %v18107_v19, %v1437_v15  ;;  %v1439_v59 = vmul.f32 %v20692_v28, %v8992_v29 }
 0x41e   : > { %v19198_v43 = vmax.f32 %v18155_v30, 0.0  ;;  %v7572_v0 = vmul.f32 %v12823_v16, %v8994_v50  ;;  %v11263_v40 = vpop.f32.mrb[158].mxu0  ;;  %v7604_v38 = vadd.f32 %v7597_v7, %v7596_v31  ;;  %v19200_v15 = vmax.f32 %v18159_v25, 0.0 }
 0x41f   : > { %v18170_v27 = vadd.f32 %v8995_v4, %v7573_v3  ;;  %v12824_v17 = vadd.f32 %v11263_v40, %v17801_v36  ;;  %v7552_v26 = vpop.f32.mrb[159].mxu0  ;;  %v18182_v62 = vadd.f32 %v18107_v19, %v1438_v11  ;;  %v7599_v36 = vadd.f32 %v19197_v8, %v19201_v14 }
 0x420   : > { %v7598_v35 = vadd.f32 %v19198_v43, %v1454_v37  ;;  %v18177_v52 = vadd.f32 %v8995_v4, %v7572_v0  ;;  %v12825_v16 = vadd.f32 %v7552_v26, %v17799_v2  ;;  %v19199_v31 = vmax.f32 %v18167_v57, 0.0 }
 0x421   : > { %v7575_v3 = vmul.f32 %v12824_v17, %v8994_v50  ;;  %v19195_v40 = vmax.f32 %v18170_v27, 0.0  ;;  %v18194_v26 = vadd.f32 %v18107_v19, %v1439_v59 }
 0x422   : > { %v7605_v29 = vadd.f32 %v7604_v38, %v7598_v35  ;;  %v19196_v7 = vmax.f32 %v18177_v52, 0.0  ;;  %v7574_v0 = vmul.f32 %v12825_v16, %v8994_v50  ;;  %v1458_v38 = vmax.f32 %v18182_v62, 0.0 }
 0x423   : > { %v18191_v2 = vadd.f32 %v8995_v4, %v7575_v3  ;;  %v7601_v50 = vadd.f32 %v19195_v40, %v19199_v31  ;;  %v1459_v59 = vmax.f32 %v18194_v26, 0.0  ;;  %v20725_v62 = vmax.f32 %v18177_v52, 0.0 }
 0x424   : > { %v7600_v11 = vadd.f32 %v19196_v7, %v19200_v15  ;;  %v7606_v28 = vadd.f32 %v7605_v29, %v7599_v36  ;;  %v18200_v17 = vadd.f32 %v8995_v4, %v7574_v0  ;;  %v20726_v26 = vmax.f32 %v18170_v27, 0.0 }
 0x425   : > { %v19202_v16 = vmax.f32 %v18191_v2, 0.0 }
 0x426   : > { %v7607_v35 = vadd.f32 %v7606_v28, %v7600_v11  ;;  %v19203_v19 = vmax.f32 %v18200_v17, 0.0 }
 0x427   : > { %v7603_v3 = vadd.f32 %v19202_v16, %v1459_v59 }
 0x428   : > { %v7602_v4 = vadd.f32 %v19203_v19, %v1458_v38  ;;  %v7608_v36 = vadd.f32 %v7607_v35, %v7601_v50  ;;  %v20697_v35 = vpack.c.bf16 %v17980_v34, %v17975_v24 }
 0x42a   : > { %v7609_v29 = vadd.f32 %v7608_v36, %v7602_v4  ;;  %v20698_v4 = vpack.c.bf16 %v18003_v53, %v18000_v42  ;;  %v20699_v36 = vpack.c.bf16 %v18042_v13, %v18034_v45 }
 0x42c   : > { %v7610_v0 = vadd.f32 %v7609_v29, %v7603_v3  ;;  %v20701_v3 = vand.u32 4294901760, %v17815_v55  ;;  %v20705_v55 = vand.u32 4294901760, %v17877_v41 }
 0x42e   : > { %v7611_v11 = vrot.slane %v7610_v0, 4 }
 0x430   : > { %v7612_v28 = vadd.f32 %v7611_v11, %v7610_v0  ;;  %v20702_v0 = vand.u32 4294901760, %v17840_v47  ;;  %v20703_v11 = vand.u32 4294901760, %v17845_v18 }
 0x432   : > { %v7613_v40 = vrot.slane %v7612_v28, 2 }
 0x434   : > { %v7614_v7 = vadd.f32 %v7613_v40, %v7612_v28  ;;  %v12726_v28 = vpack.c.bf16 %v20703_v11, %v20702_v0 }
 0x436   : > { %v7615_v8 = vrot.slane %v7614_v7, 1 }
 0x438   : > { %v7616_v43 = vadd.f32 %v7615_v8, %v7614_v7  ;;  %v20694_v7 = vpack.c.bf16 %v17877_v41, %v17872_v48  ;;  %v20711_v41 = vand.u32 4294901760, %v17980_v34 }
 0x43a   : > { %v7618_v31 = vmul.f32 0.015625, %v7616_v43  ;;  %v20693_v43 = vpack.c.bf16 %v17845_v18, %v17840_v47  ;;  %v20707_v47 = vand.u32 4294901760, %v17902_v12 }
 0x43c   : > { %v18218_v15 = vand.u32 4294901760, %v7618_v31 }
 0x43e   : > { %v7718_v14 = vsub.f32 %v7618_v31, %v18218_v15  ;;  %11332 = vmatmul.mubr.f32.vlgmr.msra.gmra.mrb[240].mxu1 %v18218_v15  ;;  %v20696_v31 = vpack.c.bf16 %v17939_v10, %v17934_v61 }
 0x43f   : > { %12676 = vmatpush3.bf16.msra.mxu1 %v12675_v60  ;;  %11366 = vmatprep.mubr.msk.f32.mxu1 %vm13109_vm2, %v13110_v56  ;;  %v20695_v60 = vpack.c.bf16 %v17902_v12, %v17897_v51  ;;  %v20713_v12 = vand.u32 4294901760, %v18003_v53 }
 0x440   : > { %12677 = vmatprep.subr.bf16.mxu1 %v13108_v54  ;;  %v7719_v50 = vand.u32 4294901760, %v7718_v14 }
 0x442   : > { %v7720_v40 = vsub.f32 %v7718_v14, %v7719_v50 }
 0x443   : > { %12679 = vmatpush3.bf16.msra.mxu1 %v20693_v43  ;;  %v20708_v43 = vand.u32 4294901760, %v17934_v61  ;;  %v20714_v61 = vand.u32 4294901760, %v18034_v45  ;;  %v8279_v45 = vld [vmem:[%s18504_s7 + $0x10] sm:$0xff] }
 0x444   : > { %12680 = vmatprep.subr.bf16.mxu1 %v13108_v54  ;;  %v7721_v8 = vand.u32 4294901760, %v7720_v40  ;;  %v8307_v53 = vand.u32 4294901760, %v8279_v45 }
 0x446   : > { %11297 = vmatmul.mubr.f32.vlgmr.msra.gmra.mrb[160].mxu0 %v7721_v8  ;;  %v20709_v8 = vand.u32 4294901760, %v17939_v10  ;;  %v20715_v10 = vand.u32 4294901760, %v18042_v13 }
 0x447   : > { %12682 = vmatpush3.bf16.msra.mxu1 %v20694_v7 }
 0x448   : > { %12683 = vmatprep.subr.bf16.mxu1 %v13108_v54  ;;  %v12735_v7 = vpack.c.bf16 %v20709_v8, %v20708_v43 }
 0x44b   : > { %12685 = vmatpush3.bf16.msra.mxu1 %v20695_v60 }
 0x44c   : > { %12686 = vmatprep.subr.bf16.mxu1 %v13108_v54 }
 0x44f   : > { %12688 = vmatpush3.bf16.msra.mxu1 %v20696_v31 }
 0x450   : > { %12689 = vmatprep.subr.bf16.mxu1 %v13108_v54 }
 0x453   : > { %12691 = vmatpush3.bf16.msra.mxu1 %v20697_v35  ;;  %v12744_v35 = vpack.c.bf16 %v20715_v10, %v20714_v61 }
 0x454   : > { %12692 = vmatprep.subr.bf16.mxu1 %v13108_v54 }
 0x457   : > { %12694 = vmatpush3.bf16.msra.mxu1 %v20698_v4 }
 0x458   : > { %12695 = vmatprep.subr.bf16.mxu1 %v13108_v54 }
 0x45b   : > { %12697 = vmatpush3.bf16.msra.mxu1 %v20699_v36 }
 0x45c   : > { %12698 = vmatprep.subr.bf16.mxu1 %v13108_v54 }
 0x45e   : > { %11367 = vmatmul.mubr.f32.vlgmr.msra.gmra.mrb[240].mxu1 %v7718_v14  ;;  %v20700_v14 = vand.u32 4294901760, %v17813_v33  ;;  %v20704_v33 = vand.u32 4294901760, %v17872_v48  ;;  %v20710_v48 = vand.u32 4294901760, %v17975_v24 }
 0x45f   : > { %12700 = vmatpush3.bf16.msra.mxu1 %v17941_v22  ;;  %11401 = vmatprep.mubr.msk.f32.mxu1 %vm13109_vm2, %v13110_v56 }
 0x460   : > { %12701 = vmatprep.subr.bf16.mxu1 %v13108_v54  ;;  %v12723_v29 = vpack.c.bf16 %v20701_v3, %v20700_v14  ;;  %v12729_v40 = vpack.c.bf16 %v20705_v55, %v20704_v33  ;;  %v12738_v60 = vpack.c.bf16 %v20711_v41, %v20710_v48  ;;  %v8281_v14 = vld [vmem:[%s18504_s7 + $0x20] sm:$0xff]  ;;  %v8283_v3 = vld [vmem:[%s18504_s7 + $0x30] sm:$0xff] }
 0x461   : > { %v8311_v11 = vand.u32 4294901760, %v8281_v14 }
 0x463   : > { %12703 = vmatpush3.bf16.msra.mxu1 %v17970_v9  ;;  %v8416_v48 = vsub.f32 %v8281_v14, %v8311_v11 }
 0x464   : > { %12704 = vmatprep.subr.bf16.mxu1 %v13108_v54 }
 0x467   : > { %12706 = vmatpush3.bf16.msra.mxu1 %v18009_v58 }
 0x468   : > { %12707 = vmatprep.subr.bf16.mxu1 %v13108_v54 }
 0x46b   : > { %12709 = vmatpush3.bf16.msra.mxu1 %v18040_v46 }
 0x46c   : > { %12710 = vmatprep.subr.bf16.mxu1 %v13108_v54 }
 0x46f   : > { %12712 = vmatpush3.bf16.msra.mxu1 %v18053_v21 }
 0x470   : > { %12713 = vmatprep.subr.bf16.mxu1 %v13108_v54 }
 0x473   : > { %12715 = vmatpush3.bf16.msra.mxu1 %v18070_v23 }
 0x474   : > { %12716 = vmatprep.subr.bf16.mxu1 %v13108_v54 }
 0x477   : > { %12718 = vmatpush3.bf16.msra.mxu1 %v18079_v63 }
 0x478   : > { %12719 = vmatprep.subr.bf16.mxu1 %v13108_v54 }
 0x47b   : > { %12721 = vmatpush3.bf16.msra.mxu1 %v18085_v20 }
 0x47c   : > { %12722 = vmatprep.subr.bf16.mxu1 %v13108_v54 }
 0x47e   : > { %11402 = vmatmul.mubr.f32.vlgmr.msra.gmra.mrb[240].mxu1 %v7719_v50  ;;  %v20706_v50 = vand.u32 4294901760, %v17897_v51  ;;  %v20712_v51 = vand.u32 4294901760, %v18000_v42 }
 0x47f   : > { %12724 = vmatpush3.bf16.msra.mxu1 %v12723_v29  ;;  %11436 = vmatprep.mubr.msk.f32.mxu1 %vm13109_vm2, %v13110_v56 }
 0x480   : > { %12725 = vmatprep.subr.bf16.mxu1 %v13108_v54  ;;  %v12732_v18 = vpack.c.bf16 %v20707_v47, %v20706_v50  ;;  %v12741_v31 = vpack.c.bf16 %v20713_v12, %v20712_v51 }
 0x483   : > { %12727 = vmatpush3.bf16.msra.mxu1 %v12726_v28  ;;  %v8315_v28 = vand.u32 4294901760, %v8283_v3 }
 0x484   : > { %12728 = vmatprep.subr.bf16.mxu1 %v13108_v54 }
 0x485   : > { %v8428_v41 = vsub.f32 %v8283_v3, %v8315_v28 }
 0x487   : > { %12730 = vmatpush3.bf16.msra.mxu1 %v12729_v40 }
 0x488   : > { %12731 = vmatprep.subr.bf16.mxu1 %v13108_v54 }
 0x48b   : > { %12733 = vmatpush3.bf16.msra.mxu1 %v12732_v18 }
 0x48c   : > { %12734 = vmatprep.subr.bf16.mxu1 %v13108_v54 }
 0x48f   : > { %12736 = vmatpush3.bf16.msra.mxu1 %v12735_v7  ;;  %v18381_v7 = vpack.c.bf16 %v8315_v28, %v8311_v11 }
 0x490   : > { %12737 = vmatprep.subr.bf16.mxu1 %v13108_v54 }
 0x493   : > { %12739 = vmatpush3.bf16.msra.mxu1 %v12738_v60 }
 0x494   : > { %12740 = vmatprep.subr.bf16.mxu1 %v13108_v54 }
 0x497   : > { %12742 = vmatpush3.bf16.msra.mxu1 %v12741_v31 }
 0x498   : > { %12743 = vmatprep.subr.bf16.mxu1 %v13108_v54 }
 0x49b   : > { %12745 = vmatpush3.bf16.msra.mxu1 %v12744_v35  ;;  %v8417_v35 = vand.u32 4294901760, %v8416_v48 }
 0x49c   : > { %12746 = vmatprep.subr.bf16.mxu1 %v13108_v54 }
 0x49e   : > { %11437 = vmatmul.mubr.f32.vlgmr.msra.gmra.mrb[240].mxu1 %v18218_v15 }
 0x49f   : > { %12748 = vmatpush3.bf16.msra.mxu1 %v17941_v22  ;;  %11471 = vmatprep.mubr.msk.f32.mxu1 %vm13109_vm2, %v13110_v56  ;;  %v8278_v22 = vld [vmem:[%s18504_s7 + $0x8] sm:$0xff] }
 0x4a0   : > { %12749 = vmatprep.subr.bf16.mxu1 %v13108_v54  ;;  %v8301_v24 = vand.u32 4294901760, %v8278_v22 }
 0x4a3   : > { %12751 = vmatpush3.bf16.msra.mxu1 %v17970_v9  ;;  %v8280_v9 = vld [vmem:[%s18504_s7 + $0x18] sm:$0xff] }
 0x4a4   : > { %12752 = vmatprep.subr.bf16.mxu1 %v13108_v54  ;;  %v8305_v34 = vand.u32 4294901760, %v8280_v9 }
 0x4a6   : > { %v18352_v13 = vsub.f32 %v8280_v9, %v8305_v34 }
 0x4a7   : > { %12754 = vmatpush3.bf16.msra.mxu1 %v18009_v58  ;;  %v18348_v58 = vpack.c.bf16 %v8305_v34, %v8301_v24 }
 0x4a8   : > { %12755 = vmatprep.subr.bf16.mxu1 %v13108_v54  ;;  %v8399_v0 = vand.u32 4294901760, %v18352_v13 }
 0x4aa   : > { %v8400_v51 = vsub.f32 %v18352_v13, %v8399_v0 }
 0x4ab   : > { %12757 = vmatpush3.bf16.msra.mxu1 %v18040_v46  ;;  %v18350_v46 = vsub.f32 %v8278_v22, %v8301_v24  ;;  %v8429_v22 = vand.u32 4294901760, %v8428_v41 }
 0x4ac   : > { %12758 = vmatprep.subr.bf16.mxu1 %v13108_v54  ;;  %v8401_v9 = vand.u32 4294901760, %v8400_v51 }
 0x4ad   : > { %v8387_v29 = vand.u32 4294901760, %v18350_v46 }
 0x4af   : > { %12760 = vmatpush3.bf16.msra.mxu1 %v18053_v21  ;;  %v8388_v43 = vsub.f32 %v18350_v46, %v8387_v29 }
 0x4b0   : > { %12761 = vmatprep.subr.bf16.mxu1 %v13108_v54 }
 0x4b1   : > { %v8389_v60 = vand.u32 4294901760, %v8388_v43  ;;  %v12786_v43 = vpack.c.bf16 %v18352_v13, %v18350_v46 }
 0x4b3   : > { %12763 = vmatpush3.bf16.msra.mxu1 %v18070_v23 }
 0x4b4   : > { %12764 = vmatprep.subr.bf16.mxu1 %v13108_v54 }
 0x4b7   : > { %12766 = vmatpush3.bf16.msra.mxu1 %v18079_v63  ;;  %v18358_v63 = vsub.f32 %v8279_v45, %v8307_v53 }
 0x4b8   : > { %12767 = vmatprep.subr.bf16.mxu1 %v13108_v54  ;;  %v8277_v54 = vld [vmem:[%s18504_s7] sm:$0xff] }
 0x4b9   : > { %v8303_v42 = vand.u32 4294901760, %v8277_v54  ;;  %v8405_v55 = vand.u32 4294901760, %v18358_v63 }
 0x4bb   : > { %12769 = vmatpush3.bf16.msra.mxu1 %v18085_v20  ;;  %v18354_v21 = vpack.c.bf16 %v8307_v53, %v8303_v42  ;;  %v18356_v23 = vsub.f32 %v8277_v54, %v8303_v42  ;;  %v8282_v20 = vld [vmem:[%s18504_s7 + $0x28] sm:$0xff]  ;;  %v8406_v31 = vsub.f32 %v18358_v63, %v8405_v55  ;;  %v8418_v42 = vsub.f32 %v8416_v48, %v8417_v35 }
 0x4bc   : > { %12771 = vmatprep.subr.bf16.mxu1 %v18348_v58  ;;  %v8309_v4 = vand.u32 4294901760, %v8282_v20  ;;  %v8430_v53 = vsub.f32 %v8428_v41, %v8429_v22 }
 0x4bd   : > { %v8393_v33 = vand.u32 4294901760, %v18356_v23  ;;  %v8407_v34 = vand.u32 4294901760, %v8406_v31  ;;  %v8419_v14 = vand.u32 4294901760, %v8418_v42  ;;  %v12802_v31 = vpack.c.bf16 %v8399_v0, %v8387_v29 }
 0x4be   : > { %11472 = vmatmul.mubr.f32.vlgmr.msra.gmra.mrb[240].mxu1 %v18218_v15  ;;  %v8284_v15 = vld [vmem:[%s18504_s7 + $0x38] sm:$0xff]  ;;  %v8410_v47 = vsub.f32 %v8282_v20, %v8309_v4  ;;  %v12778_v20 = vpack.c.bf16 %v8401_v9, %v8389_v60  ;;  %v8431_v3 = vand.u32 4294901760, %v8430_v53  ;;  %v12808_v60 = vpack.c.bf16 %v8429_v22, %v8417_v35  ;;  %v7635_v9 = vld [vmem:[%s18503_s6] sm:$0x1] }
 0x4bf   : > { %8373 = vmatprep.mubr.f32.mxu1 %v13110_v56  ;;  %v8313_v36 = vand.u32 4294901760, %v8284_v15  ;;  %12773 = vmatpush1.bf16.msra.mxu1 %v18354_v21  ;;  %v8394_v12 = vsub.f32 %v18356_v23, %v8393_v33  ;;  %v12804_v16 = vpack.c.bf16 %v8405_v55, %v8393_v33  ;;  %v8287_v29 = vlaneseq }
 0x4c0   : > { %v8411_v61 = vand.u32 4294901760, %v8410_v47  ;;  %v12784_v28 = vpack.c.bf16 %v8431_v3, %v8419_v14  ;;  %v20716_v14 = vmax.f32 %v18122_v1, 0.0 }
 0x4c1   : > { %v18378_v50 = vpack.c.bf16 %v8313_v36, %v8309_v4  ;;  %v8422_v18 = vsub.f32 %v8284_v15, %v8313_v36  ;;  %v8395_v24 = vand.u32 4294901760, %v8394_v12  ;;  %v12792_v12 = vpack.c.bf16 %v8428_v41, %v8416_v48 }
 0x4c2   : > { %v8412_v54 = vsub.f32 %v8410_v47, %v8411_v61  ;;  %v8288_v0 = vshrl.u32 %v8287_v29, 7 }
 0x4c3   : > { %12775 = vmatprep.subr.bf16.mxu1 %v18378_v50  ;;  %v8423_v10 = vand.u32 4294901760, %v8422_v18  ;;  %v12780_v15 = vpack.c.bf16 %v8407_v34, %v8395_v24  ;;  %v12790_v51 = vpack.c.bf16 %v8422_v18, %v8410_v47 }
 0x4c4   : > { %12777 = vmatpush1.bf16.msra.mxu1 %v18381_v7  ;;  %v8413_v4 = vand.u32 4294901760, %v8412_v54  ;;  %v8289_v33 = vsub.s32 0, %v8288_v0 }
 0x4c5   : > { %v8424_v45 = vsub.f32 %v8422_v18, %v8423_v10  ;;  %12779 = vmatprep.subr.bf16.mxu1 %v12778_v20  ;;  %v12806_v19 = vpack.c.bf16 %v8423_v10, %v8411_v61 }
 0x4c7   : > { %v8425_v36 = vand.u32 4294901760, %v8424_v45 }
 0x4c9   : > { %v12782_v11 = vpack.c.bf16 %v8425_v36, %v8413_v4 }
 0x519   : > { %v7723_v40 = vpop.f32.mrb[160].mxu0 }
 0x51a   : > { %v11298_v8 = vpop.f32.mrb[161].mxu0  ;;  %v7724_v24 = vadd.f32 %v7723_v40, %v7635_v9 }
 0x51b   : > { %v12788_v8 = vpack.c.bf16 %v18358_v63, %v18356_v23 }
 0x591   : > { %v8273_v34 = vpop.f32.mrb[240].mxu1 }
 0x592   : > { %v12827_v54 = vadd.f32 %v8273_v34, %v7724_v24  ;;  %v11473_v45 = vpop.f32.mrb[241].mxu1 }
 0x593   : > { %v20727_v45 = vmax.f32 %v18200_v17, 0.0 }
 0x594   : > { %v8299_v42 = vsel %vm8297_vm3, %v12827_v54, 0 }
 0x595   : > { %v8374_v46 = vand.u32 4294901760, %v8299_v42 }
 0x597   : > { %v8375_v13 = vsub.f32 %v8299_v42, %v8374_v46 }
 0x599   : > { %v8376_v53 = vand.u32 4294901760, %v8375_v13 }
 0x59b   : > { %v8377_v23 = vsub.f32 %v8375_v13, %v8376_v53 }
 0x59d   : > { %v8378_v63 = vand.u32 4294901760, %v8377_v23 }
 0x59f   : > { %8379 = vmatmul.mubr.f32.vlgmr.msra.gmra.mrb[242].mxu1 %v8378_v63 }
 0x5a0   : > { %12781 = vmatpush1.bf16.msra.mxu1 %v12780_v15  ;;  %8489 = vmatprep.mubr.f32.mxu1 %v13110_v56 }
 0x5a1   : > { %12783 = vmatprep.subr.bf16.mxu1 %v12782_v11  ;;  %v20717_v11 = vmax.f32 %v18115_v5, 0.0  ;;  %v20721_v5 = vmax.f32 %v18130_v39, 0.0  ;;  %v20728_v39 = vmax.f32 %v18191_v2, 0.0 }
 0x5a4   : > { %12785 = vmatpush1.bf16.msra.mxu1 %v12784_v28 }
 0x5a5   : > { %12787 = vmatprep.subr.bf16.mxu1 %v12786_v43 }
 0x5a7   : > { %8491 = vmatmul.mubr.f32.vlgmr.msra.gmra.mrb[242].mxu1 %v8374_v46 }
 0x5a8   : > { %12789 = vmatpush1.bf16.msra.mxu1 %v12788_v8  ;;  %8577 = vmatprep.mubr.f32.mxu1 %v13110_v56  ;;  %v20718_v8 = vmax.f32 %v18137_v6, 0.0  ;;  %v20722_v6 = vmax.f32 %v18126_v44, 0.0 }
 0x5a9   : > { %12791 = vmatprep.subr.bf16.mxu1 %v12790_v51 }
 0x5ac   : > { %12793 = vmatpush1.bf16.msra.mxu1 %v12792_v12  ;;  %v20719_v12 = vmax.f32 %v18159_v25, 0.0  ;;  %v20723_v25 = vmax.f32 %v18155_v30, 0.0 }
 0x5ad   : > { %12795 = vmatprep.subr.bf16.mxu1 %v18348_v58 }
 0x5af   : > { %8580 = vmatmul.mubr.f32.vlgmr.msra.gmra.mrb[242].mxu1 %v8375_v13 }
 0x5b0   : > { %12797 = vmatpush1.bf16.msra.mxu1 %v18354_v21  ;;  %8658 = vmatprep.mubr.f32.mxu1 %v13110_v56 }
 0x5b1   : > { %12799 = vmatprep.subr.bf16.mxu1 %v18378_v50 }
 0x5b4   : > { %12801 = vmatpush1.bf16.msra.mxu1 %v18381_v7 }
 0x5b5   : > { %12803 = vmatprep.subr.bf16.mxu1 %v12802_v31 }
 0x5b7   : > { %8662 = vmatmul.mubr.f32.vlgmr.msra.gmra.mrb[242].mxu1 %v8376_v53 }
 0x5b8   : > { %12805 = vmatpush1.bf16.msra.mxu1 %v12804_v16  ;;  %8756 = vmatprep.mubr.f32.mxu1 %v13110_v56  ;;  %v8285_v16 = vld [vmem:[%s18505_s8] sm:$0x3] }
 0x5b9   : > { %12807 = vmatprep.subr.bf16.mxu1 %v12806_v19  ;;  %v8293_v19 = vsub.s32 1, %v8288_v0  ;;  %v8290_v55 = vrot.slane %v8285_v16, %v8289_v33 }
 0x5bc   : > { %12809 = vmatpush1.bf16.msra.mxu1 %v12808_v60  ;;  %v20720_v60 = vmax.f32 %v18167_v57, 0.0  ;;  %v20724_v57 = vmax.f32 %v18144_v49, 0.0 }
 0x5bd   : > { %12811 = vmatprep.subr.bf16.mxu1 %v18348_v58  ;;  %v8294_v58 = vrot.slane %v8285_v16, %v8293_v19 }
 0x5bf   : > { %8758 = vmatmul.mubr.f32.vlgmr.msra.gmra.mrb[242].mxu1 %v8374_v46 }
 0x5c0   : > { %12813 = vmatpush1.bf16.msra.mxu1 %v18354_v21  ;;  %8836 = vmatprep.mubr.f32.mxu1 %v13110_v56 }
 0x5c1   : > { %12815 = vmatprep.subr.bf16.mxu1 %v18378_v50 }
 0x5c4   : > { %12817 = vmatpush1.bf16.msra.mxu1 %v18381_v7 }
 0x5c7   : > { %8838 = vmatmul.mubr.f32.vlgmr.msra.gmra.mrb[242].mxu1 %v8374_v46 }
 0x69a   : > { %v8839_v40 = vpop.f32.mrb[242].mxu1 }
 0x69b   : > { %v12828_v21 = vadd.f32 %v8839_v40, %v8290_v55  ;;  %v8841_v56 = vpop.f32.mrb[243].mxu1 }
 0x69c   : > { %v12829_v47 = vadd.f32 %v8841_v56, %v8294_v58 }
 0x69e   : > { %v8844_v50 = vmax.f32 %v12828_v21, %v12829_v47 }
 0x6a0   : > { %v8845_v18 = vsub.f32 %v12828_v21, %v8844_v50  ;;  %v8848_v7 = vsub.f32 %v12829_v47, %v8844_v50 }
 0x6a2   : > { %v8846_v48 = vmul.f32 1.442695, %v8845_v18  ;;  %v8849_v41 = vmul.f32 1.442695, %v8848_v7 }
 0x6a4   : > { %12986 = vpow2.f32 %v8846_v48 }
 0x6a5   : > { %12988 = vpow2.f32 %v8849_v41 }
 0x6ae   : > { %v12987_v61 = vpop.eup %12986 }
 0x6af   : > { %v12989_v10 = vpop.eup %12988 }
 0x6b0   : > { %v8851_v35 = vadd.f32 %v12989_v10, %v12987_v61 }
 0x6b2   : > { %12990 = vrcp.f32 %v8851_v35 }
 0x6bc   : > { %v12991_v22 = vpop.eup %12990 }
 0x6bd   : > { %v8854_v20 = vmul.f32 %v12991_v22, %v12987_v61  ;;  %v8867_v15 = vmul.f32 %v12991_v22, %v12989_v10 }
 0x6bf   : > { %v8858_v4 = vrot.slane %v8854_v20, %v8289_v33  ;;  %v8871_v36 = vrot.slane %v8867_v15, %v8289_v33 }
 0x6c1   : > { %v8859_v3 = vmul.f32 %v8858_v4, %v20716_v14  ;;  %v8860_v28 = vmul.f32 %v8858_v4, %v20717_v11  ;;  %v8861_v43 = vmul.f32 %v8858_v4, %v1454_v37  ;;  %v8862_v51 = vmul.f32 %v8858_v4, %v20718_v8 }
 0x6c2   : > { %v8863_v31 = vmul.f32 %v8858_v4, %v20719_v12  ;;  %v8864_v9 = vmul.f32 %v8858_v4, %v20720_v60  ;;  %v8865_v24 = vmul.f32 %v8858_v4, %v1458_v38  ;;  %v8866_v1 = vmul.f32 %v8858_v4, %v1459_v59 }
 0x6c3   : > { %v8872_v37 = vmul.f32 %v8871_v36, %v20721_v5  ;;  %v8873_v32 = vmul.f32 %v8871_v36, %v20722_v6  ;;  %v8874_v34 = vmul.f32 %v8871_v36, %v20723_v25  ;;  %v8875_v54 = vmul.f32 %v8871_v36, %v20724_v57 }
 0x6c4   : > { %v8876_v38 = vmul.f32 %v8871_v36, %v20725_v62  ;;  %v8877_v59 = vmul.f32 %v8871_v36, %v20726_v26  ;;  %v8878_v42 = vmul.f32 %v8871_v36, %v20727_v45  ;;  %v8879_v46 = vmul.f32 %v8871_v36, %v20728_v39 }
 0x6c5   : > { %v8880_v44 = vadd.f32 %v8872_v37, %v8859_v3  ;;  %v8881_v13 = vadd.f32 %v8873_v32, %v8860_v28  ;;  %v8882_v53 = vadd.f32 %v8874_v34, %v8861_v43  ;;  %v8883_v30 = vadd.f32 %v8875_v54, %v8862_v51 }
 0x6c6   : > { %v8884_v52 = vadd.f32 %v8876_v38, %v8863_v31  ;;  %v8885_v49 = vadd.f32 %v8877_v59, %v8864_v9  ;;  %v8886_v27 = vadd.f32 %v8878_v42, %v8865_v24  ;;  %v8887_v2 = vadd.f32 %v8879_v46, %v8866_v1 }
 0x6c7   : > { %8888 = vst [vmem:[%s340_s21] sm:$0xff] %v8880_v44  ;;  %8889 = vst [vmem:[%s340_s21 + $0x8] sm:$0xff] %v8881_v13 }
 0x6c8   : > { %8890 = vst [vmem:[%s340_s21 + $0x10] sm:$0xff] %v8882_v53  ;;  %8891 = vst [vmem:[%s340_s21 + $0x18] sm:$0xff] %v8883_v30 }
 0x6c9   : > { %8892 = vst [vmem:[%s340_s21 + $0x20] sm:$0xff] %v8884_v52  ;;  %8893 = vst [vmem:[%s340_s21 + $0x28] sm:$0xff] %v8885_v49 }
 0x6ca   : > { %8894 = vst [vmem:[%s340_s21 + $0x30] sm:$0xff] %v8886_v27  ;;  %8895 = vst [vmem:[%s340_s21 + $0x38] sm:$0xff] %v8887_v2 }
 0x6cb   : > { %13050 = shalt.err (!%p13047_p7)
}
 0x6cc   : > { %s13051_s22 = scalar_lea.hbm %s18450_s17, 1024  ;;  %s13055_s21 = scalar_lea.hbm %s18506_s9, 2048 }
 0x6cd   : > { %p13052_p8 = scmp.ne.s32.totalorder %s18450_s17, %s13051_s22  ;;  %p13056_p1 = scmp.lt.u32.totalorder %s18450_s17, %s18506_s9 }
 0x6ce   : > { %p13057_p0 = scmp.lt.u32.totalorder %s13055_s21, %s13051_s22  ;;  %p13059_p6 = scmp.lt.u32.totalorder %s13051_s22, %s18450_s17 }
 0x6cf   : > { %p13053_p11 = pnand %p13052_p8, %p20729_p9 }
 0x6d0   : > { %p13058_p5 = por %p13057_p0, %p13056_p1 }
 0x6d1   : > { %p13054_p13 = pneg %p13053_p11 }
 0x6d2   : > { %p13060_p10 = por %p13059_p6, %p13058_p5 }
 0x6d4   : > { %p13061_p12 = pnand %p13060_p10, %p13054_p13 }
 0x6d6   : > { %13064 = shalt.err (!%p13061_p12)
}
 0x6d7   : > { %s13112_s26 = smov 128   ;;  %s13113_s28 = smov 8  }
 0x6d8   : > { %12933 = dma.vmem_to_hbm [thread:$0]  (%p20729_p9), %s18452_s23, 1024, %s18450_s17, %s18456_s25, %s13112_s26, %s13112_s26, %s13113_s28  }
 0x6d9 PF: > { %p12945_p2 = scmp.ge.s32.totalorder %s13103_s12, 2  ;;  %s8925_s27 = sand.u32 1, %s13091_s30  }
 0x6da   : > { %p20730_p3 = scmp.ne.s32.totalorder %s19205_s20, 0  ;;  %s8926_s29 = scalar_lea.sflag [#allocation4], %s8925_s27 }
 0x6dc   : > { %p12940_p4 = pnand %p12945_p2, %p20730_p3 }
 0x6de   : > { %13086 = dma.done.wait (!%p12940_p4), %s8926_s29, 1024  }
 0x6df   : > { %13088 = vsyncadd (!%p12940_p4), %s8926_s29, 4294966272  ;;  %p20_p7 = scmp.ge.s32.totalorder %s13189_s15, 4   ;;  %s20731_s30 = smov %s13095_s10 }
 0x6e0   : > { %s20732_s10 = smov %s13099_s11  ;;  %s20733_s11 = smov %s13200_s18 }
 0x6e1   : > { %s20734_s12 = smov %s13189_s15  ;;  %22 = sbr.rel (!%p20_p7) target bundleno = 4 (0x4), region = 96 }
 0x6e8   :  { %8931 = vsyncpa [#allocation3], 1 }
 0x6e9   :  { %8933 = vsyncpa [#allocation3 + $0x1], 1 }
 0x6ea   :  { %8934 = vsyncpa [#allocation4], 1 }
 0x6eb   :  { %8936 = vsyncpa [#allocation4 + $0x1], 1 }

</bundles_post_ra>
